<compile_context>
chip_gen: v5e
topology: v5e:2x2
jax: 0.10.0
libtpu: 0.0.40
codegen_flags: <defaults>
</compile_context>

<pallas_src>
import math

import jax
import jax.numpy as jnp
from jax.experimental import pallas as pl
from jax.experimental.pallas import tpu as pltpu

_COL0 = 8                       # sublane-aligned column offset of the image interior
_SQRT_2_OVER_PI = 0.7978845608028654


def _conv_block_kernel(x_ref, w1_ref, b1_ref, w2_ref, b2_ref, g_ref,
                       o_ref, pad_ref, slab_ref):
    """One batch-block per grid step.

    x_ref   : (Bb, H, W, C) f32    NHWC activation block
    w*_ref  : (9*C, C)      bf16   3x3 taps stacked along K (tap-major), BN folded
    b*_ref  : (1, C)        f32    conv bias with BN folded in
    g_ref   : (1, C)        f32    layer-scale gamma (ones when disabled)
    o_ref   : (Bb, H, W, C)
    pad_ref : (Bb, H+2, Wp, C) f32 zero-halo scratch; image at rows [1,H],
                                   cols [_COL0, _COL0+W)
    slab_ref: (Bb*H*W, 9*C) bf16   im2col slab (matmul LHS)
    """
    Bb, H, W, C = x_ref.shape
    HW = H * W
    Wp = pad_ref.shape[2]

    # Hoisted zero tiles (JAX does not CSE broadcasts inside loops).
    zrow = jnp.zeros((1, Wp, C), jnp.float32)
    zcol = jnp.zeros((H, 1, C), jnp.float32)

    def build_slab():
        # im2col: 3 strided column-group loads per image, 9 lane-tile bf16 writes.
        for i in range(Bb):
            img = pad_ref.at[i]
            base = i * HW
            for kx in range(3):
                cs = _COL0 - 1 + kx
                col = img[:, cs:cs + W, :].astype(jnp.bfloat16)   # (H+2, W, C)
                for ky in range(3):
                    tap = ky * 3 + kx
                    slab_ref[base:base + HW, tap * C:(tap + 1) * C] = (
                        col[ky:ky + H].reshape(HW, C))

    def conv3x3(w_ref, b_ref):
        build_slab()
        # Single big-K matmul: (Bb*HW, 9C) x (9C, C), bf16 operands, f32 accumulate.
        return jnp.dot(slab_ref[...], w_ref[...],
                       preferred_element_type=jnp.float32) + b_ref[...]

    # ---- zero only the halo the taps read; write conv1 input into the interior ---
    for i in range(Bb):
        img = pad_ref.at[i]
        img[0:1, :, :] = zrow                                    # top halo row
        img[H + 1:H + 2, :, :] = zrow                            # bottom halo row
        img[1:H + 1, _COL0 - 1:_COL0, :] = zcol                  # left halo column
        img[1:H + 1, _COL0 + W:_COL0 + W + 1, :] = zcol          # right halo column
        img[1:H + 1, _COL0:_COL0 + W, :] = x_ref[i].astype(jnp.float32)

    # ---- conv1 (+ folded BN1) -----------------------------------------------------
    y = conv3x3(w1_ref, b1_ref)                                  # (Bb*HW, C) f32

    # ---- GELU, tanh approximation (== nn.GELU(approximate='tanh')) -----------------
    y = 0.5 * y * (1.0 + jnp.tanh(_SQRT_2_OVER_PI * (y + 0.044715 * y * y * y)))

    # ---- conv2 (+ folded BN2) -----------------------------------------------------
    for i in range(Bb):
        pad_ref.at[i][1:H + 1, _COL0:_COL0 + W, :] = (
            y[i * HW:(i + 1) * HW].reshape(H, W, C))
    y = conv3x3(w2_ref, b2_ref)

    # ---- layer_scale + residual (drop_path = 0 -> identity) ------------------------
    out = x_ref[...].astype(jnp.float32).reshape(Bb * HW, C) + g_ref[...] * y
    o_ref[...] = out.reshape(Bb, H, W, C).astype(o_ref.dtype)


def conv_block_forward(x, conv1_w, conv1_b, bn1, conv2_w, conv2_b, bn2,
                       gamma=None, eps=1e-5, batch_block=None):
    """ConvBlock forward (eval-mode BN).

    x       : (B, C, H, W) f32  (PyTorch NCHW layout)
    conv*_w : (C, C, 3, 3)      (PyTorch OIHW layout)
    conv*_b : (C,)
    bn*     : tuple (weight, bias, running_mean, running_var), each (C,)
    gamma   : (C,) layer-scale parameter, or None (layer_scale disabled)
    """
    B, C, H, W = x.shape
    Wp = _COL0 + W + 8          # left halo at sublane-aligned _COL0, >=1 zero col right

    def fold_bn(w, b, bn):
        g, beta, mean, var = bn
        s = g / jnp.sqrt(var + eps)                              # (C,)
        wf = w * s[:, None, None, None]                          # (Cout, Cin, 3, 3)
        bf = (b - mean) * s + beta                               # (C,)
        # (Cout, Cin, ky, kx) -> (ky, kx, Cin, Cout) -> (9*Cin, Cout), tap-major K
        wt = jnp.transpose(wf, (2, 3, 1, 0)).reshape(9 * C, C)
        return wt.astype(jnp.bfloat16), bf.reshape(1, C).astype(jnp.float32)

    w1t, b1f = fold_bn(conv1_w, conv1_b, bn1)
    w2t, b2f = fold_bn(conv2_w, conv2_b, bn2)
    g = (jnp.ones((1, C), jnp.float32) if gamma is None
         else gamma.reshape(1, C).astype(jnp.float32))

    if batch_block is None:
        # Pack images per grid step to amortize per-step overhead, but keep >= 2
        # grid steps (both v7x TensorCores busy) and a modest per-step VMEM budget.
        per_img = ((H + 2) * Wp * C * 4          # pad scratch (f32)
                   + H * W * 9 * C * 2           # im2col slab (bf16)
                   + 4 * H * W * C * 4)          # double-buffered in + out blocks
        cap = max(1, (16 * 1024 * 1024) // per_img)
        batch_block = 1
        for cand in range(min(B // 2, cap), 0, -1):
            if B % cand == 0:
                batch_block = cand
                break
    assert B % batch_block == 0
    Bb = batch_block

    # NCHW -> NHWC so C sits on the 128-wide lane axis.  In a full NHWC model these
    # two transposes disappear (keep activations NHWC end to end).
    x_nhwc = jnp.transpose(x, (0, 2, 3, 1))                      # (B, H, W, C)

    out_nhwc = pl.pallas_call(
        _conv_block_kernel,
        out_shape=jax.ShapeDtypeStruct((B, H, W, C), x.dtype),
        grid_spec=pltpu.PrefetchScalarGridSpec(
            num_scalar_prefetch=0,
            grid=(B // Bb,),
            in_specs=[
                pl.BlockSpec((Bb, H, W, C), lambda b: (b, 0, 0, 0)),
                pl.BlockSpec((9 * C, C), lambda b: (0, 0)),      # weights stay resident
                pl.BlockSpec((1, C), lambda b: (0, 0)),
                pl.BlockSpec((9 * C, C), lambda b: (0, 0)),
                pl.BlockSpec((1, C), lambda b: (0, 0)),
                pl.BlockSpec((1, C), lambda b: (0, 0)),
            ],
            out_specs=pl.BlockSpec((Bb, H, W, C), lambda b: (b, 0, 0, 0)),
            scratch_shapes=[
                pltpu.VMEM((Bb, H + 2, Wp, C), jnp.float32),     # zero-halo pad
                pltpu.VMEM((Bb * H * W, 9 * C), jnp.bfloat16),   # im2col slab
            ],
        ),
        compiler_params=pltpu.CompilerParams(
            dimension_semantics=("parallel",),
            vmem_limit_bytes=32 * 1024 * 1024),
    )(x_nhwc, w1t, b1f, w2t, b2f, g)

    return jnp.transpose(out_nhwc, (0, 3, 1, 2))                 # back to NCHW


def _reference(x, conv1_w, conv1_b, bn1, conv2_w, conv2_b, bn2, gamma=None, eps=1e-5):
    """Pure-JAX f32 replica of the PyTorch forward (eval-mode BN, drop_path=0)."""
    def conv(z, w, b):
        y = jax.lax.conv_general_dilated(
            z, w, window_strides=(1, 1), padding=((1, 1), (1, 1)),
            dimension_numbers=('NCHW', 'OIHW', 'NCHW'),
            precision=jax.lax.Precision.HIGHEST)
        return y + b[None, :, None, None]

    def bnorm(z, p):
        g, beta, mean, var = p
        inv = g / jnp.sqrt(var + eps)
        return ((z - mean[None, :, None, None]) * inv[None, :, None, None]
                + beta[None, :, None, None])

    y = bnorm(conv(x, conv1_w, conv1_b), bn1)
    y = jax.nn.gelu(y, approximate=True)                         # GELU(approximate='tanh')
    y = bnorm(conv(y, conv2_w, conv2_b), bn2)
    if gamma is not None:
        y = y * gamma[None, :, None, None]
    return x + y


if __name__ == "__main__":
    B, C, H, W = 2, 128, 16, 16
    key = jax.random.PRNGKey(0)
    ks = jax.random.split(key, 8)

    x = jax.random.normal(ks[0], (B, C, H, W), dtype=jnp.float32)
    fan = 1.0 / math.sqrt(9 * C)
    conv1_w = jax.random.normal(ks[1], (C, C, 3, 3), jnp.float32) * fan
    conv1_b = jax.random.normal(ks[2], (C,), jnp.float32) * 0.05
    conv2_w = jax.random.normal(ks[3], (C, C, 3, 3), jnp.float32) * fan
    conv2_b = jax.random.normal(ks[4], (C,), jnp.float32) * 0.05

    def make_bn(k):
        k1, k2, k3, k4 = jax.random.split(k, 4)
        weight = 1.0 + 0.1 * jax.random.normal(k1, (C,), jnp.float32)
        bias = 0.1 * jax.random.normal(k2, (C,), jnp.float32)
        running_mean = 0.1 * jax.random.normal(k3, (C,), jnp.float32)
        running_var = 0.5 + 0.5 * jnp.abs(jax.random.normal(k4, (C,), jnp.float32))
        return (weight, bias, running_mean, running_var)

    bn1 = make_bn(ks[5])
    bn2 = make_bn(ks[6])
    gamma = 0.3 * jax.random.normal(ks[7], (C,), jnp.float32)

    def check(a, b):
        # bf16 MXU operands vs f32 HIGHEST-precision reference: allow bf16-level
        # elementwise error, plus a tight relative-Frobenius-norm check so real
        # bugs (wrong tap / BN fold) still fail loudly.
        assert a.shape == b.shape
        assert bool(jnp.allclose(a, b, atol=5e-2, rtol=5e-2))
        rel = jnp.linalg.norm((a - b).ravel()) / jnp.linalg.norm(b.ravel())
        assert float(rel) < 1e-2

    # layer_scale disabled (module default: layer_scale=None)
    out0 = jax.block_until_ready(conv_block_forward(
        x, conv1_w, conv1_b, bn1, conv2_w, conv2_b, bn2, gamma=None))
    ref0 = _reference(x, conv1_w, conv1_b, bn1, conv2_w, conv2_b, bn2, gamma=None)
    check(out0, ref0)

    # layer_scale enabled
    out1 = jax.block_until_ready(conv_block_forward(
        x, conv1_w, conv1_b, bn1, conv2_w, conv2_b, bn2, gamma=gamma))
    ref1 = _reference(x, conv1_w, conv1_b, bn1, conv2_w, conv2_b, bn2, gamma=gamma)
    check(out1, ref1)

    print("KERNEL_OK")
</pallas_src>

<mosaic_0001>
module attributes {stable_mosaic.version = 11 : i64} {
  func.func @_conv_block_kernel(%arg0: i32, %arg1: memref<1x16x16x128xf32, #tpu.memory_space<vmem>>, %arg2: memref<1152x128xbf16, #tpu.memory_space<vmem>>, %arg3: memref<1x128xf32, #tpu.memory_space<vmem>>, %arg4: memref<1152x128xbf16, #tpu.memory_space<vmem>>, %arg5: memref<1x128xf32, #tpu.memory_space<vmem>>, %arg6: memref<1x128xf32, #tpu.memory_space<vmem>>, %arg7: memref<1x16x16x128xf32, #tpu.memory_space<vmem>>, %arg8: memref<1x18x32x128xf32, #tpu.memory_space<vmem>>, %arg9: memref<256x1152xbf16, #tpu.memory_space<vmem>>) attributes {dimension_semantics = [#tpu.dimension_semantics<parallel>], iteration_bounds = array<i64: 2>, scalar_prefetch = 0 : i64, scratch_operands = 2 : i64, tpu.core_type = #tpu.core_type<tc>, window_params = [{transform_indices = @transform_0, window_bounds = array<i64: 1, 16, 16, 128>}, {pipeline_mode = #tpu.pipeline_mode<synchronous>, transform_indices = @transform_1, window_bounds = array<i64: 1152, 128>}, {pipeline_mode = #tpu.pipeline_mode<synchronous>, transform_indices = @transform_2, window_bounds = array<i64: 1, 128>}, {pipeline_mode = #tpu.pipeline_mode<synchronous>, transform_indices = @transform_3, window_bounds = array<i64: 1152, 128>}, {pipeline_mode = #tpu.pipeline_mode<synchronous>, transform_indices = @transform_4, window_bounds = array<i64: 1, 128>}, {pipeline_mode = #tpu.pipeline_mode<synchronous>, transform_indices = @transform_5, window_bounds = array<i64: 1, 128>}, {transform_indices = @transform_6, window_bounds = array<i64: 1, 16, 16, 128>}]} {
    %cst = arith.constant 0.000000e+00 : f32
    %0 = vector.broadcast %cst : f32 to vector<1x32x128xf32>
    %cst_0 = arith.constant 0.000000e+00 : f32
    %1 = vector.broadcast %cst_0 : f32 to vector<16x1x128xf32>
    %c0_i32 = arith.constant 0 : i32
    %c0_i32_1 = arith.constant 0 : i32
    %c0_i32_2 = arith.constant 0 : i32
    %c0_i32_3 = arith.constant 0 : i32
    %2 = tpu.memref_slice %arg8[%c0_i32, %c0_i32_1, %c0_i32_2, %c0_i32_3] : memref<1x18x32x128xf32, #tpu.memory_space<vmem>> -> memref<1x18x32x128xf32, #tpu.memory_space<vmem>>
    %3 = tpu.memref_squeeze %2 : memref<1x18x32x128xf32, #tpu.memory_space<vmem>> -> memref<18x32x128xf32, #tpu.memory_space<vmem>>
    %c0 = arith.constant 0 : index
    %c0_4 = arith.constant 0 : index
    %c0_5 = arith.constant 0 : index
    %4 = vector.load %3[%c0, %c0_4, %c0_5] : memref<18x32x128xf32, #tpu.memory_space<vmem>>, vector<1x32x128xf32>
    tpu.vector_store %3[%c0, %c0_4, %c0_5], %0 {strides = array<i32>} : memref<18x32x128xf32, #tpu.memory_space<vmem>>, vector<1x32x128xf32>,
    %c0_i32_6 = arith.constant 0 : i32
    %c0_i32_7 = arith.constant 0 : i32
    %c0_i32_8 = arith.constant 0 : i32
    %c0_i32_9 = arith.constant 0 : i32
    %5 = tpu.memref_slice %arg8[%c0_i32_6, %c0_i32_7, %c0_i32_8, %c0_i32_9] : memref<1x18x32x128xf32, #tpu.memory_space<vmem>> -> memref<1x18x32x128xf32, #tpu.memory_space<vmem>>
    %6 = tpu.memref_squeeze %5 : memref<1x18x32x128xf32, #tpu.memory_space<vmem>> -> memref<18x32x128xf32, #tpu.memory_space<vmem>>
    %c17 = arith.constant 17 : index
    %c0_10 = arith.constant 0 : index
    %c0_11 = arith.constant 0 : index
    %7 = vector.load %6[%c17, %c0_10, %c0_11] : memref<18x32x128xf32, #tpu.memory_space<vmem>>, vector<1x32x128xf32>
    tpu.vector_store %6[%c17, %c0_10, %c0_11], %0 {strides = array<i32>} : memref<18x32x128xf32, #tpu.memory_space<vmem>>, vector<1x32x128xf32>,
    %c0_i32_12 = arith.constant 0 : i32
    %c0_i32_13 = arith.constant 0 : i32
    %c0_i32_14 = arith.constant 0 : i32
    %c0_i32_15 = arith.constant 0 : i32
    %8 = tpu.memref_slice %arg8[%c0_i32_12, %c0_i32_13, %c0_i32_14, %c0_i32_15] : memref<1x18x32x128xf32, #tpu.memory_space<vmem>> -> memref<1x18x32x128xf32, #tpu.memory_space<vmem>>
    %9 = tpu.memref_squeeze %8 : memref<1x18x32x128xf32, #tpu.memory_space<vmem>> -> memref<18x32x128xf32, #tpu.memory_space<vmem>>
    %c1 = arith.constant 1 : index
    %c7 = arith.constant 7 : index
    %c0_16 = arith.constant 0 : index
    %10 = vector.load %9[%c1, %c7, %c0_16] : memref<18x32x128xf32, #tpu.memory_space<vmem>>, vector<16x1x128xf32>
    tpu.vector_store %9[%c1, %c7, %c0_16], %1 {strides = array<i32>} : memref<18x32x128xf32, #tpu.memory_space<vmem>>, vector<16x1x128xf32>,
    %c0_i32_17 = arith.constant 0 : i32
    %c0_i32_18 = arith.constant 0 : i32
    %c0_i32_19 = arith.constant 0 : i32
    %c0_i32_20 = arith.constant 0 : i32
    %11 = tpu.memref_slice %arg8[%c0_i32_17, %c0_i32_18, %c0_i32_19, %c0_i32_20] : memref<1x18x32x128xf32, #tpu.memory_space<vmem>> -> memref<1x18x32x128xf32, #tpu.memory_space<vmem>>
    %12 = tpu.memref_squeeze %11 : memref<1x18x32x128xf32, #tpu.memory_space<vmem>> -> memref<18x32x128xf32, #tpu.memory_space<vmem>>
    %c1_21 = arith.constant 1 : index
    %c24 = arith.constant 24 : index
    %c0_22 = arith.constant 0 : index
    %13 = vector.load %12[%c1_21, %c24, %c0_22] : memref<18x32x128xf32, #tpu.memory_space<vmem>>, vector<16x1x128xf32>
    tpu.vector_store %12[%c1_21, %c24, %c0_22], %1 {strides = array<i32>} : memref<18x32x128xf32, #tpu.memory_space<vmem>>, vector<16x1x128xf32>,
    %c0_23 = arith.constant 0 : index
    %c0_24 = arith.constant 0 : index
    %c0_25 = arith.constant 0 : index
    %c0_26 = arith.constant 0 : index
    %14 = vector.load %arg1[%c0_23, %c0_24, %c0_25, %c0_26] : memref<1x16x16x128xf32, #tpu.memory_space<vmem>>, vector<1x16x16x128xf32>
    %15 = vector.shape_cast %14 : vector<1x16x16x128xf32> to vector<16x16x128xf32>
    %c0_i32_27 = arith.constant 0 : i32
    %c0_i32_28 = arith.constant 0 : i32
    %c0_i32_29 = arith.constant 0 : i32
    %c0_i32_30 = arith.constant 0 : i32
    %16 = tpu.memref_slice %arg8[%c0_i32_27, %c0_i32_28, %c0_i32_29, %c0_i32_30] : memref<1x18x32x128xf32, #tpu.memory_space<vmem>> -> memref<1x18x32x128xf32, #tpu.memory_space<vmem>>
    %17 = tpu.memref_squeeze %16 : memref<1x18x32x128xf32, #tpu.memory_space<vmem>> -> memref<18x32x128xf32, #tpu.memory_space<vmem>>
    %c1_31 = arith.constant 1 : index
    %c8 = arith.constant 8 : index
    %c0_32 = arith.constant 0 : index
    %18 = vector.load %17[%c1_31, %c8, %c0_32] : memref<18x32x128xf32, #tpu.memory_space<vmem>>, vector<16x16x128xf32>
    tpu.vector_store %17[%c1_31, %c8, %c0_32], %15 {strides = array<i32>} : memref<18x32x128xf32, #tpu.memory_space<vmem>>, vector<16x16x128xf32>,
    %c0_i32_33 = arith.constant 0 : i32
    %c0_i32_34 = arith.constant 0 : i32
    %c0_i32_35 = arith.constant 0 : i32
    %c0_i32_36 = arith.constant 0 : i32
    %19 = tpu.memref_slice %arg8[%c0_i32_33, %c0_i32_34, %c0_i32_35, %c0_i32_36] : memref<1x18x32x128xf32, #tpu.memory_space<vmem>> -> memref<1x18x32x128xf32, #tpu.memory_space<vmem>>
    %20 = tpu.memref_squeeze %19 : memref<1x18x32x128xf32, #tpu.memory_space<vmem>> -> memref<18x32x128xf32, #tpu.memory_space<vmem>>
    %c0_37 = arith.constant 0 : index
    %c7_38 = arith.constant 7 : index
    %c0_39 = arith.constant 0 : index
    %21 = vector.load %20[%c0_37, %c7_38, %c0_39] : memref<18x32x128xf32, #tpu.memory_space<vmem>>, vector<18x16x128xf32>
    %22 = arith.truncf %21 : vector<18x16x128xf32> to vector<18x16x128xbf16>
    %23 = vector.extract_strided_slice %22 {offsets = [0, 0, 0], sizes = [16, 16, 128], strides = [1, 1, 1]} : vector<18x16x128xbf16> to vector<16x16x128xbf16>
    %24 = vector.shape_cast %23 : vector<16x16x128xbf16> to vector<256x128xbf16>
    %c0_40 = arith.constant 0 : index
    %c0_41 = arith.constant 0 : index
    %25 = vector.load %arg9[%c0_40, %c0_41] : memref<256x1152xbf16, #tpu.memory_space<vmem>>, vector<256x128xbf16>
    tpu.vector_store %arg9[%c0_40, %c0_41], %24 {strides = array<i32>} : memref<256x1152xbf16, #tpu.memory_space<vmem>>, vector<256x128xbf16>,
    %26 = vector.extract_strided_slice %22 {offsets = [1, 0, 0], sizes = [16, 16, 128], strides = [1, 1, 1]} : vector<18x16x128xbf16> to vector<16x16x128xbf16>
    %27 = vector.shape_cast %26 : vector<16x16x128xbf16> to vector<256x128xbf16>
    %c0_42 = arith.constant 0 : index
    %c384 = arith.constant 384 : index
    %28 = vector.load %arg9[%c0_42, %c384] : memref<256x1152xbf16, #tpu.memory_space<vmem>>, vector<256x128xbf16>
    tpu.vector_store %arg9[%c0_42, %c384], %27 {strides = array<i32>} : memref<256x1152xbf16, #tpu.memory_space<vmem>>, vector<256x128xbf16>,
    %29 = vector.extract_strided_slice %22 {offsets = [2, 0, 0], sizes = [16, 16, 128], strides = [1, 1, 1]} : vector<18x16x128xbf16> to vector<16x16x128xbf16>
    %30 = vector.shape_cast %29 : vector<16x16x128xbf16> to vector<256x128xbf16>
    %c0_43 = arith.constant 0 : index
    %c768 = arith.constant 768 : index
    %31 = vector.load %arg9[%c0_43, %c768] : memref<256x1152xbf16, #tpu.memory_space<vmem>>, vector<256x128xbf16>
    tpu.vector_store %arg9[%c0_43, %c768], %30 {strides = array<i32>} : memref<256x1152xbf16, #tpu.memory_space<vmem>>, vector<256x128xbf16>,
    %c0_i32_44 = arith.constant 0 : i32
    %c0_i32_45 = arith.constant 0 : i32
    %c0_i32_46 = arith.constant 0 : i32
    %c0_i32_47 = arith.constant 0 : i32
    %32 = tpu.memref_slice %arg8[%c0_i32_44, %c0_i32_45, %c0_i32_46, %c0_i32_47] : memref<1x18x32x128xf32, #tpu.memory_space<vmem>> -> memref<1x18x32x128xf32, #tpu.memory_space<vmem>>
    %33 = tpu.memref_squeeze %32 : memref<1x18x32x128xf32, #tpu.memory_space<vmem>> -> memref<18x32x128xf32, #tpu.memory_space<vmem>>
    %c0_48 = arith.constant 0 : index
    %c8_49 = arith.constant 8 : index
    %c0_50 = arith.constant 0 : index
    %34 = vector.load %33[%c0_48, %c8_49, %c0_50] : memref<18x32x128xf32, #tpu.memory_space<vmem>>, vector<18x16x128xf32>
    %35 = arith.truncf %34 : vector<18x16x128xf32> to vector<18x16x128xbf16>
    %36 = vector.extract_strided_slice %35 {offsets = [0, 0, 0], sizes = [16, 16, 128], strides = [1, 1, 1]} : vector<18x16x128xbf16> to vector<16x16x128xbf16>
    %37 = vector.shape_cast %36 : vector<16x16x128xbf16> to vector<256x128xbf16>
    %c0_51 = arith.constant 0 : index
    %c128 = arith.constant 128 : index
    %38 = vector.load %arg9[%c0_51, %c128] : memref<256x1152xbf16, #tpu.memory_space<vmem>>, vector<256x128xbf16>
    tpu.vector_store %arg9[%c0_51, %c128], %37 {strides = array<i32>} : memref<256x1152xbf16, #tpu.memory_space<vmem>>, vector<256x128xbf16>,
    %39 = vector.extract_strided_slice %35 {offsets = [1, 0, 0], sizes = [16, 16, 128], strides = [1, 1, 1]} : vector<18x16x128xbf16> to vector<16x16x128xbf16>
    %40 = vector.shape_cast %39 : vector<16x16x128xbf16> to vector<256x128xbf16>
    %c0_52 = arith.constant 0 : index
    %c512 = arith.constant 512 : index
    %41 = vector.load %arg9[%c0_52, %c512] : memref<256x1152xbf16, #tpu.memory_space<vmem>>, vector<256x128xbf16>
    tpu.vector_store %arg9[%c0_52, %c512], %40 {strides = array<i32>} : memref<256x1152xbf16, #tpu.memory_space<vmem>>, vector<256x128xbf16>,
    %42 = vector.extract_strided_slice %35 {offsets = [2, 0, 0], sizes = [16, 16, 128], strides = [1, 1, 1]} : vector<18x16x128xbf16> to vector<16x16x128xbf16>
    %43 = vector.shape_cast %42 : vector<16x16x128xbf16> to vector<256x128xbf16>
    %c0_53 = arith.constant 0 : index
    %c896 = arith.constant 896 : index
    %44 = vector.load %arg9[%c0_53, %c896] : memref<256x1152xbf16, #tpu.memory_space<vmem>>, vector<256x128xbf16>
    tpu.vector_store %arg9[%c0_53, %c896], %43 {strides = array<i32>} : memref<256x1152xbf16, #tpu.memory_space<vmem>>, vector<256x128xbf16>,
    %c0_i32_54 = arith.constant 0 : i32
    %c0_i32_55 = arith.constant 0 : i32
    %c0_i32_56 = arith.constant 0 : i32
    %c0_i32_57 = arith.constant 0 : i32
    %45 = tpu.memref_slice %arg8[%c0_i32_54, %c0_i32_55, %c0_i32_56, %c0_i32_57] : memref<1x18x32x128xf32, #tpu.memory_space<vmem>> -> memref<1x18x32x128xf32, #tpu.memory_space<vmem>>
    %46 = tpu.memref_squeeze %45 : memref<1x18x32x128xf32, #tpu.memory_space<vmem>> -> memref<18x32x128xf32, #tpu.memory_space<vmem>>
    %c0_58 = arith.constant 0 : index
    %c9 = arith.constant 9 : index
    %c0_59 = arith.constant 0 : index
    %47 = vector.load %46[%c0_58, %c9, %c0_59] : memref<18x32x128xf32, #tpu.memory_space<vmem>>, vector<18x16x128xf32>
    %48 = arith.truncf %47 : vector<18x16x128xf32> to vector<18x16x128xbf16>
    %49 = vector.extract_strided_slice %48 {offsets = [0, 0, 0], sizes = [16, 16, 128], strides = [1, 1, 1]} : vector<18x16x128xbf16> to vector<16x16x128xbf16>
    %50 = vector.shape_cast %49 : vector<16x16x128xbf16> to vector<256x128xbf16>
    %c0_60 = arith.constant 0 : index
    %c256 = arith.constant 256 : index
    %51 = vector.load %arg9[%c0_60, %c256] : memref<256x1152xbf16, #tpu.memory_space<vmem>>, vector<256x128xbf16>
    tpu.vector_store %arg9[%c0_60, %c256], %50 {strides = array<i32>} : memref<256x1152xbf16, #tpu.memory_space<vmem>>, vector<256x128xbf16>,
    %52 = vector.extract_strided_slice %48 {offsets = [1, 0, 0], sizes = [16, 16, 128], strides = [1, 1, 1]} : vector<18x16x128xbf16> to vector<16x16x128xbf16>
    %53 = vector.shape_cast %52 : vector<16x16x128xbf16> to vector<256x128xbf16>
    %c0_61 = arith.constant 0 : index
    %c640 = arith.constant 640 : index
    %54 = vector.load %arg9[%c0_61, %c640] : memref<256x1152xbf16, #tpu.memory_space<vmem>>, vector<256x128xbf16>
    tpu.vector_store %arg9[%c0_61, %c640], %53 {strides = array<i32>} : memref<256x1152xbf16, #tpu.memory_space<vmem>>, vector<256x128xbf16>,
    %55 = vector.extract_strided_slice %48 {offsets = [2, 0, 0], sizes = [16, 16, 128], strides = [1, 1, 1]} : vector<18x16x128xbf16> to vector<16x16x128xbf16>
    %56 = vector.shape_cast %55 : vector<16x16x128xbf16> to vector<256x128xbf16>
    %c0_62 = arith.constant 0 : index
    %c1024 = arith.constant 1024 : index
    %57 = vector.load %arg9[%c0_62, %c1024] : memref<256x1152xbf16, #tpu.memory_space<vmem>>, vector<256x128xbf16>
    tpu.vector_store %arg9[%c0_62, %c1024], %56 {strides = array<i32>} : memref<256x1152xbf16, #tpu.memory_space<vmem>>, vector<256x128xbf16>,
    %c0_63 = arith.constant 0 : index
    %c0_64 = arith.constant 0 : index
    %58 = vector.load %arg9[%c0_63, %c0_64] : memref<256x1152xbf16, #tpu.memory_space<vmem>>, vector<256x1152xbf16>
    %c0_65 = arith.constant 0 : index
    %c0_66 = arith.constant 0 : index
    %59 = vector.load %arg2[%c0_65, %c0_66] : memref<1152x128xbf16, #tpu.memory_space<vmem>>, vector<1152x128xbf16>
    %cst_67 = arith.constant dense<0.000000e+00> : vector<256x128xf32>
    %60 = tpu.matmul %58, %59, %cst_67 {dimension_numbers = #tpu.dot_dimension_numbers<[1], [0], [0], [1], [0, 0, 1, 1], [], []>} : vector<256x1152xbf16>, vector<1152x128xbf16>, vector<256x128xf32> -> vector<256x128xf32>
    %c0_68 = arith.constant 0 : index
    %c0_69 = arith.constant 0 : index
    %61 = vector.load %arg3[%c0_68, %c0_69] : memref<1x128xf32, #tpu.memory_space<vmem>>, vector<1x128xf32>
    %62 = vector.broadcast %61 : vector<1x128xf32> to vector<256x128xf32>
    %63 = arith.addf %60, %62 : vector<256x128xf32>
    %cst_70 = arith.constant 5.000000e-01 : f32
    %64 = vector.broadcast %cst_70 : f32 to vector<256x128xf32>
    %65 = arith.mulf %64, %63 : vector<256x128xf32>
    %cst_71 = arith.constant 4.471500e-02 : f32
    %66 = vector.broadcast %cst_71 : f32 to vector<256x128xf32>
    %67 = arith.mulf %66, %63 : vector<256x128xf32>
    %68 = arith.mulf %67, %63 : vector<256x128xf32>
    %69 = arith.mulf %68, %63 : vector<256x128xf32>
    %70 = arith.addf %63, %69 : vector<256x128xf32>
    %cst_72 = arith.constant 0.797884583 : f32
    %71 = vector.broadcast %cst_72 : f32 to vector<256x128xf32>
    %72 = arith.mulf %71, %70 : vector<256x128xf32>
    %73 = math.tanh %72 : vector<256x128xf32>
    %cst_73 = arith.constant 1.000000e+00 : f32
    %74 = vector.broadcast %cst_73 : f32 to vector<256x128xf32>
    %75 = arith.addf %74, %73 : vector<256x128xf32>
    %76 = arith.mulf %65, %75 : vector<256x128xf32>
    %77 = vector.shape_cast %76 : vector<256x128xf32> to vector<16x16x128xf32>
    %c0_i32_74 = arith.constant 0 : i32
    %c0_i32_75 = arith.constant 0 : i32
    %c0_i32_76 = arith.constant 0 : i32
    %c0_i32_77 = arith.constant 0 : i32
    %78 = tpu.memref_slice %arg8[%c0_i32_74, %c0_i32_75, %c0_i32_76, %c0_i32_77] : memref<1x18x32x128xf32, #tpu.memory_space<vmem>> -> memref<1x18x32x128xf32, #tpu.memory_space<vmem>>
    %79 = tpu.memref_squeeze %78 : memref<1x18x32x128xf32, #tpu.memory_space<vmem>> -> memref<18x32x128xf32, #tpu.memory_space<vmem>>
    %c1_78 = arith.constant 1 : index
    %c8_79 = arith.constant 8 : index
    %c0_80 = arith.constant 0 : index
    %80 = vector.load %79[%c1_78, %c8_79, %c0_80] : memref<18x32x128xf32, #tpu.memory_space<vmem>>, vector<16x16x128xf32>
    tpu.vector_store %79[%c1_78, %c8_79, %c0_80], %77 {strides = array<i32>} : memref<18x32x128xf32, #tpu.memory_space<vmem>>, vector<16x16x128xf32>,
    %c0_i32_81 = arith.constant 0 : i32
    %c0_i32_82 = arith.constant 0 : i32
    %c0_i32_83 = arith.constant 0 : i32
    %c0_i32_84 = arith.constant 0 : i32
    %81 = tpu.memref_slice %arg8[%c0_i32_81, %c0_i32_82, %c0_i32_83, %c0_i32_84] : memref<1x18x32x128xf32, #tpu.memory_space<vmem>> -> memref<1x18x32x128xf32, #tpu.memory_space<vmem>>
    %82 = tpu.memref_squeeze %81 : memref<1x18x32x128xf32, #tpu.memory_space<vmem>> -> memref<18x32x128xf32, #tpu.memory_space<vmem>>
    %c0_85 = arith.constant 0 : index
    %c7_86 = arith.constant 7 : index
    %c0_87 = arith.constant 0 : index
    %83 = vector.load %82[%c0_85, %c7_86, %c0_87] : memref<18x32x128xf32, #tpu.memory_space<vmem>>, vector<18x16x128xf32>
    %84 = arith.truncf %83 : vector<18x16x128xf32> to vector<18x16x128xbf16>
    %85 = vector.extract_strided_slice %84 {offsets = [0, 0, 0], sizes = [16, 16, 128], strides = [1, 1, 1]} : vector<18x16x128xbf16> to vector<16x16x128xbf16>
    %86 = vector.shape_cast %85 : vector<16x16x128xbf16> to vector<256x128xbf16>
    %c0_88 = arith.constant 0 : index
    %c0_89 = arith.constant 0 : index
    %87 = vector.load %arg9[%c0_88, %c0_89] : memref<256x1152xbf16, #tpu.memory_space<vmem>>, vector<256x128xbf16>
    tpu.vector_store %arg9[%c0_88, %c0_89], %86 {strides = array<i32>} : memref<256x1152xbf16, #tpu.memory_space<vmem>>, vector<256x128xbf16>,
    %88 = vector.extract_strided_slice %84 {offsets = [1, 0, 0], sizes = [16, 16, 128], strides = [1, 1, 1]} : vector<18x16x128xbf16> to vector<16x16x128xbf16>
    %89 = vector.shape_cast %88 : vector<16x16x128xbf16> to vector<256x128xbf16>
    %c0_90 = arith.constant 0 : index
    %c384_91 = arith.constant 384 : index
    %90 = vector.load %arg9[%c0_90, %c384_91] : memref<256x1152xbf16, #tpu.memory_space<vmem>>, vector<256x128xbf16>
    tpu.vector_store %arg9[%c0_90, %c384_91], %89 {strides = array<i32>} : memref<256x1152xbf16, #tpu.memory_space<vmem>>, vector<256x128xbf16>,
    %91 = vector.extract_strided_slice %84 {offsets = [2, 0, 0], sizes = [16, 16, 128], strides = [1, 1, 1]} : vector<18x16x128xbf16> to vector<16x16x128xbf16>
    %92 = vector.shape_cast %91 : vector<16x16x128xbf16> to vector<256x128xbf16>
    %c0_92 = arith.constant 0 : index
    %c768_93 = arith.constant 768 : index
    %93 = vector.load %arg9[%c0_92, %c768_93] : memref<256x1152xbf16, #tpu.memory_space<vmem>>, vector<256x128xbf16>
    tpu.vector_store %arg9[%c0_92, %c768_93], %92 {strides = array<i32>} : memref<256x1152xbf16, #tpu.memory_space<vmem>>, vector<256x128xbf16>,
    %c0_i32_94 = arith.constant 0 : i32
    %c0_i32_95 = arith.constant 0 : i32
    %c0_i32_96 = arith.constant 0 : i32
    %c0_i32_97 = arith.constant 0 : i32
    %94 = tpu.memref_slice %arg8[%c0_i32_94, %c0_i32_95, %c0_i32_96, %c0_i32_97] : memref<1x18x32x128xf32, #tpu.memory_space<vmem>> -> memref<1x18x32x128xf32, #tpu.memory_space<vmem>>
    %95 = tpu.memref_squeeze %94 : memref<1x18x32x128xf32, #tpu.memory_space<vmem>> -> memref<18x32x128xf32, #tpu.memory_space<vmem>>
    %c0_98 = arith.constant 0 : index
    %c8_99 = arith.constant 8 : index
    %c0_100 = arith.constant 0 : index
    %96 = vector.load %95[%c0_98, %c8_99, %c0_100] : memref<18x32x128xf32, #tpu.memory_space<vmem>>, vector<18x16x128xf32>
    %97 = arith.truncf %96 : vector<18x16x128xf32> to vector<18x16x128xbf16>
    %98 = vector.extract_strided_slice %97 {offsets = [0, 0, 0], sizes = [16, 16, 128], strides = [1, 1, 1]} : vector<18x16x128xbf16> to vector<16x16x128xbf16>
    %99 = vector.shape_cast %98 : vector<16x16x128xbf16> to vector<256x128xbf16>
    %c0_101 = arith.constant 0 : index
    %c128_102 = arith.constant 128 : index
    %100 = vector.load %arg9[%c0_101, %c128_102] : memref<256x1152xbf16, #tpu.memory_space<vmem>>, vector<256x128xbf16>
    tpu.vector_store %arg9[%c0_101, %c128_102], %99 {strides = array<i32>} : memref<256x1152xbf16, #tpu.memory_space<vmem>>, vector<256x128xbf16>,
    %101 = vector.extract_strided_slice %97 {offsets = [1, 0, 0], sizes = [16, 16, 128], strides = [1, 1, 1]} : vector<18x16x128xbf16> to vector<16x16x128xbf16>
    %102 = vector.shape_cast %101 : vector<16x16x128xbf16> to vector<256x128xbf16>
    %c0_103 = arith.constant 0 : index
    %c512_104 = arith.constant 512 : index
    %103 = vector.load %arg9[%c0_103, %c512_104] : memref<256x1152xbf16, #tpu.memory_space<vmem>>, vector<256x128xbf16>
    tpu.vector_store %arg9[%c0_103, %c512_104], %102 {strides = array<i32>} : memref<256x1152xbf16, #tpu.memory_space<vmem>>, vector<256x128xbf16>,
    %104 = vector.extract_strided_slice %97 {offsets = [2, 0, 0], sizes = [16, 16, 128], strides = [1, 1, 1]} : vector<18x16x128xbf16> to vector<16x16x128xbf16>
    %105 = vector.shape_cast %104 : vector<16x16x128xbf16> to vector<256x128xbf16>
    %c0_105 = arith.constant 0 : index
    %c896_106 = arith.constant 896 : index
    %106 = vector.load %arg9[%c0_105, %c896_106] : memref<256x1152xbf16, #tpu.memory_space<vmem>>, vector<256x128xbf16>
    tpu.vector_store %arg9[%c0_105, %c896_106], %105 {strides = array<i32>} : memref<256x1152xbf16, #tpu.memory_space<vmem>>, vector<256x128xbf16>,
    %c0_i32_107 = arith.constant 0 : i32
    %c0_i32_108 = arith.constant 0 : i32
    %c0_i32_109 = arith.constant 0 : i32
    %c0_i32_110 = arith.constant 0 : i32
    %107 = tpu.memref_slice %arg8[%c0_i32_107, %c0_i32_108, %c0_i32_109, %c0_i32_110] : memref<1x18x32x128xf32, #tpu.memory_space<vmem>> -> memref<1x18x32x128xf32, #tpu.memory_space<vmem>>
    %108 = tpu.memref_squeeze %107 : memref<1x18x32x128xf32, #tpu.memory_space<vmem>> -> memref<18x32x128xf32, #tpu.memory_space<vmem>>
    %c0_111 = arith.constant 0 : index
    %c9_112 = arith.constant 9 : index
    %c0_113 = arith.constant 0 : index
    %109 = vector.load %108[%c0_111, %c9_112, %c0_113] : memref<18x32x128xf32, #tpu.memory_space<vmem>>, vector<18x16x128xf32>
    %110 = arith.truncf %109 : vector<18x16x128xf32> to vector<18x16x128xbf16>
    %111 = vector.extract_strided_slice %110 {offsets = [0, 0, 0], sizes = [16, 16, 128], strides = [1, 1, 1]} : vector<18x16x128xbf16> to vector<16x16x128xbf16>
    %112 = vector.shape_cast %111 : vector<16x16x128xbf16> to vector<256x128xbf16>
    %c0_114 = arith.constant 0 : index
    %c256_115 = arith.constant 256 : index
    %113 = vector.load %arg9[%c0_114, %c256_115] : memref<256x1152xbf16, #tpu.memory_space<vmem>>, vector<256x128xbf16>
    tpu.vector_store %arg9[%c0_114, %c256_115], %112 {strides = array<i32>} : memref<256x1152xbf16, #tpu.memory_space<vmem>>, vector<256x128xbf16>,
    %114 = vector.extract_strided_slice %110 {offsets = [1, 0, 0], sizes = [16, 16, 128], strides = [1, 1, 1]} : vector<18x16x128xbf16> to vector<16x16x128xbf16>
    %115 = vector.shape_cast %114 : vector<16x16x128xbf16> to vector<256x128xbf16>
    %c0_116 = arith.constant 0 : index
    %c640_117 = arith.constant 640 : index
    %116 = vector.load %arg9[%c0_116, %c640_117] : memref<256x1152xbf16, #tpu.memory_space<vmem>>, vector<256x128xbf16>
    tpu.vector_store %arg9[%c0_116, %c640_117], %115 {strides = array<i32>} : memref<256x1152xbf16, #tpu.memory_space<vmem>>, vector<256x128xbf16>,
    %117 = vector.extract_strided_slice %110 {offsets = [2, 0, 0], sizes = [16, 16, 128], strides = [1, 1, 1]} : vector<18x16x128xbf16> to vector<16x16x128xbf16>
    %118 = vector.shape_cast %117 : vector<16x16x128xbf16> to vector<256x128xbf16>
    %c0_118 = arith.constant 0 : index
    %c1024_119 = arith.constant 1024 : index
    %119 = vector.load %arg9[%c0_118, %c1024_119] : memref<256x1152xbf16, #tpu.memory_space<vmem>>, vector<256x128xbf16>
    tpu.vector_store %arg9[%c0_118, %c1024_119], %118 {strides = array<i32>} : memref<256x1152xbf16, #tpu.memory_space<vmem>>, vector<256x128xbf16>,
    %c0_120 = arith.constant 0 : index
    %c0_121 = arith.constant 0 : index
    %120 = vector.load %arg9[%c0_120, %c0_121] : memref<256x1152xbf16, #tpu.memory_space<vmem>>, vector<256x1152xbf16>
    %c0_122 = arith.constant 0 : index
    %c0_123 = arith.constant 0 : index
    %121 = vector.load %arg4[%c0_122, %c0_123] : memref<1152x128xbf16, #tpu.memory_space<vmem>>, vector<1152x128xbf16>
    %cst_124 = arith.constant dense<0.000000e+00> : vector<256x128xf32>
    %122 = tpu.matmul %120, %121, %cst_124 {dimension_numbers = #tpu.dot_dimension_numbers<[1], [0], [0], [1], [0, 0, 1, 1], [], []>} : vector<256x1152xbf16>, vector<1152x128xbf16>, vector<256x128xf32> -> vector<256x128xf32>
    %c0_125 = arith.constant 0 : index
    %c0_126 = arith.constant 0 : index
    %123 = vector.load %arg5[%c0_125, %c0_126] : memref<1x128xf32, #tpu.memory_space<vmem>>, vector<1x128xf32>
    %124 = vector.broadcast %123 : vector<1x128xf32> to vector<256x128xf32>
    %125 = arith.addf %122, %124 : vector<256x128xf32>
    %c0_127 = arith.constant 0 : index
    %c0_128 = arith.constant 0 : index
    %c0_129 = arith.constant 0 : index
    %c0_130 = arith.constant 0 : index
    %126 = vector.load %arg1[%c0_127, %c0_128, %c0_129, %c0_130] : memref<1x16x16x128xf32, #tpu.memory_space<vmem>>, vector<1x16x16x128xf32>
    %127 = vector.shape_cast %126 : vector<1x16x16x128xf32> to vector<256x128xf32>
    %c0_131 = arith.constant 0 : index
    %c0_132 = arith.constant 0 : index
    %128 = vector.load %arg6[%c0_131, %c0_132] : memref<1x128xf32, #tpu.memory_space<vmem>>, vector<1x128xf32>
    %129 = vector.broadcast %128 : vector<1x128xf32> to vector<256x128xf32>
    %130 = arith.mulf %129, %125 : vector<256x128xf32>
    %131 = arith.addf %127, %130 : vector<256x128xf32>
    %132 = vector.shape_cast %131 : vector<256x128xf32> to vector<1x16x16x128xf32>
    %c0_133 = arith.constant 0 : index
    %c0_134 = arith.constant 0 : index
    %c0_135 = arith.constant 0 : index
    %c0_136 = arith.constant 0 : index
    %133 = vector.load %arg7[%c0_133, %c0_134, %c0_135, %c0_136] : memref<1x16x16x128xf32, #tpu.memory_space<vmem>>, vector<1x16x16x128xf32>
    tpu.vector_store %arg7[%c0_133, %c0_134, %c0_135, %c0_136], %132 {strides = array<i32>} : memref<1x16x16x128xf32, #tpu.memory_space<vmem>>, vector<1x16x16x128xf32>,
    return
  }
  func.func @transform_0(%arg0: i32) -> (i32, i32, i32, i32) {
    %c0_i32 = arith.constant 0 : i32
    %c0_i32_0 = arith.constant 0 : i32
    %c0_i32_1 = arith.constant 0 : i32
    %c0_i32_2 = arith.constant 0 : i32
    return %arg0, %c0_i32, %c0_i32_0, %c0_i32_1 : i32, i32, i32, i32
  }
  func.func @transform_1(%arg0: i32) -> (i32, i32) {
    %c0_i32 = arith.constant 0 : i32
    %c0_i32_0 = arith.constant 0 : i32
    %c0_i32_1 = arith.constant 0 : i32
    return %c0_i32, %c0_i32_0 : i32, i32
  }
  func.func @transform_2(%arg0: i32) -> (i32, i32) {
    %c0_i32 = arith.constant 0 : i32
    %c0_i32_0 = arith.constant 0 : i32
    %c0_i32_1 = arith.constant 0 : i32
    return %c0_i32, %c0_i32_0 : i32, i32
  }
  func.func @transform_3(%arg0: i32) -> (i32, i32) {
    %c0_i32 = arith.constant 0 : i32
    %c0_i32_0 = arith.constant 0 : i32
    %c0_i32_1 = arith.constant 0 : i32
    return %c0_i32, %c0_i32_0 : i32, i32
  }
  func.func @transform_4(%arg0: i32) -> (i32, i32) {
    %c0_i32 = arith.constant 0 : i32
    %c0_i32_0 = arith.constant 0 : i32
    %c0_i32_1 = arith.constant 0 : i32
    return %c0_i32, %c0_i32_0 : i32, i32
  }
  func.func @transform_5(%arg0: i32) -> (i32, i32) {
    %c0_i32 = arith.constant 0 : i32
    %c0_i32_0 = arith.constant 0 : i32
    %c0_i32_1 = arith.constant 0 : i32
    return %c0_i32, %c0_i32_0 : i32, i32
  }
  func.func @transform_6(%arg0: i32) -> (i32, i32, i32, i32) {
    %c0_i32 = arith.constant 0 : i32
    %c0_i32_0 = arith.constant 0 : i32
    %c0_i32_1 = arith.constant 0 : i32
    %c0_i32_2 = arith.constant 0 : i32
    return %arg0, %c0_i32, %c0_i32_0, %c0_i32_1 : i32, i32, i32, i32
  }
}

</mosaic_0001>

<bundles_post_ra>
// kernel: tpu_custom_call.1
= control target key start
LH: loop header
LB: loop body
LE: loop exit
PB: predicated region body
PF: predicated region fallthrough
CT: control target
= control target key end

     0   :  { %11 = vsyncpa [#allocation5], 0  ;;  %s10734_s0 = inlined_call_operand.hbm [shape: f32[2,16,16,128], index: 0, kind: input, shape index: {}]   ;;  %s10735_s1 = inlined_call_operand.hbm [shape: bf16[1152,128], index: 1, kind: input, shape index: {}]   ;;  %s10736_s2 = inlined_call_operand.vmem [shape: f32[1,128], index: 2, kind: input, shape index: {}]   ;;  %s10737_s3 = inlined_call_operand.hbm [shape: bf16[1152,128], index: 3, kind: input, shape index: {}]   ;;  %s10738_s4 = inlined_call_operand.vmem [shape: f32[1,128], index: 4, kind: input, shape index: {}]   ;;  %s10739_s5 = inlined_call_operand.vmem [shape: f32[1,128], index: 5, kind: input, shape index: {}]   ;;  %s10740_s6 = inlined_call_operand.hbm [shape: f32[2,16,16,128], index: 6, kind: output, shape index: {}]  }
   0x1   :  { %13 = vsyncpa [#allocation5 + $0x1], 0 }
   0x2   :  { %14 = vsyncpa [#allocation8], 0 }
   0x3   :  { %15 = vsyncpa [#allocation6], 0 }
   0x4   :  { %17 = vsyncpa [#allocation6 + $0x1], 0  ;;  %s9081_s21 = smov 0   ;;  %s9083_s22 = smov 0  }
   0x5   :  { %s9085_s23 = smov 0   ;;  %s9087_s24 = smov 0  }
   0x6 LB: > { %s9102_s25 = sadd.s32 4294967295, %s9034_s24   ;;  %s6533_s26 = sadd.s32 4294967294, %s9034_s24   ;;  %s9034_s24 = sphi %s9087_s24, %s10824_s24   ;;  %s9030_s23 = sphi %s9085_s23, %s10823_s23   ;;  %s9026_s22 = sphi %s9083_s22, %s10822_s22   ;;  %s9022_s21 = sphi %s9081_s21, %s10821_s21  }
   0x7   : > { %p43_p0 = scmp.ne.s32.totalorder %s9026_s22, %s9022_s21  ;;  %p44_p1 = scmp.eq.s32.totalorder %s9102_s25, 0 }
   0x8   : > { %p172_p2 = scmp.eq.s32.totalorder %s9102_s25, 1  ;;  %p178_p3 = scmp.eq.s32.totalorder %s6533_s26, 1 }
   0x9   : > { %p9111_p4 = por %p44_p1, %p43_p0  ;;  %p6534_p5 = scmp.ge.s32.totalorder %s9034_s24, 1 }
   0xa   : > { %p9116_p6 = por %p178_p3, %p43_p0  ;;  %p185_p7 = scmp.lt.s32.totalorder %s9034_s24, 3 }
   0xb   : > { %s196_s7 = sshll.u32 %s10735_s1, 4  ;;  %s9036_s9 = smov [#allocation7]   ;;  %s197_s7 = int_to_ptr.hbm [resolvable:$true] %s196_s7 }
   0xc   : > { %p9124_p8 = pnand %p6534_p5, %p185_p7  ;;  %s198_s10 = sshll.u32 %s9036_s9, 4  ;;  %s199_s10 = int_to_ptr.vmem [resolvable:$true] %s198_s10 }
   0xd   : > { %s213_s13 = sshll.u32 %s10737_s3, 4  ;;  %s9037_s14 = smov 64   ;;  %s214_s13 = int_to_ptr.hbm [resolvable:$true] %s213_s13 }
   0xe   : > { %p8741_p9 = pneg %p9124_p8  ;;  %s9038_s15 = smov 4  }
   0xf   : > { %s9039_s16 = smov [#allocation9]   ;;  %s9137_s18 = sadd.s32 1, %s9034_s24  }
  0x10   : > { %p8742_p10 = pnand %p8741_p9, %p44_p1  ;;  %s215_s17 = sshll.u32 %s9039_s16, 4  ;;  %s216_s17 = int_to_ptr.vmem [resolvable:$true] %s215_s17 }
  0x11   : > { %s30_s19 = sadd.s32 1, %s9030_s23  ;;  %s27_s20 = ssub.s32 %s9034_s24, %s9137_s18 }
  0x12   : > { %8744 = dma.hbm_to_vmem [thread:$0]  (!%p8742_p10), %s197_s7, 9216, %s199_s10, [#allocation8], %s9037_s14, %s9037_s14, %s9038_s15  }
  0x13   : > { %8747 = dma.hbm_to_vmem [thread:$0]  (!%p8742_p10), %s214_s13, 9216, %s216_s17, [#allocation8], %s9037_s14, %s9037_s14, %s9038_s15  }
  0x14   : > { %p37_p12 = scmp.ne.s32.totalorder %s9030_s23, %s9026_s22  ;;  %p28_p13 = scmp.eq.s32.totalorder %s27_s20, 0 }
  0x15   : > { %p38_p0 = scmp.eq.s32.totalorder %s9034_s24, 0  ;;  %p8758_p5 = scmp.lt.s32.totalorder %s9034_s24, 2 }
  0x16   : > { %p9147_p3 = por %p172_p2, %p37_p12  ;;  %s235_s30 = sand.u32 1, %s9030_s23  }
  0x17   : > { %s9153_s29 = scalar_select %p28_p13, %s9030_s23, %s30_s19  }
  0x18   : > { %p39_p7 = por %p38_p0, %p37_p12  ;;  %s6538_s7 = sshll.u32 %s235_s30, 8 }
  0x19   : > { %s8279_s9 = sshll.u32 %s9034_s24, 8  ;;  %s239_s13 = scalar_lea.vmem [#allocation4], %s6538_s7 }
  0x1a   : > { %s244_s12 = scalar_lea.hbm %s10734_s0, %s8279_s9  ;;  %s247_s14 = sshll.u32 %s239_s13, 4  ;;  %s248_s14 = int_to_ptr.vmem [resolvable:$true] %s247_s14 }
  0x1b   : > { %s245_s15 = sshll.u32 %s244_s12, 4  ;;  %p9160_p2 = pnand %p8758_p5, %p39_p7  ;;  %s246_s15 = int_to_ptr.hbm [resolvable:$true] %s245_s15 }
  0x1c   : > { %s236_s17 = scalar_lea.sflag [#allocation5], %s235_s30  ;;  %s8934_s19 = sshra.s32 %s246_s15, 4  ;;  %s8935_s19 = int_to_ptr.hbm [resolvable:$true] %s8934_s19 }
  0x1d   : > { %s8936_s20 = scalar_lea.hbm %s8935_s19, 256  ;;  %p8938_p10 = pneg %p9160_p2 }
  0x1e   : > { %p8937_p9 = scmp.ne.s32.totalorder %s8935_s19, %s8936_s20  ;;  %s8941_s10 = scalar_lea.hbm %s10734_s0, 512 }
  0x1f   : > { %p8942_p0 = scmp.lt.s32.totalorder %s8935_s19, %s10734_s0  ;;  %p8943_p5 = scmp.lt.s32.totalorder %s8941_s10, %s8936_s20 }
  0x20   : > { %p8939_p12 = pnand %p8938_p10, %p8937_p9 }
  0x21   : > { %p8944_p7 = por %p8943_p5, %p8942_p0 }
  0x22   : > { %p8940_p13 = pneg %p8939_p12 }
  0x24   : > { %p8945_p11 = pnand %p8944_p7, %p8940_p13 }
  0x26   : > { %8948 = shalt.err (!%p8945_p11)
}
  0x27   : > { %s9040_s30 = smov 128   ;;  %s9041_s13 = smov 8  }
  0x28   : > { %8751 = dma.hbm_to_vmem [thread:$0]  (!%p9160_p2), %s246_s15, 4096, %s248_s14, %s236_s17, %s9040_s30, %s9040_s30, %s9041_s13  }
  0x29   : > { %259 = sbr.rel (%p9124_p8) target bundleno = 1665 (0x681), region = 44 }
  0x2e   : > { %s9177_s9 = sand.u32 1, %s9026_s22  }
  0x2f   : > { %s6542_s19 = sshll.u32 %s9177_s9, 8  ;;  %s262_s20 = scalar_lea.sflag [#allocation5], %s9177_s9 }
  0x30   : > { %s9183_s7 = scalar_lea.vmem [#allocation4], %s6542_s19 }
  0x31   : > { %9009 = dma.done.wait (%p9111_p4), %s262_s20, 4096  }
  0x32   : > { %9011 = vsyncadd (%p9111_p4), %s262_s20, 4294963200 }
  0x33   : > { %9013 = dma.done.wait (%p44_p1), [#allocation8], 18432  }
  0x34   : > { %9015 = vsyncadd (%p44_p1), [#allocation8], 4294948864  ;;  %v9042_v0 = vmov 0.0   ;;  %v8431_v1 = vld [vmem:[#allocation7 + $0x38] sm:$0xff]  ;;  %v8430_v3 = vld [vmem:[#allocation7 + $0x30] sm:$0xff]  ;;  %v9043_v34 = vmov 0.0|0.0  }
  0x35   : > { %305 = vst [vmem:[#allocation2] sm:$0xff] %v9042_v0  ;;  %v8439_v2 = vld [vmem:[#allocation7 + $0x78] sm:$0xff]  ;;  %2391 = vmatpush.bf16.msra.mxu0 %v8431_v1  ;;  %8713 = vmatpush.bf16.msra.mxu2 %v8431_v1  ;;  %v8438_v4 = vld [vmem:[#allocation7 + $0x70] sm:$0xff]  ;;  %v8429_v7 = vld [vmem:[#allocation7 + $0x28] sm:$0xff]  ;;  %s10482_s13 = scalar_lea.vmem [#allocation10], %s6542_s19  ;;  %s8712_s27 = sshll.u32 %s9102_s25, 8 }
  0x36   : > { %306 = vst [vmem:[#allocation2 + $0x8] sm:$0xff] %v9042_v0  ;;  %8721 = vmatpush.bf16.msra.mxu3 %v8439_v2  ;;  %2480 = vmatpush.bf16.msra.mxu1 %v8439_v2  ;;  %v8437_v8 = vld [vmem:[#allocation7 + $0x68] sm:$0xff]  ;;  %v8428_v11 = vld [vmem:[#allocation7 + $0x20] sm:$0xff]  ;;  %v8427_v13 = vld [vmem:[#allocation7 + $0x18] sm:$0xff]  ;;  %s6437_s15 = scalar_lea.hbm %s10740_s6, %s8712_s27  ;;  %s6438_s16 = sshll.u32 %s10482_s13, 4  ;;  %s6439_s16 = int_to_ptr.vmem [resolvable:$true] %s6438_s16 }
  0x37   : > { %307 = vst [vmem:[#allocation2 + $0x10] sm:$0xff] %v9042_v0  ;;  %v8436_v12 = vld [vmem:[#allocation7 + $0x60] sm:$0xff]  ;;  %v8435_v14 = vld [vmem:[#allocation7 + $0x58] sm:$0xff]  ;;  %v8426_v17 = vld [vmem:[#allocation7 + $0x10] sm:$0xff]  ;;  %s6440_s17 = sshll.u32 %s6437_s15, 4  ;;  %s6426_s25 = scalar_lea.sflag [#allocation6], %s9177_s9  ;;  %s6441_s17 = int_to_ptr.hbm [resolvable:$true] %s6440_s17 }
  0x38   : > { %308 = vst [vmem:[#allocation2 + $0x18] sm:$0xff] %v9042_v0  ;;  %v8434_v18 = vld [vmem:[#allocation7 + $0x50] sm:$0xff]  ;;  %v8425_v19 = vld [vmem:[#allocation7 + $0x8] sm:$0xff]  ;;  %v8424_v21 = vld [vmem:[#allocation7] sm:$0xff]  ;;  %s8978_s10 = sshra.s32 %s6441_s17, 4  ;;  %s8984_s19 = scalar_lea.hbm %s10740_s6, 512  ;;  %s8979_s10 = int_to_ptr.hbm [resolvable:$true] %s8978_s10 }
  0x39   : > { %310 = vst [vmem:[#allocation2 + $0x220] sm:$0xff] %v9042_v0  ;;  %2392 = vmatpush.bf16.msra.mxu0 %v8430_v3  ;;  %8714 = vmatpush.bf16.msra.mxu2 %v8430_v3  ;;  %v8433_v20 = vld [vmem:[#allocation7 + $0x48] sm:$0xff]  ;;  %v8432_v22 = vld [vmem:[#allocation7 + $0x40] sm:$0xff]  ;;  %v8447_v23 = vld [vmem:[#allocation7 + $0xb8] sm:$0xff]  ;;  %s8980_s11 = scalar_lea.hbm %s8979_s10, 256  ;;  %p8985_p11 = scmp.lt.s32.totalorder %s8979_s10, %s10740_s6 }
  0x3a   : > { %311 = vst [vmem:[#allocation2 + $0x228] sm:$0xff] %v9042_v0  ;;  %8722 = vmatpush.bf16.msra.mxu3 %v8438_v4  ;;  %2481 = vmatpush.bf16.msra.mxu1 %v8438_v4  ;;  %v8455_v24 = vld [vmem:[#allocation7 + $0xf8] sm:$0xff]  ;;  %v361_v27 = vld [vmem:[%s9183_s7 + $0x70] sm:$0xff]  ;;  %v347_v42 = vld [vmem:[%s9183_s7] sm:$0xff]  ;;  %p8981_p1 = scmp.ne.s32.totalorder %s8979_s10, %s8980_s11  ;;  %p8986_p2 = scmp.lt.s32.totalorder %s8984_s19, %s8980_s11 }
  0x3b   : > { %312 = vst [vmem:[#allocation2 + $0x230] sm:$0xff] %v9042_v0  ;;  %v8463_v26 = vld [vmem:[#allocation7 + $0x138] sm:$0xff]  ;;  %v631_v29 = vpack.c.bf16 %v361_v27, %v361_v27  ;;  %v8446_v39 = vld [vmem:[#allocation7 + $0xb0] sm:$0xff]  ;;  %v348_v44 = vld [vmem:[%s9183_s7 + $0x8] sm:$0xff]  ;;  %v617_v1 = vpack.c.bf16 %v347_v42, %v347_v42 }
  0x3c   : > { %313 = vst [vmem:[#allocation2 + $0x238] sm:$0xff] %v9042_v0  ;;  %v362_v28 = vld [vmem:[%s9183_s7 + $0x78] sm:$0xff]  ;;  %v8454_v40 = vld [vmem:[#allocation7 + $0xf0] sm:$0xff]  ;;  %v363_v47 = vld [vmem:[%s9183_s7 + $0x80] sm:$0xff]  ;;  %v618_v3 = vpack.c.bf16 %v348_v44, %v348_v44  ;;  %p8982_p4 = pnand %p8981_p1, %p9147_p3  ;;  %p8987_p9 = por %p8986_p2, %p8985_p11 }
  0x3d   : > { %315 = vst [vmem:[#allocation2 + $0x27] sm:$0x1] %v9042_v0  ;;  %v411_v5 = vld [vmem:[#allocation2 + $0x7] sm:$0xff]  ;;  %2393 = vmatpush.bf16.msra.mxu0 %v8429_v7  ;;  %8715 = vmatpush.bf16.msra.mxu2 %v8429_v7  ;;  %v632_v30 = vpack.c.bf16 %v362_v28, %v362_v28  ;;  %v8462_v48 = vld [vmem:[#allocation7 + $0x130] sm:$0xff]  ;;  %v633_v51 = vpack.c.bf16 %v363_v47, %v363_v47 }
  0x3e   : > { %316 = vst [vmem:[#allocation2 + $0x47] sm:$0x1] %v9042_v0  ;;  %v412_v6 = vld [vmem:[#allocation2 + $0xf] sm:$0xff]  ;;  %v447_v9 = vpack.c.bf16 %v411_v5, %v411_v5  ;;  %8723 = vmatpush.bf16.msra.mxu3 %v8437_v8  ;;  %2482 = vmatpush.bf16.msra.mxu1 %v8437_v8  ;;  %p8983_p8 = pneg %p8982_p4 }
  0x3f   : > { %317 = vst [vmem:[#allocation2 + $0x67] sm:$0x1] %v9042_v0  ;;  %v448_v10 = vpack.c.bf16 %v412_v6, %v412_v6  ;;  %v364_v50 = vld [vmem:[%s9183_s7 + $0x88] sm:$0xff] }
  0x40   : > { %318 = vst [vmem:[#allocation2 + $0x87] sm:$0x1] %v9042_v0  ;;  %v634_v53 = vpack.c.bf16 %v364_v50, %v364_v50  ;;  %v8445_v6 = vld [vmem:[#allocation7 + $0xa8] sm:$0xff]  ;;  %p8988_p10 = pnand %p8987_p9, %p8983_p8 }
  0x41   : > { %319 = vst [vmem:[#allocation2 + $0xa7] sm:$0x1] %v9042_v0  ;;  %2394 = vmatpush.bf16.msra.mxu0 %v8428_v11  ;;  %8716 = vmatpush.bf16.msra.mxu2 %v8428_v11  ;;  %v8453_v7 = vld [vmem:[#allocation7 + $0xe8] sm:$0xff]  ;;  %v350_v11 = vld [vmem:[%s9183_s7 + $0x18] sm:$0xff] }
  0x42   : > { %320 = vst [vmem:[#allocation2 + $0xc7] sm:$0x1] %v9042_v0  ;;  %8724 = vmatpush.bf16.msra.mxu3 %v8436_v12  ;;  %2483 = vmatpush.bf16.msra.mxu1 %v8436_v12 }
  0x43   : > { %483 = vst [vmem:[#allocation3] sm:$0xf] %v447_v9 }
  0x44   : > { %484 = vst [vmem:[#allocation3 + $0x24] sm:$0xf] %v448_v10 }
  0x45   : > { %321 = vst [vmem:[#allocation2 + $0xe7] sm:$0x1] %v9042_v0  ;;  %2395 = vmatpush.bf16.msra.mxu0 %v8427_v13  ;;  %8717 = vmatpush.bf16.msra.mxu2 %v8427_v13  ;;  %v365_v13 = vld [vmem:[%s9183_s7 + $0x90] sm:$0xff] }
  0x46   : > { %322 = vst [vmem:[#allocation2 + $0x107] sm:$0x1] %v9042_v0  ;;  %8725 = vmatpush.bf16.msra.mxu3 %v8435_v14  ;;  %2484 = vmatpush.bf16.msra.mxu1 %v8435_v14  ;;  %v366_v14 = vld [vmem:[%s9183_s7 + $0x98] sm:$0xff] }
  0x47   : > { %323 = vst [vmem:[#allocation2 + $0x127] sm:$0x1] %v9042_v0 }
  0x48   : > { %324 = vst [vmem:[#allocation2 + $0x147] sm:$0x1] %v9042_v0 }
  0x49   : > { %325 = vst [vmem:[#allocation2 + $0x167] sm:$0x1] %v9042_v0  ;;  %2396 = vmatpush.bf16.msra.mxu0 %v8426_v17  ;;  %8718 = vmatpush.bf16.msra.mxu2 %v8426_v17  ;;  %v8461_v17 = vld [vmem:[#allocation7 + $0x128] sm:$0xff] }
  0x4a   : > { %v6548_v15 = vld [vmem:[#allocation3] sm:$0xf]  ;;  %326 = vst [vmem:[#allocation2 + $0x187] sm:$0x1] %v9042_v0  ;;  %8726 = vmatpush.bf16.msra.mxu3 %v8434_v18  ;;  %2485 = vmatpush.bf16.msra.mxu1 %v8434_v18 }
  0x4b   : > { %v8284_v16 = vld [vmem:[#allocation3 + $0x20] sm:$0xf0]  ;;  %3584 = vst [vmem:[#allocation3] sm:$0xf] %v447_v9  ;;  %v349_v9 = vld [vmem:[%s9183_s7 + $0x10] sm:$0xff] }
  0x4c   : > { %3585 = vst [vmem:[#allocation3 + $0x24] sm:$0xf] %v448_v10  ;;  %v6549_v25 = vor.u32 %v8284_v16, %v6548_v15  ;;  %v635_v15 = vpack.c.bf16 %v365_v13, %v365_v13  ;;  %v636_v16 = vpack.c.bf16 %v366_v14, %v366_v14 }
  0x4d   : > { %327 = vst [vmem:[#allocation2 + $0x1a7] sm:$0x1] %v9042_v0  ;;  %2397 = vmatpush.bf16.msra.mxu0 %v8425_v19  ;;  %8719 = vmatpush.bf16.msra.mxu2 %v8425_v19 }
  0x4e   : > { %328 = vst [vmem:[#allocation2 + $0x1c7] sm:$0x1] %v9042_v0  ;;  %8727 = vmatpush.bf16.msra.mxu3 %v8433_v20  ;;  %2486 = vmatpush.bf16.msra.mxu1 %v8433_v20 }
  0x4f   : > { %329 = vst [vmem:[#allocation2 + $0x1e7] sm:$0x1] %v9042_v0 }
  0x50   : > { %330 = vst [vmem:[#allocation2 + $0x207] sm:$0x1] %v9042_v0 }
  0x51   : > { %331 = vst [vmem:[#allocation2 + $0x38] sm:$0x1] %v9042_v0  ;;  %2398 = vmatpush.bf16.msra.mxu0 %v8424_v21  ;;  %8720 = vmatpush.bf16.msra.mxu2 %v8424_v21 }
  0x52   : > { %332 = vst [vmem:[#allocation2 + $0x58] sm:$0x1] %v9042_v0  ;;  %8728 = vmatpush.bf16.msra.mxu3 %v8432_v22  ;;  %2487 = vmatpush.bf16.msra.mxu1 %v8432_v22 }
  0x53   : > { %333 = vst [vmem:[#allocation2 + $0x78] sm:$0x1] %v9042_v0 }
  0x54   : > { %334 = vst [vmem:[#allocation2 + $0x98] sm:$0x1] %v9042_v0  ;;  %2399 = vmatmul.bf16.vlgmr.msra.gmra.mxu0 %v6549_v25 }
  0x55   : > { %335 = vst [vmem:[#allocation2 + $0xb8] sm:$0x1] %v9042_v0  ;;  %2569 = vmatpush.bf16.msrb.mxu2 %v8447_v23  ;;  %2747 = vmatpush.bf16.msrb.mxu0 %v8463_v26 }
  0x56   : > { %336 = vst [vmem:[#allocation2 + $0xd8] sm:$0x1] %v9042_v0  ;;  %2658 = vmatpush.bf16.msrb.mxu3 %v8455_v24 }
  0x57   : > { %337 = vst [vmem:[#allocation2 + $0xf8] sm:$0x1] %v9042_v0 }
  0x58   : > { %338 = vst [vmem:[#allocation2 + $0x118] sm:$0x1] %v9042_v0 }
  0x59   : > { %339 = vst [vmem:[#allocation2 + $0x138] sm:$0x1] %v9042_v0  ;;  %2570 = vmatpush.bf16.msrb.mxu2 %v8446_v39  ;;  %2748 = vmatpush.bf16.msrb.mxu0 %v8462_v48  ;;  %v8452_v39 = vld [vmem:[#allocation7 + $0xe0] sm:$0xff] }
  0x5a   : > { %340 = vst [vmem:[#allocation2 + $0x158] sm:$0x1] %v9042_v0  ;;  %2659 = vmatpush.bf16.msrb.mxu3 %v8454_v40 }
  0x5b   : > { %341 = vst [vmem:[#allocation2 + $0x178] sm:$0x1] %v9042_v0 }
  0x5c   : > { %342 = vst [vmem:[#allocation2 + $0x198] sm:$0x1] %v9042_v0 }
  0x5d   : > { %343 = vst [vmem:[#allocation2 + $0x1b8] sm:$0x1] %v9042_v0  ;;  %2571 = vmatpush.bf16.msrb.mxu2 %v8445_v6  ;;  %2749 = vmatpush.bf16.msrb.mxu0 %v8461_v17  ;;  %v8451_v6 = vld [vmem:[#allocation7 + $0xd8] sm:$0xff] }
  0x5e   : > { %344 = vst [vmem:[#allocation2 + $0x1d8] sm:$0x1] %v9042_v0  ;;  %2660 = vmatpush.bf16.msrb.mxu3 %v8453_v7 }
  0x5f   : > { %345 = vst [vmem:[#allocation2 + $0x1f8] sm:$0x1] %v9042_v0 }
  0x60   : > { %346 = vst [vmem:[#allocation2 + $0x218] sm:$0x1] %v9042_v0 }
  0x61   : > { %393 = vst [vmem:[#allocation2 + $0x108] sm:$0xff] %v361_v27 }
  0x62   : > { %394 = vst [vmem:[#allocation2 + $0x110] sm:$0xff] %v362_v28  ;;  %2661 = vmatpush.bf16.msrb.mxu3 %v8452_v39 }
  0x63   : > { %667 = vst [vmem:[#allocation3 + $0x244] sm:$0xf] %v631_v29 }
  0x64   : > { %668 = vst [vmem:[#allocation3 + $0x268] sm:$0xf] %v632_v30 }
  0x65   : > { %697 = vst [vmem:[#allocation3 + $0x208] sm:$0xf] %v631_v29 }
  0x66   : > { %698 = vst [vmem:[#allocation3 + $0x22c] sm:$0xf] %v632_v30  ;;  %2662 = vmatpush.bf16.msrb.mxu3 %v8451_v6 }
  0x67   : > { %727 = vst [vmem:[#allocation3 + $0x1cc] sm:$0xf] %v631_v29 }
  0x68   : > { %v427_v31 = vld [vmem:[#allocation2 + $0x107] sm:$0xff]  ;;  %728 = vst [vmem:[#allocation3 + $0x1f0] sm:$0xf] %v632_v30 }
  0x69   : > { %v428_v32 = vld [vmem:[#allocation2 + $0x10f] sm:$0xff]  ;;  %v463_v33 = vpack.c.bf16 %v427_v31, %v427_v31  ;;  %651 = vst [vmem:[#allocation3 + $0x4] sm:$0xf] %v9043_v34 }
  0x6a   : > { %v464_v35 = vpack.c.bf16 %v428_v32, %v428_v32  ;;  %v8352_v36 = vld [vmem:[#allocation3 + $0x244] sm:$0xf]  ;;  %652 = vst [vmem:[#allocation3 + $0x28] sm:$0xf] %v9043_v34 }
  0x6b   : > { %499 = vst [vmem:[#allocation3 + $0x240] sm:$0xf] %v463_v33  ;;  %v6838_v37 = vld [vmem:[#allocation3 + $0x264] sm:$0xf0] }
  0x6c   : > { %500 = vst [vmem:[#allocation3 + $0x264] sm:$0xf] %v464_v35  ;;  %v6841_v38 = vor.u32 %v8352_v36, %v6838_v37  ;;  %v620_v36 = vpack.c.bf16 %v350_v11, %v350_v11 }
  0x6d   : > { %529 = vst [vmem:[#allocation3 + $0x204] sm:$0xf] %v463_v33 }
  0x6e   : > { %530 = vst [vmem:[#allocation3 + $0x228] sm:$0xf] %v464_v35  ;;  %2528 = vmatmul.bf16.vlgmr.msra.gmra.mxu3 %v6841_v38  ;;  %v8444_v38 = vld [vmem:[#allocation7 + $0xa0] sm:$0xff] }
  0x6f   : > { %559 = vst [vmem:[#allocation3 + $0x1c8] sm:$0xf] %v463_v33  ;;  %2572 = vmatpush.bf16.msrb.mxu2 %v8444_v38 }
  0x70   : > { %560 = vst [vmem:[#allocation3 + $0x1ec] sm:$0xf] %v464_v35  ;;  %v8280_v41 = vld [vmem:[#allocation3 + $0x4] sm:$0xf] }
  0x71   : > { %v6550_v43 = vld [vmem:[#allocation3 + $0x24] sm:$0xf0]  ;;  %3752 = vst [vmem:[#allocation3 + $0x4] sm:$0xf] %v9043_v34 }
  0x72   : > { %v6836_v45 = vld [vmem:[#allocation3 + $0x240] sm:$0xf]  ;;  %v6553_v46 = vor.u32 %v8280_v41, %v6550_v43  ;;  %3753 = vst [vmem:[#allocation3 + $0x28] sm:$0xf] %v9043_v34  ;;  %v619_v34 = vpack.c.bf16 %v349_v9, %v349_v9  ;;  %v352_v43 = vld [vmem:[%s9183_s7 + $0x28] sm:$0xff] }
  0x73   : > { %v8356_v49 = vld [vmem:[#allocation3 + $0x260] sm:$0xf0]  ;;  %379 = vst [vmem:[#allocation2 + $0x28] sm:$0xff] %v347_v42 }
  0x74   : > { %v6837_v52 = vor.u32 %v8356_v49, %v6836_v45  ;;  %2488 = vmatmul.bf16.vlgmr.msra.gmra.mxu1 %v6553_v46  ;;  %380 = vst [vmem:[#allocation2 + $0x30] sm:$0xff] %v348_v44  ;;  %v351_v42 = vld [vmem:[%s9183_s7 + $0x20] sm:$0xff]  ;;  %v368_v45 = vld [vmem:[%s9183_s7 + $0xa8] sm:$0xff] }
  0x75   : > { %395 = vst [vmem:[#allocation2 + $0x128] sm:$0xff] %v363_v47  ;;  %v367_v44 = vld [vmem:[%s9183_s7 + $0xa0] sm:$0xff]  ;;  %v638_v48 = vpack.c.bf16 %v368_v45, %v368_v45 }
  0x76   : > { %2439 = vmatmul.bf16.vlgmr.msra.gmra.mxu2 %v6837_v52  ;;  %396 = vst [vmem:[#allocation2 + $0x130] sm:$0xff] %v364_v50  ;;  %v637_v46 = vpack.c.bf16 %v367_v44, %v367_v44  ;;  %v8460_v49 = vld [vmem:[#allocation7 + $0x120] sm:$0xff] }
  0x77   : > { %669 = vst [vmem:[#allocation3 + $0x28c] sm:$0xf] %v633_v51  ;;  %2750 = vmatpush.bf16.msrb.mxu0 %v8460_v49 }
  0x78   : > { %670 = vst [vmem:[#allocation3 + $0x2b0] sm:$0xf] %v634_v53 }
  0x79   : > { %699 = vst [vmem:[#allocation3 + $0x250] sm:$0xf] %v633_v51 }
  0x7a   : > { %v413_v54 = vld [vmem:[#allocation2 + $0x27] sm:$0xff]  ;;  %700 = vst [vmem:[#allocation3 + $0x274] sm:$0xf] %v634_v53 }
  0x7b   : > { %v414_v55 = vld [vmem:[#allocation2 + $0x2f] sm:$0xff]  ;;  %v449_v56 = vpack.c.bf16 %v413_v54, %v413_v54  ;;  %729 = vst [vmem:[#allocation3 + $0x214] sm:$0xf] %v633_v51 }
  0x7c   : > { %v450_v57 = vpack.c.bf16 %v414_v55, %v414_v55  ;;  %v429_v58 = vld [vmem:[#allocation2 + $0x127] sm:$0xff]  ;;  %730 = vst [vmem:[#allocation3 + $0x238] sm:$0xf] %v634_v53 }
  0x7d   : > { %485 = vst [vmem:[#allocation3 + $0x48] sm:$0xf] %v449_v56  ;;  %v430_v59 = vld [vmem:[#allocation2 + $0x12f] sm:$0xff]  ;;  %v465_v60 = vpack.c.bf16 %v429_v58, %v429_v58 }
  0x7e   : > { %486 = vst [vmem:[#allocation3 + $0x6c] sm:$0xf] %v450_v57  ;;  %v466_v61 = vpack.c.bf16 %v430_v59, %v430_v59  ;;  %v8361_v62 = vld [vmem:[#allocation3 + $0x28c] sm:$0xf] }
  0x7f   : > { %515 = vst [vmem:[#allocation3 + $0xc] sm:$0xf] %v449_v56  ;;  %v6874_v63 = vld [vmem:[#allocation3 + $0x2ac] sm:$0xf0] }
  0x80   : > { %516 = vst [vmem:[#allocation3 + $0x30] sm:$0xf] %v450_v57  ;;  %v6877_v0 = vor.u32 %v8361_v62, %v6874_v63 }
  0x81   : > { %501 = vst [vmem:[#allocation3 + $0x288] sm:$0xf] %v465_v60 }
  0x82   : > { %502 = vst [vmem:[#allocation3 + $0x2ac] sm:$0xf] %v466_v61  ;;  %2533 = vmatmul.bf16.gmra.mxu3 %v6877_v0 }
  0x83   : > { %531 = vst [vmem:[#allocation3 + $0x24c] sm:$0xf] %v465_v60 }
  0x84   : > { %v6584_v2 = vld [vmem:[#allocation3 + $0x48] sm:$0xf]  ;;  %532 = vst [vmem:[#allocation3 + $0x270] sm:$0xf] %v466_v61 }
  0x85   : > { %v8293_v4 = vld [vmem:[#allocation3 + $0x68] sm:$0xf0]  ;;  %561 = vst [vmem:[#allocation3 + $0x210] sm:$0xf] %v465_v60 }
  0x86   : > { %v6585_v5 = vor.u32 %v8293_v4, %v6584_v2  ;;  %562 = vst [vmem:[#allocation3 + $0x234] sm:$0xf] %v466_v61 }
  0x87   : > { %653 = vst [vmem:[#allocation3 + $0x4c] sm:$0xf] %v617_v1 }
  0x88   : > { %2404 = vmatmul.bf16.gmra.mxu0 %v6585_v5  ;;  %v6872_v8 = vld [vmem:[#allocation3 + $0x288] sm:$0xf]  ;;  %654 = vst [vmem:[#allocation3 + $0x70] sm:$0xf] %v618_v3  ;;  %v8443_v5 = vld [vmem:[#allocation7 + $0x98] sm:$0xff] }
  0x89   : > { %v8365_v10 = vld [vmem:[#allocation3 + $0x2a8] sm:$0xf0]  ;;  %683 = vst [vmem:[#allocation3 + $0x10] sm:$0xf] %v617_v1  ;;  %v621_v1 = vpack.c.bf16 %v351_v42, %v351_v42  ;;  %2573 = vmatpush.bf16.msrb.mxu2 %v8443_v5 }
  0x8a   : > { %v6873_v12 = vor.u32 %v8365_v10, %v6872_v8  ;;  %684 = vst [vmem:[#allocation3 + $0x34] sm:$0xf] %v618_v3  ;;  %v622_v3 = vpack.c.bf16 %v352_v43, %v352_v43  ;;  %v354_v10 = vld [vmem:[%s9183_s7 + $0x38] sm:$0xff] }
  0x8b   : > { %381 = vst [vmem:[#allocation2 + $0x48] sm:$0xff] %v349_v9  ;;  %v353_v9 = vld [vmem:[%s9183_s7 + $0x30] sm:$0xff] }
  0x8c   : > { %2444 = vmatmul.bf16.gmra.mxu2 %v6873_v12  ;;  %382 = vst [vmem:[#allocation2 + $0x50] sm:$0xff] %v350_v11  ;;  %v369_v11 = vld [vmem:[%s9183_s7 + $0xb0] sm:$0xff]  ;;  %v370_v12 = vld [vmem:[%s9183_s7 + $0xb8] sm:$0xff] }
  0x8d   : > { %397 = vst [vmem:[#allocation2 + $0x148] sm:$0xff] %v365_v13  ;;  %v639_v13 = vpack.c.bf16 %v369_v11, %v369_v11 }
  0x8e   : > { %v8289_v18 = vld [vmem:[#allocation3 + $0x4c] sm:$0xf]  ;;  %398 = vst [vmem:[#allocation2 + $0x150] sm:$0xff] %v366_v14 }
  0x8f   : > { %v6586_v19 = vld [vmem:[#allocation3 + $0x6c] sm:$0xf0]  ;;  %671 = vst [vmem:[#allocation3 + $0x2d4] sm:$0xf] %v635_v15 }
  0x90   : > { %v6589_v20 = vor.u32 %v8289_v18, %v6586_v19  ;;  %672 = vst [vmem:[#allocation3 + $0x2f8] sm:$0xf] %v636_v16 }
  0x91   : > { %701 = vst [vmem:[#allocation3 + $0x298] sm:$0xf] %v635_v15 }
  0x92   : > { %2493 = vmatmul.bf16.gmra.mxu1 %v6589_v20  ;;  %v415_v21 = vld [vmem:[#allocation2 + $0x47] sm:$0xff]  ;;  %702 = vst [vmem:[#allocation3 + $0x2bc] sm:$0xf] %v636_v16 }
  0x93   : > { %v416_v22 = vld [vmem:[#allocation2 + $0x4f] sm:$0xff]  ;;  %v451_v23 = vpack.c.bf16 %v415_v21, %v415_v21  ;;  %731 = vst [vmem:[#allocation3 + $0x25c] sm:$0xf] %v635_v15  ;;  %v640_v15 = vpack.c.bf16 %v370_v12, %v370_v12 }
  0x94   : > { %v452_v24 = vpack.c.bf16 %v416_v22, %v416_v22  ;;  %v431_v25 = vld [vmem:[#allocation2 + $0x147] sm:$0xff]  ;;  %732 = vst [vmem:[#allocation3 + $0x280] sm:$0xf] %v636_v16  ;;  %v8459_v16 = vld [vmem:[#allocation7 + $0x118] sm:$0xff] }
  0x95   : > { %487 = vst [vmem:[#allocation3 + $0x90] sm:$0xf] %v451_v23  ;;  %v432_v26 = vld [vmem:[#allocation2 + $0x14f] sm:$0xff]  ;;  %v467_v28 = vpack.c.bf16 %v431_v25, %v431_v25  ;;  %2751 = vmatpush.bf16.msrb.mxu0 %v8459_v16 }
  0x96   : > { %488 = vst [vmem:[#allocation3 + $0xb4] sm:$0xf] %v452_v24  ;;  %v8370_v27 = vld [vmem:[#allocation3 + $0x2d4] sm:$0xf]  ;;  %v468_v30 = vpack.c.bf16 %v432_v26, %v432_v26 }
  0x97   : > { %547 = vst [vmem:[#allocation3 + $0x18] sm:$0xf] %v451_v23  ;;  %v6910_v29 = vld [vmem:[#allocation3 + $0x2f4] sm:$0xf0] }
  0x98   : > { %548 = vst [vmem:[#allocation3 + $0x3c] sm:$0xf] %v452_v24  ;;  %v6913_v31 = vor.u32 %v8370_v27, %v6910_v29 }
  0x99   : > { %517 = vst [vmem:[#allocation3 + $0x54] sm:$0xf] %v451_v23 }
  0x9a   : > { %518 = vst [vmem:[#allocation3 + $0x78] sm:$0xf] %v452_v24  ;;  %2538 = vmatmul.bf16.gmra.mxu3 %v6913_v31 }
  0x9b   : > { %503 = vst [vmem:[#allocation3 + $0x2d0] sm:$0xf] %v467_v28 }
  0x9c   : > { %v6620_v32 = vld [vmem:[#allocation3 + $0x90] sm:$0xf]  ;;  %504 = vst [vmem:[#allocation3 + $0x2f4] sm:$0xf] %v468_v30 }
  0x9d   : > { %v8302_v33 = vld [vmem:[#allocation3 + $0xb0] sm:$0xf0]  ;;  %533 = vst [vmem:[#allocation3 + $0x294] sm:$0xf] %v467_v28 }
  0x9e   : > { %v6621_v35 = vor.u32 %v8302_v33, %v6620_v32  ;;  %534 = vst [vmem:[#allocation3 + $0x2b8] sm:$0xf] %v468_v30  ;;  %v623_v32 = vpack.c.bf16 %v353_v9, %v353_v9 }
  0x9f   : > { %563 = vst [vmem:[#allocation3 + $0x258] sm:$0xf] %v467_v28 }
  0xa0   : > { %2409 = vmatmul.bf16.gmra.mxu0 %v6621_v35  ;;  %564 = vst [vmem:[#allocation3 + $0x27c] sm:$0xf] %v468_v30 }
  0xa1   : > { %655 = vst [vmem:[#allocation3 + $0x94] sm:$0xf] %v619_v34 }
  0xa2   : > { %v6908_v37 = vld [vmem:[#allocation3 + $0x2d0] sm:$0xf]  ;;  %656 = vst [vmem:[#allocation3 + $0xb8] sm:$0xf] %v620_v36 }
  0xa3   : > { %v8374_v40 = vld [vmem:[#allocation3 + $0x2f0] sm:$0xf0]  ;;  %715 = vst [vmem:[#allocation3 + $0x1c] sm:$0xf] %v619_v34 }
  0xa4   : > { %v6909_v41 = vor.u32 %v8374_v40, %v6908_v37  ;;  %716 = vst [vmem:[#allocation3 + $0x40] sm:$0xf] %v620_v36  ;;  %v8450_v37 = vld [vmem:[#allocation7 + $0xd0] sm:$0xff]  ;;  %v355_v40 = vld [vmem:[%s9183_s7 + $0x40] sm:$0xff] }
  0xa5   : > { %685 = vst [vmem:[#allocation3 + $0x58] sm:$0xf] %v619_v34  ;;  %v624_v34 = vpack.c.bf16 %v354_v10, %v354_v10  ;;  %2663 = vmatpush.bf16.msrb.mxu3 %v8450_v37  ;;  %v8448_v37 = vld [vmem:[#allocation7 + $0xc0] sm:$0xff] }
  0xa6   : > { %2449 = vmatmul.bf16.gmra.mxu2 %v6909_v41  ;;  %686 = vst [vmem:[#allocation3 + $0x7c] sm:$0xf] %v620_v36  ;;  %v8442_v36 = vld [vmem:[#allocation7 + $0x90] sm:$0xff]  ;;  %v356_v41 = vld [vmem:[%s9183_s7 + $0x48] sm:$0xff] }
  0xa7   : > { %383 = vst [vmem:[#allocation2 + $0x68] sm:$0xff] %v351_v42  ;;  %2574 = vmatpush.bf16.msrb.mxu2 %v8442_v36  ;;  %v371_v42 = vld [vmem:[%s9183_s7 + $0xc0] sm:$0xff] }
  0xa8   : > { %v8298_v47 = vld [vmem:[#allocation3 + $0x94] sm:$0xf]  ;;  %384 = vst [vmem:[#allocation2 + $0x70] sm:$0xff] %v352_v43  ;;  %v372_v43 = vld [vmem:[%s9183_s7 + $0xc8] sm:$0xff]  ;;  %v8440_v36 = vld [vmem:[#allocation7 + $0x80] sm:$0xff] }
  0xa9   : > { %v6622_v50 = vld [vmem:[#allocation3 + $0xb4] sm:$0xf0]  ;;  %399 = vst [vmem:[#allocation2 + $0x168] sm:$0xff] %v367_v44  ;;  %v641_v44 = vpack.c.bf16 %v371_v42, %v371_v42 }
  0xaa   : > { %v6625_v51 = vor.u32 %v8298_v47, %v6622_v50  ;;  %400 = vst [vmem:[#allocation2 + $0x170] sm:$0xff] %v368_v45  ;;  %v8458_v47 = vld [vmem:[#allocation7 + $0x110] sm:$0xff] }
  0xab   : > { %673 = vst [vmem:[#allocation3 + $0x31c] sm:$0xf] %v637_v46  ;;  %2752 = vmatpush.bf16.msrb.mxu0 %v8458_v47 }
  0xac   : > { %2498 = vmatmul.bf16.gmra.mxu1 %v6625_v51  ;;  %674 = vst [vmem:[#allocation3 + $0x340] sm:$0xf] %v638_v48 }
  0xad   : > { %703 = vst [vmem:[#allocation3 + $0x2e0] sm:$0xf] %v637_v46 }
  0xae   : > { %v417_v52 = vld [vmem:[#allocation2 + $0x67] sm:$0xff]  ;;  %704 = vst [vmem:[#allocation3 + $0x304] sm:$0xf] %v638_v48 }
  0xaf   : > { %v418_v53 = vld [vmem:[#allocation2 + $0x6f] sm:$0xff]  ;;  %v453_v54 = vpack.c.bf16 %v417_v52, %v417_v52  ;;  %733 = vst [vmem:[#allocation3 + $0x2a4] sm:$0xf] %v637_v46  ;;  %v642_v46 = vpack.c.bf16 %v372_v43, %v372_v43 }
  0xb0   : > { %v454_v55 = vpack.c.bf16 %v418_v53, %v418_v53  ;;  %v433_v56 = vld [vmem:[#allocation2 + $0x167] sm:$0xff]  ;;  %734 = vst [vmem:[#allocation3 + $0x2c8] sm:$0xf] %v638_v48 }
  0xb1   : > { %489 = vst [vmem:[#allocation3 + $0xd8] sm:$0xf] %v453_v54  ;;  %v434_v57 = vld [vmem:[#allocation2 + $0x16f] sm:$0xff]  ;;  %v469_v59 = vpack.c.bf16 %v433_v56, %v433_v56 }
  0xb2   : > { %490 = vst [vmem:[#allocation3 + $0xfc] sm:$0xf] %v454_v55  ;;  %v8379_v58 = vld [vmem:[#allocation3 + $0x31c] sm:$0xf]  ;;  %v470_v61 = vpack.c.bf16 %v434_v57, %v434_v57 }
  0xb3   : > { %519 = vst [vmem:[#allocation3 + $0x9c] sm:$0xf] %v453_v54  ;;  %v6946_v60 = vld [vmem:[#allocation3 + $0x33c] sm:$0xf0] }
  0xb4   : > { %520 = vst [vmem:[#allocation3 + $0xc0] sm:$0xf] %v454_v55  ;;  %v6949_v62 = vor.u32 %v8379_v58, %v6946_v60 }
  0xb5   : > { %549 = vst [vmem:[#allocation3 + $0x60] sm:$0xf] %v453_v54 }
  0xb6   : > { %550 = vst [vmem:[#allocation3 + $0x84] sm:$0xf] %v454_v55  ;;  %2543 = vmatmul.bf16.gmra.mxu3 %v6949_v62 }
  0xb7   : > { %505 = vst [vmem:[#allocation3 + $0x318] sm:$0xf] %v469_v59 }
  0xb8   : > { %v6656_v63 = vld [vmem:[#allocation3 + $0xd8] sm:$0xf]  ;;  %506 = vst [vmem:[#allocation3 + $0x33c] sm:$0xf] %v470_v61 }
  0xb9   : > { %v8311_v0 = vld [vmem:[#allocation3 + $0xf8] sm:$0xf0]  ;;  %535 = vst [vmem:[#allocation3 + $0x2dc] sm:$0xf] %v469_v59 }
  0xba   : > { %v6657_v2 = vor.u32 %v8311_v0, %v6656_v63  ;;  %536 = vst [vmem:[#allocation3 + $0x300] sm:$0xf] %v470_v61  ;;  %v625_v63 = vpack.c.bf16 %v355_v40, %v355_v40 }
  0xbb   : > { %565 = vst [vmem:[#allocation3 + $0x2a0] sm:$0xf] %v469_v59 }
  0xbc   : > { %2414 = vmatmul.bf16.gmra.mxu0 %v6657_v2  ;;  %566 = vst [vmem:[#allocation3 + $0x2c4] sm:$0xf] %v470_v61 }
  0xbd   : > { %657 = vst [vmem:[#allocation3 + $0xdc] sm:$0xf] %v621_v1 }
  0xbe   : > { %v6944_v4 = vld [vmem:[#allocation3 + $0x318] sm:$0xf]  ;;  %658 = vst [vmem:[#allocation3 + $0x100] sm:$0xf] %v622_v3 }
  0xbf   : > { %v8383_v7 = vld [vmem:[#allocation3 + $0x338] sm:$0xf0]  ;;  %687 = vst [vmem:[#allocation3 + $0xa0] sm:$0xf] %v621_v1 }
  0xc0   : > { %v6945_v8 = vor.u32 %v8383_v7, %v6944_v4  ;;  %688 = vst [vmem:[#allocation3 + $0xc4] sm:$0xf] %v622_v3  ;;  %v8449_v4 = vld [vmem:[#allocation7 + $0xc8] sm:$0xff]  ;;  %v357_v7 = vld [vmem:[%s9183_s7 + $0x50] sm:$0xff] }
  0xc1   : > { %717 = vst [vmem:[#allocation3 + $0x64] sm:$0xf] %v621_v1  ;;  %v626_v1 = vpack.c.bf16 %v356_v41, %v356_v41  ;;  %2664 = vmatpush.bf16.msrb.mxu3 %v8449_v4 }
  0xc2   : > { %2454 = vmatmul.bf16.gmra.mxu2 %v6945_v8  ;;  %718 = vst [vmem:[#allocation3 + $0x88] sm:$0xf] %v622_v3  ;;  %v8441_v3 = vld [vmem:[#allocation7 + $0x88] sm:$0xff]  ;;  %v358_v8 = vld [vmem:[%s9183_s7 + $0x58] sm:$0xff] }
  0xc3   : > { %385 = vst [vmem:[#allocation2 + $0x88] sm:$0xff] %v353_v9  ;;  %2575 = vmatpush.bf16.msrb.mxu2 %v8441_v3  ;;  %v373_v9 = vld [vmem:[%s9183_s7 + $0xd0] sm:$0xff] }
  0xc4   : > { %v8307_v14 = vld [vmem:[#allocation3 + $0xdc] sm:$0xf]  ;;  %386 = vst [vmem:[#allocation2 + $0x90] sm:$0xff] %v354_v10 }
  0xc5   : > { %v6658_v17 = vld [vmem:[#allocation3 + $0xfc] sm:$0xf0]  ;;  %401 = vst [vmem:[#allocation2 + $0x188] sm:$0xff] %v369_v11  ;;  %v374_v10 = vld [vmem:[%s9183_s7 + $0xd8] sm:$0xff]  ;;  %v643_v11 = vpack.c.bf16 %v373_v9, %v373_v9  ;;  %2665 = vmatpush.bf16.msrb.mxu3 %v8448_v37 }
  0xc6   : > { %v6661_v18 = vor.u32 %v8307_v14, %v6658_v17  ;;  %402 = vst [vmem:[#allocation2 + $0x190] sm:$0xff] %v370_v12  ;;  %v8457_v14 = vld [vmem:[#allocation7 + $0x108] sm:$0xff] }
  0xc7   : > { %675 = vst [vmem:[#allocation3 + $0x364] sm:$0xf] %v639_v13  ;;  %2753 = vmatpush.bf16.msrb.mxu0 %v8457_v14  ;;  %2576 = vmatpush.bf16.msrb.mxu2 %v8440_v36  ;;  %v8465_v14 = vld [vmem:[#allocation7 + $0x148] sm:$0xff] }
  0xc8   : > { %2503 = vmatmul.bf16.gmra.mxu1 %v6661_v18  ;;  %676 = vst [vmem:[#allocation3 + $0x388] sm:$0xf] %v640_v15 }
  0xc9   : > { %705 = vst [vmem:[#allocation3 + $0x328] sm:$0xf] %v639_v13 }
  0xca   : > { %v419_v19 = vld [vmem:[#allocation2 + $0x87] sm:$0xff]  ;;  %706 = vst [vmem:[#allocation3 + $0x34c] sm:$0xf] %v640_v15 }
  0xcb   : > { %v420_v20 = vld [vmem:[#allocation2 + $0x8f] sm:$0xff]  ;;  %v455_v21 = vpack.c.bf16 %v419_v19, %v419_v19  ;;  %735 = vst [vmem:[#allocation3 + $0x2ec] sm:$0xf] %v639_v13  ;;  %v644_v13 = vpack.c.bf16 %v374_v10, %v374_v10 }
  0xcc   : > { %v456_v22 = vpack.c.bf16 %v420_v20, %v420_v20  ;;  %v435_v23 = vld [vmem:[#allocation2 + $0x187] sm:$0xff]  ;;  %736 = vst [vmem:[#allocation3 + $0x310] sm:$0xf] %v640_v15  ;;  %v8471_v15 = vld [vmem:[#allocation7 + $0x178] sm:$0xff] }
  0xcd   : > { %491 = vst [vmem:[#allocation3 + $0x120] sm:$0xf] %v455_v21  ;;  %v436_v24 = vld [vmem:[#allocation2 + $0x18f] sm:$0xff]  ;;  %v471_v26 = vpack.c.bf16 %v435_v23, %v435_v23  ;;  %2836 = vmatpush.bf16.msrb.mxu1 %v8471_v15 }
  0xce   : > { %492 = vst [vmem:[#allocation3 + $0x144] sm:$0xf] %v456_v22  ;;  %v8388_v25 = vld [vmem:[#allocation3 + $0x364] sm:$0xf]  ;;  %v472_v28 = vpack.c.bf16 %v436_v24, %v436_v24 }
  0xcf   : > { %521 = vst [vmem:[#allocation3 + $0xe4] sm:$0xf] %v455_v21  ;;  %v6982_v27 = vld [vmem:[#allocation3 + $0x384] sm:$0xf0] }
  0xd0   : > { %522 = vst [vmem:[#allocation3 + $0x108] sm:$0xf] %v456_v22  ;;  %v6985_v29 = vor.u32 %v8388_v25, %v6982_v27 }
  0xd1   : > { %551 = vst [vmem:[#allocation3 + $0xa8] sm:$0xf] %v455_v21 }
  0xd2   : > { %552 = vst [vmem:[#allocation3 + $0xcc] sm:$0xf] %v456_v22  ;;  %2548 = vmatmul.bf16.gmra.mxu3 %v6985_v29 }
  0xd3   : > { %507 = vst [vmem:[#allocation3 + $0x360] sm:$0xf] %v471_v26 }
  0xd4   : > { %v6692_v30 = vld [vmem:[#allocation3 + $0x120] sm:$0xf]  ;;  %508 = vst [vmem:[#allocation3 + $0x384] sm:$0xf] %v472_v28 }
  0xd5   : > { %v8320_v31 = vld [vmem:[#allocation3 + $0x140] sm:$0xf0]  ;;  %537 = vst [vmem:[#allocation3 + $0x324] sm:$0xf] %v471_v26 }
  0xd6   : > { %v6693_v33 = vor.u32 %v8320_v31, %v6692_v30  ;;  %538 = vst [vmem:[#allocation3 + $0x348] sm:$0xf] %v472_v28  ;;  %v627_v31 = vpack.c.bf16 %v357_v7, %v357_v7 }
  0xd7   : > { %567 = vst [vmem:[#allocation3 + $0x2e8] sm:$0xf] %v471_v26 }
  0xd8   : > { %2419 = vmatmul.bf16.gmra.mxu0 %v6693_v33  ;;  %568 = vst [vmem:[#allocation3 + $0x30c] sm:$0xf] %v472_v28  ;;  %v628_v33 = vpack.c.bf16 %v358_v8, %v358_v8 }
  0xd9   : > { %659 = vst [vmem:[#allocation3 + $0x124] sm:$0xf] %v623_v32 }
  0xda   : > { %v6980_v35 = vld [vmem:[#allocation3 + $0x360] sm:$0xf]  ;;  %660 = vst [vmem:[#allocation3 + $0x148] sm:$0xf] %v624_v34 }
  0xdb   : > { %v8392_v38 = vld [vmem:[#allocation3 + $0x380] sm:$0xf0]  ;;  %689 = vst [vmem:[#allocation3 + $0xe8] sm:$0xf] %v623_v32 }
  0xdc   : > { %v6981_v39 = vor.u32 %v8392_v38, %v6980_v35  ;;  %690 = vst [vmem:[#allocation3 + $0x10c] sm:$0xf] %v624_v34 }
  0xdd   : > { %719 = vst [vmem:[#allocation3 + $0xac] sm:$0xf] %v623_v32 }
  0xde   : > { %2459 = vmatmul.bf16.gmra.mxu2 %v6981_v39  ;;  %720 = vst [vmem:[#allocation3 + $0xd0] sm:$0xf] %v624_v34  ;;  %v8470_v34 = vld [vmem:[#allocation7 + $0x170] sm:$0xff] }
  0xdf   : > { %387 = vst [vmem:[#allocation2 + $0xa8] sm:$0xff] %v355_v40  ;;  %2837 = vmatpush.bf16.msrb.mxu1 %v8470_v34  ;;  %v9260_v40 = vld [vmem:[%s9183_s7 + $0x60] sm:$0xff] }
  0xe0   : > { %v8316_v45 = vld [vmem:[#allocation3 + $0x124] sm:$0xf]  ;;  %388 = vst [vmem:[#allocation2 + $0xb0] sm:$0xff] %v356_v41  ;;  %v9263_v41 = vld [vmem:[%s9183_s7 + $0x68] sm:$0xff] }
  0xe1   : > { %v6694_v48 = vld [vmem:[#allocation3 + $0x144] sm:$0xf0]  ;;  %403 = vst [vmem:[#allocation2 + $0x1a8] sm:$0xff] %v371_v42  ;;  %v375_v42 = vld [vmem:[%s9183_s7 + $0xe0] sm:$0xff] }
  0xe2   : > { %v6697_v49 = vor.u32 %v8316_v45, %v6694_v48  ;;  %404 = vst [vmem:[#allocation2 + $0x1b0] sm:$0xff] %v372_v43  ;;  %v376_v43 = vld [vmem:[%s9183_s7 + $0xe8] sm:$0xff]  ;;  %v8456_v48 = vld [vmem:[#allocation7 + $0x100] sm:$0xff] }
  0xe3   : > { %677 = vst [vmem:[#allocation3 + $0x3ac] sm:$0xf] %v641_v44  ;;  %v8469_v45 = vld [vmem:[#allocation7 + $0x168] sm:$0xff]  ;;  %v646_v47 = vpack.c.bf16 %v376_v43, %v376_v43  ;;  %2754 = vmatpush.bf16.msrb.mxu0 %v8456_v48 }
  0xe4   : > { %2508 = vmatmul.bf16.gmra.mxu1 %v6697_v49  ;;  %678 = vst [vmem:[#allocation3 + $0x3d0] sm:$0xf] %v642_v46 }
  0xe5   : > { %707 = vst [vmem:[#allocation3 + $0x370] sm:$0xf] %v641_v44  ;;  %2838 = vmatpush.bf16.msrb.mxu1 %v8469_v45 }
  0xe6   : > { %v421_v50 = vld [vmem:[#allocation2 + $0xa7] sm:$0xff]  ;;  %708 = vst [vmem:[#allocation3 + $0x394] sm:$0xf] %v642_v46 }
  0xe7   : > { %v422_v51 = vld [vmem:[#allocation2 + $0xaf] sm:$0xff]  ;;  %v457_v52 = vpack.c.bf16 %v421_v50, %v421_v50  ;;  %737 = vst [vmem:[#allocation3 + $0x334] sm:$0xf] %v641_v44  ;;  %v645_v44 = vpack.c.bf16 %v375_v42, %v375_v42  ;;  %v8468_v50 = vld [vmem:[#allocation7 + $0x160] sm:$0xff] }
  0xe8   : > { %v458_v53 = vpack.c.bf16 %v422_v51, %v422_v51  ;;  %v437_v54 = vld [vmem:[#allocation2 + $0x1a7] sm:$0xff]  ;;  %738 = vst [vmem:[#allocation3 + $0x358] sm:$0xf] %v642_v46  ;;  %v2400_v51 = vpop.f32.mrf.mxu0 }
  0xe9   : > { %493 = vst [vmem:[#allocation3 + $0x168] sm:$0xf] %v457_v52  ;;  %v438_v55 = vld [vmem:[#allocation2 + $0x1af] sm:$0xff]  ;;  %v473_v57 = vpack.c.bf16 %v437_v54, %v437_v54  ;;  %2839 = vmatpush.bf16.msrb.mxu1 %v8468_v50  ;;  %v8467_v54 = vld [vmem:[#allocation7 + $0x158] sm:$0xff] }
  0xea   : > { %494 = vst [vmem:[#allocation3 + $0x18c] sm:$0xf] %v458_v53  ;;  %v8397_v56 = vld [vmem:[#allocation3 + $0x3ac] sm:$0xf]  ;;  %v474_v59 = vpack.c.bf16 %v438_v55, %v438_v55 }
  0xeb   : > { %523 = vst [vmem:[#allocation3 + $0x12c] sm:$0xf] %v457_v52  ;;  %v7018_v58 = vld [vmem:[#allocation3 + $0x3cc] sm:$0xf0] }
  0xec   : > { %524 = vst [vmem:[#allocation3 + $0x150] sm:$0xf] %v458_v53  ;;  %v7021_v60 = vor.u32 %v8397_v56, %v7018_v58 }
  0xed   : > { %553 = vst [vmem:[#allocation3 + $0xf0] sm:$0xf] %v457_v52  ;;  %2840 = vmatpush.bf16.msrb.mxu1 %v8467_v54 }
  0xee   : > { %554 = vst [vmem:[#allocation3 + $0x114] sm:$0xf] %v458_v53  ;;  %2553 = vmatmul.bf16.gmra.mxu3 %v7021_v60  ;;  %v9272_v53 = vld [vmem:[%s10736_s2] ss:$0 sm:$0xff] }
  0xef   : > { %509 = vst [vmem:[#allocation3 + $0x3a8] sm:$0xf] %v473_v57  ;;  %v2401_v58 = vadd.f32 %v9272_v53, %v2400_v51  ;;  %v8286_v51 = vld [vmem:[#allocation3 + $0x30] sm:$0xf0] }
  0xf0   : > { %v6728_v61 = vld [vmem:[#allocation3 + $0x168] sm:$0xf]  ;;  %510 = vst [vmem:[#allocation3 + $0x3cc] sm:$0xf] %v474_v59 }
  0xf1   : > { %v8329_v62 = vld [vmem:[#allocation3 + $0x188] sm:$0xf0]  ;;  %539 = vst [vmem:[#allocation3 + $0x36c] sm:$0xf] %v473_v57 }
  0xf2   : > { %v6729_v0 = vor.u32 %v8329_v62, %v6728_v61  ;;  %540 = vst [vmem:[#allocation3 + $0x390] sm:$0xf] %v474_v59 }
  0xf3   : > { %569 = vst [vmem:[#allocation3 + $0x330] sm:$0xf] %v473_v57 }
  0xf4   : > { %2424 = vmatmul.bf16.gmra.mxu0 %v6729_v0  ;;  %570 = vst [vmem:[#allocation3 + $0x354] sm:$0xf] %v474_v59 }
  0xf5   : > { %661 = vst [vmem:[#allocation3 + $0x16c] sm:$0xf] %v625_v63 }
  0xf6   : > { %v7016_v2 = vld [vmem:[#allocation3 + $0x3a8] sm:$0xf]  ;;  %662 = vst [vmem:[#allocation3 + $0x190] sm:$0xf] %v626_v1 }
  0xf7   : > { %v8401_v5 = vld [vmem:[#allocation3 + $0x3c8] sm:$0xf0]  ;;  %691 = vst [vmem:[#allocation3 + $0x130] sm:$0xf] %v625_v63 }
  0xf8   : > { %v7017_v6 = vor.u32 %v8401_v5, %v7016_v2  ;;  %692 = vst [vmem:[#allocation3 + $0x154] sm:$0xf] %v626_v1  ;;  %v2529_v5 = vpop.f32.mrf.mxu3 }
  0xf9   : > { %721 = vst [vmem:[#allocation3 + $0xf4] sm:$0xf] %v625_v63  ;;  %v2489_v63 = vpop.f32.mrf.mxu1  ;;  %v2440_v0 = vpop.f32.mrf.mxu2 }
  0xfa   : > { %2464 = vmatmul.bf16.gmra.mxu2 %v7017_v6  ;;  %722 = vst [vmem:[#allocation3 + $0x118] sm:$0xf] %v626_v1  ;;  %v9275_v3 = vadd.f32 %v2489_v63, %v2401_v58  ;;  %v2441_v4 = vadd.f32 %v9272_v53, %v2440_v0  ;;  %v9278_v6 = vpop.f32.mrf.mxu0 }
  0xfb   : > { %389 = vst [vmem:[#allocation2 + $0xc8] sm:$0xff] %v357_v7 }
  0xfc   : > { %v8325_v12 = vld [vmem:[#allocation3 + $0x16c] sm:$0xf]  ;;  %390 = vst [vmem:[#allocation2 + $0xd0] sm:$0xff] %v358_v8 }
  0xfd   : > { %v6730_v16 = vld [vmem:[#allocation3 + $0x18c] sm:$0xf0]  ;;  %405 = vst [vmem:[#allocation2 + $0x1c8] sm:$0xff] %v373_v9  ;;  %v8479_v9 = vld [vmem:[#allocation7 + $0x1b8] sm:$0xff] }
  0xfe   : > { %v6733_v17 = vor.u32 %v8325_v12, %v6730_v16  ;;  %406 = vst [vmem:[#allocation2 + $0x1d0] sm:$0xff] %v374_v10  ;;  %v8466_v10 = vld [vmem:[#allocation7 + $0x150] sm:$0xff]  ;;  %v9280_v12 = vadd.f32 %v2529_v5, %v2441_v4  ;;  %2925 = vmatpush.bf16.msra.mxu2 %v8479_v9 }
  0xff   : > { %679 = vst [vmem:[#allocation3 + $0x3f4] sm:$0xf] %v643_v11  ;;  %2841 = vmatpush.bf16.msrb.mxu1 %v8466_v10  ;;  %v8478_v9 = vld [vmem:[#allocation7 + $0x1b0] sm:$0xff] }
 0x100   : > { %2513 = vmatmul.bf16.gmra.mxu1 %v6733_v17  ;;  %680 = vst [vmem:[#allocation3 + $0x418] sm:$0xf] %v644_v13  ;;  %v629_v17 = vpack.c.bf16 %v9260_v40, %v9260_v40 }
 0x101   : > { %709 = vst [vmem:[#allocation3 + $0x3b8] sm:$0xf] %v643_v11 }
 0x102   : > { %v423_v18 = vld [vmem:[#allocation2 + $0xc7] sm:$0xff]  ;;  %710 = vst [vmem:[#allocation3 + $0x3dc] sm:$0xf] %v644_v13  ;;  %2926 = vmatpush.bf16.msra.mxu2 %v8478_v9 }
 0x103   : > { %v424_v19 = vld [vmem:[#allocation2 + $0xcf] sm:$0xff]  ;;  %v459_v20 = vpack.c.bf16 %v423_v18, %v423_v18  ;;  %739 = vst [vmem:[#allocation3 + $0x37c] sm:$0xf] %v643_v11  ;;  %v8487_v11 = vld [vmem:[#allocation7 + $0x1f8] sm:$0xff]  ;;  %2842 = vmatpush.bf16.msrb.mxu1 %v8465_v14 }
 0x104   : > { %v460_v21 = vpack.c.bf16 %v424_v19, %v424_v19  ;;  %v439_v22 = vld [vmem:[#allocation2 + $0x1c7] sm:$0xff]  ;;  %740 = vst [vmem:[#allocation3 + $0x3a0] sm:$0xf] %v644_v13  ;;  %v8495_v13 = vld [vmem:[#allocation7 + $0x238] sm:$0xff]  ;;  %3014 = vmatpush.bf16.msra.mxu3 %v8487_v11  ;;  %v630_v19 = vpack.c.bf16 %v9263_v41, %v9263_v41  ;;  %v8486_v14 = vld [vmem:[#allocation7 + $0x1f0] sm:$0xff] }
 0x105   : > { %495 = vst [vmem:[#allocation3 + $0x1b0] sm:$0xf] %v459_v20  ;;  %v440_v23 = vld [vmem:[#allocation2 + $0x1cf] sm:$0xff]  ;;  %v475_v25 = vpack.c.bf16 %v439_v22, %v439_v22  ;;  %3103 = vmatpush.bf16.msra.mxu0 %v8495_v13  ;;  %v8464_v22 = vld [vmem:[#allocation7 + $0x140] sm:$0xff] }
 0x106   : > { %496 = vst [vmem:[#allocation3 + $0x1d4] sm:$0xf] %v460_v21  ;;  %v8406_v24 = vld [vmem:[#allocation3 + $0x3f4] sm:$0xf]  ;;  %v476_v27 = vpack.c.bf16 %v440_v23, %v440_v23  ;;  %v9290_v23 = vpop.f32.mrf.mxu3 }
 0x107   : > { %525 = vst [vmem:[#allocation3 + $0x174] sm:$0xf] %v459_v20  ;;  %v7054_v26 = vld [vmem:[#allocation3 + $0x414] sm:$0xf0]  ;;  %2843 = vmatpush.bf16.msrb.mxu1 %v8464_v22 }
 0x108   : > { %526 = vst [vmem:[#allocation3 + $0x198] sm:$0xf] %v460_v21  ;;  %v7057_v28 = vor.u32 %v8406_v24, %v7054_v26  ;;  %v2405_v24 = vpop.f32.mrf.mxu0  ;;  %v748_v26 = vld [vmem:[#allocation2 + $0x11] sm:$0xff]  ;;  %3015 = vmatpush.bf16.msra.mxu3 %v8486_v14  ;;  %v6666_v14 = vld [vmem:[#allocation3 + $0x104] sm:$0xf0] }
 0x109   : > { %555 = vst [vmem:[#allocation3 + $0x138] sm:$0xf] %v459_v20  ;;  %v9286_v20 = vpop.f32.mrf.mxu1  ;;  %v2406_v34 = vadd.f32 %v9272_v53, %v2405_v24  ;;  %v784_v36 = vpack.c.bf16 %v748_v26, %v748_v26  ;;  %v754_v24 = vld [vmem:[#allocation2 + $0x71] sm:$0xff] }
 0x10a   : > { %556 = vst [vmem:[#allocation3 + $0x15c] sm:$0xf] %v460_v21  ;;  %2558 = vmatmul.bf16.gmra.mxu3 %v7057_v28  ;;  %v9288_v21 = vpop.f32.mrf.mxu2  ;;  %v6558_v28 = vld [vmem:[#allocation3 + $0x2c] sm:$0xf0]  ;;  %v6600_v26 = vld [vmem:[#allocation3 + $0x58] sm:$0xf] }
 0x10b   : > { %511 = vst [vmem:[#allocation3 + $0x3f0] sm:$0xf] %v475_v25 }
 0x10c   : > { %v6764_v29 = vld [vmem:[#allocation3 + $0x1b0] sm:$0xf]  ;;  %512 = vst [vmem:[#allocation3 + $0x414] sm:$0xf] %v476_v27 }
 0x10d   : > { %v8338_v30 = vld [vmem:[#allocation3 + $0x1d0] sm:$0xf0]  ;;  %541 = vst [vmem:[#allocation3 + $0x3b4] sm:$0xf] %v475_v25 }
 0x10e   : > { %v6765_v32 = vor.u32 %v8338_v30, %v6764_v29  ;;  %542 = vst [vmem:[#allocation3 + $0x3d8] sm:$0xf] %v476_v27  ;;  %v749_v30 = vld [vmem:[#allocation2 + $0x29] sm:$0xff] }
 0x10f   : > { %571 = vst [vmem:[#allocation3 + $0x378] sm:$0xf] %v475_v25  ;;  %v747_v25 = vld [vmem:[#allocation2 + $0x9] sm:$0xff]  ;;  %v785_v37 = vpack.c.bf16 %v749_v30, %v749_v30 }
 0x110   : > { %2429 = vmatmul.bf16.gmra.mxu0 %v6765_v32  ;;  %572 = vst [vmem:[#allocation3 + $0x39c] sm:$0xf] %v476_v27  ;;  %v8281_v27 = vld [vmem:[#allocation3 + $0xc] sm:$0xf]  ;;  %v783_v32 = vpack.c.bf16 %v747_v25, %v747_v25  ;;  %v9296_v45 = vpop.f32.mrf.mxu0 }
 0x111   : > { %663 = vst [vmem:[#allocation3 + $0x1b4] sm:$0xf] %v627_v31 }
 0x112   : > { %v7052_v35 = vld [vmem:[#allocation3 + $0x3f0] sm:$0xf]  ;;  %664 = vst [vmem:[#allocation3 + $0x1d8] sm:$0xf] %v628_v33 }
 0x113   : > { %v8410_v38 = vld [vmem:[#allocation3 + $0x410] sm:$0xf0]  ;;  %693 = vst [vmem:[#allocation3 + $0x178] sm:$0xf] %v627_v31 }
 0x114   : > { %v7053_v39 = vor.u32 %v8410_v38, %v7052_v35  ;;  %694 = vst [vmem:[#allocation3 + $0x19c] sm:$0xf] %v628_v33  ;;  %v6561_v38 = vor.u32 %v8281_v27, %v6558_v28  ;;  %v8295_v27 = vld [vmem:[#allocation3 + $0x78] sm:$0xf0] }
 0x115   : > { %723 = vst [vmem:[#allocation3 + $0x13c] sm:$0xf] %v627_v31  ;;  %v6601_v30 = vor.u32 %v8295_v27, %v6600_v26 }
 0x116   : > { %2469 = vmatmul.bf16.gmra.mxu2 %v7053_v39  ;;  %724 = vst [vmem:[#allocation3 + $0x160] sm:$0xf] %v628_v33  ;;  %v750_v33 = vld [vmem:[#allocation2 + $0x31] sm:$0xff] }
 0x117   : > { %391 = vst [vmem:[#allocation2 + $0xe8] sm:$0xff] %v9260_v40  ;;  %v786_v39 = vpack.c.bf16 %v750_v33, %v750_v33  ;;  %v2494_v40 = vpop.f32.mrf.mxu1 }
 0x118   : > { %v8334_v46 = vld [vmem:[#allocation3 + $0x1b4] sm:$0xf]  ;;  %392 = vst [vmem:[#allocation2 + $0xf0] sm:$0xff] %v9263_v41  ;;  %v2445_v41 = vpop.f32.mrf.mxu2 }
 0x119   : > { %v6766_v49 = vld [vmem:[#allocation3 + $0x1d4] sm:$0xf0]  ;;  %407 = vst [vmem:[#allocation2 + $0x1e8] sm:$0xff] %v375_v42  ;;  %v9293_v42 = vadd.f32 %v2494_v40, %v2406_v34 }
 0x11a   : > { %v6769_v52 = vor.u32 %v8334_v46, %v6766_v49  ;;  %408 = vst [vmem:[#allocation2 + $0x1f0] sm:$0xff] %v376_v43  ;;  %v2446_v43 = vadd.f32 %v9272_v53, %v2445_v41  ;;  %v751_v46 = vld [vmem:[#allocation2 + $0x49] sm:$0xff] }
 0x11b   : > { %681 = vst [vmem:[#allocation3 + $0x43c] sm:$0xf] %v645_v44  ;;  %v6564_v49 = vld [vmem:[#allocation3 + $0x10] sm:$0xf]  ;;  %v787_v54 = vpack.c.bf16 %v751_v46, %v751_v46 }
 0x11c   : > { %2518 = vmatmul.bf16.gmra.mxu1 %v6769_v52  ;;  %682 = vst [vmem:[#allocation3 + $0x460] sm:$0xf] %v646_v47 }
 0x11d   : > { %711 = vst [vmem:[#allocation3 + $0x400] sm:$0xf] %v645_v44  ;;  %v2410_v63 = vpop.f32.mrf.mxu0 }
 0x11e   : > { %v425_v55 = vld [vmem:[#allocation2 + $0xe7] sm:$0xff]  ;;  %712 = vst [vmem:[#allocation3 + $0x424] sm:$0xf] %v646_v47  ;;  %v2411_v4 = vadd.f32 %v9272_v53, %v2410_v63 }
 0x11f   : > { %v426_v56 = vld [vmem:[#allocation2 + $0xef] sm:$0xff]  ;;  %v461_v57 = vpack.c.bf16 %v425_v55, %v425_v55  ;;  %741 = vst [vmem:[#allocation3 + $0x3c4] sm:$0xf] %v645_v44  ;;  %v2534_v44 = vpop.f32.mrf.mxu3  ;;  %v8304_v63 = vld [vmem:[#allocation3 + $0xc0] sm:$0xf0] }
 0x120   : > { %v462_v59 = vpack.c.bf16 %v426_v56, %v426_v56  ;;  %v441_v60 = vld [vmem:[#allocation2 + $0x1e7] sm:$0xff]  ;;  %742 = vst [vmem:[#allocation3 + $0x3e8] sm:$0xf] %v646_v47  ;;  %v752_v47 = vld [vmem:[#allocation2 + $0x51] sm:$0xff]  ;;  %v9298_v52 = vadd.f32 %v2534_v44, %v2446_v43 }
 0x121   : > { %497 = vst [vmem:[#allocation3 + $0x1f8] sm:$0xf] %v461_v57  ;;  %v442_v61 = vld [vmem:[#allocation2 + $0x1ef] sm:$0xff]  ;;  %v477_v1 = vpack.c.bf16 %v441_v60, %v441_v60  ;;  %v788_v56 = vpack.c.bf16 %v752_v47, %v752_v47  ;;  %v9302_v60 = vpop.f32.mrf.mxu2 }
 0x122   : > { %498 = vst [vmem:[#allocation3 + $0x21c] sm:$0xf] %v462_v59  ;;  %v8415_v62 = vld [vmem:[#allocation3 + $0x43c] sm:$0xf]  ;;  %v478_v7 = vpack.c.bf16 %v442_v61, %v442_v61 }
 0x123   : > { %527 = vst [vmem:[#allocation3 + $0x1bc] sm:$0xf] %v461_v57  ;;  %v7090_v2 = vld [vmem:[#allocation3 + $0x45c] sm:$0xf0] }
 0x124   : > { %528 = vst [vmem:[#allocation3 + $0x1e0] sm:$0xf] %v462_v59  ;;  %v7093_v8 = vor.u32 %v8415_v62, %v7090_v2  ;;  %v6594_v2 = vld [vmem:[#allocation3 + $0x74] sm:$0xf0] }
 0x125   : > { %557 = vst [vmem:[#allocation3 + $0x180] sm:$0xf] %v461_v57  ;;  %v6565_v57 = vor.u32 %v8286_v51, %v6564_v49  ;;  %v756_v49 = vld [vmem:[#allocation2 + $0x91] sm:$0xff] }
 0x126   : > { %558 = vst [vmem:[#allocation3 + $0x1a4] sm:$0xf] %v462_v59  ;;  %2563 = vmatmul.bf16.gmra.mxu3 %v7093_v8  ;;  %v9300_v59 = vpop.f32.mrf.mxu1 }
 0x127   : > { %513 = vst [vmem:[#allocation3 + $0x438] sm:$0xf] %v477_v1  ;;  %v9304_v62 = vpop.f32.mrf.mxu3 }
 0x128   : > { %v6800_v15 = vld [vmem:[#allocation3 + $0x1f8] sm:$0xf]  ;;  %514 = vst [vmem:[#allocation3 + $0x45c] sm:$0xf] %v478_v7 }
 0x129   : > { %v8347_v16 = vld [vmem:[#allocation3 + $0x218] sm:$0xf0]  ;;  %543 = vst [vmem:[#allocation3 + $0x3fc] sm:$0xf] %v477_v1  ;;  %v2450_v11 = vpop.f32.mrf.mxu2 }
 0x12a   : > { %v6801_v18 = vor.u32 %v8347_v16, %v6800_v15  ;;  %544 = vst [vmem:[#allocation3 + $0x420] sm:$0xf] %v478_v7  ;;  %v2451_v15 = vadd.f32 %v9272_v53, %v2450_v11  ;;  %v8308_v11 = vld [vmem:[#allocation3 + $0xe4] sm:$0xf] }
 0x12b   : > { %573 = vst [vmem:[#allocation3 + $0x3c0] sm:$0xf] %v477_v1  ;;  %v8290_v1 = vld [vmem:[#allocation3 + $0x54] sm:$0xf] }
 0x12c   : > { %2434 = vmatmul.bf16.gmra.mxu0 %v6801_v18  ;;  %574 = vst [vmem:[#allocation3 + $0x3e4] sm:$0xf] %v478_v7  ;;  %v6597_v8 = vor.u32 %v8290_v1, %v6594_v2  ;;  %v8494_v18 = vld [vmem:[#allocation7 + $0x230] sm:$0xff] }
 0x12d   : > { %665 = vst [vmem:[#allocation3 + $0x1fc] sm:$0xf] %v629_v17  ;;  %3104 = vmatpush.bf16.msra.mxu0 %v8494_v18 }
 0x12e   : > { %v7088_v29 = vld [vmem:[#allocation3 + $0x438] sm:$0xf]  ;;  %666 = vst [vmem:[#allocation3 + $0x220] sm:$0xf] %v630_v19  ;;  %v2499_v10 = vpop.f32.mrf.mxu1 }
 0x12f   : > { %v8419_v31 = vld [vmem:[#allocation3 + $0x458] sm:$0xf0]  ;;  %695 = vst [vmem:[#allocation3 + $0x1c0] sm:$0xf] %v629_v17  ;;  %v9307_v13 = vadd.f32 %v2499_v10, %v2411_v4  ;;  %v2539_v16 = vpop.f32.mrf.mxu3 }
 0x130   : > { %v7089_v35 = vor.u32 %v8419_v31, %v7088_v29  ;;  %696 = vst [vmem:[#allocation3 + $0x1e4] sm:$0xf] %v630_v19  ;;  %v9312_v28 = vadd.f32 %v2539_v16, %v2451_v15  ;;  %v790_v29 = vpack.c.bf16 %v754_v24, %v754_v24 }
 0x131   : > { %725 = vst [vmem:[#allocation3 + $0x184] sm:$0xf] %v629_v17  ;;  %v9310_v17 = vpop.f32.mrf.mxu0 }
 0x132   : > { %2474 = vmatmul.bf16.gmra.mxu2 %v7089_v35  ;;  %726 = vst [vmem:[#allocation3 + $0x1a8] sm:$0xf] %v630_v19  ;;  %v753_v19 = vld [vmem:[#allocation2 + $0x69] sm:$0xff] }
 0x133   : > { %819 = vst [vmem:[#allocation3 + $0x8] sm:$0xf] %v783_v32  ;;  %v789_v25 = vpack.c.bf16 %v753_v19, %v753_v19  ;;  %v6669_v19 = vor.u32 %v8308_v11, %v6666_v14  ;;  %v6708_v11 = vld [vmem:[#allocation3 + $0x130] sm:$0xf]  ;;  %v8322_v14 = vld [vmem:[#allocation3 + $0x150] sm:$0xf0] }
 0x134   : > { %v8343_v48 = vld [vmem:[#allocation3 + $0x1fc] sm:$0xf]  ;;  %820 = vst [vmem:[#allocation3 + $0x2c] sm:$0xf] %v784_v36 }
 0x135   : > { %v6802_v50 = vld [vmem:[#allocation3 + $0x21c] sm:$0xf0]  ;;  %851 = vst [vmem:[#allocation3 + $0x14] sm:$0xf] %v785_v37 }
 0x136   : > { %v6805_v55 = vor.u32 %v8343_v48, %v6802_v50  ;;  %2666 = vmatmul.bf16.vlgmr.msrb.gmra.mxu3 %v6561_v38  ;;  %852 = vst [vmem:[#allocation3 + $0x38] sm:$0xf] %v786_v39  ;;  %v9314_v31 = vpop.f32.mrf.mxu1  ;;  %v8299_v38 = vld [vmem:[#allocation3 + $0x9c] sm:$0xf]  ;;  %v755_v48 = vld [vmem:[#allocation2 + $0x89] sm:$0xff] }
 0x137   : > { %821 = vst [vmem:[#allocation3 + $0x50] sm:$0xf] %v785_v37  ;;  %v9318_v35 = vpop.f32.mrf.mxu3 }
 0x138   : > { %2523 = vmatmul.bf16.gmra.mxu1 %v6805_v55  ;;  %822 = vst [vmem:[#allocation3 + $0x74] sm:$0xf] %v786_v39  ;;  %v6630_v39 = vld [vmem:[#allocation3 + $0xbc] sm:$0xf0]  ;;  %v791_v55 = vpack.c.bf16 %v755_v48, %v755_v48 }
 0x139   : > { %853 = vst [vmem:[#allocation3 + $0x5c] sm:$0xf] %v787_v54  ;;  %v6633_v44 = vor.u32 %v8299_v38, %v6630_v39 }
 0x13a   : > { %v6556_v58 = vld [vmem:[#allocation3 + $0x8] sm:$0xf]  ;;  %854 = vst [vmem:[#allocation3 + $0x80] sm:$0xf] %v788_v56 }
 0x13b   : > { %v8285_v61 = vld [vmem:[#allocation3 + $0x28] sm:$0xf0]  ;;  %3920 = vst [vmem:[#allocation3 + $0x8] sm:$0xf] %v783_v32  ;;  %v9316_v32 = vpop.f32.mrf.mxu2 }
 0x13c   : > { %3921 = vst [vmem:[#allocation3 + $0x2c] sm:$0xf] %v784_v36  ;;  %2755 = vmatmul.bf16.vlgmr.msrb.gmra.mxu0 %v6565_v57  ;;  %v6557_v0 = vor.u32 %v8285_v61, %v6556_v58  ;;  %v8282_v5 = vld [vmem:[#allocation3 + $0x14] sm:$0xf]  ;;  %v2415_v36 = vpop.f32.mrf.mxu0  ;;  %v792_v58 = vpack.c.bf16 %v756_v49, %v756_v49  ;;  %v6636_v61 = vld [vmem:[#allocation3 + $0xa0] sm:$0xf] }
 0x13d   : > { %883 = vst [vmem:[#allocation3 + $0x20] sm:$0xf] %v787_v54  ;;  %v6566_v7 = vld [vmem:[#allocation3 + $0x34] sm:$0xf0]  ;;  %v2416_v40 = vadd.f32 %v9272_v53, %v2415_v36  ;;  %v6637_v1 = vor.u32 %v8304_v63, %v6636_v61  ;;  %v8317_v49 = vld [vmem:[#allocation3 + $0x12c] sm:$0xf] }
 0x13e   : > { %884 = vst [vmem:[#allocation3 + $0x44] sm:$0xf] %v788_v56  ;;  %v6569_v22 = vor.u32 %v8282_v5, %v6566_v7  ;;  %v6592_v33 = vld [vmem:[#allocation3 + $0x50] sm:$0xf] }
 0x13f   : > { %823 = vst [vmem:[#allocation3 + $0x98] sm:$0xf] %v787_v54  ;;  %v8294_v34 = vld [vmem:[#allocation3 + $0x70] sm:$0xf0]  ;;  %v2544_v54 = vpop.f32.mrf.mxu3  ;;  %v759_v61 = vld [vmem:[#allocation2 + $0xc9] sm:$0xff] }
 0x140   : > { %824 = vst [vmem:[#allocation3 + $0xbc] sm:$0xf] %v788_v56  ;;  %v6593_v37 = vor.u32 %v8294_v34, %v6592_v33  ;;  %v8291_v41 = vld [vmem:[#allocation3 + $0x5c] sm:$0xf]  ;;  %v757_v33 = vld [vmem:[#allocation2 + $0xa9] sm:$0xff]  ;;  %v758_v34 = vld [vmem:[#allocation2 + $0xb1] sm:$0xff] }
 0x141   : > { %855 = vst [vmem:[#allocation3 + $0xa4] sm:$0xf] %v789_v25  ;;  %v6602_v43 = vld [vmem:[#allocation3 + $0x7c] sm:$0xf0]  ;;  %v793_v38 = vpack.c.bf16 %v757_v33, %v757_v33  ;;  %v794_v39 = vpack.c.bf16 %v758_v34, %v758_v34  ;;  %v760_v63 = vld [vmem:[#allocation2 + $0xd1] sm:$0xff] }
 0x142   : > { %2577 = vmatmul.bf16.vlgmr.msrb.gmra.mxu2 %v6557_v0  ;;  %856 = vst [vmem:[#allocation3 + $0xc8] sm:$0xf] %v790_v29  ;;  %v6605_v56 = vor.u32 %v8291_v41, %v6602_v43  ;;  %v8313_v41 = vld [vmem:[#allocation3 + $0x108] sm:$0xf0]  ;;  %v8326_v34 = vld [vmem:[#allocation3 + $0x174] sm:$0xf] }
 0x143   : > { %825 = vst [vmem:[#allocation3 + $0xe0] sm:$0xf] %v789_v25 }
 0x144   : > { %826 = vst [vmem:[#allocation3 + $0x104] sm:$0xf] %v790_v29  ;;  %v9324_v57 = vpop.f32.mrf.mxu0 }
 0x145   : > { %885 = vst [vmem:[#allocation3 + $0x68] sm:$0xf] %v789_v25  ;;  %v2504_v46 = vpop.f32.mrf.mxu1  ;;  %v2455_v47 = vpop.f32.mrf.mxu2  ;;  %v8485_v25 = vld [vmem:[#allocation7 + $0x1e8] sm:$0xff] }
 0x146   : > { %2671 = vmatmul.bf16.gmra.mxu3 %v6597_v8  ;;  %886 = vst [vmem:[#allocation3 + $0x8c] sm:$0xf] %v790_v29  ;;  %v9321_v50 = vadd.f32 %v2504_v46, %v2416_v40  ;;  %v2456_v51 = vadd.f32 %v9272_v53, %v2455_v47  ;;  %v6628_v5 = vld [vmem:[#allocation3 + $0x98] sm:$0xf]  ;;  %v6672_v40 = vld [vmem:[#allocation3 + $0xe8] sm:$0xf] }
 0x147   : > { %857 = vst [vmem:[#allocation3 + $0xec] sm:$0xf] %v791_v55  ;;  %v8303_v7 = vld [vmem:[#allocation3 + $0xb8] sm:$0xf0]  ;;  %v9332_v8 = vpop.f32.mrf.mxu3  ;;  %3016 = vmatpush.bf16.msra.mxu3 %v8485_v25 }
 0x148   : > { %2844 = vmatmul.bf16.vlgmr.msrb.gmra.mxu1 %v6569_v22  ;;  %v9326_v0 = vadd.f32 %v2544_v54, %v2456_v51  ;;  %858 = vst [vmem:[#allocation3 + $0x110] sm:$0xf] %v792_v58  ;;  %v6629_v9 = vor.u32 %v8303_v7, %v6628_v5  ;;  %v8300_v16 = vld [vmem:[#allocation3 + $0xa4] sm:$0xf]  ;;  %v8477_v22 = vld [vmem:[#allocation7 + $0x1a8] sm:$0xff]  ;;  %v795_v7 = vpack.c.bf16 %v759_v61, %v759_v61 }
 0x149   : > { %827 = vst [vmem:[#allocation3 + $0x128] sm:$0xf] %v791_v55  ;;  %v6638_v18 = vld [vmem:[#allocation3 + $0xc4] sm:$0xf0]  ;;  %2927 = vmatpush.bf16.msra.mxu2 %v8477_v22  ;;  %v6702_v51 = vld [vmem:[#allocation3 + $0x14c] sm:$0xf0] }
 0x14a   : > { %828 = vst [vmem:[#allocation3 + $0x14c] sm:$0xf] %v792_v58  ;;  %v6641_v36 = vor.u32 %v8300_v16, %v6638_v18  ;;  %v6664_v46 = vld [vmem:[#allocation3 + $0xe0] sm:$0xf]  ;;  %v6709_v16 = vor.u32 %v8322_v14, %v6708_v11  ;;  %v8331_v61 = vld [vmem:[#allocation3 + $0x198] sm:$0xf0] }
 0x14b   : > { %887 = vst [vmem:[#allocation3 + $0xb0] sm:$0xf] %v791_v55  ;;  %v8312_v47 = vld [vmem:[#allocation3 + $0x100] sm:$0xf0] }
 0x14c   : > { %2760 = vmatmul.bf16.gmra.mxu0 %v6601_v30  ;;  %888 = vst [vmem:[#allocation3 + $0xd4] sm:$0xf] %v792_v58  ;;  %v8493_v30 = vld [vmem:[#allocation7 + $0x228] sm:$0xff]  ;;  %v6665_v48 = vor.u32 %v8312_v47, %v6664_v46  ;;  %v6705_v58 = vor.u32 %v8317_v49, %v6702_v51  ;;  %v8484_v46 = vld [vmem:[#allocation7 + $0x1e0] sm:$0xff]  ;;  %v762_v49 = vld [vmem:[#allocation2 + $0xf1] sm:$0xff] }
 0x14d   : > { %v9328_v2 = vpop.f32.mrf.mxu1  ;;  %v9330_v4 = vpop.f32.mrf.mxu2  ;;  %3105 = vmatpush.bf16.msra.mxu0 %v8493_v30  ;;  %859 = vst [vmem:[#allocation3 + $0x134] sm:$0xf] %v793_v38  ;;  %v8492_v47 = vld [vmem:[#allocation7 + $0x220] sm:$0xff]  ;;  %3017 = vmatpush.bf16.msra.mxu3 %v8484_v46 }
 0x14e   : > { %860 = vst [vmem:[#allocation3 + $0x158] sm:$0xf] %v794_v39  ;;  %v8309_v55 = vld [vmem:[#allocation3 + $0xec] sm:$0xf] }
 0x14f   : > { %829 = vst [vmem:[#allocation3 + $0x170] sm:$0xf] %v793_v38 }
 0x150   : > { %830 = vst [vmem:[#allocation3 + $0x194] sm:$0xf] %v794_v39  ;;  %v6700_v22 = vld [vmem:[#allocation3 + $0x128] sm:$0xf] }
 0x151   : > { %889 = vst [vmem:[#allocation3 + $0xf8] sm:$0xf] %v793_v38  ;;  %3106 = vmatpush.bf16.msra.mxu0 %v8492_v47 }
 0x152   : > { %2582 = vmatmul.bf16.gmra.mxu2 %v6593_v37  ;;  %890 = vst [vmem:[#allocation3 + $0x11c] sm:$0xf] %v794_v39 }
 0x153   : > { %861 = vst [vmem:[#allocation3 + $0x17c] sm:$0xf] %v795_v7 }
 0x154   : > { %831 = vst [vmem:[#allocation3 + $0x1b8] sm:$0xf] %v795_v7  ;;  %v8318_v39 = vld [vmem:[#allocation3 + $0x134] sm:$0xf] }
 0x155   : > { %v2420_v10 = vpop.f32.mrf.mxu0  ;;  %v2549_v37 = vpop.f32.mrf.mxu3  ;;  %891 = vst [vmem:[#allocation3 + $0x140] sm:$0xf] %v795_v7 }
 0x156   : > { %2676 = vmatmul.bf16.gmra.mxu3 %v6633_v44  ;;  %v2421_v15 = vadd.f32 %v9272_v53, %v2420_v10  ;;  %v6673_v44 = vor.u32 %v8313_v41, %v6672_v40  ;;  %v6710_v40 = vld [vmem:[#allocation3 + $0x154] sm:$0xf0]  ;;  %v6736_v7 = vld [vmem:[#allocation3 + $0x170] sm:$0xf] }
 0x157   : > { %v6713_v51 = vor.u32 %v8318_v39, %v6710_v40  ;;  %v6780_v40 = vld [vmem:[#allocation3 + $0x1c0] sm:$0xf] }
 0x158   : > { %2849 = vmatmul.bf16.gmra.mxu1 %v6605_v56  ;;  %v6674_v56 = vld [vmem:[#allocation3 + $0x10c] sm:$0xf0] }
 0x159   : > { %v6677_v10 = vor.u32 %v8309_v55, %v6674_v56  ;;  %v798_v56 = vpack.c.bf16 %v762_v49, %v762_v49 }
 0x15b   : > { %864 = vst [vmem:[#allocation3 + $0x1e8] sm:$0xf] %v798_v56 }
 0x15c   : > { %2765 = vmatmul.bf16.gmra.mxu0 %v6637_v1  ;;  %834 = vst [vmem:[#allocation3 + $0x224] sm:$0xf] %v798_v56 }
 0x15d   : > { %v9340_v54 = vpop.f32.mrf.mxu0  ;;  %894 = vst [vmem:[#allocation3 + $0x1ac] sm:$0xf] %v798_v56  ;;  %v6772_v56 = vld [vmem:[#allocation3 + $0x1b8] sm:$0xf] }
 0x161   : > { %v2509_v24 = vpop.f32.mrf.mxu1  ;;  %v2460_v26 = vpop.f32.mrf.mxu2 }
 0x162   : > { %2587 = vmatmul.bf16.gmra.mxu2 %v6629_v9  ;;  %v9335_v27 = vadd.f32 %v2509_v24, %v2421_v15  ;;  %v2461_v29 = vadd.f32 %v9272_v53, %v2460_v26  ;;  %v796_v9 = vpack.c.bf16 %v760_v63, %v760_v63  ;;  %v9346_v15 = vpop.f32.mrf.mxu3  ;;  %v8321_v24 = vld [vmem:[#allocation3 + $0x148] sm:$0xf0] }
 0x164   : > { %v9338_v43 = vadd.f32 %v2549_v37, %v2461_v29  ;;  %862 = vst [vmem:[#allocation3 + $0x1a0] sm:$0xf] %v796_v9  ;;  %v6701_v29 = vor.u32 %v8321_v24, %v6700_v22  ;;  %v6774_v22 = vld [vmem:[#allocation3 + $0x1dc] sm:$0xf0]  ;;  %v8327_v24 = vld [vmem:[#allocation3 + $0x17c] sm:$0xf] }
 0x165   : > { %832 = vst [vmem:[#allocation3 + $0x1dc] sm:$0xf] %v796_v9 }
 0x166   : > { %2681 = vmatmul.bf16.gmra.mxu3 %v6669_v19  ;;  %892 = vst [vmem:[#allocation3 + $0x164] sm:$0xf] %v796_v9  ;;  %v8330_v9 = vld [vmem:[#allocation3 + $0x190] sm:$0xf0] }
 0x167   : > { %v6737_v14 = vor.u32 %v8330_v9, %v6736_v7 }
 0x168   : > { %2854 = vmatmul.bf16.gmra.mxu1 %v6641_v36  ;;  %v6738_v36 = vld [vmem:[#allocation3 + $0x194] sm:$0xf0] }
 0x169   : > { %v9342_v1 = vpop.f32.mrf.mxu1  ;;  %v9344_v5 = vpop.f32.mrf.mxu2  ;;  %v6741_v41 = vor.u32 %v8326_v34, %v6738_v36 }
 0x16c   : > { %2770 = vmatmul.bf16.gmra.mxu0 %v6673_v44  ;;  %v8476_v44 = vld [vmem:[#allocation7 + $0x1a0] sm:$0xff] }
 0x16d   : > { %2928 = vmatpush.bf16.msra.mxu2 %v8476_v44 }
 0x171   : > { %v2425_v18 = vpop.f32.mrf.mxu0  ;;  %v2554_v37 = vpop.f32.mrf.mxu3 }
 0x172   : > { %2592 = vmatmul.bf16.gmra.mxu2 %v6665_v48  ;;  %v2426_v19 = vadd.f32 %v9272_v53, %v2425_v18  ;;  %v761_v48 = vld [vmem:[#allocation2 + $0xe9] sm:$0xff] }
 0x173   : > { %v797_v55 = vpack.c.bf16 %v761_v48, %v761_v48 }
 0x175   : > { %863 = vst [vmem:[#allocation3 + $0x1c4] sm:$0xf] %v797_v55 }
 0x176   : > { %2686 = vmatmul.bf16.gmra.mxu3 %v6705_v58  ;;  %v6744_v58 = vld [vmem:[#allocation3 + $0x178] sm:$0xf]  ;;  %833 = vst [vmem:[#allocation3 + $0x200] sm:$0xf] %v797_v55 }
 0x177   : > { %v6745_v63 = vor.u32 %v8331_v61, %v6744_v58  ;;  %893 = vst [vmem:[#allocation3 + $0x188] sm:$0xf] %v797_v55  ;;  %v8339_v58 = vld [vmem:[#allocation3 + $0x1d8] sm:$0xf0] }
 0x178   : > { %2859 = vmatmul.bf16.gmra.mxu1 %v6677_v10 }
 0x179   : > { %v9354_v10 = vpop.f32.mrf.mxu0  ;;  %v9356_v11 = vpop.f32.mrf.mxu3 }
 0x17a   : > { %10746 = vst [vmem:[#allocation14_spill] sm:$0xff] %v9356_v11 }
 0x17c   : > { %2775 = vmatmul.bf16.gmra.mxu0 %v6709_v16 }
 0x17d   : > { %v2514_v25 = vpop.f32.mrf.mxu1  ;;  %v2465_v26 = vpop.f32.mrf.mxu2 }
 0x17e   : > { %v9349_v30 = vadd.f32 %v2514_v25, %v2426_v19  ;;  %v2466_v33 = vadd.f32 %v9272_v53, %v2465_v26  ;;  %v8335_v19 = vld [vmem:[#allocation3 + $0x1bc] sm:$0xf]  ;;  %v6746_v25 = vld [vmem:[#allocation3 + $0x19c] sm:$0xf0] }
 0x17f   : > { %v6777_v26 = vor.u32 %v8335_v19, %v6774_v22  ;;  %v6749_v34 = vor.u32 %v8327_v24, %v6746_v25  ;;  %v6810_v19 = vld [vmem:[#allocation3 + $0x224] sm:$0xf0]  ;;  %v8336_v22 = vld [vmem:[#allocation3 + $0x1c4] sm:$0xf] }
 0x180   : > { %v9352_v38 = vadd.f32 %v2554_v37, %v2466_v33  ;;  %v764_v33 = vld [vmem:[#allocation2 + $0x111] sm:$0xff]  ;;  %v6782_v24 = vld [vmem:[#allocation3 + $0x1e4] sm:$0xf0] }
 0x181   : > { %v800_v37 = vpack.c.bf16 %v764_v33, %v764_v33  ;;  %v8475_v33 = vld [vmem:[#allocation7 + $0x198] sm:$0xff] }
 0x182   : > { %2597 = vmatmul.bf16.gmra.mxu2 %v6701_v29  ;;  %v763_v29 = vld [vmem:[#allocation2 + $0x109] sm:$0xff] }
 0x183   : > { %v799_v36 = vpack.c.bf16 %v763_v29, %v763_v29  ;;  %866 = vst [vmem:[#allocation3 + $0x230] sm:$0xf] %v800_v37  ;;  %2929 = vmatpush.bf16.msra.mxu2 %v8475_v33 }
 0x184   : > { %836 = vst [vmem:[#allocation3 + $0x26c] sm:$0xf] %v800_v37 }
 0x185   : > { %v9358_v16 = vpop.f32.mrf.mxu1  ;;  %v9360_v18 = vpop.f32.mrf.mxu2  ;;  %865 = vst [vmem:[#allocation3 + $0x20c] sm:$0xf] %v799_v36 }
 0x186   : > { %2691 = vmatmul.bf16.gmra.mxu3 %v6741_v41  ;;  %10747 = vst [vmem:[#allocation15_spill] sm:$0xff] %v9360_v18  ;;  %v8340_v41 = vld [vmem:[#allocation3 + $0x1e0] sm:$0xf0]  ;;  %v8367_v18 = vld [vmem:[#allocation3 + $0x2b8] sm:$0xf0] }
 0x187   : > { %v6781_v47 = vor.u32 %v8340_v41, %v6780_v40  ;;  %835 = vst [vmem:[#allocation3 + $0x248] sm:$0xf] %v799_v36 }
 0x188   : > { %2864 = vmatmul.bf16.gmra.mxu1 %v6713_v51  ;;  %895 = vst [vmem:[#allocation3 + $0x1d0] sm:$0xf] %v799_v36  ;;  %v6785_v36 = vor.u32 %v8336_v22, %v6782_v24  ;;  %v6846_v22 = vld [vmem:[#allocation3 + $0x26c] sm:$0xf0] }
 0x189   : > { %896 = vst [vmem:[#allocation3 + $0x1f4] sm:$0xf] %v800_v37  ;;  %v765_v37 = vld [vmem:[#allocation2 + $0x129] sm:$0xff] }
 0x18a   : > { %v801_v41 = vpack.c.bf16 %v765_v37, %v765_v37  ;;  %v768_v37 = vld [vmem:[#allocation2 + $0x151] sm:$0xff] }
 0x18c   : > { %2780 = vmatmul.bf16.gmra.mxu0 %v6745_v63  ;;  %v6773_v63 = vor.u32 %v8339_v58, %v6772_v56  ;;  %867 = vst [vmem:[#allocation3 + $0x254] sm:$0xf] %v801_v41  ;;  %v6808_v58 = vld [vmem:[#allocation3 + $0x200] sm:$0xf] }
 0x18d   : > { %v2430_v39 = vpop.f32.mrf.mxu0  ;;  %v2559_v44 = vpop.f32.mrf.mxu3  ;;  %837 = vst [vmem:[#allocation3 + $0x290] sm:$0xf] %v801_v41 }
 0x18e   : > { %v2431_v46 = vadd.f32 %v9272_v53, %v2430_v39  ;;  %v766_v39 = vld [vmem:[#allocation2 + $0x131] sm:$0xff]  ;;  %897 = vst [vmem:[#allocation3 + $0x218] sm:$0xf] %v801_v41 }
 0x192   : > { %2602 = vmatmul.bf16.gmra.mxu2 %v6737_v14  ;;  %v8344_v14 = vld [vmem:[#allocation3 + $0x204] sm:$0xf] }
 0x193   : > { %v6813_v29 = vor.u32 %v8344_v14, %v6810_v19  ;;  %v8353_v19 = vld [vmem:[#allocation3 + $0x24c] sm:$0xf] }
 0x195   : > { %v9368_v7 = vpop.f32.mrf.mxu0  ;;  %v2561_v9 = vpop.f32.mrf.mxu3 }
 0x196   : > { %2696 = vmatmul.bf16.gmra.mxu3 %v6777_v26 }
 0x198   : > { %2869 = vmatmul.bf16.gmra.mxu1 %v6749_v34  ;;  %v8483_v34 = vld [vmem:[#allocation7 + $0x1d8] sm:$0xff] }
 0x199   : > { %v2519_v48 = vpop.f32.mrf.mxu1  ;;  %v2470_v49 = vpop.f32.mrf.mxu2  ;;  %3018 = vmatpush.bf16.msra.mxu3 %v8483_v34  ;;  %v6849_v34 = vor.u32 %v8353_v19, %v6846_v22 }
 0x19a   : > { %v9363_v51 = vadd.f32 %v2519_v48, %v2431_v46  ;;  %v2471_v55 = vadd.f32 %v9272_v53, %v2470_v49  ;;  %v6816_v46 = vld [vmem:[#allocation3 + $0x208] sm:$0xf] }
 0x19c   : > { %2785 = vmatmul.bf16.gmra.mxu0 %v6781_v47  ;;  %v9366_v61 = vadd.f32 %v2559_v44, %v2471_v55  ;;  %v802_v44 = vpack.c.bf16 %v766_v39, %v766_v39  ;;  %v8349_v47 = vld [vmem:[#allocation3 + $0x228] sm:$0xf0] }
 0x19d   : > { %v6817_v48 = vor.u32 %v8349_v47, %v6816_v46  ;;  %v804_v46 = vpack.c.bf16 %v768_v37, %v768_v37 }
 0x19e   : > { %10748 = vst [vmem:[#allocation16_spill] sm:$0xff] %v9366_v61 }
 0x19f   : > { %868 = vst [vmem:[#allocation3 + $0x278] sm:$0xf] %v802_v44 }
 0x1a0   : > { %838 = vst [vmem:[#allocation3 + $0x2b4] sm:$0xf] %v802_v44 }
 0x1a1   : > { %v2472_v25 = vpop.f32.mrf.mxu2  ;;  %v9373_v56 = vpop.f32.mrf.mxu1  ;;  %898 = vst [vmem:[#allocation3 + $0x23c] sm:$0xf] %v802_v44 }
 0x1a2   : > { %2607 = vmatmul.bf16.gmra.mxu2 %v6773_v63  ;;  %v2473_v26 = vadd.f32 %v9272_v53, %v2472_v25  ;;  %v8348_v63 = vld [vmem:[#allocation3 + $0x220] sm:$0xf0]  ;;  %870 = vst [vmem:[#allocation3 + $0x2c0] sm:$0xf] %v804_v46 }
 0x1a3   : > { %v6809_v14 = vor.u32 %v8348_v63, %v6808_v58  ;;  %v8358_v58 = vld [vmem:[#allocation3 + $0x270] sm:$0xf0]  ;;  %840 = vst [vmem:[#allocation3 + $0x2fc] sm:$0xf] %v804_v46 }
 0x1a4   : > { %v9371_v40 = vadd.f32 %v2561_v9, %v2473_v26  ;;  %v8491_v9 = vld [vmem:[#allocation7 + $0x218] sm:$0xff]  ;;  %v8345_v26 = vld [vmem:[#allocation3 + $0x20c] sm:$0xf]  ;;  %900 = vst [vmem:[#allocation3 + $0x284] sm:$0xf] %v804_v46 }
 0x1a5   : > { %3107 = vmatpush.bf16.msra.mxu0 %v8491_v9  ;;  %v769_v46 = vld [vmem:[#allocation2 + $0x169] sm:$0xff] }
 0x1a6   : > { %10749 = vst [vmem:[#allocation17_spill] sm:$0xff] %v9371_v40  ;;  %2701 = vmatmul.bf16.gmra.mxu3 %v6813_v29  ;;  %v6818_v29 = vld [vmem:[#allocation3 + $0x22c] sm:$0xf0] }
 0x1a7   : > { %v6821_v39 = vor.u32 %v8345_v26, %v6818_v29  ;;  %v6844_v26 = vld [vmem:[#allocation3 + $0x248] sm:$0xf]  ;;  %v8357_v29 = vld [vmem:[#allocation3 + $0x268] sm:$0xf0] }
 0x1a8   : > { %2874 = vmatmul.bf16.gmra.mxu1 %v6785_v36  ;;  %v767_v36 = vld [vmem:[#allocation2 + $0x149] sm:$0xff]  ;;  %v6845_v37 = vor.u32 %v8357_v29, %v6844_v26  ;;  %v6888_v29 = vld [vmem:[#allocation3 + $0x298] sm:$0xf] }
 0x1a9   : > { %v2435_v49 = vpop.f32.mrf.mxu0  ;;  %v2564_v55 = vpop.f32.mrf.mxu3  ;;  %v803_v41 = vpack.c.bf16 %v767_v36, %v767_v36 }
 0x1aa   : > { %v2436_v33 = vadd.f32 %v9272_v53, %v2435_v49 }
 0x1ab   : > { %869 = vst [vmem:[#allocation3 + $0x29c] sm:$0xf] %v803_v41 }
 0x1ac   : > { %2790 = vmatmul.bf16.gmra.mxu0 %v6817_v48  ;;  %v6852_v48 = vld [vmem:[#allocation3 + $0x250] sm:$0xf]  ;;  %839 = vst [vmem:[#allocation3 + $0x2d8] sm:$0xf] %v803_v41 }
 0x1ad   : > { %v6853_v49 = vor.u32 %v8358_v58, %v6852_v48  ;;  %899 = vst [vmem:[#allocation3 + $0x260] sm:$0xf] %v803_v41 }
 0x1b1   : > { %v2437_v24 = vpop.f32.mrf.mxu0  ;;  %v2566_v25 = vpop.f32.mrf.mxu3 }
 0x1b2   : > { %2612 = vmatmul.bf16.gmra.mxu2 %v6809_v14  ;;  %v2438_v22 = vadd.f32 %v9272_v53, %v2437_v24  ;;  %v6854_v24 = vld [vmem:[#allocation3 + $0x274] sm:$0xf0] }
 0x1b5   : > { %v2524_v44 = vpop.f32.mrf.mxu1  ;;  %v2475_v47 = vpop.f32.mrf.mxu2 }
 0x1b6   : > { %v9376_v63 = vadd.f32 %v2524_v44, %v2436_v33  ;;  %v2476_v9 = vadd.f32 %v9272_v53, %v2475_v47  ;;  %2706 = vmatmul.bf16.gmra.mxu3 %v6849_v34  ;;  %v6882_v44 = vld [vmem:[#allocation3 + $0x2b4] sm:$0xf0] }
 0x1b8   : > { %v9379_v40 = vadd.f32 %v2564_v55, %v2476_v9  ;;  %2879 = vmatmul.bf16.gmra.mxu1 %v6821_v39  ;;  %v8362_v39 = vld [vmem:[#allocation3 + $0x294] sm:$0xf] }
 0x1b9   : > { %v2756_v14 = vpop.f32.mrf.mxu0  ;;  %v2667_v19 = vpop.f32.mrf.mxu3  ;;  %v8354_v9 = vld [vmem:[#allocation3 + $0x254] sm:$0xf]  ;;  %v6885_v41 = vor.u32 %v8362_v39, %v6882_v44  ;;  %v6889_v39 = vor.u32 %v8367_v18, %v6888_v29  ;;  %v8371_v18 = vld [vmem:[#allocation3 + $0x2dc] sm:$0xf] }
 0x1ba   : > { %10750 = vst [vmem:[#allocation18_spill] sm:$0xff] %v9379_v40  ;;  %v8474_v40 = vld [vmem:[#allocation7 + $0x190] sm:$0xff]  ;;  %v6857_v61 = vor.u32 %v8354_v9, %v6854_v24 }
 0x1bb   : > { %2930 = vmatpush.bf16.msra.mxu2 %v8474_v40  ;;  %v6880_v24 = vld [vmem:[#allocation3 + $0x290] sm:$0xf] }
 0x1bc   : > { %2795 = vmatmul.bf16.gmra.mxu0 %v6853_v49  ;;  %v770_v49 = vld [vmem:[#allocation2 + $0x171] sm:$0xff] }
 0x1bd   : > { %v2526_v33 = vpop.f32.mrf.mxu1  ;;  %v2477_v36 = vpop.f32.mrf.mxu2  ;;  %v806_v11 = vpack.c.bf16 %v770_v49, %v770_v49  ;;  %v8490_v49 = vld [vmem:[#allocation7 + $0x210] sm:$0xff] }
 0x1be   : > { %v9382_v34 = vadd.f32 %v2526_v33, %v2438_v22  ;;  %v2478_v55 = vadd.f32 %v9272_v53, %v2477_v36  ;;  %v8482_v22 = vld [vmem:[#allocation7 + $0x1d0] sm:$0xff]  ;;  %v805_v33 = vpack.c.bf16 %v769_v46, %v769_v46  ;;  %3108 = vmatpush.bf16.msra.mxu0 %v8490_v49 }
 0x1bf   : > { %3019 = vmatpush.bf16.msra.mxu3 %v8482_v22  ;;  %872 = vst [vmem:[#allocation3 + $0x308] sm:$0xf] %v806_v11  ;;  %v8366_v46 = vld [vmem:[#allocation3 + $0x2b0] sm:$0xf0] }
 0x1c0   : > { %v9385_v47 = vadd.f32 %v2566_v25, %v2478_v55  ;;  %871 = vst [vmem:[#allocation3 + $0x2e4] sm:$0xf] %v805_v33  ;;  %v2403_v55 = vadd.f32 %v9272_v53, %v9278_v6 }
 0x1c1   : > { %v2758_v48 = vpop.f32.mrf.mxu0  ;;  %v2669_v58 = vpop.f32.mrf.mxu3  ;;  %841 = vst [vmem:[#allocation3 + $0x320] sm:$0xf] %v805_v33 }
 0x1c2   : > { %10751 = vst [vmem:[#allocation19_spill] sm:$0xff] %v9385_v47  ;;  %2617 = vmatmul.bf16.gmra.mxu2 %v6845_v37  ;;  %v6890_v47 = vld [vmem:[#allocation3 + $0x2bc] sm:$0xf0] }
 0x1c3   : > { %842 = vst [vmem:[#allocation3 + $0x344] sm:$0xf] %v806_v11 }
 0x1c4   : > { %901 = vst [vmem:[#allocation3 + $0x2a8] sm:$0xf] %v805_v33 }
 0x1c5   : > { %v2578_v36 = vpop.f32.mrf.mxu2  ;;  %v2845_v26 = vpop.f32.mrf.mxu1  ;;  %902 = vst [vmem:[#allocation3 + $0x2cc] sm:$0xf] %v806_v11 }
 0x1c6   : > { %v2579_v25 = vadd.f32 %v2578_v36, %v9275_v3  ;;  %2711 = vmatmul.bf16.gmra.mxu3 %v6885_v41  ;;  %v2492_v3 = vadd.f32 %v9286_v20, %v2403_v55  ;;  %v6918_v36 = vld [vmem:[#allocation3 + $0x2fc] sm:$0xf0]  ;;  %v772_v55 = vld [vmem:[#allocation2 + $0x191] sm:$0xff] }
 0x1c7   : > { %v6921_v20 = vor.u32 %v8371_v18, %v6918_v36 }
 0x1c8   : > { %v2668_v37 = vadd.f32 %v2667_v19, %v2579_v25  ;;  %2884 = vmatmul.bf16.gmra.mxu1 %v6857_v61  ;;  %v6881_v61 = vor.u32 %v8366_v46, %v6880_v24  ;;  %v8647_v25 = vld [vmem:[#allocation9 + $0x38] sm:$0xff]  ;;  %v808_v24 = vpack.c.bf16 %v772_v55, %v772_v55 }
 0x1c9   : > { %v2761_v40 = vpop.f32.mrf.mxu0  ;;  %v2672_v44 = vpop.f32.mrf.mxu3  ;;  %5492 = vmatpush.bf16.msra.mxu1 %v8647_v25  ;;  %v8375_v25 = vld [vmem:[#allocation3 + $0x2f8] sm:$0xf0] }
 0x1ca   : > { %v2757_v9 = vadd.f32 %v2756_v14, %v2668_v37  ;;  %v8363_v37 = vld [vmem:[#allocation3 + $0x29c] sm:$0xf]  ;;  %874 = vst [vmem:[#allocation3 + $0x350] sm:$0xf] %v808_v24 }
 0x1cb   : > { %844 = vst [vmem:[#allocation3 + $0x38c] sm:$0xf] %v808_v24 }
 0x1cc   : > { %v9391_v41 = vadd.f32 %v2845_v26, %v2757_v9  ;;  %2800 = vmatmul.bf16.gmra.mxu0 %v6889_v39  ;;  %v771_v26 = vld [vmem:[#allocation2 + $0x189] sm:$0xff]  ;;  %v6893_v9 = vor.u32 %v8363_v37, %v6890_v47  ;;  %904 = vst [vmem:[#allocation3 + $0x314] sm:$0xf] %v808_v24 }
 0x1cd   : > { %v2580_v22 = vpop.f32.mrf.mxu2  ;;  %v2847_v6 = vpop.f32.mrf.mxu1  ;;  %v8473_v24 = vld [vmem:[#allocation7 + $0x188] sm:$0xff] }
 0x1ce   : > { %v2581_v19 = vadd.f32 %v2580_v22, %v2492_v3  ;;  %v807_v3 = vpack.c.bf16 %v771_v26, %v771_v26  ;;  %v6924_v22 = vld [vmem:[#allocation3 + $0x2e0] sm:$0xf]  ;;  %v6954_v26 = vld [vmem:[#allocation3 + $0x344] sm:$0xf0]  ;;  %2931 = vmatpush.bf16.msra.mxu2 %v8473_v24 }
 0x1d0   : > { %v2670_v29 = vadd.f32 %v2669_v58, %v2581_v19  ;;  %v8376_v58 = vld [vmem:[#allocation3 + $0x300] sm:$0xf0]  ;;  %873 = vst [vmem:[#allocation3 + $0x32c] sm:$0xf] %v807_v3 }
 0x1d1   : > { %v2763_v14 = vpop.f32.mrf.mxu0  ;;  %v2674_v33 = vpop.f32.mrf.mxu3  ;;  %v6925_v18 = vor.u32 %v8376_v58, %v6924_v22  ;;  %843 = vst [vmem:[#allocation3 + $0x368] sm:$0xf] %v807_v3  ;;  %v8372_v22 = vld [vmem:[#allocation3 + $0x2e4] sm:$0xf] }
 0x1d2   : > { %2622 = vmatmul.bf16.gmra.mxu2 %v6881_v61  ;;  %v2759_v11 = vadd.f32 %v2758_v48, %v2670_v29  ;;  %v2408_v48 = vadd.f32 %v9272_v53, %v9296_v45  ;;  %903 = vst [vmem:[#allocation3 + $0x2f0] sm:$0xf] %v807_v3  ;;  %v6916_v29 = vld [vmem:[#allocation3 + $0x2d8] sm:$0xf] }
 0x1d3   : > { %v6917_v45 = vor.u32 %v8375_v25, %v6916_v29 }
 0x1d4   : > { %v9393_v39 = vadd.f32 %v2847_v6, %v2759_v11 }
 0x1d5   : > { %v2583_v46 = vpop.f32.mrf.mxu2  ;;  %v2850_v49 = vpop.f32.mrf.mxu1 }
 0x1d6   : > { %v2584_v19 = vadd.f32 %v2583_v46, %v9293_v42  ;;  %2716 = vmatmul.bf16.gmra.mxu3 %v6921_v20  ;;  %v2497_v42 = vadd.f32 %v9300_v59, %v2408_v48  ;;  %v774_v59 = vld [vmem:[#allocation2 + $0x1b1] sm:$0xff] }
 0x1d8   : > { %v2673_v61 = vadd.f32 %v2672_v44, %v2584_v19  ;;  %2889 = vmatmul.bf16.gmra.mxu1 %v6893_v9  ;;  %v8380_v44 = vld [vmem:[#allocation3 + $0x324] sm:$0xf]  ;;  %v773_v19 = vld [vmem:[#allocation2 + $0x1a9] sm:$0xff] }
 0x1d9   : > { %v2766_v6 = vpop.f32.mrf.mxu0  ;;  %v2677_v47 = vpop.f32.mrf.mxu3  ;;  %v6957_v58 = vor.u32 %v8380_v44, %v6954_v26 }
 0x1da   : > { %v2762_v36 = vadd.f32 %v2761_v40, %v2673_v61  ;;  %v6926_v40 = vld [vmem:[#allocation3 + $0x304] sm:$0xf0] }
 0x1db   : > { %v6929_v48 = vor.u32 %v8372_v22, %v6926_v40  ;;  %v8481_v61 = vld [vmem:[#allocation7 + $0x1c8] sm:$0xff]  ;;  %v8384_v22 = vld [vmem:[#allocation3 + $0x340] sm:$0xf0] }
 0x1dc   : > { %v9399_v37 = vadd.f32 %v2850_v49, %v2762_v36  ;;  %2805 = vmatmul.bf16.gmra.mxu0 %v6925_v18  ;;  %v809_v18 = vpack.c.bf16 %v773_v19, %v773_v19  ;;  %v810_v36 = vpack.c.bf16 %v774_v59, %v774_v59  ;;  %3020 = vmatpush.bf16.msra.mxu3 %v8481_v61  ;;  %v8389_v59 = vld [vmem:[#allocation3 + $0x36c] sm:$0xf] }
 0x1dd   : > { %v2585_v11 = vpop.f32.mrf.mxu2  ;;  %v2852_v20 = vpop.f32.mrf.mxu1 }
 0x1de   : > { %v2586_v53 = vadd.f32 %v2585_v11, %v2497_v42  ;;  %v8385_v42 = vld [vmem:[#allocation3 + $0x348] sm:$0xf0]  ;;  %875 = vst [vmem:[#allocation3 + $0x374] sm:$0xf] %v809_v18 }
 0x1df   : > { %876 = vst [vmem:[#allocation3 + $0x398] sm:$0xf] %v810_v36 }
 0x1e0   : > { %v2675_v55 = vadd.f32 %v2674_v33, %v2586_v53  ;;  %v6960_v33 = vld [vmem:[#allocation3 + $0x328] sm:$0xf]  ;;  %845 = vst [vmem:[#allocation3 + $0x3b0] sm:$0xf] %v809_v18 }
 0x1e1   : > { %v2768_v9 = vpop.f32.mrf.mxu0  ;;  %v2679_v46 = vpop.f32.mrf.mxu3  ;;  %846 = vst [vmem:[#allocation3 + $0x3d4] sm:$0xf] %v810_v36 }
 0x1e2   : > { %2627 = vmatmul.bf16.gmra.mxu2 %v6917_v45  ;;  %v2764_v3 = vadd.f32 %v2763_v14, %v2675_v55  ;;  %v9407_v14 = vld [vmem:[%s10736_s2] ss:$0 sm:$0xff]  ;;  %v6961_v45 = vor.u32 %v8385_v42, %v6960_v33  ;;  %905 = vst [vmem:[#allocation3 + $0x338] sm:$0xf] %v809_v18  ;;  %v8381_v33 = vld [vmem:[#allocation3 + $0x32c] sm:$0xf] }
 0x1e3   : > { %v6952_v55 = vld [vmem:[#allocation3 + $0x320] sm:$0xf]  ;;  %906 = vst [vmem:[#allocation3 + $0x35c] sm:$0xf] %v810_v36  ;;  %v6962_v42 = vld [vmem:[#allocation3 + $0x34c] sm:$0xf0] }
 0x1e4   : > { %v9401_v49 = vadd.f32 %v2852_v20, %v2764_v3  ;;  %v2413_v20 = vadd.f32 %v9407_v14, %v9310_v17  ;;  %v6953_v19 = vor.u32 %v8384_v22, %v6952_v55 }
 0x1e5   : > { %v2588_v29 = vpop.f32.mrf.mxu2  ;;  %v2855_v25 = vpop.f32.mrf.mxu1 }
 0x1e6   : > { %v2589_v11 = vadd.f32 %v2588_v29, %v9307_v13  ;;  %2721 = vmatmul.bf16.gmra.mxu3 %v6957_v58  ;;  %v2502_v40 = vadd.f32 %v9314_v31, %v2413_v20  ;;  %v8489_v58 = vld [vmem:[#allocation7 + $0x208] sm:$0xff]  ;;  %v8646_v29 = vld [vmem:[#allocation9 + $0x30] sm:$0xff] }
 0x1e7   : > { %3109 = vmatpush.bf16.msra.mxu0 %v8489_v58  ;;  %5493 = vmatpush.bf16.msra.mxu1 %v8646_v29 }
 0x1e8   : > { %v2678_v53 = vadd.f32 %v2677_v47, %v2589_v11  ;;  %2894 = vmatmul.bf16.gmra.mxu1 %v6929_v48  ;;  %v6990_v48 = vld [vmem:[#allocation3 + $0x38c] sm:$0xf0] }
 0x1e9   : > { %v2771_v44 = vpop.f32.mrf.mxu0  ;;  %v2682_v26 = vpop.f32.mrf.mxu3  ;;  %v6993_v31 = vor.u32 %v8389_v59, %v6990_v48  ;;  %v776_v11 = vld [vmem:[#allocation2 + $0x1d1] sm:$0xff]  ;;  %v6988_v48 = vld [vmem:[#allocation3 + $0x368] sm:$0xf] }
 0x1ea   : > { %v2767_v13 = vadd.f32 %v2766_v6, %v2678_v53  ;;  %v6965_v53 = vor.u32 %v8381_v33, %v6962_v42 }
 0x1ec   : > { %v9412_v3 = vadd.f32 %v2855_v25, %v2767_v13  ;;  %2810 = vmatmul.bf16.gmra.mxu0 %v6961_v45  ;;  %v775_v25 = vld [vmem:[#allocation2 + $0x1c9] sm:$0xff]  ;;  %v812_v13 = vpack.c.bf16 %v776_v11, %v776_v11  ;;  %v378_v11 = vld [vmem:[%s9183_s7 + $0xf8] sm:$0xff] }
 0x1ed   : > { %v2590_v24 = vpop.f32.mrf.mxu2  ;;  %v2857_v17 = vpop.f32.mrf.mxu1  ;;  %v811_v45 = vpack.c.bf16 %v775_v25, %v775_v25  ;;  %v377_v25 = vld [vmem:[%s9183_s7 + $0xf0] sm:$0xff]  ;;  %410 = vst [vmem:[#allocation2 + $0x210] sm:$0xff] %v378_v11 }
 0x1ee   : > { %v2591_v47 = vadd.f32 %v2590_v24, %v2502_v40  ;;  %v6996_v40 = vld [vmem:[#allocation3 + $0x370] sm:$0xf]  ;;  %878 = vst [vmem:[#allocation3 + $0x3e0] sm:$0xf] %v812_v13 }
 0x1ef   : > { %877 = vst [vmem:[#allocation3 + $0x3bc] sm:$0xf] %v811_v45 }
 0x1f0   : > { %v2680_v61 = vadd.f32 %v2679_v46, %v2591_v47  ;;  %v8394_v46 = vld [vmem:[#allocation3 + $0x390] sm:$0xf0]  ;;  %847 = vst [vmem:[#allocation3 + $0x3f8] sm:$0xf] %v811_v45 }
 0x1f1   : > { %v2773_v6 = vpop.f32.mrf.mxu0  ;;  %v2684_v18 = vpop.f32.mrf.mxu3  ;;  %v6997_v47 = vor.u32 %v8394_v46, %v6996_v40  ;;  %848 = vst [vmem:[#allocation3 + $0x41c] sm:$0xf] %v812_v13  ;;  %v8472_v40 = vld [vmem:[#allocation7 + $0x180] sm:$0xff]  ;;  %v777_v46 = vld [vmem:[#allocation2 + $0x1e9] sm:$0xff] }
 0x1f2   : > { %2632 = vmatmul.bf16.gmra.mxu2 %v6953_v19  ;;  %v2769_v36 = vadd.f32 %v2768_v9, %v2680_v61  ;;  %v2418_v9 = vadd.f32 %v9407_v14, %v9324_v57  ;;  %907 = vst [vmem:[#allocation3 + $0x380] sm:$0xf] %v811_v45  ;;  %v8393_v61 = vld [vmem:[#allocation3 + $0x388] sm:$0xf0] }
 0x1f3   : > { %908 = vst [vmem:[#allocation3 + $0x3a4] sm:$0xf] %v812_v13  ;;  %v6989_v33 = vor.u32 %v8393_v61, %v6988_v48  ;;  %v6998_v13 = vld [vmem:[#allocation3 + $0x394] sm:$0xf0]  ;;  %2932 = vmatpush.bf16.msra.mxu2 %v8472_v40  ;;  %v8402_v40 = vld [vmem:[#allocation3 + $0x3d0] sm:$0xf0] }
 0x1f4   : > { %v9414_v20 = vadd.f32 %v2857_v17, %v2769_v36  ;;  %v8398_v36 = vld [vmem:[#allocation3 + $0x3b4] sm:$0xf]  ;;  %409 = vst [vmem:[#allocation2 + $0x208] sm:$0xff] %v377_v25  ;;  %v7032_v61 = vld [vmem:[#allocation3 + $0x3b8] sm:$0xf] }
 0x1f5   : > { %v2593_v55 = vpop.f32.mrf.mxu2  ;;  %v2860_v22 = vpop.f32.mrf.mxu1 }
 0x1f6   : > { %v2594_v58 = vadd.f32 %v2593_v55, %v9321_v50  ;;  %2726 = vmatmul.bf16.gmra.mxu3 %v6993_v31  ;;  %v2507_v50 = vadd.f32 %v9328_v2, %v2418_v9  ;;  %v7026_v31 = vld [vmem:[#allocation3 + $0x3d4] sm:$0xf0]  ;;  %v8390_v55 = vld [vmem:[#allocation3 + $0x374] sm:$0xf] }
 0x1f8   : > { %v2683_v24 = vadd.f32 %v2682_v26, %v2594_v58  ;;  %2899 = vmatmul.bf16.gmra.mxu1 %v6965_v53  ;;  %v778_v58 = vld [vmem:[#allocation2 + $0x1f1] sm:$0xff] }
 0x1f9   : > { %v2776_v17 = vpop.f32.mrf.mxu0  ;;  %v2687_v19 = vpop.f32.mrf.mxu3 }
 0x1fa   : > { %v2772_v59 = vadd.f32 %v2771_v44, %v2683_v24  ;;  %v7001_v24 = vor.u32 %v8390_v55, %v6998_v13 }
 0x1fb   : > { %v444_v13 = vld [vmem:[#allocation2 + $0x20f] sm:$0xff] }
 0x1fc   : > { %v9420_v29 = vadd.f32 %v2860_v22, %v2772_v59  ;;  %2815 = vmatmul.bf16.gmra.mxu0 %v6997_v47  ;;  %v7029_v22 = vor.u32 %v8398_v36, %v7026_v31  ;;  %v8480_v47 = vld [vmem:[#allocation7 + $0x1c0] sm:$0xff]  ;;  %v813_v59 = vpack.c.bf16 %v777_v46, %v777_v46 }
 0x1fd   : > { %v2595_v57 = vpop.f32.mrf.mxu2  ;;  %v2862_v42 = vpop.f32.mrf.mxu1  ;;  %3021 = vmatpush.bf16.msra.mxu3 %v8480_v47 }
 0x1fe   : > { %v2596_v26 = vadd.f32 %v2595_v57, %v2507_v50  ;;  %v8403_v50 = vld [vmem:[#allocation3 + $0x3d8] sm:$0xf0]  ;;  %879 = vst [vmem:[#allocation3 + $0x404] sm:$0xf] %v813_v59 }
 0x1ff   : > { %v7033_v36 = vor.u32 %v8403_v50, %v7032_v61  ;;  %849 = vst [vmem:[#allocation3 + $0x440] sm:$0xf] %v813_v59  ;;  %v7062_v61 = vld [vmem:[#allocation3 + $0x41c] sm:$0xf0] }
 0x200   : > { %v2685_v53 = vadd.f32 %v2684_v18, %v2596_v26  ;;  %v814_v18 = vpack.c.bf16 %v778_v58, %v778_v58  ;;  %v443_v26 = vld [vmem:[#allocation2 + $0x207] sm:$0xff]  ;;  %909 = vst [vmem:[#allocation3 + $0x3c8] sm:$0xf] %v813_v59  ;;  %v8407_v59 = vld [vmem:[#allocation3 + $0x3fc] sm:$0xf] }
 0x201   : > { %v9424_v44 = vpop.f32.mrf.mxu0  ;;  %v2689_v45 = vpop.f32.mrf.mxu3  ;;  %v479_v31 = vpack.c.bf16 %v443_v26, %v443_v26  ;;  %v7034_v26 = vld [vmem:[#allocation3 + $0x3dc] sm:$0xf0] }
 0x202   : > { %2637 = vmatmul.bf16.gmra.mxu2 %v6989_v33  ;;  %v2774_v2 = vadd.f32 %v2773_v6, %v2685_v53  ;;  %v2423_v6 = vadd.f32 %v9407_v14, %v9340_v54  ;;  %880 = vst [vmem:[#allocation3 + $0x428] sm:$0xf] %v814_v18 }
 0x203   : > { %850 = vst [vmem:[#allocation3 + $0x464] sm:$0xf] %v814_v18 }
 0x204   : > { %v9426_v9 = vadd.f32 %v2862_v42, %v2774_v2  ;;  %910 = vst [vmem:[#allocation3 + $0x3ec] sm:$0xf] %v814_v18  ;;  %v2512_v54 = vadd.f32 %v9342_v1, %v2423_v6  ;;  %v8645_v18 = vld [vmem:[#allocation9 + $0x28] sm:$0xff]  ;;  %v8399_v6 = vld [vmem:[#allocation3 + $0x3bc] sm:$0xf] }
 0x205   : > { %v2598_v48 = vpop.f32.mrf.mxu2  ;;  %v2865_v42 = vpop.f32.mrf.mxu1  ;;  %545 = vst [vmem:[#allocation3 + $0x444] sm:$0xf] %v479_v31  ;;  %5494 = vmatpush.bf16.msra.mxu1 %v8645_v18 }
 0x206   : > { %v2599_v57 = vadd.f32 %v2598_v48, %v9335_v27  ;;  %2731 = vmatmul.bf16.gmra.mxu3 %v7029_v22  ;;  %v480_v27 = vpack.c.bf16 %v444_v13, %v444_v13  ;;  %v7024_v22 = vld [vmem:[#allocation3 + $0x3b0] sm:$0xf]  ;;  %575 = vst [vmem:[#allocation3 + $0x408] sm:$0xf] %v479_v31 }
 0x207   : > { %v7025_v48 = vor.u32 %v8402_v40, %v7024_v22 }
 0x208   : > { %v2688_v33 = vadd.f32 %v2687_v19, %v2599_v57  ;;  %2904 = vmatmul.bf16.gmra.mxu1 %v7001_v24  ;;  %v8488_v19 = vld [vmem:[#allocation7 + $0x200] sm:$0xff]  ;;  %546 = vst [vmem:[#allocation3 + $0x468] sm:$0xf] %v480_v27  ;;  %v647_v24 = vpack.c.bf16 %v377_v25, %v377_v25  ;;  %v7065_v25 = vor.u32 %v8407_v59, %v7062_v61 }
 0x209   : > { %v2781_v53 = vpop.f32.mrf.mxu0  ;;  %v2692_v55 = vpop.f32.mrf.mxu3  ;;  %3110 = vmatpush.bf16.msra.mxu0 %v8488_v19  ;;  %576 = vst [vmem:[#allocation3 + $0x42c] sm:$0xf] %v480_v27  ;;  %v8412_v27 = vld [vmem:[#allocation3 + $0x420] sm:$0xf0] }
 0x20a   : > { %v2777_v2 = vadd.f32 %v2776_v17, %v2688_v33  ;;  %v648_v17 = vpack.c.bf16 %v378_v11, %v378_v11  ;;  %713 = vst [vmem:[#allocation3 + $0x448] sm:$0xf] %v647_v24  ;;  %v780_v11 = vld [vmem:[#allocation2 + $0x211] sm:$0xff] }
 0x20b   : > { %743 = vst [vmem:[#allocation3 + $0x40c] sm:$0xf] %v647_v24 }
 0x20c   : > { %v9432_v46 = vadd.f32 %v2865_v42, %v2777_v2  ;;  %2820 = vmatmul.bf16.gmra.mxu0 %v7033_v36  ;;  %714 = vst [vmem:[#allocation3 + $0x46c] sm:$0xf] %v648_v17  ;;  %v779_v42 = vld [vmem:[#allocation2 + $0x209] sm:$0xff]  ;;  %v7037_v36 = vor.u32 %v8399_v6, %v7034_v26  ;;  %v7068_v2 = vld [vmem:[#allocation3 + $0x400] sm:$0xf] }
 0x20d   : > { %v2600_v58 = vpop.f32.mrf.mxu2  ;;  %744 = vst [vmem:[#allocation3 + $0x430] sm:$0xf] %v648_v17  ;;  %v815_v31 = vpack.c.bf16 %v779_v42, %v779_v42  ;;  %v8408_v26 = vld [vmem:[#allocation3 + $0x404] sm:$0xf] }
 0x20e   : > { %v2601_v47 = vadd.f32 %v2600_v58, %v2512_v54  ;;  %v7069_v54 = vor.u32 %v8412_v27, %v7068_v2 }
 0x20f   : > { %881 = vst [vmem:[#allocation3 + $0x44c] sm:$0xf] %v815_v31  ;;  %v7098_v18 = vld [vmem:[#allocation3 + $0x464] sm:$0xf0] }
 0x210   : > { %v2690_v50 = vadd.f32 %v2689_v45, %v2601_v47  ;;  %v816_v45 = vpack.c.bf16 %v780_v11, %v780_v11  ;;  %911 = vst [vmem:[#allocation3 + $0x410] sm:$0xf] %v815_v31  ;;  %v7060_v47 = vld [vmem:[#allocation3 + $0x3f8] sm:$0xf] }
 0x211   : > { %v2783_v57 = vpop.f32.mrf.mxu0  ;;  %v2694_v1 = vpop.f32.mrf.mxu3  ;;  %v7104_v31 = vld [vmem:[#allocation3 + $0x448] sm:$0xf] }
 0x212   : > { %2642 = vmatmul.bf16.gmra.mxu2 %v7025_v48  ;;  %v9435_v33 = vadd.f32 %v9424_v44, %v2690_v50  ;;  %882 = vst [vmem:[#allocation3 + $0x470] sm:$0xf] %v816_v45  ;;  %v2428_v44 = vadd.f32 %v9407_v14, %v9354_v10  ;;  %v8411_v48 = vld [vmem:[#allocation3 + $0x418] sm:$0xf0]  ;;  %v8416_v50 = vld [vmem:[#allocation3 + $0x444] sm:$0xf] }
 0x213   : > { %912 = vst [vmem:[#allocation3 + $0x434] sm:$0xf] %v816_v45  ;;  %v7061_v61 = vor.u32 %v8411_v48, %v7060_v47  ;;  %v8421_v45 = vld [vmem:[#allocation3 + $0x468] sm:$0xf0] }
 0x214   : > { %v2517_v17 = vadd.f32 %v9358_v16, %v2428_v44 }
 0x215   : > { %v2603_v13 = vpop.f32.mrf.mxu2 }
 0x216   : > { %v2604_v22 = vadd.f32 %v2603_v13, %v9349_v30  ;;  %2736 = vmatmul.bf16.gmra.mxu3 %v7065_v25  ;;  %v7070_v25 = vld [vmem:[#allocation3 + $0x424] sm:$0xf0]  ;;  %v2433_v13 = vadd.f32 %v9407_v14, %v9368_v7 }
 0x217   : > { %v7073_v11 = vor.u32 %v8408_v26, %v7070_v25 }
 0x218   : > { %v2693_v40 = vadd.f32 %v2692_v55, %v2604_v22  ;;  %2909 = vmatmul.bf16.gmra.mxu1 %v7037_v36 }
 0x219   : > { %v2786_v19 = vpop.f32.mrf.mxu0  ;;  %v2697_v58 = vpop.f32.mrf.mxu3 }
 0x21a   : > { %v9440_v24 = vadd.f32 %v2781_v53, %v2693_v40  ;;  %v7101_v53 = vor.u32 %v8416_v50, %v7098_v18  ;;  %v8420_v40 = vld [vmem:[#allocation3 + $0x460] sm:$0xf0]  ;;  %v8417_v50 = vld [vmem:[#allocation3 + $0x44c] sm:$0xf]  ;;  %v7106_v18 = vld [vmem:[#allocation3 + $0x46c] sm:$0xf0] }
 0x21b   : > { %v7109_v26 = vor.u32 %v8417_v50, %v7106_v18 }
 0x21c   : > { %2825 = vmatmul.bf16.gmra.mxu0 %v7069_v54  ;;  %v2522_v54 = vadd.f32 %v9373_v56, %v2433_v13  ;;  %v6580_v56 = vld [vmem:[#allocation3 + $0x20] sm:$0xf]  ;;  %v6572_v13 = vld [vmem:[#allocation3 + $0x18] sm:$0xf] }
 0x21d   : > { %v2605_v30 = vpop.f32.mrf.mxu2 }
 0x21e   : > { %v2606_v59 = vadd.f32 %v2605_v30, %v2517_v17  ;;  %v6574_v30 = vld [vmem:[#allocation3 + $0x3c] sm:$0xf0] }
 0x220   : > { %v2695_v10 = vadd.f32 %v2694_v1, %v2606_v59  ;;  %v7105_v1 = vor.u32 %v8421_v45, %v7104_v31 }
 0x221   : > { %v2788_v55 = vpop.f32.mrf.mxu0  ;;  %v2699_v6 = vpop.f32.mrf.mxu3 }
 0x222   : > { %2647 = vmatmul.bf16.gmra.mxu2 %v7061_v61  ;;  %v9443_v42 = vadd.f32 %v2783_v57, %v2695_v10  ;;  %v7096_v57 = vld [vmem:[#allocation3 + $0x440] sm:$0xf] }
 0x223   : > { %v7097_v17 = vor.u32 %v8420_v40, %v7096_v57  ;;  %v8644_v61 = vld [vmem:[#allocation9 + $0x20] sm:$0xff] }
 0x224   : > { %5495 = vmatpush.bf16.msra.mxu1 %v8644_v61  ;;  %v8292_v40 = vld [vmem:[#allocation3 + $0x64] sm:$0xf]  ;;  %v2443_v61 = vadd.f32 %v9407_v14, %v9288_v21 }
 0x225   : > { %v2608_v36 = vpop.f32.mrf.mxu2 }
 0x226   : > { %v2609_v16 = vadd.f32 %v2608_v36, %v9363_v51  ;;  %2741 = vmatmul.bf16.gmra.mxu3 %v7101_v53  ;;  %v8283_v51 = vld [vmem:[#allocation3 + $0x1c] sm:$0xf]  ;;  %v8288_v53 = vld [vmem:[#allocation3 + $0x40] sm:$0xf0] }
 0x228   : > { %v2698_v2 = vadd.f32 %v2697_v58, %v2609_v16  ;;  %2914 = vmatmul.bf16.gmra.mxu1 %v7073_v11 }
 0x229   : > { %v2791_v27 = vpop.f32.mrf.mxu0  ;;  %v2702_v22 = vpop.f32.mrf.mxu3 }
 0x22a   : > { %v9448_v44 = vadd.f32 %v2786_v19, %v2698_v2  ;;  %v6577_v19 = vor.u32 %v8283_v51, %v6574_v30  ;;  %v8287_v2 = vld [vmem:[#allocation3 + $0x38] sm:$0xf0]  ;;  %v6616_v30 = vld [vmem:[#allocation3 + $0x68] sm:$0xf] }
 0x22b   : > { %v6573_v57 = vor.u32 %v8287_v2, %v6572_v13  ;;  %v8643_v13 = vld [vmem:[#allocation9 + $0x18] sm:$0xff] }
 0x22c   : > { %2830 = vmatmul.bf16.gmra.mxu0 %v7105_v1  ;;  %5496 = vmatpush.bf16.msra.mxu1 %v8643_v13 }
 0x22d   : > { %v2610_v47 = vpop.f32.mrf.mxu2 }
 0x22e   : > { %v2611_v48 = vadd.f32 %v2610_v47, %v2522_v54  ;;  %v6610_v54 = vld [vmem:[#allocation3 + $0x84] sm:$0xf0] }
 0x230   : > { %v2700_v59 = vadd.f32 %v2699_v6, %v2611_v48  ;;  %v6581_v6 = vor.u32 %v8288_v53, %v6580_v56 }
 0x231   : > { %v2793_v7 = vpop.f32.mrf.mxu0  ;;  %v2704_v58 = vpop.f32.mrf.mxu3 }
 0x232   : > { %2652 = vmatmul.bf16.gmra.mxu2 %v7097_v17  ;;  %v9451_v10 = vadd.f32 %v2788_v55, %v2700_v59  ;;  %v6613_v17 = vor.u32 %v8292_v40, %v6610_v54  ;;  %v2448_v40 = vadd.f32 %v9407_v14, %v9302_v60 }
 0x235   : > { %v2613_v25 = vpop.f32.mrf.mxu2 }
 0x236   : > { %v2614_v11 = vadd.f32 %v2613_v25, %v9376_v63  ;;  %3022 = vmatmul.bf16.vlgmr.msra.gmra.mxu3 %v6577_v19  ;;  %v8296_v25 = vld [vmem:[#allocation3 + $0x80] sm:$0xf0] }
 0x238   : > { %v2703_v36 = vadd.f32 %v2702_v22, %v2614_v11  ;;  %2919 = vmatmul.bf16.gmra.mxu1 %v7109_v26  ;;  %v6608_v26 = vld [vmem:[#allocation3 + $0x60] sm:$0xf] }
 0x239   : > { %v2796_v31 = vpop.f32.mrf.mxu0  ;;  %v2707_v45 = vpop.f32.mrf.mxu3  ;;  %v6609_v11 = vor.u32 %v8296_v25, %v6608_v26 }
 0x23a   : > { %v9454_v16 = vadd.f32 %v2791_v27, %v2703_v36  ;;  %v8297_v27 = vld [vmem:[#allocation3 + $0x88] sm:$0xf0] }
 0x23b   : > { %v6617_v50 = vor.u32 %v8297_v27, %v6616_v30  ;;  %v8301_v36 = vld [vmem:[#allocation3 + $0xac] sm:$0xf]  ;;  %v6644_v30 = vld [vmem:[#allocation3 + $0xa8] sm:$0xf]  ;;  %v2537_v27 = vadd.f32 %v9304_v62, %v2448_v40  ;;  %v2453_v62 = vadd.f32 %v9407_v14, %v9316_v32  ;;  %v8319_v40 = vld [vmem:[#allocation3 + $0x13c] sm:$0xf] }
 0x23c   : > { %3111 = vmatmul.bf16.vlgmr.msra.gmra.mxu0 %v6581_v6 }
 0x23d   : > { %v2615_v55 = vpop.f32.mrf.mxu2 }
 0x23e   : > { %v2616_v1 = vadd.f32 %v2615_v55, %v9382_v34 }
 0x240   : > { %v2705_v47 = vadd.f32 %v2704_v58, %v2616_v1  ;;  %v6652_v1 = vld [vmem:[#allocation3 + $0xb0] sm:$0xf] }
 0x241   : > { %v2798_v48 = vpop.f32.mrf.mxu0  ;;  %v2709_v63 = vpop.f32.mrf.mxu3 }
 0x242   : > { %2933 = vmatmul.bf16.vlgmr.msra.gmra.mxu2 %v6573_v57  ;;  %v9457_v22 = vadd.f32 %v2793_v7, %v2705_v47  ;;  %v2532_v7 = vadd.f32 %v9290_v23, %v2443_v61  ;;  %v8306_v57 = vld [vmem:[#allocation3 + $0xd0] sm:$0xf0] }
 0x243   : > { %v6653_v47 = vor.u32 %v8306_v57, %v6652_v1 }
 0x245   : > { %v2618_v51 = vpop.f32.mrf.mxu2 }
 0x246   : > { %v2619_v59 = vadd.f32 %v2618_v51, %v9280_v12  ;;  %3027 = vmatmul.bf16.gmra.mxu3 %v6613_v17  ;;  %v6646_v12 = vld [vmem:[#allocation3 + $0xcc] sm:$0xf0] }
 0x247   : > { %v6649_v55 = vor.u32 %v8301_v36, %v6646_v12 }
 0x248   : > { %v2708_v34 = vadd.f32 %v2707_v45, %v2619_v59 }
 0x249   : > { %v2801_v18 = vpop.f32.mrf.mxu0  ;;  %v2712_v19 = vpop.f32.mrf.mxu3 }
 0x24a   : > { %v9462_v58 = vadd.f32 %v2796_v31, %v2708_v34 }
 0x24c   : > { %3116 = vmatmul.bf16.gmra.mxu0 %v6617_v50  ;;  %v8310_v50 = vld [vmem:[#allocation3 + $0xf4] sm:$0xf] }
 0x24d   : > { %v2620_v56 = vpop.f32.mrf.mxu2 }
 0x24e   : > { %v2621_v53 = vadd.f32 %v2620_v56, %v2532_v7 }
 0x250   : > { %v2710_v6 = vadd.f32 %v2709_v63, %v2621_v53  ;;  %v8315_v53 = vld [vmem:[#allocation3 + $0x118] sm:$0xf0] }
 0x251   : > { %v2803_v2 = vpop.f32.mrf.mxu0  ;;  %v2714_v21 = vpop.f32.mrf.mxu3 }
 0x252   : > { %2938 = vmatmul.bf16.gmra.mxu2 %v6609_v11  ;;  %v9465_v45 = vadd.f32 %v2798_v48, %v2710_v6  ;;  %v8305_v48 = vld [vmem:[#allocation3 + $0xc8] sm:$0xf0] }
 0x253   : > { %v6645_v34 = vor.u32 %v8305_v48, %v6644_v30 }
 0x255   : > { %v2623_v31 = vpop.f32.mrf.mxu2 }
 0x256   : > { %v2624_v23 = vadd.f32 %v2623_v31, %v9298_v52  ;;  %3032 = vmatmul.bf16.gmra.mxu3 %v6649_v55  ;;  %v6682_v52 = vld [vmem:[#allocation3 + $0x114] sm:$0xf0]  ;;  %v6680_v55 = vld [vmem:[#allocation3 + $0xf0] sm:$0xf]  ;;  %v8314_v31 = vld [vmem:[#allocation3 + $0x110] sm:$0xf0] }
 0x258   : > { %v2713_v54 = vadd.f32 %v2712_v19, %v2624_v23  ;;  %v6685_v19 = vor.u32 %v8310_v50, %v6682_v52  ;;  %v6681_v23 = vor.u32 %v8314_v31, %v6680_v55  ;;  %v9491_v31 = vpop.f32.mrf.mxu1 }
 0x259   : > { %v2806_v63 = vpop.f32.mrf.mxu0  ;;  %v2717_v17 = vpop.f32.mrf.mxu3 }
 0x25a   : > { %v9470_v51 = vadd.f32 %v2801_v18, %v2713_v54  ;;  %v6688_v18 = vld [vmem:[#allocation3 + $0xf8] sm:$0xf] }
 0x25b   : > { %v6689_v12 = vor.u32 %v8315_v53, %v6688_v18 }
 0x25c   : > { %3121 = vmatmul.bf16.gmra.mxu0 %v6653_v47  ;;  %v8642_v47 = vld [vmem:[#allocation9 + $0x10] sm:$0xff] }
 0x25d   : > { %v2625_v59 = vpop.f32.mrf.mxu2  ;;  %5497 = vmatpush.bf16.msra.mxu1 %v8642_v47 }
 0x25e   : > { %v2626_v61 = vadd.f32 %v2625_v59, %v2537_v27  ;;  %v6724_v27 = vld [vmem:[#allocation3 + $0x140] sm:$0xf]  ;;  %v8324_v59 = vld [vmem:[#allocation3 + $0x160] sm:$0xf0] }
 0x25f   : > { %v6725_v50 = vor.u32 %v8324_v59, %v6724_v27 }
 0x260   : > { %v2715_v26 = vadd.f32 %v2714_v21, %v2626_v61  ;;  %v2458_v61 = vadd.f32 %v9407_v14, %v9330_v4  ;;  %v9499_v27 = vpop.f32.mrf.mxu1 }
 0x261   : > { %v2808_v25 = vpop.f32.mrf.mxu0  ;;  %v2719_v7 = vpop.f32.mrf.mxu3 }
 0x262   : > { %2943 = vmatmul.bf16.gmra.mxu2 %v6645_v34  ;;  %v9473_v60 = vadd.f32 %v2803_v2, %v2715_v26  ;;  %v2542_v2 = vadd.f32 %v9318_v35, %v2453_v62  ;;  %v8328_v62 = vld [vmem:[#allocation3 + $0x184] sm:$0xf] }
 0x265   : > { %v2628_v56 = vpop.f32.mrf.mxu2 }
 0x266   : > { %v2629_v11 = vadd.f32 %v2628_v56, %v9312_v28  ;;  %3037 = vmatmul.bf16.gmra.mxu3 %v6685_v19  ;;  %v6718_v28 = vld [vmem:[#allocation3 + $0x15c] sm:$0xf0]  ;;  %v6716_v19 = vld [vmem:[#allocation3 + $0x138] sm:$0xf]  ;;  %v2547_v56 = vadd.f32 %v9332_v8, %v2458_v61  ;;  %v6790_v61 = vld [vmem:[#allocation3 + $0x1ec] sm:$0xf0] }
 0x267   : > { %v6721_v48 = vor.u32 %v8319_v40, %v6718_v28 }
 0x268   : > { %v2718_v36 = vadd.f32 %v2717_v17, %v2629_v11 }
 0x269   : > { %v2811_v6 = vpop.f32.mrf.mxu0  ;;  %v2722_v13 = vpop.f32.mrf.mxu3 }
 0x26a   : > { %v9478_v21 = vadd.f32 %v2806_v63, %v2718_v36 }
 0x26c   : > { %3126 = vmatmul.bf16.gmra.mxu0 %v6689_v12 }
 0x26d   : > { %v2630_v1 = vpop.f32.mrf.mxu2 }
 0x26e   : > { %v2631_v57 = vadd.f32 %v2630_v1, %v2542_v2  ;;  %v6760_v2 = vld [vmem:[#allocation3 + $0x188] sm:$0xf]  ;;  %v8333_v1 = vld [vmem:[#allocation3 + $0x1a8] sm:$0xf0] }
 0x26f   : > { %v6761_v40 = vor.u32 %v8333_v1, %v6760_v2  ;;  %v8341_v2 = vld [vmem:[#allocation3 + $0x1e8] sm:$0xf0]  ;;  %v10753_v1 = vld [vmem:[#allocation14_spill] sm:$0xff] }
 0x270   : > { %v2720_v54 = vadd.f32 %v2719_v7, %v2631_v57  ;;  %v2463_v57 = vadd.f32 %v9407_v14, %v9344_v5  ;;  %v8641_v5 = vld [vmem:[#allocation9 + $0x8] sm:$0xff] }
 0x271   : > { %v2813_v30 = vpop.f32.mrf.mxu0  ;;  %v2724_v32 = vpop.f32.mrf.mxu3  ;;  %5498 = vmatpush.bf16.msra.mxu1 %v8641_v5 }
 0x272   : > { %2948 = vmatmul.bf16.gmra.mxu2 %v6681_v23  ;;  %v9481_v17 = vadd.f32 %v2808_v25, %v2720_v54  ;;  %v8323_v25 = vld [vmem:[#allocation3 + $0x158] sm:$0xf0] }
 0x273   : > { %v6717_v11 = vor.u32 %v8323_v25, %v6716_v19 }
 0x275   : > { %v2633_v63 = vpop.f32.mrf.mxu2 }
 0x276   : > { %v2634_v35 = vadd.f32 %v2633_v63, %v9326_v0  ;;  %3042 = vmatmul.bf16.gmra.mxu3 %v6721_v48  ;;  %v6754_v0 = vld [vmem:[#allocation3 + $0x1a4] sm:$0xf0]  ;;  %v2552_v48 = vadd.f32 %v9346_v15, %v2463_v57  ;;  %v8342_v15 = vld [vmem:[#allocation3 + $0x1f0] sm:$0xf0] }
 0x278   : > { %v2723_v34 = vadd.f32 %v2722_v13, %v2634_v35  ;;  %v6757_v13 = vor.u32 %v8328_v62, %v6754_v0  ;;  %v8337_v35 = vld [vmem:[#allocation3 + $0x1cc] sm:$0xf]  ;;  %v9506_v62 = vpop.f32.mrf.mxu1 }
 0x279   : > { %v2816_v52 = vpop.f32.mrf.mxu0  ;;  %v2727_v26 = vpop.f32.mrf.mxu3 }
 0x27a   : > { %v9486_v7 = vadd.f32 %v2811_v6, %v2723_v34 }
 0x27c   : > { %3131 = vmatmul.bf16.gmra.mxu0 %v6725_v50 }
 0x27d   : > { %v2635_v18 = vpop.f32.mrf.mxu2 }
 0x27e   : > { %v2636_v53 = vadd.f32 %v2635_v18, %v2547_v56  ;;  %v6796_v56 = vld [vmem:[#allocation3 + $0x1d0] sm:$0xf] }
 0x280   : > { %v2725_v36 = vadd.f32 %v2724_v32, %v2636_v53  ;;  %v8332_v32 = vld [vmem:[#allocation3 + $0x1a0] sm:$0xf0]  ;;  %v10752_v53 = vld [vmem:[#allocation15_spill] sm:$0xff] }
 0x281   : > { %v2818_v12 = vpop.f32.mrf.mxu0  ;;  %v2729_v55 = vpop.f32.mrf.mxu3 }
 0x282   : > { %2953 = vmatmul.bf16.gmra.mxu2 %v6717_v11  ;;  %v9489_v4 = vadd.f32 %v2813_v30, %v2725_v36  ;;  %v6752_v30 = vld [vmem:[#allocation3 + $0x180] sm:$0xf]  ;;  %v2468_v11 = vadd.f32 %v9407_v14, %v10752_v53  ;;  %v6797_v36 = vor.u32 %v8342_v15, %v6796_v56 }
 0x285   : > { %v2638_v6 = vpop.f32.mrf.mxu2 }
 0x286   : > { %v2639_v8 = vadd.f32 %v2638_v6, %v9338_v43  ;;  %3047 = vmatmul.bf16.gmra.mxu3 %v6757_v13  ;;  %v6753_v43 = vor.u32 %v8332_v32, %v6752_v30  ;;  %v6826_v30 = vld [vmem:[#allocation3 + $0x234] sm:$0xf0] }
 0x288   : > { %v2728_v23 = vadd.f32 %v2727_v26, %v2639_v8  ;;  %v2557_v8 = vadd.f32 %v10753_v1, %v2468_v11  ;;  %v10755_v11 = vld [vmem:[#allocation17_spill] sm:$0xff] }
 0x289   : > { %v2821_v28 = vpop.f32.mrf.mxu0  ;;  %v2732_v54 = vpop.f32.mrf.mxu3 }
 0x28a   : > { %v9496_v47 = vadd.f32 %v2816_v52, %v2728_v23  ;;  %v6793_v52 = vor.u32 %v8337_v35, %v6790_v61  ;;  %v8351_v35 = vld [vmem:[#allocation3 + $0x238] sm:$0xf0]  ;;  %v10754_v61 = vld [vmem:[#allocation16_spill] sm:$0xff] }
 0x28c   : > { %3136 = vmatmul.bf16.gmra.mxu0 %v6761_v40  ;;  %v8346_v40 = vld [vmem:[#allocation3 + $0x214] sm:$0xf] }
 0x28d   : > { %v2640_v63 = vpop.f32.mrf.mxu2 }
 0x28e   : > { %v2641_v59 = vadd.f32 %v2640_v63, %v2552_v48  ;;  %v9511_v63 = vpop.f32.mrf.mxu1 }
 0x290   : > { %v2730_v34 = vadd.f32 %v2729_v55, %v2641_v59 }
 0x291   : > { %v2823_v50 = vpop.f32.mrf.mxu0  ;;  %v2734_v26 = vpop.f32.mrf.mxu3 }
 0x292   : > { %2958 = vmatmul.bf16.gmra.mxu2 %v6753_v43  ;;  %v9501_v19 = vadd.f32 %v2818_v12, %v2730_v34  ;;  %v6788_v12 = vld [vmem:[#allocation3 + $0x1c8] sm:$0xf]  ;;  %v6832_v43 = vld [vmem:[#allocation3 + $0x218] sm:$0xf] }
 0x295   : > { %v2643_v25 = vpop.f32.mrf.mxu2 }
 0x296   : > { %v2644_v18 = vadd.f32 %v2643_v25, %v9352_v38  ;;  %3052 = vmatmul.bf16.gmra.mxu3 %v6793_v52  ;;  %v6789_v38 = vor.u32 %v8341_v2, %v6788_v12  ;;  %v6833_v52 = vor.u32 %v8351_v35, %v6832_v43  ;;  %v9518_v53 = vpop.f32.mrf.mxu1  ;;  %v8355_v12 = vld [vmem:[#allocation3 + $0x25c] sm:$0xf]  ;;  %v6862_v2 = vld [vmem:[#allocation3 + $0x27c] sm:$0xf0] }
 0x298   : > { %v2733_v0 = vadd.f32 %v2732_v54, %v2644_v18  ;;  %v8350_v18 = vld [vmem:[#allocation3 + $0x230] sm:$0xf0] }
 0x299   : > { %v2826_v55 = vpop.f32.mrf.mxu0  ;;  %v2737_v13 = vpop.f32.mrf.mxu3 }
 0x29a   : > { %v9508_v6 = vadd.f32 %v2821_v28, %v2733_v0  ;;  %v6829_v28 = vor.u32 %v8346_v40, %v6826_v30  ;;  %v8360_v40 = vld [vmem:[#allocation3 + $0x280] sm:$0xf0] }
 0x29c   : > { %3141 = vmatmul.bf16.gmra.mxu0 %v6797_v36 }
 0x29d   : > { %v2645_v57 = vpop.f32.mrf.mxu2 }
 0x29e   : > { %v2646_v23 = vadd.f32 %v2645_v57, %v2557_v8  ;;  %v9523_v30 = vpop.f32.mrf.mxu1 }
 0x2a0   : > { %v2735_v32 = vadd.f32 %v2734_v26, %v2646_v23  ;;  %v6824_v26 = vld [vmem:[#allocation3 + $0x210] sm:$0xf]  ;;  %v6865_v23 = vor.u32 %v8355_v12, %v6862_v2 }
 0x2a1   : > { %v2828_v14 = vpop.f32.mrf.mxu0  ;;  %v2739_v48 = vpop.f32.mrf.mxu3  ;;  %v6825_v36 = vor.u32 %v8350_v18, %v6824_v26 }
 0x2a2   : > { %2963 = vmatmul.bf16.gmra.mxu2 %v6789_v38  ;;  %v9513_v54 = vadd.f32 %v2823_v50, %v2735_v32  ;;  %v6868_v38 = vld [vmem:[#allocation3 + $0x260] sm:$0xf] }
 0x2a3   : > { %v10757_v32 = vld [vmem:[#allocation18_spill] sm:$0xff]  ;;  %v6869_v43 = vor.u32 %v8360_v40, %v6868_v38  ;;  %v6904_v40 = vld [vmem:[#allocation3 + $0x2a8] sm:$0xf] }
 0x2a5   : > { %v2648_v59 = vpop.f32.mrf.mxu2 }
 0x2a6   : > { %v2649_v34 = vadd.f32 %v2648_v59, %v10754_v61  ;;  %3057 = vmatmul.bf16.gmra.mxu3 %v6829_v28 }
 0x2a8   : > { %v2738_v5 = vadd.f32 %v2737_v13, %v2649_v34 }
 0x2a9   : > { %v2831_v25 = vpop.f32.mrf.mxu0  ;;  %v2742_v56 = vpop.f32.mrf.mxu3 }
 0x2aa   : > { %v9516_v15 = vadd.f32 %v2826_v55, %v2738_v5  ;;  %v8359_v5 = vld [vmem:[#allocation3 + $0x278] sm:$0xf0] }
 0x2ac   : > { %3146 = vmatmul.bf16.gmra.mxu0 %v6833_v52  ;;  %v10759_v52 = vld [vmem:[#allocation19_spill] sm:$0xff] }
 0x2ad   : > { %v2650_v50 = vpop.f32.mrf.mxu2 }
 0x2ae   : > { %v2651_v0 = vadd.f32 %v2650_v50, %v10755_v11  ;;  %v8364_v50 = vld [vmem:[#allocation3 + $0x2a4] sm:$0xf]  ;;  %v6898_v11 = vld [vmem:[#allocation3 + $0x2c4] sm:$0xf0] }
 0x2b0   : > { %v2740_v1 = vadd.f32 %v2739_v48, %v2651_v0  ;;  %v6860_v48 = vld [vmem:[#allocation3 + $0x258] sm:$0xf]  ;;  %v9529_v0 = vpop.f32.mrf.mxu1 }
 0x2b1   : > { %v2833_v8 = vpop.f32.mrf.mxu0  ;;  %v2744_v57 = vpop.f32.mrf.mxu3  ;;  %v6861_v18 = vor.u32 %v8359_v5, %v6860_v48 }
 0x2b2   : > { %2968 = vmatmul.bf16.gmra.mxu2 %v6825_v36  ;;  %v9521_v13 = vadd.f32 %v2828_v14, %v2740_v1  ;;  %v8640_v1 = vld [vmem:[#allocation9] sm:$0xff] }
 0x2b3   : > { %5499 = vmatpush.bf16.msra.mxu1 %v8640_v1 }
 0x2b4   : > { %10756 = vst [vmem:[#allocation15_spill] sm:$0xff] %v9521_v13 }
 0x2b5   : > { %v2653_v55 = vpop.f32.mrf.mxu2 }
 0x2b6   : > { %v2654_v28 = vadd.f32 %v2653_v55, %v10757_v32  ;;  %3062 = vmatmul.bf16.gmra.mxu3 %v6865_v23  ;;  %v7412_v23 = vld [vmem:[#allocation3] sm:$0xf]  ;;  %v8500_v55 = vld [vmem:[#allocation3 + $0x20] sm:$0xf0]  ;;  %v8369_v32 = vld [vmem:[#allocation3 + $0x2c8] sm:$0xf0] }
 0x2b8   : > { %v2743_v59 = vadd.f32 %v2742_v56, %v2654_v28  ;;  %v7413_v28 = vor.u32 %v8500_v55, %v7412_v23  ;;  %v8373_v23 = vld [vmem:[#allocation3 + $0x2ec] sm:$0xf] }
 0x2b9   : > { %v3112_v35 = vpop.f32.mrf.mxu0  ;;  %v3023_v61 = vpop.f32.mrf.mxu3 }
 0x2ba   : > { %v9526_v34 = vadd.f32 %v2831_v25, %v2743_v59  ;;  %v6901_v25 = vor.u32 %v8364_v50, %v6898_v11  ;;  %5500 = vmatmul.bf16.vlgmr.msra.gmra.mxu1 %v7413_v28 }
 0x2bc   : > { %10758 = vst [vmem:[#allocation14_spill] sm:$0xff] %v9526_v34  ;;  %3151 = vmatmul.bf16.gmra.mxu0 %v6869_v43 }
 0x2bd   : > { %v2655_v14 = vpop.f32.mrf.mxu2 }
 0x2be   : > { %v2656_v26 = vadd.f32 %v2655_v14, %v10759_v52  ;;  %v9534_v14 = vpop.f32.mrf.mxu1  ;;  %v6896_v52 = vld [vmem:[#allocation3 + $0x2a0] sm:$0xf] }
 0x2c0   : > { %v2745_v36 = vadd.f32 %v2744_v57, %v2656_v26  ;;  %v6905_v57 = vor.u32 %v8369_v32, %v6904_v40  ;;  %v8368_v26 = vld [vmem:[#allocation3 + $0x2c0] sm:$0xf0] }
 0x2c1   : > { %v3114_v12 = vpop.f32.mrf.mxu0  ;;  %v3025_v2 = vpop.f32.mrf.mxu3  ;;  %v6897_v1 = vor.u32 %v8368_v26, %v6896_v52 }
 0x2c2   : > { %2973 = vmatmul.bf16.gmra.mxu2 %v6861_v18  ;;  %v9531_v56 = vadd.f32 %v2833_v8, %v2745_v36 }
 0x2c4   : > { %10760 = vst [vmem:[#allocation16_spill] sm:$0xff] %v9531_v56  ;;  %v6940_v56 = vld [vmem:[#allocation3 + $0x2f0] sm:$0xf] }
 0x2c5   : > { %v2934_v38 = vpop.f32.mrf.mxu2 }
 0x2c6   : > { %v2935_v59 = vadd.f32 %v2934_v38, %v9391_v41  ;;  %3067 = vmatmul.bf16.gmra.mxu3 %v6901_v25  ;;  %v6934_v41 = vld [vmem:[#allocation3 + $0x30c] sm:$0xf0] }
 0x2c7   : > { %v6937_v28 = vor.u32 %v8373_v23, %v6934_v41 }
 0x2c8   : > { %v3024_v43 = vadd.f32 %v3023_v61, %v2935_v59 }
 0x2c9   : > { %v3117_v48 = vpop.f32.mrf.mxu0  ;;  %v3028_v5 = vpop.f32.mrf.mxu3 }
 0x2ca   : > { %v3113_v8 = vadd.f32 %v3112_v35, %v3024_v43  ;;  %v9537_v35 = vpop.f32.mrf.mxu1 }
 0x2cc   : > { %v3224_v18 = vmul.f32 0.044715, %v3113_v8  ;;  %3156 = vmatmul.bf16.gmra.mxu0 %v6905_v57 }
 0x2cd   : > { %v2936_v50 = vpop.f32.mrf.mxu2 }
 0x2ce   : > { %v3256_v11 = vmul.f32 %v3224_v18, %v3113_v8  ;;  %v2937_v36 = vadd.f32 %v2936_v50, %v9393_v39  ;;  %v8378_v18 = vld [vmem:[#allocation3 + $0x310] sm:$0xf0] }
 0x2cf   : > { %v6941_v50 = vor.u32 %v8378_v18, %v6940_v56 }
 0x2d0   : > { %v3288_v25 = vmul.f32 %v3256_v11, %v3113_v8  ;;  %v3026_v55 = vadd.f32 %v3025_v2, %v2937_v36  ;;  %v8655_v36 = vld [vmem:[#allocation9 + $0x78] sm:$0xff] }
 0x2d1   : > { %v3119_v61 = vpop.f32.mrf.mxu0  ;;  %v3030_v38 = vpop.f32.mrf.mxu3  ;;  %5581 = vmatpush.bf16.msrb.mxu2 %v8655_v36 }
 0x2d2   : > { %v3320_v40 = vadd.f32 %v3288_v25, %v3113_v8  ;;  %v3115_v32 = vadd.f32 %v3114_v12, %v3026_v55  ;;  %2978 = vmatmul.bf16.gmra.mxu2 %v6897_v1  ;;  %v8663_v12 = vld [vmem:[#allocation9 + $0xb8] sm:$0xff]  ;;  %v6932_v25 = vld [vmem:[#allocation3 + $0x2e8] sm:$0xf]  ;;  %v8377_v55 = vld [vmem:[#allocation3 + $0x308] sm:$0xf0]  ;;  %v9543_v56 = vpop.f32.mrf.mxu1 }
 0x2d3   : > { %5670 = vmatpush.bf16.msrb.mxu3 %v8663_v12  ;;  %v6933_v18 = vor.u32 %v8377_v55, %v6932_v25 }
 0x2d4   : > { %v3352_v59 = vmul.f32 0.7978846, %v3320_v40  ;;  %v3225_v43 = vmul.f32 0.044715, %v3115_v32 }
 0x2d5   : > { %v2939_v57 = vpop.f32.mrf.mxu2 }
 0x2d6   : > { %8806 = vtanh.f32 %v3352_v59  ;;  %v3257_v39 = vmul.f32 %v3225_v43, %v3115_v32  ;;  %v2940_v52 = vadd.f32 %v2939_v57, %v9399_v37  ;;  %3072 = vmatmul.bf16.gmra.mxu3 %v6937_v28  ;;  %v3192_v37 = vmul.f32 0.5, %v3113_v8  ;;  %v8671_v8 = vld [vmem:[#allocation9 + $0xf8] sm:$0xff] }
 0x2d7   : > { %5759 = vmatpush.bf16.msrb.mxu0 %v8671_v8 }
 0x2d8   : > { %v3289_v26 = vmul.f32 %v3257_v39, %v3115_v32  ;;  %v3029_v2 = vadd.f32 %v3028_v5, %v2940_v52  ;;  %v8382_v52 = vld [vmem:[#allocation3 + $0x334] sm:$0xf] }
 0x2d9   : > { %v3122_v11 = vpop.f32.mrf.mxu0  ;;  %v3033_v1 = vpop.f32.mrf.mxu3 }
 0x2da   : > { %v3321_v23 = vadd.f32 %v3289_v26, %v3115_v32  ;;  %v9540_v41 = vadd.f32 %v3117_v48, %v3029_v2  ;;  %v6970_v26 = vld [vmem:[#allocation3 + $0x354] sm:$0xf0] }
 0x2dc   : > { %v8807_v40 = vpop.eup %8806  ;;  %v3353_v59 = vmul.f32 0.7978846, %v3321_v23  ;;  %v3226_v43 = vmul.f32 0.044715, %v9540_v41  ;;  %3161 = vmatmul.bf16.gmra.mxu0 %v6941_v50 }
 0x2dd   : > { %v3416_v28 = vadd.f32 1.0, %v8807_v40  ;;  %v2941_v5 = vpop.f32.mrf.mxu2 }
 0x2de   : > { %8808 = vtanh.f32 %v3353_v59  ;;  %v3258_v57 = vmul.f32 %v3226_v43, %v9540_v41  ;;  %v2942_v48 = vadd.f32 %v2941_v5, %v9401_v49  ;;  %v6973_v59 = vor.u32 %v8382_v52, %v6970_v26  ;;  %v8387_v5 = vld [vmem:[#allocation3 + $0x358] sm:$0xf0] }
 0x2df   : > { %v3448_v39 = vmul.f32 %v3416_v28, %v3192_v37  ;;  %v3193_v43 = vmul.f32 0.5, %v3115_v32  ;;  %v8679_v32 = vld [vmem:[#allocation9 + $0x138] sm:$0xff] }
 0x2e0   : > { %v3290_v2 = vmul.f32 %v3258_v57, %v9540_v41  ;;  %v3031_v36 = vadd.f32 %v3030_v38, %v2942_v48  ;;  %v6976_v38 = vld [vmem:[#allocation3 + $0x338] sm:$0xf]  ;;  %5848 = vmatpush.bf16.msrb.mxu1 %v8679_v32 }
 0x2e1   : > { %3480 = vst [vmem:[#allocation2 + $0x28] sm:$0xff] %v3448_v39  ;;  %v9548_v12 = vpop.f32.mrf.mxu0  ;;  %v3035_v50 = vpop.f32.mrf.mxu3  ;;  %v6977_v26 = vor.u32 %v8387_v5, %v6976_v38  ;;  %v3194_v38 = vmul.f32 0.5, %v9540_v41 }
 0x2e2   : > { %v3322_v23 = vadd.f32 %v3290_v2, %v9540_v41  ;;  %v9551_v40 = vadd.f32 %v3119_v61, %v3031_v36  ;;  %2983 = vmatmul.bf16.gmra.mxu2 %v6933_v18  ;;  %v9556_v39 = vpop.f32.mrf.mxu1 }
 0x2e4   : > { %v8809_v49 = vpop.eup %8808  ;;  %v3354_v25 = vmul.f32 0.7978846, %v3322_v23  ;;  %v3227_v55 = vmul.f32 0.044715, %v9551_v40 }
 0x2e5   : > { %v3417_v37 = vadd.f32 1.0, %v8809_v49  ;;  %v2944_v28 = vpop.f32.mrf.mxu2 }
 0x2e6   : > { %8810 = vtanh.f32 %v3354_v25  ;;  %v3259_v57 = vmul.f32 %v3227_v55, %v9551_v40  ;;  %v2945_v48 = vadd.f32 %v2944_v28, %v9412_v3  ;;  %3077 = vmatmul.bf16.gmra.mxu3 %v6973_v59  ;;  %v6968_v59 = vld [vmem:[#allocation3 + $0x330] sm:$0xf] }
 0x2e7   : > { %v3449_v61 = vmul.f32 %v3417_v37, %v3193_v43  ;;  %v8386_v43 = vld [vmem:[#allocation3 + $0x350] sm:$0xf0] }
 0x2e8   : > { %v3291_v18 = vmul.f32 %v3259_v57, %v9551_v40  ;;  %v3034_v52 = vadd.f32 %v3033_v1, %v2945_v48  ;;  %v3514_v2 = vld [vmem:[#allocation2 + $0x27] sm:$0xff] }
 0x2e9   : > { %v3682_v36 = vld [vmem:[#allocation2 + $0x28] sm:$0xff]  ;;  %3481 = vst [vmem:[#allocation2 + $0x30] sm:$0xff] %v3449_v61  ;;  %v9559_v8 = vpop.f32.mrf.mxu0  ;;  %v3038_v23 = vpop.f32.mrf.mxu3  ;;  %v3550_v49 = vpack.c.bf16 %v3514_v2, %v3514_v2  ;;  %v6969_v61 = vor.u32 %v8386_v43, %v6968_v59  ;;  %v7006_v2 = vld [vmem:[#allocation3 + $0x39c] sm:$0xf0] }
 0x2ea   : > { %v3323_v25 = vadd.f32 %v3291_v18, %v9551_v40  ;;  %v9562_v55 = vadd.f32 %v3122_v11, %v3034_v52  ;;  %v3718_v3 = vpack.c.bf16 %v3682_v36, %v3682_v36  ;;  %v8391_v52 = vld [vmem:[#allocation3 + $0x37c] sm:$0xf] }
 0x2eb   : > { %3586 = vst [vmem:[#allocation3 + $0x48] sm:$0xf] %v3550_v49 }
 0x2ec   : > { %v8811_v37 = vpop.eup %8810  ;;  %v3355_v1 = vmul.f32 0.7978846, %v3323_v25  ;;  %v3228_v28 = vmul.f32 0.044715, %v9562_v55  ;;  %3166 = vmatmul.bf16.gmra.mxu0 %v6977_v26  ;;  %3616 = vst [vmem:[#allocation3 + $0xc] sm:$0xf] %v3550_v49 }
 0x2ed   : > { %v3418_v5 = vadd.f32 1.0, %v8811_v37  ;;  %v2946_v57 = vpop.f32.mrf.mxu2  ;;  %3754 = vst [vmem:[#allocation3 + $0x4c] sm:$0xf] %v3718_v3 }
 0x2ee   : > { %8812 = vtanh.f32 %v3355_v1  ;;  %v3260_v48 = vmul.f32 %v3228_v28, %v9562_v55  ;;  %v2947_v11 = vadd.f32 %v2946_v57, %v9414_v20  ;;  %3784 = vst [vmem:[#allocation3 + $0x10] sm:$0xf] %v3718_v3  ;;  %v9573_v28 = vpop.f32.mrf.mxu1  ;;  %v7009_v3 = vor.u32 %v8391_v52, %v7006_v2 }
 0x2ef   : > { %v3450_v18 = vmul.f32 %v3418_v5, %v3194_v38 }
 0x2f0   : > { %v3292_v36 = vmul.f32 %v3260_v48, %v9562_v55  ;;  %v3036_v32 = vadd.f32 %v3035_v50, %v2947_v11  ;;  %v3515_v26 = vld [vmem:[#allocation2 + $0x2f] sm:$0xff]  ;;  %v7012_v48 = vld [vmem:[#allocation3 + $0x380] sm:$0xf] }
 0x2f1   : > { %v3683_v25 = vld [vmem:[#allocation2 + $0x30] sm:$0xff]  ;;  %3482 = vst [vmem:[#allocation2 + $0x48] sm:$0xff] %v3450_v18  ;;  %v9569_v41 = vpop.f32.mrf.mxu0  ;;  %v9571_v49 = vpop.f32.mrf.mxu3  ;;  %v3551_v37 = vpack.c.bf16 %v3515_v26, %v3515_v26  ;;  %v3195_v18 = vmul.f32 0.5, %v9551_v40 }
 0x2f2   : > { %v3850_v1 = vld [vmem:[#allocation2 + $0x29] sm:$0xff]  ;;  %v3324_v20 = vadd.f32 %v3292_v36, %v9562_v55  ;;  %v9577_v59 = vadd.f32 %v9548_v12, %v3036_v32  ;;  %2988 = vmatmul.bf16.gmra.mxu2 %v6969_v61  ;;  %v3719_v43 = vpack.c.bf16 %v3683_v25, %v3683_v25  ;;  %v3851_v50 = vld [vmem:[#allocation2 + $0x31] sm:$0xff]  ;;  %v8396_v36 = vld [vmem:[#allocation3 + $0x3a0] sm:$0xf0] }
 0x2f3   : > { %3587 = vst [vmem:[#allocation3 + $0x6c] sm:$0xf] %v3551_v37  ;;  %v3886_v11 = vpack.c.bf16 %v3850_v1, %v3850_v1  ;;  %v3887_v52 = vpack.c.bf16 %v3851_v50, %v3851_v50  ;;  %v7013_v1 = vor.u32 %v8396_v36, %v7012_v48  ;;  %v7004_v50 = vld [vmem:[#allocation3 + $0x378] sm:$0xf]  ;;  %v8395_v48 = vld [vmem:[#allocation3 + $0x398] sm:$0xf0] }
 0x2f4   : > { %v8813_v38 = vpop.eup %8812  ;;  %v3356_v5 = vmul.f32 0.7978846, %v3324_v20  ;;  %v3229_v57 = vmul.f32 0.044715, %v9577_v59  ;;  %3617 = vst [vmem:[#allocation3 + $0x30] sm:$0xf] %v3551_v37 }
 0x2f5   : > { %v3419_v26 = vadd.f32 1.0, %v8813_v38  ;;  %v2949_v34 = vpop.f32.mrf.mxu2  ;;  %3755 = vst [vmem:[#allocation3 + $0x70] sm:$0xf] %v3719_v43  ;;  %v8654_v37 = vld [vmem:[#allocation9 + $0x70] sm:$0xff] }
 0x2f6   : > { %8814 = vtanh.f32 %v3356_v5  ;;  %v3261_v12 = vmul.f32 %v3229_v57, %v9577_v59  ;;  %v2950_v61 = vadd.f32 %v2949_v34, %v9420_v29  ;;  %3082 = vmatmul.bf16.gmra.mxu3 %v7009_v3  ;;  %3785 = vst [vmem:[#allocation3 + $0x34] sm:$0xf] %v3719_v43  ;;  %v8662_v38 = vld [vmem:[#allocation9 + $0xb0] sm:$0xff]  ;;  %v7448_v3 = vld [vmem:[#allocation3 + $0x48] sm:$0xf]  ;;  %5582 = vmatpush.bf16.msrb.mxu2 %v8654_v37 }
 0x2f7   : > { %v3451_v2 = vmul.f32 %v3419_v26, %v3195_v18  ;;  %3922 = vst [vmem:[#allocation3 + $0x50] sm:$0xf] %v3886_v11  ;;  %5671 = vmatpush.bf16.msrb.mxu3 %v8662_v38  ;;  %v9592_v26 = vpop.f32.mrf.mxu1  ;;  %v8400_v38 = vld [vmem:[#allocation3 + $0x3c4] sm:$0xf] }
 0x2f8   : > { %v3293_v32 = vmul.f32 %v3261_v12, %v9577_v59  ;;  %v3039_v25 = vadd.f32 %v3038_v23, %v2950_v61  ;;  %v3516_v20 = vld [vmem:[#allocation2 + $0x47] sm:$0xff]  ;;  %3923 = vst [vmem:[#allocation3 + $0x74] sm:$0xf] %v3887_v52  ;;  %v3196_v61 = vmul.f32 0.5, %v9562_v55 }
 0x2f9   : > { %3483 = vst [vmem:[#allocation2 + $0x50] sm:$0xff] %v3451_v2  ;;  %v9584_v40 = vpop.f32.mrf.mxu0  ;;  %v9586_v5 = vpop.f32.mrf.mxu3  ;;  %v3552_v57 = vpack.c.bf16 %v3516_v20, %v3516_v20  ;;  %v7005_v20 = vor.u32 %v8395_v48, %v7004_v50 }
 0x2fa   : > { %v3325_v29 = vadd.f32 %v3293_v32, %v9577_v59  ;;  %v9590_v34 = vadd.f32 %v9559_v8, %v3039_v25  ;;  %v8509_v43 = vld [vmem:[#allocation3 + $0x68] sm:$0xf0]  ;;  %3952 = vst [vmem:[#allocation3 + $0x14] sm:$0xf] %v3886_v11 }
 0x2fb   : > { %v7449_v23 = vor.u32 %v8509_v43, %v7448_v3  ;;  %3588 = vst [vmem:[#allocation3 + $0x90] sm:$0xf] %v3552_v57  ;;  %v7042_v3 = vld [vmem:[#allocation3 + $0x3e4] sm:$0xf0] }
 0x2fc   : > { %v8815_v18 = vpop.eup %8814  ;;  %v3357_v36 = vmul.f32 0.7978846, %v3325_v29  ;;  %v3230_v12 = vmul.f32 0.044715, %v9590_v34  ;;  %3171 = vmatmul.bf16.gmra.mxu0 %v7013_v1  ;;  %3618 = vst [vmem:[#allocation3 + $0x54] sm:$0xf] %v3552_v57  ;;  %v7045_v11 = vor.u32 %v8400_v38, %v7042_v3 }
 0x2fd   : > { %v3420_v8 = vadd.f32 1.0, %v8815_v18  ;;  %v2951_v2 = vpop.f32.mrf.mxu2  ;;  %5505 = vmatmul.bf16.gmra.mxu1 %v7449_v23  ;;  %3648 = vst [vmem:[#allocation3 + $0x18] sm:$0xf] %v3552_v57  ;;  %v3684_v43 = vld [vmem:[#allocation2 + $0x48] sm:$0xff]  ;;  %v8670_v18 = vld [vmem:[#allocation9 + $0xf0] sm:$0xff] }
 0x2fe   : > { %8816 = vtanh.f32 %v3357_v36  ;;  %v3262_v32 = vmul.f32 %v3230_v12, %v9590_v34  ;;  %v2952_v25 = vadd.f32 %v2951_v2, %v9426_v9  ;;  %3953 = vst [vmem:[#allocation3 + $0x38] sm:$0xf] %v3887_v52  ;;  %5760 = vmatpush.bf16.msrb.mxu0 %v8670_v18 }
 0x2ff   : > { %v3452_v37 = vmul.f32 %v3420_v8, %v3196_v61  ;;  %v7048_v8 = vld [vmem:[#allocation3 + $0x3c8] sm:$0xf] }
 0x300   : > { %v3294_v29 = vmul.f32 %v3262_v32, %v9590_v34  ;;  %v3041_v1 = vadd.f32 %v9571_v49, %v2952_v25  ;;  %v3517_v55 = vld [vmem:[#allocation2 + $0x4f] sm:$0xff]  ;;  %v9608_v49 = vpack.c.bf16 %v3684_v43, %v3684_v43  ;;  %v3197_v32 = vmul.f32 0.5, %v9577_v59 }
 0x301   : > { %3484 = vst [vmem:[#allocation2 + $0x68] sm:$0xff] %v3452_v37  ;;  %v9600_v23 = vpop.f32.mrf.mxu0  ;;  %v9602_v36 = vpop.f32.mrf.mxu3  ;;  %v3553_v9 = vpack.c.bf16 %v3517_v55, %v3517_v55  ;;  %v3685_v50 = vld [vmem:[#allocation2 + $0x50] sm:$0xff]  ;;  %v9621_v55 = vld [vmem:[#allocation3 + $0x3c0] sm:$0xf] }
 0x302   : > { %v3326_v57 = vadd.f32 %v3294_v29, %v9590_v34  ;;  %v9606_v48 = vadd.f32 %v9569_v41, %v3041_v1  ;;  %2993 = vmatmul.bf16.gmra.mxu2 %v7005_v20  ;;  %v9611_v2 = vpack.c.bf16 %v3685_v50, %v3685_v50  ;;  %v8405_v41 = vld [vmem:[#allocation3 + $0x3e8] sm:$0xf0]  ;;  %v9614_v29 = vpop.f32.mrf.mxu1  ;;  %3756 = vst [vmem:[#allocation3 + $0x94] sm:$0xf] %v9608_v49 }
 0x303   : > { %3589 = vst [vmem:[#allocation3 + $0xb4] sm:$0xf] %v3553_v9  ;;  %v7049_v43 = vor.u32 %v8405_v41, %v7048_v8  ;;  %v445_v50 = vld [vmem:[#allocation2 + $0x227] sm:$0xff] }
 0x304   : > { %v8817_v52 = vpop.eup %8816  ;;  %v3358_v12 = vmul.f32 0.7978846, %v3326_v57  ;;  %v3231_v61 = vmul.f32 0.044715, %v9606_v48  ;;  %3619 = vst [vmem:[#allocation3 + $0x78] sm:$0xf] %v3553_v9 }
 0x305   : > { %v3421_v25 = vadd.f32 1.0, %v8817_v52  ;;  %v2954_v37 = vpop.f32.mrf.mxu2  ;;  %3649 = vst [vmem:[#allocation3 + $0x3c] sm:$0xf] %v3553_v9  ;;  %v8678_v57 = vld [vmem:[#allocation9 + $0x130] sm:$0xff] }
 0x306   : > { %8818 = vtanh.f32 %v3358_v12  ;;  %v3263_v20 = vmul.f32 %v3231_v61, %v9606_v48  ;;  %v2955_v38 = vadd.f32 %v2954_v37, %v9432_v46  ;;  %3087 = vmatmul.bf16.gmra.mxu3 %v7045_v11  ;;  %3757 = vst [vmem:[#allocation3 + $0xb8] sm:$0xf] %v9611_v2  ;;  %v8404_v46 = vld [vmem:[#allocation3 + $0x3e0] sm:$0xf0]  ;;  %v446_v12 = vld [vmem:[#allocation2 + $0x22f] sm:$0xff]  ;;  %5849 = vmatpush.bf16.msrb.mxu1 %v8678_v57 }
 0x307   : > { %v3453_v3 = vmul.f32 %v3421_v25, %v3197_v32  ;;  %v7484_v32 = vld [vmem:[#allocation3 + $0x90] sm:$0xf]  ;;  %3786 = vst [vmem:[#allocation3 + $0x58] sm:$0xf] %v9608_v49  ;;  %v9633_v37 = vpack.c.bf16 %v445_v50, %v445_v50  ;;  %v7041_v57 = vor.u32 %v8404_v46, %v9621_v55  ;;  %v8661_v50 = vld [vmem:[#allocation9 + $0xa8] sm:$0xff] }
 0x308   : > { %v3295_v1 = vmul.f32 %v3263_v20, %v9606_v48  ;;  %v3044_v59 = vadd.f32 %v9586_v5, %v2955_v38  ;;  %v3518_v18 = vld [vmem:[#allocation2 + $0x67] sm:$0xff]  ;;  %v2868_v20 = vadd.f32 %v9491_v31, %v9435_v33  ;;  %5672 = vmatpush.bf16.msrb.mxu3 %v8661_v50  ;;  %3787 = vst [vmem:[#allocation3 + $0x7c] sm:$0xf] %v9611_v2 }
 0x309   : > { %3485 = vst [vmem:[#allocation2 + $0x70] sm:$0xff] %v3453_v3  ;;  %v9624_v52 = vpop.f32.mrf.mxu0  ;;  %v9626_v9 = vpop.f32.mrf.mxu3  ;;  %v3554_v11 = vpack.c.bf16 %v3518_v18, %v3518_v18 }
 0x30a   : > { %v3327_v61 = vadd.f32 %v3295_v1, %v9606_v48  ;;  %v9630_v5 = vadd.f32 %v9584_v40, %v3044_v59  ;;  %v8518_v8 = vld [vmem:[#allocation3 + $0xb0] sm:$0xf0]  ;;  %v8653_v1 = vld [vmem:[#allocation9 + $0x68] sm:$0xff]  ;;  %v9638_v40 = vpack.c.bf16 %v446_v12, %v446_v12  ;;  %v3198_v59 = vmul.f32 0.5, %v9590_v34  ;;  %v7078_v34 = vld [vmem:[#allocation3 + $0x42c] sm:$0xf0]  ;;  %v9646_v55 = vpop.f32.mrf.mxu1 }
 0x30b   : > { %v7485_v25 = vor.u32 %v8518_v8, %v7484_v32  ;;  %3590 = vst [vmem:[#allocation3 + $0xd8] sm:$0xf] %v3554_v11  ;;  %v8669_v32 = vld [vmem:[#allocation9 + $0xe8] sm:$0xff]  ;;  %5583 = vmatpush.bf16.msrb.mxu2 %v8653_v1  ;;  %v8668_v1 = vld [vmem:[#allocation9 + $0xe0] sm:$0xff] }
 0x30c   : > { %v8819_v41 = vpop.eup %8818  ;;  %v3359_v38 = vmul.f32 0.7978846, %v3327_v61  ;;  %v3232_v3 = vmul.f32 0.044715, %v9630_v5  ;;  %3176 = vmatmul.bf16.gmra.mxu0 %v7049_v43  ;;  %3620 = vst [vmem:[#allocation3 + $0x9c] sm:$0xf] %v3554_v11 }
 0x30d   : > { %v3422_v18 = vadd.f32 1.0, %v8819_v41  ;;  %v2956_v13 = vpop.f32.mrf.mxu2  ;;  %5510 = vmatmul.bf16.gmra.mxu1 %v7485_v25  ;;  %3650 = vst [vmem:[#allocation3 + $0x60] sm:$0xf] %v3554_v11  ;;  %v8871_v43 = vld [vmem:[#allocation2] sm:$0xff]  ;;  %v8409_v8 = vld [vmem:[#allocation3 + $0x40c] sm:$0xf]  ;;  %5761 = vmatpush.bf16.msrb.mxu0 %v8669_v32 }
 0x30e   : > { %8820 = vtanh.f32 %v3359_v38  ;;  %v3264_v33 = vmul.f32 %v3232_v3, %v9630_v5  ;;  %v2957_v31 = vadd.f32 %v2956_v13, %v2868_v20  ;;  %v9643_v61 = vpack.c.bf16 %v8871_v43, %v8871_v43  ;;  %577 = vst [vmem:[#allocation3 + $0x450] sm:$0xf] %v9633_v37  ;;  %v8652_v13 = vld [vmem:[#allocation9 + $0x60] sm:$0xff]  ;;  %v8414_v32 = vld [vmem:[#allocation3 + $0x430] sm:$0xf0] }
 0x30f   : > { %v3454_v12 = vmul.f32 %v3422_v18, %v3198_v59  ;;  %v8660_v11 = vld [vmem:[#allocation9 + $0xa0] sm:$0xff]  ;;  %578 = vst [vmem:[#allocation3 + $0x474] sm:$0xf] %v9638_v40  ;;  %v7081_v50 = vor.u32 %v8409_v8, %v7078_v34  ;;  %5584 = vmatpush.bf16.msrb.mxu2 %v8652_v13  ;;  %v8659_v34 = vld [vmem:[#allocation9 + $0x98] sm:$0xff] }
 0x310   : > { %v3296_v46 = vmul.f32 %v3264_v33, %v9630_v5  ;;  %v3046_v25 = vadd.f32 %v9602_v36, %v2957_v31  ;;  %v3519_v41 = vld [vmem:[#allocation2 + $0x6f] sm:$0xff]  ;;  %745 = vst [vmem:[#allocation3 + $0x454] sm:$0xf] %v9643_v61  ;;  %5673 = vmatpush.bf16.msrb.mxu3 %v8660_v11  ;;  %v2871_v31 = vadd.f32 %v9499_v27, %v9440_v24 }
 0x311   : > { %3486 = vst [vmem:[#allocation2 + $0x88] sm:$0xff] %v3454_v12  ;;  %v9651_v20 = vpop.f32.mrf.mxu0  ;;  %v9653_v38 = vpop.f32.mrf.mxu3  ;;  %v3555_v3 = vpack.c.bf16 %v3519_v41, %v3519_v41  ;;  %v7084_v36 = vld [vmem:[#allocation3 + $0x410] sm:$0xf]  ;;  %5762 = vmatpush.bf16.msrb.mxu0 %v8668_v1 }
 0x312   : > { %v3328_v59 = vadd.f32 %v3296_v46, %v9630_v5  ;;  %v9657_v18 = vadd.f32 %v9600_v23, %v3046_v25  ;;  %2998 = vmatmul.bf16.gmra.mxu2 %v7041_v57  ;;  %v8651_v46 = vld [vmem:[#allocation9 + $0x58] sm:$0xff]  ;;  %v3199_v23 = vmul.f32 0.5, %v9606_v48  ;;  %746 = vst [vmem:[#allocation3 + $0x478] sm:$0xf] %v9643_v61 }
 0x313   : > { %3591 = vst [vmem:[#allocation3 + $0xfc] sm:$0xf] %v3555_v3  ;;  %v8667_v25 = vld [vmem:[#allocation9 + $0xd8] sm:$0xff]  ;;  %5585 = vmatpush.bf16.msrb.mxu2 %v8651_v46  ;;  %v8666_v46 = vld [vmem:[#allocation9 + $0xd0] sm:$0xff] }
 0x314   : > { %v8821_v33 = vpop.eup %8820  ;;  %v3360_v43 = vmul.f32 0.7978846, %v3328_v59  ;;  %v3233_v12 = vmul.f32 0.044715, %v9657_v18  ;;  %3621 = vst [vmem:[#allocation3 + $0xc0] sm:$0xf] %v3555_v3  ;;  %5674 = vmatpush.bf16.msrb.mxu3 %v8659_v34  ;;  %v7085_v59 = vor.u32 %v8414_v32, %v7084_v36 }
 0x315   : > { %v3423_v57 = vadd.f32 1.0, %v8821_v33  ;;  %v2959_v8 = vpop.f32.mrf.mxu2  ;;  %3651 = vst [vmem:[#allocation3 + $0x84] sm:$0xf] %v3555_v3  ;;  %v9665_v11 = vld [vmem:[#allocation3 + $0x450] sm:$0xf]  ;;  %5763 = vmatpush.bf16.msrb.mxu0 %v8667_v25 }
 0x316   : > { %8822 = vtanh.f32 %v3360_v43  ;;  %v3265_v41 = vmul.f32 %v3233_v12, %v9657_v18  ;;  %v2960_v13 = vadd.f32 %v2959_v8, %v2871_v31  ;;  %3092 = vmatmul.bf16.gmra.mxu3 %v7081_v50  ;;  %v9667_v27 = vld [vmem:[#allocation3 + $0x470] sm:$0xf0]  ;;  %3678 = vst [vmem:[#allocation3 + $0x450] sm:$0xf] %v9633_v37  ;;  %v781_v37 = vld [vmem:[#allocation2 + $0x229] sm:$0xff] }
 0x317   : > { %v3455_v24 = vmul.f32 %v3423_v57, %v3199_v23  ;;  %3679 = vst [vmem:[#allocation3 + $0x474] sm:$0xf] %v9638_v40  ;;  %v8650_v3 = vld [vmem:[#allocation9 + $0x50] sm:$0xff]  ;;  %v9677_v23 = vpop.f32.mrf.mxu1  ;;  %v7520_v36 = vld [vmem:[#allocation3 + $0xd8] sm:$0xf] }
 0x318   : > { %v3297_v48 = vmul.f32 %v3265_v41, %v9657_v18  ;;  %v3049_v1 = vadd.f32 %v9626_v9, %v2960_v13  ;;  %v3520_v33 = vld [vmem:[#allocation2 + $0x87] sm:$0xff]  ;;  %v8658_v50 = vld [vmem:[#allocation9 + $0x90] sm:$0xff]  ;;  %5586 = vmatpush.bf16.msrb.mxu2 %v8650_v3  ;;  %v2873_v41 = vadd.f32 %v9506_v62, %v9443_v42  ;;  %3816 = vst [vmem:[#allocation3 + $0x1c] sm:$0xf] %v9608_v49 }
 0x319   : > { %3487 = vst [vmem:[#allocation2 + $0x90] sm:$0xff] %v3455_v24  ;;  %v9673_v31 = vpop.f32.mrf.mxu0  ;;  %v9675_v43 = vpop.f32.mrf.mxu3  ;;  %v3556_v12 = vpack.c.bf16 %v3520_v33, %v3520_v33  ;;  %v7076_v8 = vld [vmem:[#allocation3 + $0x408] sm:$0xf]  ;;  %v8413_v34 = vld [vmem:[#allocation3 + $0x428] sm:$0xf0]  ;;  %5675 = vmatpush.bf16.msrb.mxu3 %v8658_v50  ;;  %5764 = vmatpush.bf16.msrb.mxu0 %v8666_v46 }
 0x31a   : > { %v3329_v57 = vadd.f32 %v3297_v48, %v9657_v18  ;;  %v9681_v9 = vadd.f32 %v9624_v52, %v3049_v1  ;;  %v8527_v40 = vld [vmem:[#allocation3 + $0xf8] sm:$0xf0]  ;;  %v9687_v52 = vpack.c.bf16 %v781_v37, %v781_v37  ;;  %v8649_v48 = vld [vmem:[#allocation9 + $0x48] sm:$0xff]  ;;  %v3200_v1 = vmul.f32 0.5, %v9630_v5  ;;  %v782_v37 = vld [vmem:[#allocation2 + $0x231] sm:$0xff] }
 0x31b   : > { %v7521_v32 = vor.u32 %v8527_v40, %v7520_v36  ;;  %3592 = vst [vmem:[#allocation3 + $0x120] sm:$0xf] %v3556_v12  ;;  %v8657_v3 = vld [vmem:[#allocation9 + $0x88] sm:$0xff]  ;;  %v7077_v62 = vor.u32 %v8413_v34, %v7076_v8  ;;  %v7114_v34 = vld [vmem:[#allocation3 + $0x474] sm:$0xf0] }
 0x31c   : > { %v8823_v25 = vpop.eup %8822  ;;  %v3361_v13 = vmul.f32 0.7978846, %v3329_v57  ;;  %v3234_v24 = vmul.f32 0.044715, %v9681_v9  ;;  %3181 = vmatmul.bf16.gmra.mxu0 %v7085_v59  ;;  %3622 = vst [vmem:[#allocation3 + $0xe4] sm:$0xf] %v3556_v12  ;;  %5587 = vmatpush.bf16.msrb.mxu2 %v8649_v48 }
 0x31d   : > { %v3424_v33 = vadd.f32 1.0, %v8823_v25  ;;  %v2961_v36 = vpop.f32.mrf.mxu2  ;;  %5515 = vmatmul.bf16.gmra.mxu1 %v7521_v32  ;;  %v8665_v50 = vld [vmem:[#allocation9 + $0xc8] sm:$0xff]  ;;  %3652 = vst [vmem:[#allocation3 + $0xa8] sm:$0xf] %v3556_v12  ;;  %v8418_v57 = vld [vmem:[#allocation3 + $0x454] sm:$0xf]  ;;  %5676 = vmatpush.bf16.msrb.mxu3 %v8657_v3  ;;  %v2876_v3 = vadd.f32 %v9511_v63, %v9448_v44 }
 0x31e   : > { %8824 = vtanh.f32 %v3361_v13  ;;  %v3266_v40 = vmul.f32 %v3234_v24, %v9681_v9  ;;  %v2962_v42 = vadd.f32 %v2961_v36, %v2873_v41  ;;  %3846 = vst [vmem:[#allocation3 + $0x454] sm:$0xf] %v9643_v61  ;;  %v8648_v25 = vld [vmem:[#allocation9 + $0x40] sm:$0xff]  ;;  %5765 = vmatpush.bf16.msrb.mxu0 %v8665_v50 }
 0x31f   : > { %v3456_v59 = vmul.f32 %v3424_v33, %v3200_v1  ;;  %913 = vst [vmem:[#allocation3 + $0x458] sm:$0xf] %v9687_v52  ;;  %v8656_v13 = vld [vmem:[#allocation9 + $0x80] sm:$0xff]  ;;  %v818_v33 = vpack.c.bf16 %v782_v37, %v782_v37 }
 0x320   : > { %v3298_v5 = vmul.f32 %v3266_v40, %v9681_v9  ;;  %v3051_v32 = vadd.f32 %v9653_v38, %v2962_v42  ;;  %v3521_v46 = vld [vmem:[#allocation2 + $0x8f] sm:$0xff]  ;;  %v8664_v24 = vld [vmem:[#allocation9 + $0xc0] sm:$0xff]  ;;  %v7117_v38 = vor.u32 %v8418_v57, %v7114_v34  ;;  %3847 = vst [vmem:[#allocation3 + $0x478] sm:$0xf] %v9643_v61  ;;  %5588 = vmatpush.bf16.msrb.mxu2 %v8648_v25  ;;  %v9706_v40 = vpop.f32.mrf.mxu1 }
 0x321   : > { %3488 = vst [vmem:[#allocation2 + $0xa8] sm:$0xff] %v3456_v59  ;;  %v9695_v41 = vpop.f32.mrf.mxu0  ;;  %v9697_v12 = vpop.f32.mrf.mxu3  ;;  %v3557_v8 = vpack.c.bf16 %v3521_v46, %v3521_v46  ;;  %5677 = vmatpush.bf16.msrb.mxu3 %v8656_v13 }
 0x322   : > { %v3330_v48 = vadd.f32 %v3298_v5, %v9681_v9  ;;  %v9701_v1 = vadd.f32 %v9651_v20, %v3051_v32  ;;  %3003 = vmatmul.bf16.gmra.mxu2 %v7077_v62  ;;  %v3201_v20 = vmul.f32 0.5, %v9657_v18  ;;  %5766 = vmatpush.bf16.msrb.mxu0 %v8664_v24  ;;  %914 = vst [vmem:[#allocation3 + $0x47c] sm:$0xf] %v818_v33  ;;  %v8677_v32 = vld [vmem:[#allocation9 + $0x128] sm:$0xff]  ;;  %v7556_v24 = vld [vmem:[#allocation3 + $0x120] sm:$0xf] }
 0x323   : > { %3593 = vst [vmem:[#allocation3 + $0x144] sm:$0xf] %v3557_v8  ;;  %5850 = vmatpush.bf16.msrb.mxu1 %v8677_v32  ;;  %v3852_v32 = vld [vmem:[#allocation2 + $0x49] sm:$0xff] }
 0x324   : > { %v8825_v36 = vpop.eup %8824  ;;  %v3362_v50 = vmul.f32 0.7978846, %v3330_v48  ;;  %v3235_v42 = vmul.f32 0.044715, %v9701_v1  ;;  %3623 = vst [vmem:[#allocation3 + $0x108] sm:$0xf] %v3557_v8  ;;  %v3888_v49 = vpack.c.bf16 %v3852_v32, %v3852_v32 }
 0x325   : > { %v3425_v59 = vadd.f32 1.0, %v8825_v36  ;;  %v2964_v62 = vpop.f32.mrf.mxu2  ;;  %3653 = vst [vmem:[#allocation3 + $0xcc] sm:$0xf] %v3557_v8 }
 0x326   : > { %8826 = vtanh.f32 %v3362_v50  ;;  %v3267_v61 = vmul.f32 %v3235_v42, %v9701_v1  ;;  %v2965_v57 = vadd.f32 %v2964_v62, %v2876_v3  ;;  %3097 = vmatmul.bf16.gmra.mxu3 %v7117_v38  ;;  %v7120_v44 = vld [vmem:[#allocation3 + $0x458] sm:$0xf]  ;;  %v2878_v38 = vadd.f32 %v9518_v53, %v9451_v10  ;;  %3817 = vst [vmem:[#allocation3 + $0x40] sm:$0xf] %v9611_v2 }
 0x327   : > { %v3457_v37 = vmul.f32 %v3425_v59, %v3201_v20  ;;  %4014 = vst [vmem:[#allocation3 + $0x458] sm:$0xf] %v9687_v52  ;;  %v3202_v50 = vmul.f32 0.5, %v9681_v9  ;;  %v8501_v9 = vld [vmem:[#allocation3 + $0x28] sm:$0xf0] }
 0x328   : > { %v3299_v63 = vmul.f32 %v3267_v61, %v9701_v1  ;;  %v3054_v5 = vadd.f32 %v9675_v43, %v2965_v57  ;;  %v3522_v18 = vld [vmem:[#allocation2 + $0xa7] sm:$0xff]  ;;  %v7113_v61 = vor.u32 %v9667_v27, %v9665_v11  ;;  %3924 = vst [vmem:[#allocation3 + $0x98] sm:$0xf] %v3888_v49 }
 0x329   : > { %3489 = vst [vmem:[#allocation2 + $0xb0] sm:$0xff] %v3457_v37  ;;  %v9714_v46 = vpop.f32.mrf.mxu0  ;;  %v9716_v25 = vpop.f32.mrf.mxu3  ;;  %v3558_v13 = vpack.c.bf16 %v3522_v18, %v3522_v18  ;;  %v8423_v57 = vld [vmem:[#allocation3 + $0x478] sm:$0xf0]  ;;  %v7420_v37 = vld [vmem:[#allocation3 + $0x8] sm:$0xf] }
 0x32a   : > { %v3331_v8 = vadd.f32 %v3299_v63, %v9701_v1  ;;  %v9720_v34 = vadd.f32 %v9673_v31, %v3054_v5  ;;  %v8536_v48 = vld [vmem:[#allocation3 + $0x140] sm:$0xf0]  ;;  %v9727_v31 = vpop.f32.mrf.mxu1  ;;  %v7121_v53 = vor.u32 %v8423_v57, %v7120_v44  ;;  %4015 = vst [vmem:[#allocation3 + $0x47c] sm:$0xf] %v818_v33 }
 0x32b   : > { %v7557_v43 = vor.u32 %v8536_v48, %v7556_v24  ;;  %3594 = vst [vmem:[#allocation3 + $0x168] sm:$0xf] %v3558_v13  ;;  %v7421_v24 = vor.u32 %v8501_v9, %v7420_v37  ;;  %v2881_v48 = vadd.f32 %v9523_v30, %v9454_v16 }
 0x32c   : > { %v8827_v52 = vpop.eup %8826  ;;  %v3363_v36 = vmul.f32 0.7978846, %v3331_v8  ;;  %v3236_v3 = vmul.f32 0.044715, %v9720_v34  ;;  %3624 = vst [vmem:[#allocation3 + $0x12c] sm:$0xf] %v3558_v13  ;;  %3186 = vmatmul.bf16.gmra.mxu0 %v7121_v53 }
 0x32d   : > { %v3426_v42 = vadd.f32 1.0, %v8827_v52  ;;  %v2966_v20 = vpop.f32.mrf.mxu2  ;;  %5520 = vmatmul.bf16.gmra.mxu1 %v7557_v43  ;;  %3654 = vst [vmem:[#allocation3 + $0xf0] sm:$0xf] %v3558_v13  ;;  %v3853_v13 = vld [vmem:[#allocation2 + $0x51] sm:$0xff] }
 0x32e   : > { %8828 = vtanh.f32 %v3363_v36  ;;  %v3268_v59 = vmul.f32 %v3236_v3, %v9720_v34  ;;  %v2967_v62 = vadd.f32 %v2966_v20, %v2878_v38  ;;  %v9747_v38 = vpack.c.bf16 %v3853_v13, %v3853_v13  ;;  %3954 = vst [vmem:[#allocation3 + $0x5c] sm:$0xf] %v3888_v49  ;;  %v7422_v13 = vld [vmem:[#allocation3 + $0x2c] sm:$0xf0] }
 0x32f   : > { %v3458_v10 = vmul.f32 %v3426_v42, %v3202_v50  ;;  %v3203_v36 = vmul.f32 0.5, %v9701_v1  ;;  %3984 = vst [vmem:[#allocation3 + $0x20] sm:$0xf] %v3888_v49 }
 0x330   : > { %v3300_v63 = vmul.f32 %v3268_v59, %v9720_v34  ;;  %v3056_v5 = vadd.f32 %v9697_v12, %v2967_v62  ;;  %v3523_v18 = vld [vmem:[#allocation2 + $0xaf] sm:$0xff]  ;;  %3925 = vst [vmem:[#allocation3 + $0xbc] sm:$0xf] %v9747_v38 }
 0x331   : > { %3490 = vst [vmem:[#allocation2 + $0xc8] sm:$0xff] %v3458_v10  ;;  %v9735_v8 = vpop.f32.mrf.mxu0  ;;  %v9737_v11 = vpop.f32.mrf.mxu3  ;;  %v3559_v27 = vpack.c.bf16 %v3523_v18, %v3523_v18  ;;  %v2883_v18 = vadd.f32 %v9529_v0, %v9457_v22 }
 0x332   : > { %v3332_v33 = vadd.f32 %v3300_v63, %v9720_v34  ;;  %v9741_v44 = vadd.f32 %v9695_v41, %v3056_v5  ;;  %3008 = vmatmul.bf16.gmra.mxu2 %v7113_v61  ;;  %v9751_v20 = vpop.f32.mrf.mxu1  ;;  %v7592_v53 = vld [vmem:[#allocation3 + $0x168] sm:$0xf]  ;;  %v8496_v63 = vld [vmem:[#allocation3 + $0x4] sm:$0xf]  ;;  %3955 = vst [vmem:[#allocation3 + $0x80] sm:$0xf] %v9747_v38 }
 0x333   : > { %3595 = vst [vmem:[#allocation3 + $0x18c] sm:$0xf] %v3559_v27 }
 0x334   : > { %v8829_v12 = vpop.eup %8828  ;;  %v3364_v43 = vmul.f32 0.7978846, %v3332_v33  ;;  %v3237_v52 = vmul.f32 0.044715, %v9741_v44  ;;  %3625 = vst [vmem:[#allocation3 + $0x150] sm:$0xf] %v3559_v27 }
 0x335   : > { %v3427_v3 = vadd.f32 1.0, %v8829_v12  ;;  %v2969_v41 = vpop.f32.mrf.mxu2  ;;  %3655 = vst [vmem:[#allocation3 + $0x114] sm:$0xf] %v3559_v27  ;;  %v3204_v33 = vmul.f32 0.5, %v9720_v34 }
 0x336   : > { %8830 = vtanh.f32 %v3364_v43  ;;  %v3269_v50 = vmul.f32 %v3237_v52, %v9741_v44  ;;  %v2970_v2 = vadd.f32 %v2969_v41, %v2881_v48  ;;  %5678 = vmatmul.bf16.vlgmr.msrb.gmra.mxu3 %v7421_v24  ;;  %v8497_v52 = vld [vmem:[#allocation3 + $0xc] sm:$0xf]  ;;  %3985 = vst [vmem:[#allocation3 + $0x44] sm:$0xf] %v9747_v38 }
 0x337   : > { %v3459_v42 = vmul.f32 %v3427_v3, %v3203_v36  ;;  %v7425_v3 = vor.u32 %v8497_v52, %v7422_v13  ;;  %v3686_v41 = vld [vmem:[#allocation2 + $0x68] sm:$0xff] }
 0x338   : > { %v3301_v16 = vmul.f32 %v3269_v50, %v9741_v44  ;;  %v3059_v30 = vadd.f32 %v9716_v25, %v2970_v2  ;;  %v3524_v59 = vld [vmem:[#allocation2 + $0xc7] sm:$0xff]  ;;  %v3722_v49 = vpack.c.bf16 %v3686_v41, %v3686_v41 }
 0x339   : > { %3491 = vst [vmem:[#allocation2 + $0xd0] sm:$0xff] %v3459_v42  ;;  %v9756_v1 = vpop.f32.mrf.mxu0  ;;  %v9758_v62 = vpop.f32.mrf.mxu3  ;;  %v3560_v61 = vpack.c.bf16 %v3524_v59, %v3524_v59  ;;  %v7414_v25 = vld [vmem:[#allocation3 + $0x24] sm:$0xf0]  ;;  %v3687_v59 = vld [vmem:[#allocation2 + $0x70] sm:$0xff] }
 0x33a   : > { %v3333_v57 = vadd.f32 %v3301_v16, %v9741_v44  ;;  %v9762_v10 = vadd.f32 %v9714_v46, %v3059_v30  ;;  %v8545_v37 = vld [vmem:[#allocation3 + $0x188] sm:$0xf0]  ;;  %v7417_v43 = vor.u32 %v8496_v63, %v7414_v25  ;;  %v7456_v16 = vld [vmem:[#allocation3 + $0x50] sm:$0xf]  ;;  %v8510_v30 = vld [vmem:[#allocation3 + $0x70] sm:$0xf0] }
 0x33b   : > { %v7593_v9 = vor.u32 %v8545_v37, %v7592_v53  ;;  %3596 = vst [vmem:[#allocation3 + $0x1b0] sm:$0xf] %v3560_v61  ;;  %v7457_v25 = vor.u32 %v8510_v30, %v7456_v16 }
 0x33c   : > { %v8831_v5 = vpop.eup %8830  ;;  %v3365_v32 = vmul.f32 0.7978846, %v3333_v57  ;;  %v3238_v27 = vmul.f32 0.044715, %v9762_v10  ;;  %3626 = vst [vmem:[#allocation3 + $0x174] sm:$0xf] %v3560_v61  ;;  %5767 = vmatmul.bf16.vlgmr.msrb.gmra.mxu0 %v7425_v3 }
 0x33d   : > { %v3428_v24 = vadd.f32 1.0, %v8831_v5  ;;  %v2971_v46 = vpop.f32.mrf.mxu2  ;;  %5525 = vmatmul.bf16.gmra.mxu1 %v7593_v9  ;;  %3656 = vst [vmem:[#allocation3 + $0x138] sm:$0xf] %v3560_v61  ;;  %v9776_v61 = vpop.f32.mrf.mxu1  ;;  %v9786_v5 = vpack.c.bf16 %v3687_v59, %v3687_v59  ;;  %v3206_v16 = vmul.f32 0.5, %v9762_v10  ;;  %v7450_v59 = vld [vmem:[#allocation3 + $0x6c] sm:$0xf0] }
 0x33e   : > { %8832 = vtanh.f32 %v3365_v32  ;;  %v3270_v12 = vmul.f32 %v3238_v27, %v9762_v10  ;;  %v2972_v48 = vadd.f32 %v2971_v46, %v2883_v18  ;;  %v3205_v18 = vmul.f32 0.5, %v9741_v44  ;;  %3758 = vst [vmem:[#allocation3 + $0xdc] sm:$0xf] %v3722_v49  ;;  %v8676_v44 = vld [vmem:[#allocation9 + $0x120] sm:$0xff] }
 0x33f   : > { %v3460_v36 = vmul.f32 %v3428_v24, %v3204_v33  ;;  %3759 = vst [vmem:[#allocation3 + $0x100] sm:$0xf] %v9786_v5  ;;  %5851 = vmatpush.bf16.msrb.mxu1 %v8676_v44 }
 0x340   : > { %v3302_v22 = vmul.f32 %v3270_v12, %v9762_v10  ;;  %v3061_v0 = vadd.f32 %v9737_v11, %v2972_v48  ;;  %v3525_v34 = vld [vmem:[#allocation2 + $0xcf] sm:$0xff]  ;;  %v2886_v11 = vadd.f32 %v9534_v14, %v9462_v58  ;;  %3788 = vst [vmem:[#allocation3 + $0xa0] sm:$0xf] %v3722_v49 }
 0x341   : > { %3492 = vst [vmem:[#allocation2 + $0xe8] sm:$0xff] %v3460_v36  ;;  %v9772_v50 = vpop.f32.mrf.mxu0  ;;  %v9774_v2 = vpop.f32.mrf.mxu3  ;;  %v3561_v42 = vpack.c.bf16 %v3525_v34, %v3525_v34 }
 0x342   : > { %v3334_v57 = vadd.f32 %v3302_v22, %v9762_v10  ;;  %v9780_v53 = vadd.f32 %v9735_v8, %v3061_v0  ;;  %5589 = vmatmul.bf16.vlgmr.msrb.gmra.mxu2 %v7417_v43  ;;  %v7628_v52 = vld [vmem:[#allocation3 + $0x1b0] sm:$0xf]  ;;  %v2888_v22 = vadd.f32 %v9537_v35, %v9465_v45  ;;  %v8505_v35 = vld [vmem:[#allocation3 + $0x4c] sm:$0xf]  ;;  %3789 = vst [vmem:[#allocation3 + $0xc4] sm:$0xf] %v9786_v5 }
 0x343   : > { %3597 = vst [vmem:[#allocation3 + $0x1d4] sm:$0xf] %v3561_v42 }
 0x344   : > { %v8833_v37 = vpop.eup %8832  ;;  %v3366_v9 = vmul.f32 0.7978846, %v3334_v57  ;;  %v3239_v63 = vmul.f32 0.044715, %v9780_v53  ;;  %3627 = vst [vmem:[#allocation3 + $0x198] sm:$0xf] %v3561_v42 }
 0x345   : > { %v3429_v32 = vadd.f32 1.0, %v8833_v37  ;;  %v2974_v8 = vpop.f32.mrf.mxu2  ;;  %3657 = vst [vmem:[#allocation3 + $0x15c] sm:$0xf] %v3561_v42  ;;  %v9803_v0 = vpop.f32.mrf.mxu1  ;;  %v7458_v42 = vld [vmem:[#allocation3 + $0x74] sm:$0xf0] }
 0x346   : > { %8834 = vtanh.f32 %v3366_v9  ;;  %v3271_v38 = vmul.f32 %v3239_v63, %v9780_v53  ;;  %v2975_v27 = vadd.f32 %v2974_v8, %v2886_v11  ;;  %5683 = vmatmul.bf16.gmra.mxu3 %v7457_v25  ;;  %v8506_v37 = vld [vmem:[#allocation3 + $0x54] sm:$0xf]  ;;  %v7453_v25 = vor.u32 %v8505_v35, %v7450_v59  ;;  %3818 = vst [vmem:[#allocation3 + $0x64] sm:$0xf] %v3722_v49 }
 0x347   : > { %v3461_v58 = vmul.f32 %v3429_v32, %v3205_v18  ;;  %v7461_v9 = vor.u32 %v8506_v37, %v7458_v42  ;;  %v3854_v32 = vld [vmem:[#allocation2 + $0x69] sm:$0xff]  ;;  %3819 = vst [vmem:[#allocation3 + $0x88] sm:$0xf] %v9786_v5 }
 0x348   : > { %v3303_v14 = vmul.f32 %v3271_v38, %v9780_v53  ;;  %v3064_v13 = vadd.f32 %v9758_v62, %v2975_v27  ;;  %v3526_v33 = vld [vmem:[#allocation2 + $0xe7] sm:$0xff]  ;;  %v3890_v49 = vpack.c.bf16 %v3854_v32, %v3854_v32 }
 0x349   : > { %3493 = vst [vmem:[#allocation2 + $0xf0] sm:$0xff] %v3461_v58  ;;  %v9793_v24 = vpop.f32.mrf.mxu0  ;;  %v9795_v46 = vpop.f32.mrf.mxu3  ;;  %v3562_v12 = vpack.c.bf16 %v3526_v33, %v3526_v33  ;;  %v7492_v58 = vld [vmem:[#allocation3 + $0x98] sm:$0xf] }
 0x34a   : > { %v3335_v48 = vadd.f32 %v3303_v14, %v9780_v53  ;;  %v9799_v43 = vadd.f32 %v9756_v1, %v3064_v13  ;;  %v8554_v36 = vld [vmem:[#allocation3 + $0x1d0] sm:$0xf0]  ;;  %v8519_v14 = vld [vmem:[#allocation3 + $0xb8] sm:$0xf0]  ;;  %3926 = vst [vmem:[#allocation3 + $0xe0] sm:$0xf] %v3890_v49 }
 0x34b   : > { %v7629_v3 = vor.u32 %v8554_v36, %v7628_v52  ;;  %3598 = vst [vmem:[#allocation3 + $0x1f8] sm:$0xf] %v3562_v12  ;;  %v3855_v13 = vld [vmem:[#allocation2 + $0x71] sm:$0xff]  ;;  %v7493_v36 = vor.u32 %v8519_v14, %v7492_v58 }
 0x34c   : > { %v8835_v62 = vpop.eup %8834  ;;  %v3367_v34 = vmul.f32 0.7978846, %v3335_v48  ;;  %v3240_v41 = vmul.f32 0.044715, %v9799_v43  ;;  %3628 = vst [vmem:[#allocation3 + $0x1bc] sm:$0xf] %v3562_v12  ;;  %5772 = vmatmul.bf16.gmra.mxu0 %v7461_v9  ;;  %v2893_v9 = vadd.f32 %v9556_v39, %v9473_v60 }
 0x34d   : > { %v3430_v1 = vadd.f32 1.0, %v8835_v62  ;;  %v2976_v30 = vpop.f32.mrf.mxu2  ;;  %5530 = vmatmul.bf16.gmra.mxu1 %v7629_v3  ;;  %3658 = vst [vmem:[#allocation3 + $0x180] sm:$0xf] %v3562_v12  ;;  %v3891_v3 = vpack.c.bf16 %v3855_v13, %v3855_v13  ;;  %v3207_v62 = vmul.f32 0.5, %v9780_v53  ;;  %v3208_v32 = vmul.f32 0.5, %v9799_v43 }
 0x34e   : > { %8836 = vtanh.f32 %v3367_v34  ;;  %v3272_v57 = vmul.f32 %v3240_v41, %v9799_v43  ;;  %v2977_v11 = vadd.f32 %v2976_v30, %v2888_v22  ;;  %v3689_v30 = vld [vmem:[#allocation2 + $0x90] sm:$0xff]  ;;  %3956 = vst [vmem:[#allocation3 + $0xa4] sm:$0xf] %v3890_v49  ;;  %v7486_v58 = vld [vmem:[#allocation3 + $0xb4] sm:$0xf0] }
 0x34f   : > { %v3462_v45 = vmul.f32 %v3430_v1, %v3206_v16  ;;  %3927 = vst [vmem:[#allocation3 + $0x104] sm:$0xf] %v3891_v3  ;;  %v3688_v16 = vld [vmem:[#allocation2 + $0x88] sm:$0xff]  ;;  %v8514_v60 = vld [vmem:[#allocation3 + $0x94] sm:$0xf] }
 0x350   : > { %v3304_v63 = vmul.f32 %v3272_v57, %v9799_v43  ;;  %v3066_v10 = vadd.f32 %v9774_v2, %v2977_v11  ;;  %v3527_v18 = vld [vmem:[#allocation2 + $0xef] sm:$0xff]  ;;  %v2891_v2 = vadd.f32 %v9543_v56, %v9470_v51  ;;  %3957 = vst [vmem:[#allocation3 + $0xc8] sm:$0xf] %v3891_v3  ;;  %v3724_v35 = vpack.c.bf16 %v3688_v16, %v3688_v16 }
 0x351   : > { %3494 = vst [vmem:[#allocation2 + $0x108] sm:$0xff] %v3462_v45  ;;  %v9811_v8 = vpop.f32.mrf.mxu0  ;;  %v9813_v38 = vpop.f32.mrf.mxu3  ;;  %v3563_v27 = vpack.c.bf16 %v3527_v18, %v3527_v18  ;;  %v3725_v18 = vpack.c.bf16 %v3689_v30, %v3689_v30 }
 0x352   : > { %v3336_v33 = vadd.f32 %v3304_v63, %v9799_v43  ;;  %v9817_v44 = vadd.f32 %v9772_v50, %v3066_v10  ;;  %5594 = vmatmul.bf16.gmra.mxu2 %v7453_v25  ;;  %v9824_v50 = vpop.f32.mrf.mxu1  ;;  %v7664_v11 = vld [vmem:[#allocation3 + $0x1f8] sm:$0xf]  ;;  %v7494_v25 = vld [vmem:[#allocation3 + $0xbc] sm:$0xf0]  ;;  %3986 = vst [vmem:[#allocation3 + $0x68] sm:$0xf] %v3890_v49 }
 0x353   : > { %3599 = vst [vmem:[#allocation3 + $0x21c] sm:$0xf] %v3563_v27 }
 0x354   : > { %v8837_v12 = vpop.eup %8836  ;;  %v3368_v48 = vmul.f32 0.7978846, %v3336_v33  ;;  %v3241_v52 = vmul.f32 0.044715, %v9817_v44  ;;  %3629 = vst [vmem:[#allocation3 + $0x1e0] sm:$0xf] %v3563_v27 }
 0x355   : > { %v3431_v22 = vadd.f32 1.0, %v8837_v12  ;;  %v2979_v34 = vpop.f32.mrf.mxu2  ;;  %3659 = vst [vmem:[#allocation3 + $0x1a4] sm:$0xf] %v3563_v27  ;;  %v8515_v33 = vld [vmem:[#allocation3 + $0x9c] sm:$0xf] }
 0x356   : > { %8838 = vtanh.f32 %v3368_v48  ;;  %v3273_v5 = vmul.f32 %v3241_v52, %v9817_v44  ;;  %v2980_v41 = vadd.f32 %v2979_v34, %v2891_v2  ;;  %5688 = vmatmul.bf16.gmra.mxu3 %v7493_v36  ;;  %3987 = vst [vmem:[#allocation3 + $0x8c] sm:$0xf] %v3891_v3  ;;  %v7497_v39 = vor.u32 %v8515_v33, %v7494_v25  ;;  %v3856_v36 = vld [vmem:[#allocation2 + $0x89] sm:$0xff]  ;;  %v3857_v3 = vld [vmem:[#allocation2 + $0x91] sm:$0xff] }
 0x357   : > { %v3463_v51 = vmul.f32 %v3431_v22, %v3207_v62  ;;  %3760 = vst [vmem:[#allocation3 + $0x124] sm:$0xf] %v3724_v35  ;;  %v7489_v52 = vor.u32 %v8514_v60, %v7486_v58  ;;  %v7528_v62 = vld [vmem:[#allocation3 + $0xe0] sm:$0xf]  ;;  %v8528_v22 = vld [vmem:[#allocation3 + $0x100] sm:$0xf0] }
 0x358   : > { %v3305_v56 = vmul.f32 %v3273_v5, %v9817_v44  ;;  %v3069_v42 = vadd.f32 %v9795_v46, %v2980_v41  ;;  %3761 = vst [vmem:[#allocation3 + $0x148] sm:$0xf] %v3725_v18  ;;  %v7529_v30 = vor.u32 %v8528_v22, %v7528_v62  ;;  %v8523_v22 = vld [vmem:[#allocation3 + $0xdc] sm:$0xf] }
 0x359   : > { %3495 = vst [vmem:[#allocation2 + $0x110] sm:$0xff] %v3463_v51  ;;  %v9829_v53 = vpop.f32.mrf.mxu0  ;;  %v9831_v1 = vpop.f32.mrf.mxu3  ;;  %v9854_v51 = vpack.c.bf16 %v3856_v36, %v3856_v36  ;;  %v8524_v36 = vld [vmem:[#allocation3 + $0xe4] sm:$0xf] }
 0x35a   : > { %v3337_v59 = vadd.f32 %v3305_v56, %v9817_v44  ;;  %v9835_v57 = vadd.f32 %v9793_v24, %v3069_v42  ;;  %v8563_v37 = vld [vmem:[#allocation3 + $0x218] sm:$0xf0]  ;;  %v9842_v12 = vpop.f32.mrf.mxu1  ;;  %3790 = vst [vmem:[#allocation3 + $0xe8] sm:$0xf] %v3724_v35 }
 0x35b   : > { %v7665_v45 = vor.u32 %v8563_v37, %v7664_v11  ;;  %3791 = vst [vmem:[#allocation3 + $0x10c] sm:$0xf] %v3725_v18  ;;  %v3209_v11 = vmul.f32 0.5, %v9817_v44  ;;  %v3528_v44 = vld [vmem:[#allocation2 + $0x107] sm:$0xff] }
 0x35c   : > { %v8839_v46 = vpop.eup %8838  ;;  %v3369_v63 = vmul.f32 0.7978846, %v3337_v59  ;;  %v3242_v10 = vmul.f32 0.044715, %v9835_v57  ;;  %5777 = vmatmul.bf16.gmra.mxu0 %v7497_v39  ;;  %v9857_v59 = vpack.c.bf16 %v3857_v3, %v3857_v3  ;;  %3820 = vst [vmem:[#allocation3 + $0xac] sm:$0xf] %v3724_v35 }
 0x35d   : > { %v3432_v27 = vadd.f32 1.0, %v8839_v46  ;;  %v2981_v24 = vpop.f32.mrf.mxu2  ;;  %5535 = vmatmul.bf16.gmra.mxu1 %v7665_v45  ;;  %3821 = vst [vmem:[#allocation3 + $0xd0] sm:$0xf] %v3725_v18 }
 0x35e   : > { %8840 = vtanh.f32 %v3369_v63  ;;  %v3274_v14 = vmul.f32 %v3242_v10, %v9835_v57  ;;  %v2982_v13 = vadd.f32 %v2981_v24, %v2893_v9  ;;  %3928 = vst [vmem:[#allocation3 + $0x128] sm:$0xf] %v9854_v51  ;;  %v8675_v10 = vld [vmem:[#allocation9 + $0x118] sm:$0xff] }
 0x35f   : > { %v3464_v2 = vmul.f32 %v3432_v27, %v3208_v32  ;;  %3929 = vst [vmem:[#allocation3 + $0x14c] sm:$0xf] %v9857_v59  ;;  %v3564_v27 = vpack.c.bf16 %v3528_v44, %v3528_v44  ;;  %5852 = vmatpush.bf16.msrb.mxu1 %v8675_v10 }
 0x360   : > { %v3306_v48 = vmul.f32 %v3274_v14, %v9835_v57  ;;  %v3071_v43 = vadd.f32 %v9813_v38, %v2982_v13  ;;  %v2896_v38 = vadd.f32 %v9573_v28, %v9478_v21  ;;  %v3529_v35 = vld [vmem:[#allocation2 + $0x10f] sm:$0xff]  ;;  %3958 = vst [vmem:[#allocation3 + $0xec] sm:$0xf] %v9854_v51  ;;  %v2898_v14 = vadd.f32 %v9592_v26, %v9481_v17 }
 0x361   : > { %3496 = vst [vmem:[#allocation2 + $0x128] sm:$0xff] %v3464_v2  ;;  %v9846_v49 = vpop.f32.mrf.mxu0  ;;  %v3075_v41 = vpop.f32.mrf.mxu3  ;;  %v3565_v24 = vpack.c.bf16 %v3529_v35, %v3529_v35  ;;  %v7530_v2 = vld [vmem:[#allocation3 + $0x104] sm:$0xf0] }
 0x362   : > { %v3338_v34 = vadd.f32 %v3306_v48, %v9835_v57  ;;  %v9850_v5 = vadd.f32 %v9811_v8, %v3071_v43  ;;  %5599 = vmatmul.bf16.gmra.mxu2 %v7489_v52  ;;  %v9863_v9 = vpop.f32.mrf.mxu1  ;;  %3959 = vst [vmem:[#allocation3 + $0x110] sm:$0xf] %v9857_v59  ;;  %v7522_v48 = vld [vmem:[#allocation3 + $0xfc] sm:$0xf0]  ;;  %v7533_v17 = vor.u32 %v8524_v36, %v7530_v2 }
 0x363   : > { %3600 = vst [vmem:[#allocation3 + $0x240] sm:$0xf] %v3564_v27 }
 0x364   : > { %v8841_v56 = vpop.eup %8840  ;;  %v3370_v42 = vmul.f32 0.7978846, %v3338_v34  ;;  %v3243_v16 = vmul.f32 0.044715, %v9850_v5  ;;  %3601 = vst [vmem:[#allocation3 + $0x264] sm:$0xf] %v3565_v24  ;;  %v7525_v34 = vor.u32 %v8523_v22, %v7522_v48 }
 0x365   : > { %v3433_v8 = vadd.f32 1.0, %v8841_v56  ;;  %v2984_v37 = vpop.f32.mrf.mxu2  ;;  %3630 = vst [vmem:[#allocation3 + $0x204] sm:$0xf] %v3564_v27  ;;  %v3211_v44 = vmul.f32 0.5, %v9850_v5 }
 0x366   : > { %8842 = vtanh.f32 %v3370_v42  ;;  %v3275_v45 = vmul.f32 %v3243_v16, %v9850_v5  ;;  %v2985_v46 = vadd.f32 %v2984_v37, %v2896_v38  ;;  %5693 = vmatmul.bf16.gmra.mxu3 %v7529_v30  ;;  %3631 = vst [vmem:[#allocation3 + $0x228] sm:$0xf] %v3565_v24  ;;  %v7564_v38 = vld [vmem:[#allocation3 + $0x128] sm:$0xf]  ;;  %v8537_v56 = vld [vmem:[#allocation3 + $0x148] sm:$0xf0]  ;;  %v2901_v37 = vadd.f32 %v9614_v29, %v9486_v7 }
 0x367   : > { %v3465_v21 = vmul.f32 %v3433_v8, %v3209_v11  ;;  %v3690_v42 = vld [vmem:[#allocation2 + $0xa8] sm:$0xff]  ;;  %3660 = vst [vmem:[#allocation3 + $0x1c8] sm:$0xf] %v3564_v27 }
 0x368   : > { %v3307_v28 = vmul.f32 %v3275_v45, %v9850_v5  ;;  %v3074_v63 = vadd.f32 %v9831_v1, %v2985_v46  ;;  %3661 = vst [vmem:[#allocation3 + $0x1ec] sm:$0xf] %v3565_v24 }
 0x369   : > { %3497 = vst [vmem:[#allocation2 + $0x130] sm:$0xff] %v3465_v21  ;;  %v9867_v25 = vpop.f32.mrf.mxu0  ;;  %v9873_v58 = vpop.f32.mrf.mxu3 }
 0x36a   : > { %v3339_v32 = vadd.f32 %v3307_v28, %v9850_v5  ;;  %v9871_v18 = vadd.f32 %v9829_v53, %v3074_v63  ;;  %v3210_v53 = vmul.f32 0.5, %v9835_v57  ;;  %v9886_v30 = vpop.f32.mrf.mxu1  ;;  %v7565_v28 = vor.u32 %v8537_v56, %v7564_v38  ;;  %3988 = vst [vmem:[#allocation3 + $0xb0] sm:$0xf] %v9854_v51  ;;  %v8533_v38 = vld [vmem:[#allocation3 + $0x12c] sm:$0xf] }
 0x36b   : > { %v9894_v63 = vpack.c.bf16 %v3690_v42, %v3690_v42  ;;  %v8572_v10 = vld [vmem:[#allocation3 + $0x260] sm:$0xf0]  ;;  %3989 = vst [vmem:[#allocation3 + $0xd4] sm:$0xf] %v9857_v59 }
 0x36c   : > { %v8843_v1 = vpop.eup %8842  ;;  %v3371_v13 = vmul.f32 0.7978846, %v3339_v32  ;;  %v3244_v33 = vmul.f32 0.044715, %v9871_v18  ;;  %5782 = vmatmul.bf16.gmra.mxu0 %v7533_v17  ;;  %v8532_v42 = vld [vmem:[#allocation3 + $0x124] sm:$0xf] }
 0x36d   : > { %v3434_v60 = vadd.f32 1.0, %v8843_v1  ;;  %v2986_v39 = vpop.f32.mrf.mxu2  ;;  %3762 = vst [vmem:[#allocation3 + $0x16c] sm:$0xf] %v9894_v63 }
 0x36e   : > { %8844 = vtanh.f32 %v3371_v13  ;;  %v3276_v43 = vmul.f32 %v3244_v33, %v9871_v18  ;;  %v2987_v52 = vadd.f32 %v2986_v39, %v2898_v14  ;;  %v3530_v13 = vld [vmem:[#allocation2 + $0x127] sm:$0xff]  ;;  %3792 = vst [vmem:[#allocation3 + $0x130] sm:$0xf] %v9894_v63 }
 0x36f   : > { %v3466_v62 = vmul.f32 %v3434_v60, %v3210_v53  ;;  %v3566_v59 = vpack.c.bf16 %v3530_v13, %v3530_v13  ;;  %3822 = vst [vmem:[#allocation3 + $0xf4] sm:$0xf] %v9894_v63 }
 0x370   : > { %v3308_v26 = vmul.f32 %v3276_v43, %v9871_v18  ;;  %v3076_v3 = vadd.f32 %v3075_v41, %v2987_v52  ;;  %v3691_v41 = vld [vmem:[#allocation2 + $0xb0] sm:$0xff]  ;;  %v2903_v43 = vadd.f32 %v9646_v55, %v9489_v4 }
 0x371   : > { %3498 = vst [vmem:[#allocation2 + $0x148] sm:$0xff] %v3466_v62  ;;  %v9883_v57 = vpop.f32.mrf.mxu0  ;;  %v3080_v8 = vpop.f32.mrf.mxu3  ;;  %v9897_v27 = vpack.c.bf16 %v3691_v41, %v3691_v41  ;;  %v3531_v33 = vld [vmem:[#allocation2 + $0x12f] sm:$0xff] }
 0x372   : > { %v3340_v16 = vadd.f32 %v3308_v26, %v9871_v18  ;;  %v9889_v11 = vadd.f32 %v9846_v49, %v3076_v3  ;;  %5604 = vmatmul.bf16.gmra.mxu2 %v7525_v34  ;;  %v7700_v49 = vld [vmem:[#allocation3 + $0x240] sm:$0xf]  ;;  %v3567_v39 = vpack.c.bf16 %v3531_v33, %v3531_v33  ;;  %v7566_v62 = vld [vmem:[#allocation3 + $0x14c] sm:$0xf0]  ;;  %3602 = vst [vmem:[#allocation3 + $0x288] sm:$0xf] %v3566_v59 }
 0x373   : > { %v7701_v7 = vor.u32 %v8572_v10, %v7700_v49  ;;  %3763 = vst [vmem:[#allocation3 + $0x190] sm:$0xf] %v9897_v27  ;;  %v7558_v26 = vld [vmem:[#allocation3 + $0x144] sm:$0xf0]  ;;  %v7569_v4 = vor.u32 %v8533_v38, %v7566_v62  ;;  %v3859_v10 = vld [vmem:[#allocation2 + $0xb1] sm:$0xff] }
 0x374   : > { %v8845_v45 = vpop.eup %8844  ;;  %v3372_v46 = vmul.f32 0.7978846, %v3340_v16  ;;  %v3245_v21 = vmul.f32 0.044715, %v9889_v11  ;;  %3603 = vst [vmem:[#allocation3 + $0x2ac] sm:$0xf] %v3567_v39  ;;  %v7561_v41 = vor.u32 %v8532_v42, %v7558_v26 }
 0x375   : > { %v3435_v35 = vadd.f32 1.0, %v8845_v45  ;;  %v2989_v32 = vpop.f32.mrf.mxu2  ;;  %5540 = vmatmul.bf16.gmra.mxu1 %v7701_v7  ;;  %3632 = vst [vmem:[#allocation3 + $0x24c] sm:$0xf] %v3566_v59  ;;  %v7602_v26 = vld [vmem:[#allocation3 + $0x194] sm:$0xf0] }
 0x376   : > { %8846 = vtanh.f32 %v3372_v46  ;;  %v3277_v1 = vmul.f32 %v3245_v21, %v9889_v11  ;;  %v2990_v29 = vadd.f32 %v2989_v32, %v2901_v37  ;;  %5698 = vmatmul.bf16.gmra.mxu3 %v7565_v28  ;;  %3633 = vst [vmem:[#allocation3 + $0x270] sm:$0xf] %v3567_v39  ;;  %v3858_v28 = vld [vmem:[#allocation2 + $0xa9] sm:$0xff]  ;;  %v3213_v32 = vmul.f32 0.5, %v9889_v11 }
 0x377   : > { %v3467_v24 = vmul.f32 %v3435_v35, %v3211_v44  ;;  %3662 = vst [vmem:[#allocation3 + $0x210] sm:$0xf] %v3566_v59 }
 0x378   : > { %v3309_v14 = vmul.f32 %v3277_v1, %v9889_v11  ;;  %v3079_v5 = vadd.f32 %v9873_v58, %v2990_v29  ;;  %3663 = vst [vmem:[#allocation3 + $0x234] sm:$0xf] %v3567_v39  ;;  %v8674_v39 = vld [vmem:[#allocation9 + $0x110] sm:$0xff] }
 0x379   : > { %3499 = vst [vmem:[#allocation2 + $0x150] sm:$0xff] %v3467_v24  ;;  %v9905_v2 = vpop.f32.mrf.mxu0  ;;  %v3083_v48 = vpop.f32.mrf.mxu3  ;;  %v9933_v24 = vpack.c.bf16 %v3858_v28, %v3858_v28  ;;  %5853 = vmatpush.bf16.msrb.mxu1 %v8674_v39 }
 0x37a   : > { %v3341_v53 = vadd.f32 %v3309_v14, %v9889_v11  ;;  %v9909_v60 = vadd.f32 %v9867_v25, %v3079_v5  ;;  %v9911_v51 = vpop.f32.mrf.mxu1  ;;  %v3212_v25 = vmul.f32 0.5, %v9871_v18  ;;  %3793 = vst [vmem:[#allocation3 + $0x154] sm:$0xf] %v9897_v27  ;;  %v7594_v38 = vld [vmem:[#allocation3 + $0x18c] sm:$0xf0] }
 0x37b   : > { %v8581_v7 = vld [vmem:[#allocation3 + $0x2a8] sm:$0xf0]  ;;  %3823 = vst [vmem:[#allocation3 + $0x118] sm:$0xf] %v9897_v27 }
 0x37c   : > { %v8847_v58 = vpop.eup %8846  ;;  %v3373_v52 = vmul.f32 0.7978846, %v3341_v53  ;;  %v3246_v36 = vmul.f32 0.044715, %v9909_v60  ;;  %5787 = vmatmul.bf16.gmra.mxu0 %v7569_v4  ;;  %v3532_v53 = vld [vmem:[#allocation2 + $0x147] sm:$0xff] }
 0x37d   : > { %v3436_v22 = vadd.f32 1.0, %v8847_v58  ;;  %v2991_v17 = vpop.f32.mrf.mxu2  ;;  %3930 = vst [vmem:[#allocation3 + $0x170] sm:$0xf] %v9933_v24  ;;  %v8542_v4 = vld [vmem:[#allocation3 + $0x174] sm:$0xf] }
 0x37e   : > { %8848 = vtanh.f32 %v3373_v52  ;;  %v3278_v3 = vmul.f32 %v3246_v36, %v9909_v60  ;;  %v2992_v34 = vadd.f32 %v2991_v17, %v2903_v43  ;;  %v3568_v36 = vpack.c.bf16 %v3532_v53, %v3532_v53  ;;  %3960 = vst [vmem:[#allocation3 + $0x134] sm:$0xf] %v9933_v24 }
 0x37f   : > { %v3468_v56 = vmul.f32 %v3436_v22, %v3212_v25  ;;  %v2908_v25 = vadd.f32 %v9706_v40, %v9501_v19  ;;  %v7605_v19 = vor.u32 %v8542_v4, %v7602_v26  ;;  %3990 = vst [vmem:[#allocation3 + $0xf8] sm:$0xf] %v9933_v24  ;;  %v8551_v4 = vld [vmem:[#allocation3 + $0x1bc] sm:$0xf] }
 0x380   : > { %v3310_v55 = vmul.f32 %v3278_v3, %v9909_v60  ;;  %v3081_v16 = vadd.f32 %v3080_v8, %v2992_v34  ;;  %v2906_v8 = vadd.f32 %v9677_v23, %v9496_v47  ;;  %v9938_v23 = vpack.c.bf16 %v3859_v10, %v3859_v10  ;;  %v3533_v59 = vld [vmem:[#allocation2 + $0x14f] sm:$0xff]  ;;  %3604 = vst [vmem:[#allocation3 + $0x2d0] sm:$0xf] %v3568_v36 }
 0x381   : > { %3500 = vst [vmem:[#allocation2 + $0x168] sm:$0xff] %v3468_v56  ;;  %v9921_v18 = vpop.f32.mrf.mxu0  ;;  %v3085_v21 = vpop.f32.mrf.mxu3  ;;  %v3569_v62 = vpack.c.bf16 %v3533_v59, %v3533_v59 }
 0x382   : > { %v3342_v37 = vadd.f32 %v3310_v55, %v9909_v60  ;;  %v9925_v45 = vadd.f32 %v9883_v57, %v3081_v16  ;;  %v9927_v46 = vpop.f32.mrf.mxu1  ;;  %5609 = vmatmul.bf16.gmra.mxu2 %v7561_v41  ;;  %v7736_v57 = vld [vmem:[#allocation3 + $0x288] sm:$0xf]  ;;  %3931 = vst [vmem:[#allocation3 + $0x194] sm:$0xf] %v9938_v23  ;;  %v8541_v16 = vld [vmem:[#allocation3 + $0x16c] sm:$0xf] }
 0x383   : > { %v7737_v5 = vor.u32 %v8581_v7, %v7736_v57  ;;  %3605 = vst [vmem:[#allocation3 + $0x2f4] sm:$0xf] %v3569_v62 }
 0x384   : > { %v8849_v44 = vpop.eup %8848  ;;  %v3374_v35 = vmul.f32 0.7978846, %v3342_v37  ;;  %v3247_v49 = vmul.f32 0.044715, %v9925_v45  ;;  %3634 = vst [vmem:[#allocation3 + $0x294] sm:$0xf] %v3568_v36  ;;  %v7597_v37 = vor.u32 %v8541_v16, %v7594_v38 }
 0x385   : > { %v3437_v1 = vadd.f32 1.0, %v8849_v44  ;;  %v2994_v29 = vpop.f32.mrf.mxu2  ;;  %5545 = vmatmul.bf16.gmra.mxu1 %v7737_v5  ;;  %3635 = vst [vmem:[#allocation3 + $0x2b8] sm:$0xf] %v3569_v62  ;;  %v3693_v16 = vld [vmem:[#allocation2 + $0xd0] sm:$0xff] }
 0x386   : > { %8850 = vtanh.f32 %v3374_v35  ;;  %v3279_v14 = vmul.f32 %v3247_v49, %v9925_v45  ;;  %v2995_v13 = vadd.f32 %v2994_v29, %v2906_v8  ;;  %3664 = vst [vmem:[#allocation3 + $0x258] sm:$0xf] %v3568_v36  ;;  %v3692_v29 = vld [vmem:[#allocation2 + $0xc8] sm:$0xff] }
 0x387   : > { %v3469_v47 = vmul.f32 %v3437_v1, %v3213_v32  ;;  %3665 = vst [vmem:[#allocation3 + $0x27c] sm:$0xf] %v3569_v62  ;;  %v2911_v1 = vadd.f32 %v9727_v31, %v9508_v6  ;;  %v7772_v5 = vld [vmem:[#allocation3 + $0x2d0] sm:$0xf]  ;;  %v9973_v6 = vpack.c.bf16 %v3692_v29, %v3692_v29 }
 0x388   : > { %v3311_v11 = vmul.f32 %v3279_v14, %v9925_v45  ;;  %v3084_v33 = vadd.f32 %v3083_v48, %v2995_v13  ;;  %v3215_v14 = vmul.f32 0.5, %v9925_v45  ;;  %3961 = vst [vmem:[#allocation3 + $0x158] sm:$0xf] %v9938_v23  ;;  %v3534_v39 = vld [vmem:[#allocation2 + $0x167] sm:$0xff] }
 0x389   : > { %3501 = vst [vmem:[#allocation2 + $0x170] sm:$0xff] %v3469_v47  ;;  %v9942_v58 = vpop.f32.mrf.mxu0  ;;  %v3088_v48 = vpop.f32.mrf.mxu3  ;;  %v8546_v49 = vld [vmem:[#allocation3 + $0x190] sm:$0xf0] }
 0x38a   : > { %v3343_v43 = vadd.f32 %v3311_v11, %v9925_v45  ;;  %v9946_v52 = vadd.f32 %v9905_v2, %v3084_v33  ;;  %v9948_v63 = vpop.f32.mrf.mxu1  ;;  %v3214_v2 = vmul.f32 0.5, %v9909_v60  ;;  %v7600_v60 = vld [vmem:[#allocation3 + $0x170] sm:$0xf]  ;;  %v8590_v13 = vld [vmem:[#allocation3 + $0x2f0] sm:$0xf0] }
 0x38b   : > { %v7773_v33 = vor.u32 %v8590_v13, %v7772_v5  ;;  %3991 = vst [vmem:[#allocation3 + $0x11c] sm:$0xf] %v9938_v23  ;;  %v3861_v13 = vld [vmem:[#allocation2 + $0xd1] sm:$0xff] }
 0x38c   : > { %v8851_v27 = vpop.eup %8850  ;;  %v3375_v22 = vmul.f32 0.7978846, %v3343_v43  ;;  %v3248_v17 = vmul.f32 0.044715, %v9946_v52  ;;  %5792 = vmatmul.bf16.gmra.mxu0 %v7605_v19  ;;  %3764 = vst [vmem:[#allocation3 + $0x1b4] sm:$0xf] %v9973_v6 }
 0x38d   : > { %v3438_v3 = vadd.f32 1.0, %v8851_v27  ;;  %v2996_v34 = vpop.f32.mrf.mxu2  ;;  %v3216_v23 = vmul.f32 0.5, %v9946_v52  ;;  %3794 = vst [vmem:[#allocation3 + $0x178] sm:$0xf] %v9973_v6 }
 0x38e   : > { %8852 = vtanh.f32 %v3375_v22  ;;  %v3280_v56 = vmul.f32 %v3248_v17, %v9946_v52  ;;  %v2997_v42 = vadd.f32 %v2996_v34, %v2908_v25  ;;  %v3570_v22 = vpack.c.bf16 %v3534_v39, %v3534_v39  ;;  %v7638_v34 = vld [vmem:[#allocation3 + $0x1dc] sm:$0xf0]  ;;  %3824 = vst [vmem:[#allocation3 + $0x13c] sm:$0xf] %v9973_v6 }
 0x38f   : > { %v3470_v55 = vmul.f32 %v3438_v3, %v3214_v2  ;;  %v7641_v19 = vor.u32 %v8551_v4, %v7638_v34  ;;  %v7674_v4 = vld [vmem:[#allocation3 + $0x224] sm:$0xf0] }
 0x390   : > { %v3312_v40 = vmul.f32 %v3280_v56, %v9946_v52  ;;  %v3086_v41 = vadd.f32 %v3085_v21, %v2997_v42  ;;  %v7601_v21 = vor.u32 %v8546_v49, %v7600_v60  ;;  %v3535_v43 = vld [vmem:[#allocation2 + $0x16f] sm:$0xff]  ;;  %3606 = vst [vmem:[#allocation3 + $0x318] sm:$0xf] %v3570_v22  ;;  %v2916_v49 = vadd.f32 %v9776_v61, %v9516_v15 }
 0x391   : > { %3502 = vst [vmem:[#allocation2 + $0x188] sm:$0xff] %v3470_v55  ;;  %v9958_v28 = vpop.f32.mrf.mxu0  ;;  %v3090_v10 = vpop.f32.mrf.mxu3  ;;  %v3571_v17 = vpack.c.bf16 %v3535_v43, %v3535_v43 }
 0x392   : > { %v3344_v44 = vadd.f32 %v3312_v40, %v9946_v52  ;;  %v9962_v8 = vadd.f32 %v9921_v18, %v3086_v41  ;;  %v9964_v35 = vpop.f32.mrf.mxu1  ;;  %5614 = vmatmul.bf16.gmra.mxu2 %v7597_v37  ;;  %5703 = vmatmul.bf16.gmra.mxu3 %v7601_v21  ;;  %3636 = vst [vmem:[#allocation3 + $0x2dc] sm:$0xf] %v3570_v22 }
 0x393   : > { %3607 = vst [vmem:[#allocation3 + $0x33c] sm:$0xf] %v3571_v17  ;;  %v3729_v37 = vpack.c.bf16 %v3693_v16, %v3693_v16  ;;  %v8550_v39 = vld [vmem:[#allocation3 + $0x1b4] sm:$0xf] }
 0x394   : > { %v8853_v32 = vpop.eup %8852  ;;  %v3376_v57 = vmul.f32 0.7978846, %v3344_v44  ;;  %v3249_v7 = vmul.f32 0.044715, %v9962_v8  ;;  %3637 = vst [vmem:[#allocation3 + $0x300] sm:$0xf] %v3571_v17 }
 0x395   : > { %v3439_v18 = vadd.f32 1.0, %v8853_v32  ;;  %v2999_v47 = vpop.f32.mrf.mxu2  ;;  %5550 = vmatmul.bf16.gmra.mxu1 %v7773_v33  ;;  %3666 = vst [vmem:[#allocation3 + $0x2a0] sm:$0xf] %v3570_v22  ;;  %v3860_v32 = vld [vmem:[#allocation2 + $0xc9] sm:$0xff]  ;;  %v3897_v33 = vpack.c.bf16 %v3861_v13, %v3861_v13 }
 0x396   : > { %8854 = vtanh.f32 %v3376_v57  ;;  %v3281_v11 = vmul.f32 %v3249_v7, %v9962_v8  ;;  %v3000_v53 = vadd.f32 %v2999_v47, %v2911_v1  ;;  %3667 = vst [vmem:[#allocation3 + $0x2c4] sm:$0xf] %v3571_v17  ;;  %v3217_v57 = vmul.f32 0.5, %v9962_v8 }
 0x397   : > { %v3471_v59 = vmul.f32 %v3439_v18, %v3215_v14  ;;  %3765 = vst [vmem:[#allocation3 + $0x1d8] sm:$0xf] %v3729_v37  ;;  %v3896_v61 = vpack.c.bf16 %v3860_v32, %v3860_v32 }
 0x398   : > { %v3313_v31 = vmul.f32 %v3281_v11, %v9962_v8  ;;  %v3089_v45 = vadd.f32 %v3088_v48, %v3000_v53  ;;  %v2913_v48 = vadd.f32 %v9751_v20, %v9513_v54  ;;  %3795 = vst [vmem:[#allocation3 + $0x19c] sm:$0xf] %v3729_v37  ;;  %v8673_v53 = vld [vmem:[#allocation9 + $0x108] sm:$0xff] }
 0x399   : > { %3503 = vst [vmem:[#allocation2 + $0x190] sm:$0xff] %v3471_v59  ;;  %v9977_v36 = vpop.f32.mrf.mxu0  ;;  %v3093_v26 = vpop.f32.mrf.mxu3  ;;  %5854 = vmatpush.bf16.msrb.mxu1 %v8673_v53  ;;  %v3862_v53 = vld [vmem:[#allocation2 + $0xe9] sm:$0xff] }
 0x39a   : > { %v3345_v62 = vadd.f32 %v3313_v31, %v9962_v8  ;;  %v9982_v27 = vadd.f32 %v9942_v58, %v3089_v45  ;;  %v9984_v25 = vpop.f32.mrf.mxu1  ;;  %v8599_v29 = vld [vmem:[#allocation3 + $0x338] sm:$0xf0]  ;;  %3825 = vst [vmem:[#allocation3 + $0x160] sm:$0xf] %v3729_v37 }
 0x39b   : > { %3932 = vst [vmem:[#allocation3 + $0x1b8] sm:$0xf] %v3896_v61 }
 0x39c   : > { %v8855_v24 = vpop.eup %8854  ;;  %v3377_v2 = vmul.f32 0.7978846, %v3345_v62  ;;  %v3250_v3 = vmul.f32 0.044715, %v9982_v27  ;;  %5797 = vmatmul.bf16.gmra.mxu0 %v7641_v19  ;;  %v10761_v62 = vld [vmem:[#allocation15_spill] sm:$0xff] }
 0x39d   : > { %v3440_v38 = vadd.f32 1.0, %v8855_v24  ;;  %v3001_v58 = vpop.f32.mrf.mxu2  ;;  %v2918_v22 = vadd.f32 %v9803_v0, %v10761_v62  ;;  %v3218_v24 = vmul.f32 0.5, %v9982_v27  ;;  %3933 = vst [vmem:[#allocation3 + $0x1dc] sm:$0xf] %v3897_v33  ;;  %v3863_v62 = vld [vmem:[#allocation2 + $0xf1] sm:$0xff] }
 0x39e   : > { %8856 = vtanh.f32 %v3377_v2  ;;  %v3282_v56 = vmul.f32 %v3250_v3, %v9982_v27  ;;  %v3002_v42 = vadd.f32 %v3001_v58, %v2913_v48  ;;  %v7630_v2 = vld [vmem:[#allocation3 + $0x1d4] sm:$0xf0]  ;;  %3962 = vst [vmem:[#allocation3 + $0x17c] sm:$0xf] %v3896_v61 }
 0x39f   : > { %v3472_v55 = vmul.f32 %v3440_v38, %v3216_v23  ;;  %v7633_v3 = vor.u32 %v8550_v39, %v7630_v2  ;;  %3963 = vst [vmem:[#allocation3 + $0x1a0] sm:$0xf] %v3897_v33  ;;  %v3898_v2 = vpack.c.bf16 %v3862_v53, %v3862_v53 }
 0x3a0   : > { %v3314_v54 = vmul.f32 %v3282_v56, %v9982_v27  ;;  %v3091_v20 = vadd.f32 %v3090_v10, %v3002_v42  ;;  %v3537_v38 = vld [vmem:[#allocation2 + $0x18f] sm:$0xff]  ;;  %v8560_v42 = vld [vmem:[#allocation3 + $0x204] sm:$0xf]  ;;  %3992 = vst [vmem:[#allocation3 + $0x140] sm:$0xf] %v3896_v61 }
 0x3a1   : > { %3504 = vst [vmem:[#allocation2 + $0x1a8] sm:$0xff] %v3472_v55  ;;  %v3095_v60 = vpop.f32.mrf.mxu3  ;;  %v3184_v1 = vpop.f32.mrf.mxu0  ;;  %v7677_v16 = vor.u32 %v8560_v42, %v7674_v4  ;;  %v3573_v19 = vpack.c.bf16 %v3537_v38, %v3537_v38 }
 0x3a2   : > { %v3346_v52 = vadd.f32 %v3314_v54, %v9982_v27  ;;  %v9995_v40 = vadd.f32 %v9958_v28, %v3091_v20  ;;  %v9997_v41 = vpop.f32.mrf.mxu1  ;;  %v7808_v28 = vld [vmem:[#allocation3 + $0x318] sm:$0xf]  ;;  %5619 = vmatmul.bf16.gmra.mxu2 %v7633_v3  ;;  %3993 = vst [vmem:[#allocation3 + $0x164] sm:$0xf] %v3897_v33 }
 0x3a3   : > { %v7809_v5 = vor.u32 %v8599_v29, %v7808_v28  ;;  %v7636_v37 = vld [vmem:[#allocation3 + $0x1b8] sm:$0xf]  ;;  %3609 = vst [vmem:[#allocation3 + $0x384] sm:$0xf] %v3573_v19  ;;  %v3695_v29 = vld [vmem:[#allocation2 + $0xf0] sm:$0xff] }
 0x3a4   : > { %v8857_v44 = vpop.eup %8856  ;;  %v3378_v21 = vmul.f32 0.7978846, %v3346_v52  ;;  %v3251_v10 = vmul.f32 0.044715, %v9995_v40  ;;  %3639 = vst [vmem:[#allocation3 + $0x348] sm:$0xf] %v3573_v19 }
 0x3a5   : > { %v3441_v7 = vadd.f32 1.0, %v8857_v44  ;;  %v3004_v14 = vpop.f32.mrf.mxu2  ;;  %5555 = vmatmul.bf16.gmra.mxu1 %v7809_v5  ;;  %3669 = vst [vmem:[#allocation3 + $0x30c] sm:$0xf] %v3573_v19 }
 0x3a6   : > { %8858 = vtanh.f32 %v3378_v21  ;;  %v3283_v18 = vmul.f32 %v3251_v10, %v9995_v40  ;;  %v3005_v47 = vadd.f32 %v3004_v14, %v2916_v49  ;;  %v10763_v49 = vld [vmem:[#allocation14_spill] sm:$0xff]  ;;  %v8555_v10 = vld [vmem:[#allocation3 + $0x1d8] sm:$0xf0]  ;;  %3934 = vst [vmem:[#allocation3 + $0x200] sm:$0xf] %v3898_v2 }
 0x3a7   : > { %v3473_v11 = vmul.f32 %v3441_v7, %v3217_v57  ;;  %v2921_v21 = vadd.f32 %v9824_v50, %v10763_v49  ;;  %v3694_v57 = vld [vmem:[#allocation2 + $0xe8] sm:$0xff]  ;;  %v3219_v7 = vmul.f32 0.5, %v9995_v40  ;;  %3964 = vst [vmem:[#allocation3 + $0x1c4] sm:$0xf] %v3898_v2 }
 0x3a8   : > { %v3315_v15 = vmul.f32 %v3283_v18, %v9995_v40  ;;  %v3094_v8 = vadd.f32 %v3093_v26, %v3005_v47  ;;  %v3536_v26 = vld [vmem:[#allocation2 + $0x187] sm:$0xff]  ;;  %v3730_v50 = vpack.c.bf16 %v3694_v57, %v3694_v57  ;;  %3994 = vst [vmem:[#allocation3 + $0x188] sm:$0xf] %v3898_v2 }
 0x3a9   : > { %3505 = vst [vmem:[#allocation2 + $0x1b0] sm:$0xff] %v3473_v11  ;;  %v3187_v58 = vpop.f32.mrf.mxu0  ;;  %v3572_v0 = vpack.c.bf16 %v3536_v26, %v3536_v26  ;;  %v3538_v42 = vld [vmem:[#allocation2 + $0x1a7] sm:$0xff] }
 0x3aa   : > { %v3347_v59 = vadd.f32 %v3315_v15, %v9995_v40  ;;  %v10009_v31 = vadd.f32 %v9977_v36, %v3094_v8  ;;  %v10011_v45 = vpop.f32.mrf.mxu1  ;;  %v3098_v36 = vpop.f32.mrf.mxu3  ;;  %v3731_v40 = vpack.c.bf16 %v3695_v29, %v3695_v29  ;;  %3766 = vst [vmem:[#allocation3 + $0x1fc] sm:$0xf] %v3730_v50 }
 0x3ab   : > { %3608 = vst [vmem:[#allocation3 + $0x360] sm:$0xf] %v3572_v0 }
 0x3ac   : > { %v8859_v43 = vpop.eup %8858  ;;  %v3379_v17 = vmul.f32 0.7978846, %v3347_v59  ;;  %v3252_v34 = vmul.f32 0.044715, %v10009_v31  ;;  %5802 = vmatmul.bf16.gmra.mxu0 %v7677_v16  ;;  %3638 = vst [vmem:[#allocation3 + $0x324] sm:$0xf] %v3572_v0 }
 0x3ad   : > { %v3442_v48 = vadd.f32 1.0, %v8859_v43  ;;  %v3006_v6 = vpop.f32.mrf.mxu2  ;;  %3668 = vst [vmem:[#allocation3 + $0x2e8] sm:$0xf] %v3572_v0  ;;  %v3220_v38 = vmul.f32 0.5, %v10009_v31  ;;  %v7710_v16 = vld [vmem:[#allocation3 + $0x26c] sm:$0xf0] }
 0x3ae   : > { %8860 = vtanh.f32 %v3379_v17  ;;  %v3007_v23 = vadd.f32 %v3006_v6, %v2918_v22  ;;  %v3284_v27 = vmul.f32 %v3252_v34, %v10009_v31  ;;  %v10764_v22 = vld [vmem:[#allocation16_spill] sm:$0xff]  ;;  %3767 = vst [vmem:[#allocation3 + $0x220] sm:$0xf] %v3731_v40  ;;  %v3899_v34 = vpack.c.bf16 %v3863_v62, %v3863_v62 }
 0x3af   : > { %v3474_v56 = vmul.f32 %v3442_v48, %v3218_v24  ;;  %v2923_v17 = vadd.f32 %v9842_v12, %v10764_v22  ;;  %v8608_v24 = vld [vmem:[#allocation3 + $0x380] sm:$0xf0]  ;;  %3796 = vst [vmem:[#allocation3 + $0x1c0] sm:$0xf] %v3730_v50 }
 0x3b0   : > { %v3096_v55 = vadd.f32 %v3095_v60, %v3007_v23  ;;  %v3316_v54 = vmul.f32 %v3284_v27, %v10009_v31  ;;  %3797 = vst [vmem:[#allocation3 + $0x1e4] sm:$0xf] %v3731_v40 }
 0x3b1   : > { %3506 = vst [vmem:[#allocation2 + $0x1c8] sm:$0xff] %v3474_v56  ;;  %v3189_v11 = vpop.f32.mrf.mxu0  ;;  %v10043_v56 = vld [vmem:[%s10738_s4] ss:$0 sm:$0xff] }
 0x3b2   : > { %v10019_v20 = vadd.f32 %v3184_v1, %v3096_v55  ;;  %v10021_v52 = vpop.f32.mrf.mxu1  ;;  %v3348_v60 = vadd.f32 %v3316_v54, %v10009_v31  ;;  %v7637_v1 = vor.u32 %v8555_v10, %v7636_v37  ;;  %v3100_v15 = vpop.f32.mrf.mxu3  ;;  %v7844_v43 = vld [vmem:[#allocation3 + $0x360] sm:$0xf]  ;;  %3826 = vst [vmem:[#allocation3 + $0x184] sm:$0xf] %v3730_v50  ;;  %v8569_v31 = vld [vmem:[#allocation3 + $0x24c] sm:$0xf]  ;;  %v5502_v57 = vadd.f32 %v10043_v56, %v9863_v9 }
 0x3b3   : > { %10762 = vst [vmem:[#allocation17_spill] sm:$0xff] %v10021_v52  ;;  %v7845_v48 = vor.u32 %v8608_v24, %v7844_v43  ;;  %v7713_v37 = vor.u32 %v8569_v31, %v7710_v16  ;;  %v3539_v10 = vld [vmem:[#allocation2 + $0x1af] sm:$0xff]  ;;  %v7672_v9 = vld [vmem:[#allocation3 + $0x200] sm:$0xf]  ;;  %v7746_v16 = vld [vmem:[#allocation3 + $0x2b4] sm:$0xf0] }
 0x3b4   : > { %v8861_v44 = vpop.eup %8860  ;;  %v3253_v32 = vmul.f32 0.044715, %v10019_v20  ;;  %v3380_v18 = vmul.f32 0.7978846, %v3348_v60  ;;  %5708 = vmatmul.bf16.gmra.mxu3 %v7637_v1  ;;  %3827 = vst [vmem:[#allocation3 + $0x1a8] sm:$0xf] %v3731_v40  ;;  %v3574_v1 = vpack.c.bf16 %v3538_v42, %v3538_v42 }
 0x3b5   : > { %v3443_v28 = vadd.f32 1.0, %v8861_v44  ;;  %v3009_v14 = vpop.f32.mrf.mxu2  ;;  %5560 = vmatmul.bf16.gmra.mxu1 %v7845_v48  ;;  %3935 = vst [vmem:[#allocation3 + $0x224] sm:$0xf] %v3899_v34  ;;  %v8559_v44 = vld [vmem:[#allocation3 + $0x1fc] sm:$0xf]  ;;  %v3221_v29 = vmul.f32 0.5, %v10019_v20 }
 0x3b6   : > { %v3285_v5 = vmul.f32 %v3253_v32, %v10019_v20  ;;  %v3010_v13 = vadd.f32 %v3009_v14, %v2921_v21  ;;  %8862 = vtanh.f32 %v3380_v18  ;;  %v7666_v49 = vld [vmem:[#allocation3 + $0x21c] sm:$0xf0]  ;;  %3965 = vst [vmem:[#allocation3 + $0x1e8] sm:$0xf] %v3899_v34  ;;  %v8578_v31 = vld [vmem:[#allocation3 + $0x294] sm:$0xf] }
 0x3b7   : > { %v3475_v47 = vmul.f32 %v3443_v28, %v3219_v7  ;;  %v7669_v7 = vor.u32 %v8559_v44, %v7666_v49  ;;  %3995 = vst [vmem:[#allocation3 + $0x1ac] sm:$0xf] %v3899_v34  ;;  %v3864_v34 = vld [vmem:[#allocation2 + $0x109] sm:$0xff] }
 0x3b8   : > { %v3317_v61 = vmul.f32 %v3285_v5, %v10019_v20  ;;  %v3099_v8 = vadd.f32 %v3098_v36, %v3010_v13  ;;  %3610 = vst [vmem:[#allocation3 + $0x3a8] sm:$0xf] %v3574_v1  ;;  %v3900_v42 = vpack.c.bf16 %v3864_v34, %v3864_v34 }
 0x3b9   : > { %3507 = vst [vmem:[#allocation2 + $0x1d0] sm:$0xff] %v3475_v47  ;;  %v10046_v55 = vpop.f32.mrf.mxu0  ;;  %5624 = vmatmul.bf16.gmra.mxu2 %v7669_v7  ;;  %v3575_v47 = vpack.c.bf16 %v3539_v10, %v3539_v10 }
 0x3ba   : > { %v3349_v33 = vadd.f32 %v3317_v61, %v10019_v20  ;;  %v10031_v59 = vadd.f32 %v3187_v58, %v3099_v8  ;;  %v10033_v39 = vpop.f32.mrf.mxu1  ;;  %v5679_v19 = vpop.f32.mrf.mxu3  ;;  %v3696_v61 = vld [vmem:[#allocation2 + $0x108] sm:$0xff]  ;;  %v8672_v20 = vld [vmem:[#allocation9 + $0x100] sm:$0xff]  ;;  %3640 = vst [vmem:[#allocation3 + $0x36c] sm:$0xf] %v3574_v1 }
 0x3bb   : > { %3611 = vst [vmem:[#allocation3 + $0x3cc] sm:$0xf] %v3575_v47  ;;  %5855 = vmatpush.bf16.msrb.mxu1 %v8672_v20  ;;  %v3732_v22 = vpack.c.bf16 %v3696_v61, %v3696_v61 }
 0x3bc   : > { %v3381_v26 = vmul.f32 0.7978846, %v3349_v33  ;;  %v3254_v6 = vmul.f32 0.044715, %v10031_v59  ;;  %v8863_v3 = vpop.eup %8862  ;;  %5807 = vmatmul.bf16.gmra.mxu0 %v7713_v37  ;;  %v8564_v8 = vld [vmem:[#allocation3 + $0x220] sm:$0xf0] }
 0x3bd   : > { %v3011_v36 = vpop.f32.mrf.mxu2  ;;  %v3444_v58 = vadd.f32 1.0, %v8863_v3  ;;  %v3697_v33 = vld [vmem:[#allocation2 + $0x110] sm:$0xff]  ;;  %v7673_v53 = vor.u32 %v8564_v8, %v7672_v9  ;;  %3641 = vst [vmem:[#allocation3 + $0x390] sm:$0xf] %v3575_v47 }
 0x3be   : > { %8864 = vtanh.f32 %v3381_v26  ;;  %v3012_v23 = vadd.f32 %v3011_v36, %v2923_v17  ;;  %v3286_v12 = vmul.f32 %v3254_v6, %v10031_v59  ;;  %v3733_v24 = vpack.c.bf16 %v3697_v33, %v3697_v33  ;;  %3670 = vst [vmem:[#allocation3 + $0x330] sm:$0xf] %v3574_v1  ;;  %v3699_v9 = vld [vmem:[#allocation2 + $0x130] sm:$0xff] }
 0x3bf   : > { %v3476_v4 = vmul.f32 %v3444_v58, %v3220_v38  ;;  %v3222_v36 = vmul.f32 0.5, %v10031_v59  ;;  %3671 = vst [vmem:[#allocation3 + $0x354] sm:$0xf] %v3575_v47  ;;  %v3865_v38 = vld [vmem:[#allocation2 + $0x111] sm:$0xff]  ;;  %v7880_v58 = vld [vmem:[#allocation3 + $0x3a8] sm:$0xf] }
 0x3c0   : > { %v3101_v0 = vadd.f32 %v3100_v15, %v3012_v23  ;;  %v3318_v27 = vmul.f32 %v3286_v12, %v10031_v59  ;;  %3768 = vst [vmem:[#allocation3 + $0x244] sm:$0xf] %v3732_v22  ;;  %v3698_v47 = vld [vmem:[#allocation2 + $0x128] sm:$0xff] }
 0x3c1   : > { %3508 = vst [vmem:[#allocation2 + $0x1e8] sm:$0xff] %v3476_v4  ;;  %v10064_v17 = vpop.f32.mrf.mxu0  ;;  %v3901_v4 = vpack.c.bf16 %v3865_v38, %v3865_v38  ;;  %v3734_v8 = vpack.c.bf16 %v3698_v47, %v3698_v47  ;;  %v8587_v38 = vld [vmem:[#allocation3 + $0x2dc] sm:$0xf] }
 0x3c2   : > { %v10048_v54 = vadd.f32 %v3189_v11, %v3101_v0  ;;  %v3350_v21 = vadd.f32 %v3318_v27, %v10031_v59  ;;  %v10051_v60 = vpop.f32.mrf.mxu1  ;;  %v10062_v62 = vpop.f32.mrf.mxu3  ;;  %3769 = vst [vmem:[#allocation3 + $0x268] sm:$0xf] %v3733_v24  ;;  %v8617_v12 = vld [vmem:[#allocation3 + $0x3c8] sm:$0xf0]  ;;  %v5507_v59 = vadd.f32 %v10043_v56, %v9911_v51 }
 0x3c3   : > { %10765 = vst [vmem:[#allocation18_spill] sm:$0xff] %v10051_v60  ;;  %v7881_v0 = vor.u32 %v8617_v12, %v7880_v58  ;;  %v7782_v58 = vld [vmem:[#allocation3 + $0x2fc] sm:$0xf0]  ;;  %v8682_v60 = vld [vmem:[#allocation9 + $0x150] sm:$0xff] }
 0x3c4   : > { %v8865_v32 = vpop.eup %8864  ;;  %v3255_v28 = vmul.f32 0.044715, %v10048_v54  ;;  %v3382_v18 = vmul.f32 0.7978846, %v3350_v21  ;;  %5713 = vmatmul.bf16.gmra.mxu3 %v7673_v53  ;;  %3798 = vst [vmem:[#allocation3 + $0x208] sm:$0xf] %v3732_v22  ;;  %v7749_v21 = vor.u32 %v8578_v31, %v7746_v16  ;;  %v3735_v53 = vpack.c.bf16 %v3699_v9, %v3699_v9 }
 0x3c5   : > { %v3445_v14 = vadd.f32 1.0, %v8865_v32  ;;  %v5590_v5 = vpop.f32.mrf.mxu2  ;;  %3799 = vst [vmem:[#allocation3 + $0x22c] sm:$0xf] %v3733_v24  ;;  %5565 = vmatmul.bf16.gmra.mxu1 %v7881_v0  ;;  %v3223_v37 = vmul.f32 0.5, %v10048_v54  ;;  %v3540_v32 = vld [vmem:[#allocation2 + $0x1c7] sm:$0xff] }
 0x3c6   : > { %v3287_v13 = vmul.f32 %v3255_v28, %v10048_v54  ;;  %v5591_v50 = vadd.f32 %v5590_v5, %v5502_v57  ;;  %8866 = vtanh.f32 %v3382_v18  ;;  %3828 = vst [vmem:[#allocation3 + $0x1cc] sm:$0xf] %v3732_v22  ;;  %v3541_v57 = vld [vmem:[#allocation2 + $0x1cf] sm:$0xff]  ;;  %v3576_v18 = vpack.c.bf16 %v3540_v32, %v3540_v32 }
 0x3c7   : > { %v3477_v11 = vmul.f32 %v3445_v14, %v3221_v29  ;;  %3829 = vst [vmem:[#allocation3 + $0x1f0] sm:$0xf] %v3733_v24  ;;  %v8568_v1 = vld [vmem:[#allocation3 + $0x244] sm:$0xf]  ;;  %v3577_v5 = vpack.c.bf16 %v3541_v57, %v3541_v57  ;;  %v3866_v22 = vld [vmem:[#allocation2 + $0x129] sm:$0xff]  ;;  %v5512_v24 = vadd.f32 %v10043_v56, %v9948_v63 }
 0x3c8   : > { %v3319_v15 = vmul.f32 %v3287_v13, %v10048_v54  ;;  %v10059_v40 = vadd.f32 %v5679_v19, %v5591_v50  ;;  %3936 = vst [vmem:[#allocation3 + $0x248] sm:$0xf] %v3900_v42  ;;  %v8687_v13 = vld [vmem:[#allocation9 + $0x178] sm:$0xff]  ;;  %v3542_v31 = vld [vmem:[#allocation2 + $0x1e7] sm:$0xff] }
 0x3c9   : > { %3509 = vst [vmem:[#allocation2 + $0x1f0] sm:$0xff] %v3477_v11  ;;  %v10074_v49 = vpop.f32.mrf.mxu0  ;;  %v7702_v51 = vld [vmem:[#allocation3 + $0x264] sm:$0xf0]  ;;  %5937 = vmatpush.bf16.msra.mxu2 %v8687_v13 }
 0x3ca   : > { %v3351_v43 = vadd.f32 %v3319_v15, %v10048_v54  ;;  %v10066_v2 = vpop.f32.mrf.mxu1  ;;  %v5684_v19 = vpop.f32.mrf.mxu3  ;;  %3937 = vst [vmem:[#allocation3 + $0x26c] sm:$0xf] %v3901_v4  ;;  %v7705_v14 = vor.u32 %v8568_v1, %v7702_v51 }
 0x3cb   : > { %3966 = vst [vmem:[#allocation3 + $0x20c] sm:$0xf] %v3900_v42 }
 0x3cc   : > { %v3383_v26 = vmul.f32 0.7978846, %v3351_v43  ;;  %v8867_v48 = vpop.eup %8866  ;;  %5812 = vmatmul.bf16.gmra.mxu0 %v7749_v21  ;;  %5629 = vmatmul.bf16.gmra.mxu2 %v7705_v14  ;;  %3967 = vst [vmem:[#allocation3 + $0x230] sm:$0xf] %v3901_v4  ;;  %v3701_v14 = vld [vmem:[#allocation2 + $0x150] sm:$0xff] }
 0x3cd   : > { %v10068_v6 = vpop.f32.mrf.mxu2  ;;  %v3446_v3 = vadd.f32 1.0, %v8867_v48  ;;  %3996 = vst [vmem:[#allocation3 + $0x1d0] sm:$0xf] %v3900_v42  ;;  %v7785_v42 = vor.u32 %v8587_v38, %v7782_v58 }
 0x3ce   : > { %8868 = vtanh.f32 %v3383_v26  ;;  %3997 = vst [vmem:[#allocation3 + $0x1f4] sm:$0xf] %v3901_v4  ;;  %v3867_v26 = vld [vmem:[#allocation2 + $0x131] sm:$0xff] }
 0x3cf   : > { %v3478_v23 = vmul.f32 %v3446_v3, %v3222_v36  ;;  %v7708_v11 = vld [vmem:[#allocation3 + $0x248] sm:$0xf]  ;;  %3612 = vst [vmem:[#allocation3 + $0x3f0] sm:$0xf] %v3576_v18  ;;  %v3902_v3 = vpack.c.bf16 %v3866_v22, %v3866_v22  ;;  %v8695_v4 = vld [vmem:[#allocation9 + $0x1b8] sm:$0xff] }
 0x3d0   : > { %3613 = vst [vmem:[#allocation3 + $0x414] sm:$0xf] %v3577_v5  ;;  %v3543_v63 = vld [vmem:[#allocation2 + $0x1ef] sm:$0xff]  ;;  %6026 = vmatpush.bf16.msra.mxu3 %v8695_v4 }
 0x3d1   : > { %3510 = vst [vmem:[#allocation2 + $0x208] sm:$0xff] %v3478_v23  ;;  %v8573_v61 = vld [vmem:[#allocation3 + $0x268] sm:$0xf0]  ;;  %v10084_v33 = vpop.f32.mrf.mxu0  ;;  %v3903_v23 = vpack.c.bf16 %v3867_v26, %v3867_v26  ;;  %v8596_v26 = vld [vmem:[#allocation3 + $0x324] sm:$0xf]  ;;  %v3703_v4 = vld [vmem:[#allocation2 + $0x170] sm:$0xff] }
 0x3d2   : > { %v10076_v29 = vpop.f32.mrf.mxu1  ;;  %v10080_v50 = vpop.f32.mrf.mxu3  ;;  %v7709_v20 = vor.u32 %v8573_v61, %v7708_v11  ;;  %3642 = vst [vmem:[#allocation3 + $0x3b4] sm:$0xf] %v3576_v18  ;;  %v3737_v11 = vpack.c.bf16 %v3701_v14, %v3701_v14  ;;  %v3868_v61 = vld [vmem:[#allocation2 + $0x149] sm:$0xff] }
 0x3d3   : > { %10766 = vst [vmem:[#allocation19_spill] sm:$0xff] %v10076_v29  ;;  %v8683_v29 = vld [vmem:[#allocation9 + $0x158] sm:$0xff] }
 0x3d4   : > { %v8869_v27 = vpop.eup %8868  ;;  %3643 = vst [vmem:[#allocation3 + $0x3d8] sm:$0xf] %v3577_v5  ;;  %5718 = vmatmul.bf16.gmra.mxu3 %v7709_v20  ;;  %v5517_v20 = vadd.f32 %v10043_v56, %v9984_v25 }
 0x3d5   : > { %v3447_v44 = vadd.f32 1.0, %v8869_v27  ;;  %v5595_v10 = vpop.f32.mrf.mxu2  ;;  %3672 = vst [vmem:[#allocation3 + $0x378] sm:$0xf] %v3576_v18 }
 0x3d6   : > { %v5596_v7 = vadd.f32 %v5595_v10, %v5507_v59  ;;  %3673 = vst [vmem:[#allocation3 + $0x39c] sm:$0xf] %v3577_v5  ;;  %v7916_v48 = vld [vmem:[#allocation3 + $0x3f0] sm:$0xf]  ;;  %v8703_v59 = vld [vmem:[#allocation9 + $0x1f8] sm:$0xff]  ;;  %v3578_v10 = vpack.c.bf16 %v3542_v31, %v3542_v31 }
 0x3d7   : > { %v3479_v28 = vmul.f32 %v3447_v44, %v3223_v37  ;;  %3770 = vst [vmem:[#allocation3 + $0x28c] sm:$0xf] %v3734_v8  ;;  %v8626_v36 = vld [vmem:[#allocation3 + $0x410] sm:$0xf0]  ;;  %6115 = vmatpush.bf16.msra.mxu0 %v8703_v59  ;;  %v8711_v37 = vld [vmem:[#allocation9 + $0x238] sm:$0xff] }
 0x3d8   : > { %v10078_v54 = vadd.f32 %v5684_v19, %v5596_v7  ;;  %3771 = vst [vmem:[#allocation3 + $0x2b0] sm:$0xf] %v3735_v53  ;;  %v7917_v34 = vor.u32 %v8626_v36, %v7916_v48  ;;  %v3579_v7 = vpack.c.bf16 %v3543_v63, %v3543_v63  ;;  %6204 = vmatpush.bf16.msra.mxu1 %v8711_v37 }
 0x3d9   : > { %3511 = vst [vmem:[#allocation2 + $0x210] sm:$0xff] %v3479_v28  ;;  %v10090_v16 = vpop.f32.mrf.mxu0  ;;  %v3700_v28 = vld [vmem:[#allocation2 + $0x148] sm:$0xff] }
 0x3da   : > { %v10086_v43 = vpop.f32.mrf.mxu1  ;;  %3800 = vst [vmem:[#allocation3 + $0x250] sm:$0xf] %v3734_v8  ;;  %v5689_v0 = vpop.f32.mrf.mxu3  ;;  %5570 = vmatmul.bf16.gmra.mxu1 %v7917_v34  ;;  %v3736_v13 = vpack.c.bf16 %v3700_v28, %v3700_v28  ;;  %v7818_v34 = vld [vmem:[#allocation3 + $0x344] sm:$0xf0]  ;;  %v3871_v28 = vld [vmem:[#allocation2 + $0x171] sm:$0xff] }
 0x3db   : > { %3801 = vst [vmem:[#allocation3 + $0x274] sm:$0xf] %v3735_v53 }
 0x3dc   : > { %3830 = vst [vmem:[#allocation3 + $0x214] sm:$0xf] %v3734_v8  ;;  %5817 = vmatmul.bf16.gmra.mxu0 %v7785_v42  ;;  %v3869_v8 = vld [vmem:[#allocation2 + $0x151] sm:$0xff] }
 0x3dd   : > { %v10082_v15 = vpop.f32.mrf.mxu2  ;;  %3831 = vst [vmem:[#allocation3 + $0x238] sm:$0xf] %v3735_v53  ;;  %v3905_v58 = vpack.c.bf16 %v3869_v8, %v3869_v8  ;;  %v8686_v42 = vld [vmem:[#allocation9 + $0x170] sm:$0xff] }
 0x3de   : > { %3938 = vst [vmem:[#allocation3 + $0x290] sm:$0xf] %v3902_v3  ;;  %v8577_v44 = vld [vmem:[#allocation3 + $0x28c] sm:$0xf]  ;;  %5938 = vmatpush.bf16.msra.mxu2 %v8686_v42 }
 0x3df   : > { %3939 = vst [vmem:[#allocation3 + $0x2b4] sm:$0xf] %v3903_v23  ;;  %v7738_v21 = vld [vmem:[#allocation3 + $0x2ac] sm:$0xf0] }
 0x3e0   : > { %3968 = vst [vmem:[#allocation3 + $0x254] sm:$0xf] %v3902_v3  ;;  %v7741_v57 = vor.u32 %v8577_v44, %v7738_v21  ;;  %v3739_v21 = vpack.c.bf16 %v3703_v4, %v3703_v4 }
 0x3e1   : > { %3969 = vst [vmem:[#allocation3 + $0x278] sm:$0xf] %v3903_v23  ;;  %v10100_v9 = vpop.f32.mrf.mxu0 }
 0x3e2   : > { %v10094_v32 = vpop.f32.mrf.mxu1  ;;  %3998 = vst [vmem:[#allocation3 + $0x218] sm:$0xf] %v3902_v3  ;;  %5634 = vmatmul.bf16.gmra.mxu2 %v7741_v57  ;;  %v10098_v51 = vpop.f32.mrf.mxu3  ;;  %v3904_v3 = vpack.c.bf16 %v3868_v61, %v3868_v61  ;;  %v7428_v61 = vld [vmem:[#allocation3 + $0x10] sm:$0xf] }
 0x3e3   : > { %3999 = vst [vmem:[#allocation3 + $0x23c] sm:$0xf] %v3903_v23 }
 0x3e4   : > { %3614 = vst [vmem:[#allocation3 + $0x438] sm:$0xf] %v3578_v10 }
 0x3e5   : > { %v5600_v12 = vpop.f32.mrf.mxu2  ;;  %v7744_v18 = vld [vmem:[#allocation3 + $0x290] sm:$0xf]  ;;  %3615 = vst [vmem:[#allocation3 + $0x45c] sm:$0xf] %v3579_v7 }
 0x3e6   : > { %v5601_v27 = vadd.f32 %v5600_v12, %v5512_v24  ;;  %v8582_v5 = vld [vmem:[#allocation3 + $0x2b0] sm:$0xf0]  ;;  %3644 = vst [vmem:[#allocation3 + $0x3fc] sm:$0xf] %v3578_v10  ;;  %v7821_v12 = vor.u32 %v8596_v26, %v7818_v34 }
 0x3e7   : > { %v7745_v47 = vor.u32 %v8582_v5, %v7744_v18  ;;  %3645 = vst [vmem:[#allocation3 + $0x420] sm:$0xf] %v3579_v7  ;;  %v3705_v26 = vld [vmem:[#allocation2 + $0x190] sm:$0xff] }
 0x3e8   : > { %v10092_v19 = vadd.f32 %v5689_v0, %v5601_v27  ;;  %3674 = vst [vmem:[#allocation3 + $0x3c0] sm:$0xf] %v3578_v10  ;;  %v3702_v0 = vld [vmem:[#allocation2 + $0x168] sm:$0xff]  ;;  %v8694_v34 = vld [vmem:[#allocation9 + $0x1b0] sm:$0xff]  ;;  %v3741_v4 = vpack.c.bf16 %v3705_v26, %v3705_v26 }
 0x3e9   : > { %5723 = vmatmul.bf16.gmra.mxu3 %v7745_v47  ;;  %3675 = vst [vmem:[#allocation3 + $0x3e4] sm:$0xf] %v3579_v7  ;;  %v10108_v31 = vpop.f32.mrf.mxu0  ;;  %v3738_v37 = vpack.c.bf16 %v3702_v0, %v3702_v0  ;;  %v3870_v7 = vld [vmem:[#allocation2 + $0x169] sm:$0xff]  ;;  %v3907_v47 = vpack.c.bf16 %v3871_v28, %v3871_v28 }
 0x3ea   : > { %3772 = vst [vmem:[#allocation3 + $0x2d4] sm:$0xf] %v3736_v13  ;;  %v5694_v48 = vpop.f32.mrf.mxu3  ;;  %v3906_v5 = vpack.c.bf16 %v3870_v7, %v3870_v7  ;;  %6027 = vmatpush.bf16.msra.mxu3 %v8694_v34  ;;  %v3873_v7 = vld [vmem:[#allocation2 + $0x191] sm:$0xff] }
 0x3eb   : > { %v7952_v22 = vld [vmem:[#allocation3 + $0x438] sm:$0xf]  ;;  %3773 = vst [vmem:[#allocation3 + $0x2f8] sm:$0xf] %v3737_v11 }
 0x3ec   : > { %v8635_v36 = vld [vmem:[#allocation3 + $0x458] sm:$0xf0]  ;;  %3802 = vst [vmem:[#allocation3 + $0x298] sm:$0xf] %v3736_v13  ;;  %5822 = vmatmul.bf16.gmra.mxu0 %v7821_v12 }
 0x3ed   : > { %v10096_v1 = vpop.f32.mrf.mxu2  ;;  %v7953_v38 = vor.u32 %v8635_v36, %v7952_v22  ;;  %3803 = vst [vmem:[#allocation3 + $0x2bc] sm:$0xf] %v3737_v11  ;;  %v3704_v22 = vld [vmem:[#allocation2 + $0x188] sm:$0xff] }
 0x3ee   : > { %3832 = vst [vmem:[#allocation3 + $0x25c] sm:$0xf] %v3736_v13  ;;  %v3740_v0 = vpack.c.bf16 %v3704_v22, %v3704_v22  ;;  %v3707_v22 = vld [vmem:[#allocation2 + $0x1b0] sm:$0xff] }
 0x3ef   : > { %5575 = vmatmul.bf16.gmra.mxu1 %v7953_v38  ;;  %3833 = vst [vmem:[#allocation3 + $0x280] sm:$0xf] %v3737_v11  ;;  %v5522_v11 = vadd.f32 %v10043_v56, %v10011_v45  ;;  %v8702_v38 = vld [vmem:[#allocation9 + $0x1f0] sm:$0xff]  ;;  %v3743_v34 = vpack.c.bf16 %v3707_v22, %v3707_v22  ;;  %v3708_v22 = vld [vmem:[#allocation2 + $0x1c8] sm:$0xff] }
 0x3f0   : > { %3940 = vst [vmem:[#allocation3 + $0x2d8] sm:$0xf] %v3904_v3  ;;  %6116 = vmatpush.bf16.msra.mxu0 %v8702_v38 }
 0x3f1   : > { %3941 = vst [vmem:[#allocation3 + $0x2fc] sm:$0xf] %v3905_v58  ;;  %v8586_v27 = vld [vmem:[#allocation3 + $0x2d4] sm:$0xf]  ;;  %v10120_v45 = vpop.f32.mrf.mxu0 }
 0x3f2   : > { %v10104_v53 = vpop.f32.mrf.mxu1  ;;  %v7774_v59 = vld [vmem:[#allocation3 + $0x2f4] sm:$0xf0]  ;;  %3970 = vst [vmem:[#allocation3 + $0x29c] sm:$0xf] %v3904_v3  ;;  %v10114_v57 = vpop.f32.mrf.mxu3 }
 0x3f3   : > { %v7777_v44 = vor.u32 %v8586_v27, %v7774_v59  ;;  %3971 = vst [vmem:[#allocation3 + $0x2c0] sm:$0xf] %v3905_v58  ;;  %v8710_v27 = vld [vmem:[#allocation9 + $0x230] sm:$0xff] }
 0x3f4   : > { %10768 = vst [vmem:[#allocation14_spill] sm:$0xff] %v10114_v57  ;;  %6205 = vmatpush.bf16.msra.mxu1 %v8710_v27  ;;  %v3874_v27 = vld [vmem:[#allocation2 + $0x1a9] sm:$0xff] }
 0x3f5   : > { %v5605_v24 = vpop.f32.mrf.mxu2  ;;  %4000 = vst [vmem:[#allocation3 + $0x260] sm:$0xf] %v3904_v3  ;;  %5639 = vmatmul.bf16.gmra.mxu2 %v7777_v44  ;;  %v8605_v3 = vld [vmem:[#allocation3 + $0x36c] sm:$0xf] }
 0x3f6   : > { %v5606_v23 = vadd.f32 %v5605_v24, %v5517_v20  ;;  %4001 = vst [vmem:[#allocation3 + $0x284] sm:$0xf] %v3905_v58  ;;  %v8502_v20 = vld [vmem:[#allocation3 + $0x30] sm:$0xf0]  ;;  %v7854_v24 = vld [vmem:[#allocation3 + $0x38c] sm:$0xf0] }
 0x3f7   : > { %3774 = vst [vmem:[#allocation3 + $0x31c] sm:$0xf] %v3738_v37  ;;  %v7780_v14 = vld [vmem:[#allocation3 + $0x2d8] sm:$0xf]  ;;  %v7429_v58 = vor.u32 %v8502_v20, %v7428_v61  ;;  %v7857_v12 = vor.u32 %v8605_v3, %v7854_v24  ;;  %v3706_v20 = vld [vmem:[#allocation2 + $0x1a8] sm:$0xff]  ;;  %v5527_v24 = vadd.f32 %v10043_v56, %v10033_v39 }
 0x3f8   : > { %v10106_v25 = vadd.f32 %v5694_v48, %v5606_v23  ;;  %3775 = vst [vmem:[#allocation3 + $0x340] sm:$0xf] %v3739_v21  ;;  %v8591_v18 = vld [vmem:[#allocation3 + $0x2f8] sm:$0xf0]  ;;  %v3742_v3 = vpack.c.bf16 %v3706_v20, %v3706_v20  ;;  %v3875_v39 = vld [vmem:[#allocation2 + $0x1b1] sm:$0xff] }
 0x3f9   : > { %3804 = vst [vmem:[#allocation3 + $0x2e0] sm:$0xf] %v3738_v37  ;;  %v7781_v13 = vor.u32 %v8591_v18, %v7780_v14  ;;  %v10130_v61 = vpop.f32.mrf.mxu0  ;;  %v8517_v57 = vld [vmem:[#allocation3 + $0xac] sm:$0xf] }
 0x3fa   : > { %v10110_v63 = vpop.f32.mrf.mxu1  ;;  %3805 = vst [vmem:[#allocation3 + $0x304] sm:$0xf] %v3739_v21  ;;  %v5699_v36 = vpop.f32.mrf.mxu3 }
 0x3fb   : > { %3834 = vst [vmem:[#allocation3 + $0x2a4] sm:$0xf] %v3738_v37  ;;  %5728 = vmatmul.bf16.gmra.mxu3 %v7781_v13  ;;  %v3872_v37 = vld [vmem:[#allocation2 + $0x189] sm:$0xff] }
 0x3fc   : > { %3835 = vst [vmem:[#allocation3 + $0x2c8] sm:$0xf] %v3739_v21  ;;  %5827 = vmatmul.bf16.gmra.mxu0 %v7857_v12  ;;  %v3908_v13 = vpack.c.bf16 %v3872_v37, %v3872_v37  ;;  %v8614_v12 = vld [vmem:[#allocation3 + $0x3b4] sm:$0xf] }
 0x3fd   : > { %v10112_v10 = vpop.f32.mrf.mxu2  ;;  %3942 = vst [vmem:[#allocation3 + $0x320] sm:$0xf] %v3906_v5 }
 0x3fe   : > { %10767 = vst [vmem:[#allocation15_spill] sm:$0xff] %v10112_v10  ;;  %v8595_v44 = vld [vmem:[#allocation3 + $0x31c] sm:$0xf] }
 0x3ff   : > { %3943 = vst [vmem:[#allocation3 + $0x344] sm:$0xf] %v3907_v47  ;;  %5856 = vmatmul.bf16.vlgmr.msrb.gmra.mxu1 %v7429_v58  ;;  %v7810_v59 = vld [vmem:[#allocation3 + $0x33c] sm:$0xf0]  ;;  %v7464_v58 = vld [vmem:[#allocation3 + $0x58] sm:$0xf] }
 0x400   : > { %10769 = vst [vmem:[#allocation16_spill] sm:$0xff] %v10120_v45  ;;  %v7813_v28 = vor.u32 %v8595_v44, %v7810_v59 }
 0x401   : > { %3972 = vst [vmem:[#allocation3 + $0x2e4] sm:$0xf] %v3906_v5 }
 0x402   : > { %v10118_v8 = vpop.f32.mrf.mxu1  ;;  %3973 = vst [vmem:[#allocation3 + $0x308] sm:$0xf] %v3907_v47  ;;  %v10128_v18 = vpop.f32.mrf.mxu3 }
 0x403   : > { %4002 = vst [vmem:[#allocation3 + $0x2a8] sm:$0xf] %v3906_v5 }
 0x404   : > { %4003 = vst [vmem:[#allocation3 + $0x2cc] sm:$0xf] %v3907_v47  ;;  %v7816_v5 = vld [vmem:[#allocation3 + $0x320] sm:$0xf] }
 0x405   : > { %v5610_v48 = vpop.f32.mrf.mxu2  ;;  %3776 = vst [vmem:[#allocation3 + $0x364] sm:$0xf] %v3740_v0  ;;  %5644 = vmatmul.bf16.gmra.mxu2 %v7813_v28 }
 0x406   : > { %v5611_v23 = vadd.f32 %v5610_v48, %v5522_v11  ;;  %3777 = vst [vmem:[#allocation3 + $0x388] sm:$0xf] %v3741_v4  ;;  %v3909_v11 = vpack.c.bf16 %v3873_v7, %v3873_v7  ;;  %v8600_v47 = vld [vmem:[#allocation3 + $0x340] sm:$0xf0]  ;;  %v8511_v48 = vld [vmem:[#allocation3 + $0x78] sm:$0xf0] }
 0x407   : > { %10771 = vst [vmem:[#allocation21_spill] sm:$0xff] %v10128_v18  ;;  %v7817_v26 = vor.u32 %v8600_v47, %v7816_v5  ;;  %v8685_v7 = vld [vmem:[#allocation9 + $0x168] sm:$0xff]  ;;  %v3910_v5 = vpack.c.bf16 %v3874_v27, %v3874_v27  ;;  %v10138_v47 = vpop.f32.mrf.mxu0 }
 0x408   : > { %v10122_v42 = vadd.f32 %v5699_v36, %v5611_v23  ;;  %3806 = vst [vmem:[#allocation3 + $0x328] sm:$0xf] %v3740_v0  ;;  %v7890_v23 = vld [vmem:[#allocation3 + $0x3d4] sm:$0xf0]  ;;  %5939 = vmatpush.bf16.msra.mxu2 %v8685_v7 }
 0x409   : > { %3807 = vst [vmem:[#allocation3 + $0x34c] sm:$0xf] %v3741_v4  ;;  %v7893_v59 = vor.u32 %v8614_v12, %v7890_v23 }
 0x40a   : > { %v10124_v21 = vpop.f32.mrf.mxu1  ;;  %3836 = vst [vmem:[#allocation3 + $0x2ec] sm:$0xf] %v3740_v0 }
 0x40b   : > { %3837 = vst [vmem:[#allocation3 + $0x310] sm:$0xf] %v3741_v4  ;;  %5733 = vmatmul.bf16.gmra.mxu3 %v7817_v26  ;;  %v7465_v4 = vor.u32 %v8511_v48, %v7464_v58 }
 0x40c   : > { %3944 = vst [vmem:[#allocation3 + $0x368] sm:$0xf] %v3908_v13  ;;  %5832 = vmatmul.bf16.gmra.mxu0 %v7893_v59 }
 0x40d   : > { %v10126_v14 = vpop.f32.mrf.mxu2  ;;  %3945 = vst [vmem:[#allocation3 + $0x38c] sm:$0xf] %v3909_v11  ;;  %v7846_v28 = vld [vmem:[#allocation3 + $0x384] sm:$0xf0] }
 0x40e   : > { %10770 = vst [vmem:[#allocation20_spill] sm:$0xff] %v10126_v14  ;;  %v8508_v14 = vld [vmem:[#allocation3 + $0x64] sm:$0xf] }
 0x40f   : > { %3974 = vst [vmem:[#allocation3 + $0x32c] sm:$0xf] %v3908_v13  ;;  %5861 = vmatmul.bf16.gmra.mxu1 %v7465_v4  ;;  %v7500_v4 = vld [vmem:[#allocation3 + $0xa0] sm:$0xf]  ;;  %v10142_v27 = vpop.f32.mrf.mxu0 }
 0x410   : > { %3975 = vst [vmem:[#allocation3 + $0x350] sm:$0xf] %v3909_v11 }
 0x411   : > { %4004 = vst [vmem:[#allocation3 + $0x2f0] sm:$0xf] %v3908_v13  ;;  %v3911_v13 = vpack.c.bf16 %v3875_v39, %v3875_v39  ;;  %v7926_v39 = vld [vmem:[#allocation3 + $0x41c] sm:$0xf0] }
 0x412   : > { %v10134_v36 = vpop.f32.mrf.mxu1  ;;  %4005 = vst [vmem:[#allocation3 + $0x314] sm:$0xf] %v3909_v11  ;;  %v8604_v11 = vld [vmem:[#allocation3 + $0x364] sm:$0xf] }
 0x413   : > { %3778 = vst [vmem:[#allocation3 + $0x3ac] sm:$0xf] %v3742_v3  ;;  %v7849_v20 = vor.u32 %v8604_v11, %v7846_v28  ;;  %v7852_v48 = vld [vmem:[#allocation3 + $0x368] sm:$0xf] }
 0x414   : > { %3779 = vst [vmem:[#allocation3 + $0x3d0] sm:$0xf] %v3743_v34  ;;  %v8609_v23 = vld [vmem:[#allocation3 + $0x388] sm:$0xf0] }
 0x415   : > { %v5615_v38 = vpop.f32.mrf.mxu2  ;;  %v5704_v37 = vpop.f32.mrf.mxu3  ;;  %3808 = vst [vmem:[#allocation3 + $0x370] sm:$0xf] %v3742_v3  ;;  %5649 = vmatmul.bf16.gmra.mxu2 %v7849_v20  ;;  %v7853_v12 = vor.u32 %v8609_v23, %v7852_v48  ;;  %v8701_v20 = vld [vmem:[#allocation9 + $0x1e8] sm:$0xff]  ;;  %v8684_v23 = vld [vmem:[#allocation9 + $0x160] sm:$0xff] }
 0x416   : > { %v5616_v0 = vadd.f32 %v5615_v38, %v5527_v24  ;;  %10772 = vst [vmem:[#allocation22_spill] sm:$0xff] %v10138_v47  ;;  %v3709_v24 = vld [vmem:[#allocation2 + $0x1d0] sm:$0xff]  ;;  %v3744_v38 = vpack.c.bf16 %v3708_v22, %v3708_v22  ;;  %v8709_v48 = vld [vmem:[#allocation9 + $0x228] sm:$0xff]  ;;  %6117 = vmatpush.bf16.msra.mxu0 %v8701_v20  ;;  %5940 = vmatpush.bf16.msra.mxu2 %v8684_v23 }
 0x417   : > { %3809 = vst [vmem:[#allocation3 + $0x394] sm:$0xf] %v3743_v34  ;;  %v3745_v58 = vpack.c.bf16 %v3709_v24, %v3709_v24  ;;  %6206 = vmatpush.bf16.msra.mxu1 %v8709_v48  ;;  %v3879_v48 = vld [vmem:[#allocation2 + $0x1f1] sm:$0xff]  ;;  %v5532_v23 = vadd.f32 %v10043_v56, %v10066_v2  ;;  %v3880_v47 = vld [vmem:[#allocation2 + $0x209] sm:$0xff] }
 0x418   : > { %v10136_v44 = vadd.f32 %v5704_v37, %v5616_v0  ;;  %3838 = vst [vmem:[#allocation3 + $0x334] sm:$0xf] %v3742_v3  ;;  %v3876_v0 = vld [vmem:[#allocation2 + $0x1c9] sm:$0xff]  ;;  %v8520_v3 = vld [vmem:[#allocation3 + $0xc0] sm:$0xf0]  ;;  %v8691_v2 = vld [vmem:[#allocation9 + $0x198] sm:$0xff] }
 0x419   : > { %3839 = vst [vmem:[#allocation3 + $0x358] sm:$0xf] %v3743_v34  ;;  %v3877_v34 = vld [vmem:[#allocation2 + $0x1d1] sm:$0xff]  ;;  %v3912_v59 = vpack.c.bf16 %v3876_v0, %v3876_v0  ;;  %v8623_v37 = vld [vmem:[#allocation3 + $0x3fc] sm:$0xf]  ;;  %v7501_v7 = vor.u32 %v8520_v3, %v7500_v4  ;;  %v8692_v0 = vld [vmem:[#allocation9 + $0x1a0] sm:$0xff] }
 0x41a   : > { %v10140_v26 = vpop.f32.mrf.mxu1  ;;  %3946 = vst [vmem:[#allocation3 + $0x3b0] sm:$0xf] %v3910_v5  ;;  %v3913_v28 = vpack.c.bf16 %v3877_v34, %v3877_v34  ;;  %v7929_v11 = vor.u32 %v8623_v37, %v7926_v39  ;;  %v8700_v3 = vld [vmem:[#allocation9 + $0x1e0] sm:$0xff]  ;;  %v3711_v34 = vld [vmem:[#allocation2 + $0x1f0] sm:$0xff]  ;;  %v8613_v4 = vld [vmem:[#allocation3 + $0x3ac] sm:$0xf]  ;;  %5941 = vmatpush.bf16.msra.mxu2 %v8683_v29 }
 0x41b   : > { %3947 = vst [vmem:[#allocation3 + $0x3d4] sm:$0xf] %v3911_v13  ;;  %5738 = vmatmul.bf16.gmra.mxu3 %v7853_v12  ;;  %v3710_v12 = vld [vmem:[#allocation2 + $0x1e8] sm:$0xff]  ;;  %6118 = vmatpush.bf16.msra.mxu0 %v8700_v3 }
 0x41c   : > { %3976 = vst [vmem:[#allocation3 + $0x374] sm:$0xf] %v3910_v5  ;;  %5837 = vmatmul.bf16.gmra.mxu0 %v7929_v11  ;;  %v3746_v37 = vpack.c.bf16 %v3710_v12, %v3710_v12 }
 0x41d   : > { %3977 = vst [vmem:[#allocation3 + $0x398] sm:$0xf] %v3911_v13  ;;  %v10146_v24 = vpop.f32.mrf.mxu2  ;;  %v10150_v11 = vpop.f32.mrf.mxu3 }
 0x41e   : > { %4006 = vst [vmem:[#allocation3 + $0x338] sm:$0xf] %v3910_v5  ;;  %v8693_v5 = vld [vmem:[#allocation9 + $0x1a8] sm:$0xff]  ;;  %5942 = vmatpush.bf16.msra.mxu2 %v8682_v60 }
 0x41f   : > { %4007 = vst [vmem:[#allocation3 + $0x35c] sm:$0xf] %v3911_v13  ;;  %v7882_v13 = vld [vmem:[#allocation3 + $0x3cc] sm:$0xf0]  ;;  %5866 = vmatmul.bf16.gmra.mxu1 %v7501_v7  ;;  %6028 = vmatpush.bf16.msra.mxu3 %v8693_v5  ;;  %v10148_v7 = vpop.f32.mrf.mxu0 }
 0x420   : > { %3780 = vst [vmem:[#allocation3 + $0x3f4] sm:$0xf] %v3744_v38  ;;  %v7885_v39 = vor.u32 %v8613_v4, %v7882_v13  ;;  %v3878_v5 = vld [vmem:[#allocation2 + $0x1e9] sm:$0xff] }
 0x421   : > { %3781 = vst [vmem:[#allocation3 + $0x418] sm:$0xf] %v3745_v58  ;;  %v3914_v12 = vpack.c.bf16 %v3878_v5, %v3878_v5  ;;  %v8529_v4 = vld [vmem:[#allocation3 + $0x108] sm:$0xf0]  ;;  %v8690_v5 = vld [vmem:[#allocation9 + $0x190] sm:$0xff] }
 0x422   : > { %3810 = vst [vmem:[#allocation3 + $0x3b8] sm:$0xf] %v3744_v38  ;;  %v10144_v22 = vpop.f32.mrf.mxu1  ;;  %v8618_v20 = vld [vmem:[#allocation3 + $0x3d0] sm:$0xf0] }
 0x423   : > { %3811 = vst [vmem:[#allocation3 + $0x3dc] sm:$0xf] %v3745_v58  ;;  %6029 = vmatpush.bf16.msra.mxu3 %v8692_v0 }
 0x424   : > { %10773 = vst [vmem:[#allocation23_spill] sm:$0xff] %v10146_v24 }
 0x425   : > { %3840 = vst [vmem:[#allocation3 + $0x37c] sm:$0xf] %v3744_v38  ;;  %v3747_v38 = vpack.c.bf16 %v3711_v34, %v3711_v34  ;;  %5654 = vmatmul.bf16.gmra.mxu2 %v7885_v39  ;;  %v3915_v34 = vpack.c.bf16 %v3879_v48, %v3879_v48  ;;  %v3544_v39 = vld [vmem:[#allocation2 + $0x207] sm:$0xff] }
 0x426   : > { %3841 = vst [vmem:[#allocation3 + $0x3a0] sm:$0xf] %v3745_v58  ;;  %v7888_v58 = vld [vmem:[#allocation3 + $0x3b0] sm:$0xf] }
 0x427   : > { %3948 = vst [vmem:[#allocation3 + $0x3f8] sm:$0xf] %v3912_v59  ;;  %v7889_v0 = vor.u32 %v8618_v20, %v7888_v58  ;;  %v3580_v58 = vpack.c.bf16 %v3544_v39, %v3544_v39  ;;  %6030 = vmatpush.bf16.msra.mxu3 %v8691_v2  ;;  %v8698_v20 = vld [vmem:[#allocation9 + $0x1d0] sm:$0xff]  ;;  %v8697_v2 = vld [vmem:[#allocation9 + $0x1c8] sm:$0xff] }
 0x428   : > { %3949 = vst [vmem:[#allocation3 + $0x41c] sm:$0xf] %v3913_v28  ;;  %v8622_v29 = vld [vmem:[#allocation3 + $0x3f4] sm:$0xf] }
 0x429   : > { %3978 = vst [vmem:[#allocation3 + $0x3bc] sm:$0xf] %v3912_v59 }
 0x42a   : > { %3979 = vst [vmem:[#allocation3 + $0x3e0] sm:$0xf] %v3913_v28  ;;  %v10154_v13 = vpop.f32.mrf.mxu1 }
 0x42b   : > { %4008 = vst [vmem:[#allocation3 + $0x380] sm:$0xf] %v3912_v59  ;;  %v5620_v59 = vpop.f32.mrf.mxu2  ;;  %5743 = vmatmul.bf16.gmra.mxu3 %v7889_v0  ;;  %v3712_v0 = vld [vmem:[#allocation2 + $0x208] sm:$0xff] }
 0x42c   : > { %10774 = vst [vmem:[#allocation24_spill] sm:$0xff] %v10148_v7  ;;  %v5621_v3 = vadd.f32 %v5620_v59, %v5532_v23  ;;  %v3545_v7 = vld [vmem:[#allocation2 + $0x20f] sm:$0xff]  ;;  %v7918_v23 = vld [vmem:[#allocation3 + $0x414] sm:$0xf0]  ;;  %6031 = vmatpush.bf16.msra.mxu3 %v8690_v5  ;;  %v8680_v5 = vld [vmem:[#allocation9 + $0x140] sm:$0xff] }
 0x42d   : > { %10775 = vst [vmem:[#allocation25_spill] sm:$0xff] %v10150_v11  ;;  %v8699_v11 = vld [vmem:[#allocation9 + $0x1d8] sm:$0xff]  ;;  %v3581_v48 = vpack.c.bf16 %v3545_v7, %v3545_v7  ;;  %v7921_v39 = vor.u32 %v8622_v29, %v7918_v23  ;;  %v3713_v7 = vld [vmem:[#allocation2 + $0x210] sm:$0xff]  ;;  %v8696_v23 = vld [vmem:[#allocation9 + $0x1c0] sm:$0xff] }
 0x42e   : > { %4009 = vst [vmem:[#allocation3 + $0x3a4] sm:$0xf] %v3913_v28  ;;  %v7536_v28 = vld [vmem:[#allocation3 + $0xe8] sm:$0xf]  ;;  %6119 = vmatpush.bf16.msra.mxu0 %v8699_v11  ;;  %v7924_v60 = vld [vmem:[#allocation3 + $0x3f8] sm:$0xf] }
 0x42f   : > { %3782 = vst [vmem:[#allocation3 + $0x43c] sm:$0xf] %v3746_v37  ;;  %v7537_v24 = vor.u32 %v8529_v4, %v7536_v28  ;;  %v8681_v11 = vld [vmem:[#allocation9 + $0x148] sm:$0xff]  ;;  %v3748_v28 = vpack.c.bf16 %v3712_v0, %v3712_v0  ;;  %v3916_v0 = vpack.c.bf16 %v3880_v47, %v3880_v47  ;;  %v7572_v47 = vld [vmem:[#allocation3 + $0x130] sm:$0xf] }
 0x430   : > { %3783 = vst [vmem:[#allocation3 + $0x460] sm:$0xf] %v3747_v38  ;;  %5943 = vmatpush.bf16.msra.mxu2 %v8681_v11 }
 0x431   : > { %3812 = vst [vmem:[#allocation3 + $0x400] sm:$0xf] %v3746_v37  ;;  %5871 = vmatmul.bf16.gmra.mxu1 %v7537_v24  ;;  %v8689_v24 = vld [vmem:[#allocation9 + $0x188] sm:$0xff] }
 0x432   : > { %3813 = vst [vmem:[#allocation3 + $0x424] sm:$0xf] %v3747_v38  ;;  %v10160_v4 = vpop.f32.mrf.mxu1  ;;  %6120 = vmatpush.bf16.msra.mxu0 %v8698_v20  ;;  %6032 = vmatpush.bf16.msra.mxu3 %v8689_v24  ;;  %v8688_v20 = vld [vmem:[#allocation9 + $0x180] sm:$0xff] }
 0x433   : > { %3842 = vst [vmem:[#allocation3 + $0x3c4] sm:$0xf] %v3746_v37  ;;  %v10156_v37 = vpop.f32.mrf.mxu0 }
 0x434   : > { %3843 = vst [vmem:[#allocation3 + $0x3e8] sm:$0xf] %v3747_v38  ;;  %5944 = vmatpush.bf16.msra.mxu2 %v8680_v5  ;;  %v8708_v5 = vld [vmem:[#allocation9 + $0x220] sm:$0xff] }
 0x435   : > { %3950 = vst [vmem:[#allocation3 + $0x440] sm:$0xf] %v3914_v12  ;;  %5659 = vmatmul.bf16.gmra.mxu2 %v7921_v39  ;;  %6207 = vmatpush.bf16.msra.mxu1 %v8708_v5 }
 0x436   : > { %3951 = vst [vmem:[#allocation3 + $0x464] sm:$0xf] %v3915_v34  ;;  %6121 = vmatpush.bf16.msra.mxu0 %v8697_v2  ;;  %6033 = vmatpush.bf16.msra.mxu3 %v8688_v20 }
 0x437   : > { %3980 = vst [vmem:[#allocation3 + $0x404] sm:$0xf] %v3914_v12  ;;  %v5709_v38 = vpop.f32.mrf.mxu3 }
 0x438   : > { %3981 = vst [vmem:[#allocation3 + $0x428] sm:$0xf] %v3915_v34  ;;  %v10158_v59 = vadd.f32 %v5709_v38, %v5621_v3  ;;  %v10162_v3 = vpop.f32.mrf.mxu2  ;;  %v8627_v38 = vld [vmem:[#allocation3 + $0x418] sm:$0xf0] }
 0x439   : > { %4010 = vst [vmem:[#allocation3 + $0x3c8] sm:$0xf] %v3914_v12  ;;  %v3749_v12 = vpack.c.bf16 %v3713_v7, %v3713_v7  ;;  %v7925_v18 = vor.u32 %v8627_v38, %v7924_v60  ;;  %v7954_v60 = vld [vmem:[#allocation3 + $0x45c] sm:$0xf0]  ;;  %v8631_v38 = vld [vmem:[#allocation3 + $0x43c] sm:$0xf] }
 0x43a   : > { %4011 = vst [vmem:[#allocation3 + $0x3ec] sm:$0xf] %v3915_v34  ;;  %v3881_v34 = vld [vmem:[#allocation2 + $0x211] sm:$0xff]  ;;  %6122 = vmatpush.bf16.msra.mxu0 %v8696_v23  ;;  %v10168_v24 = vpop.f32.mrf.mxu1  ;;  %v7957_v20 = vor.u32 %v8631_v38, %v7954_v60 }
 0x43b   : > { %3646 = vst [vmem:[#allocation3 + $0x444] sm:$0xf] %v3580_v58  ;;  %v3917_v29 = vpack.c.bf16 %v3881_v34, %v3881_v34  ;;  %5748 = vmatmul.bf16.gmra.mxu3 %v7925_v18  ;;  %v7608_v38 = vld [vmem:[#allocation3 + $0x178] sm:$0xf] }
 0x43c   : > { %3647 = vst [vmem:[#allocation3 + $0x468] sm:$0xf] %v3581_v48 }
 0x43d   : > { %10776 = vst [vmem:[#allocation26_spill] sm:$0xff] %v10162_v3  ;;  %v10164_v3 = vpop.f32.mrf.mxu0 }
 0x43e   : > { %3676 = vst [vmem:[#allocation3 + $0x408] sm:$0xf] %v3580_v58  ;;  %v8538_v58 = vld [vmem:[#allocation3 + $0x150] sm:$0xf0] }
 0x43f   : > { %3677 = vst [vmem:[#allocation3 + $0x42c] sm:$0xf] %v3581_v48  ;;  %v10166_v39 = vpop.f32.mrf.mxu3  ;;  %v7573_v2 = vor.u32 %v8538_v58, %v7572_v47 }
 0x440   : > { %3814 = vst [vmem:[#allocation3 + $0x448] sm:$0xf] %v3748_v28 }
 0x441   : > { %3815 = vst [vmem:[#allocation3 + $0x46c] sm:$0xf] %v3749_v12  ;;  %5876 = vmatmul.bf16.gmra.mxu1 %v7573_v2  ;;  %v8547_v2 = vld [vmem:[#allocation3 + $0x198] sm:$0xf0] }
 0x442   : > { %3844 = vst [vmem:[#allocation3 + $0x40c] sm:$0xf] %v3748_v28  ;;  %v8632_v48 = vld [vmem:[#allocation3 + $0x444] sm:$0xf]  ;;  %v5537_v28 = vadd.f32 %v10043_v56, %v10086_v43  ;;  %v10176_v56 = vpop.f32.mrf.mxu1 }
 0x443   : > { %10777 = vst [vmem:[#allocation27_spill] sm:$0xff] %v10164_v3  ;;  %v7962_v7 = vld [vmem:[#allocation3 + $0x464] sm:$0xf0] }
 0x444   : > { %3845 = vst [vmem:[#allocation3 + $0x430] sm:$0xf] %v3749_v12  ;;  %v7965_v11 = vor.u32 %v8632_v48, %v7962_v7  ;;  %v5625_v12 = vpop.f32.mrf.mxu2  ;;  %v8636_v7 = vld [vmem:[#allocation3 + $0x460] sm:$0xf0] }
 0x445   : > { %10778 = vst [vmem:[#allocation28_spill] sm:$0xff] %v10166_v39  ;;  %v5626_v34 = vadd.f32 %v5625_v12, %v5537_v28  ;;  %v10172_v18 = vpop.f32.mrf.mxu0  ;;  %5664 = vmatmul.bf16.gmra.mxu2 %v7957_v20  ;;  %v8499_v12 = vld [vmem:[#allocation3 + $0x1c] sm:$0xf]  ;;  %v8498_v39 = vld [vmem:[#allocation3 + $0x14] sm:$0xf] }
 0x446   : > { %3982 = vst [vmem:[#allocation3 + $0x44c] sm:$0xf] %v3916_v0  ;;  %5842 = vmatmul.bf16.gmra.mxu0 %v7965_v11  ;;  %v7438_v11 = vld [vmem:[#allocation3 + $0x3c] sm:$0xf0] }
 0x447   : > { %3983 = vst [vmem:[#allocation3 + $0x470] sm:$0xf] %v3917_v29  ;;  %v5714_v23 = vpop.f32.mrf.mxu3 }
 0x448   : > { %4012 = vst [vmem:[#allocation3 + $0x410] sm:$0xf] %v3916_v0  ;;  %v10174_v48 = vadd.f32 %v5714_v23, %v5626_v34  ;;  %v7960_v0 = vld [vmem:[#allocation3 + $0x440] sm:$0xf]  ;;  %v7441_v34 = vor.u32 %v8499_v12, %v7438_v11  ;;  %v7609_v23 = vor.u32 %v8547_v2, %v7608_v38  ;;  %v8503_v11 = vld [vmem:[#allocation3 + $0x38] sm:$0xf0] }
 0x449   : > { %4013 = vst [vmem:[#allocation3 + $0x434] sm:$0xf] %v3917_v29  ;;  %v10181_v29 = vld [vmem:[%s10738_s4] ss:$0 sm:$0xff]  ;;  %v7961_v47 = vor.u32 %v8636_v7, %v7960_v0  ;;  %v7436_v12 = vld [vmem:[#allocation3 + $0x18] sm:$0xf] }
 0x44a   : > { %v5539_v58 = vadd.f32 %v10181_v29, %v10094_v32  ;;  %v10189_v3 = vpop.f32.mrf.mxu1  ;;  %v7430_v32 = vld [vmem:[#allocation3 + $0x34] sm:$0xf0]  ;;  %v5542_v0 = vadd.f32 %v10181_v29, %v10104_v53 }
 0x44b   : > { %5753 = vmatmul.bf16.gmra.mxu3 %v7961_v47 }
 0x44c   : > { %v5627_v43 = vpop.f32.mrf.mxu2 }
 0x44d   : > { %v5628_v28 = vadd.f32 %v5627_v43, %v5539_v58  ;;  %v10185_v5 = vpop.f32.mrf.mxu0  ;;  %v7433_v43 = vor.u32 %v8498_v39, %v7430_v32  ;;  %v5544_v39 = vadd.f32 %v10181_v29, %v10110_v63  ;;  %v7644_v32 = vld [vmem:[#allocation3 + $0x1c0] sm:$0xf]  ;;  %v8512_v63 = vld [vmem:[#allocation3 + $0x80] sm:$0xf0] }
 0x44f   : > { %v5716_v60 = vpop.f32.mrf.mxu3 }
 0x450   : > { %v10187_v20 = vadd.f32 %v5716_v60, %v5628_v28  ;;  %v7474_v28 = vld [vmem:[#allocation3 + $0x84] sm:$0xf0]  ;;  %v7437_v60 = vor.u32 %v8503_v11, %v7436_v12  ;;  %v7466_v11 = vld [vmem:[#allocation3 + $0x7c] sm:$0xf0] }
 0x451   : > { %5881 = vmatmul.bf16.gmra.mxu1 %v7609_v23  ;;  %v8556_v23 = vld [vmem:[#allocation3 + $0x1e0] sm:$0xf0]  ;;  %v7477_v53 = vor.u32 %v8508_v14, %v7474_v28  ;;  %v5547_v14 = vadd.f32 %v10181_v29, %v10118_v8 }
 0x454   : > { %v5630_v7 = vpop.f32.mrf.mxu2 }
 0x455   : > { %v5631_v58 = vadd.f32 %v5630_v7, %v5542_v0  ;;  %5945 = vmatmul.bf16.vlgmr.msra.gmra.mxu2 %v7433_v43  ;;  %v10193_v47 = vpop.f32.mrf.mxu0  ;;  %v7645_v0 = vor.u32 %v8556_v23, %v7644_v32  ;;  %v8507_v43 = vld [vmem:[#allocation3 + $0x5c] sm:$0xf] }
 0x456   : > { %6123 = vmatmul.bf16.vlgmr.msra.gmra.mxu0 %v7441_v34 }
 0x457   : > { %v5719_v2 = vpop.f32.mrf.mxu3  ;;  %v10197_v38 = vpop.f32.mrf.mxu1 }
 0x458   : > { %v10195_v34 = vadd.f32 %v5719_v2, %v5631_v58 }
 0x45b   : > { %6034 = vmatmul.bf16.vlgmr.msra.gmra.mxu3 %v7437_v60  ;;  %v7469_v60 = vor.u32 %v8507_v43, %v7466_v11  ;;  %v7680_v11 = vld [vmem:[#allocation3 + $0x208] sm:$0xf] }
 0x45c   : > { %v5632_v52 = vpop.f32.mrf.mxu2 }
 0x45d   : > { %v5633_v7 = vadd.f32 %v5632_v52, %v5544_v39  ;;  %v10201_v12 = vpop.f32.mrf.mxu0  ;;  %v7472_v52 = vld [vmem:[#allocation3 + $0x60] sm:$0xf]  ;;  %v7510_v39 = vld [vmem:[#allocation3 + $0xcc] sm:$0xf0] }
 0x45e   : > { %10779 = vst [vmem:[#allocation29_spill] sm:$0xff] %v10201_v12  ;;  %v7473_v32 = vor.u32 %v8512_v63, %v7472_v52  ;;  %v8516_v63 = vld [vmem:[#allocation3 + $0xa4] sm:$0xf] }
 0x45f   : > { %v5721_v58 = vpop.f32.mrf.mxu3  ;;  %v10205_v45 = vpop.f32.mrf.mxu1 }
 0x460   : > { %v10203_v2 = vadd.f32 %v5721_v58, %v5633_v7  ;;  %v7513_v7 = vor.u32 %v8517_v57, %v7510_v39 }
 0x461   : > { %5886 = vmatmul.bf16.gmra.mxu1 %v7645_v0  ;;  %v8565_v0 = vld [vmem:[#allocation3 + $0x228] sm:$0xf0] }
 0x465   : > { %5950 = vmatmul.bf16.gmra.mxu2 %v7469_v60  ;;  %v5635_v28 = vpop.f32.mrf.mxu2  ;;  %v10209_v10 = vpop.f32.mrf.mxu0  ;;  %v7681_v60 = vor.u32 %v8565_v0, %v7680_v11  ;;  %v5552_v0 = vadd.f32 %v10181_v29, %v10134_v36 }
 0x466   : > { %6128 = vmatmul.bf16.gmra.mxu0 %v7477_v53  ;;  %v5636_v23 = vadd.f32 %v5635_v28, %v5547_v14  ;;  %v8707_v53 = vld [vmem:[#allocation9 + $0x218] sm:$0xff]  ;;  %10780 = vst [vmem:[#allocation30_spill] sm:$0xff] %v10209_v10  ;;  %v5549_v28 = vadd.f32 %v10181_v29, %v10124_v21 }
 0x467   : > { %6208 = vmatpush.bf16.msra.mxu1 %v8707_v53  ;;  %v7502_v53 = vld [vmem:[#allocation3 + $0xc4] sm:$0xf0]  ;;  %v7546_v21 = vld [vmem:[#allocation3 + $0x114] sm:$0xf0] }
 0x468   : > { %v7505_v12 = vor.u32 %v8516_v63, %v7502_v53 }
 0x46b   : > { %6039 = vmatmul.bf16.gmra.mxu3 %v7473_v32 }
 0x46c   : > { %v5724_v58 = vpop.f32.mrf.mxu3  ;;  %v10211_v43 = vpop.f32.mrf.mxu1 }
 0x46d   : > { %v10213_v8 = vadd.f32 %v5724_v58, %v5636_v23  ;;  %v5637_v14 = vpop.f32.mrf.mxu2  ;;  %v10219_v57 = vpop.f32.mrf.mxu0  ;;  %v8521_v23 = vld [vmem:[#allocation3 + $0xc8] sm:$0xf0] }
 0x46e   : > { %v5638_v52 = vadd.f32 %v5637_v14, %v5549_v28  ;;  %10782 = vst [vmem:[#allocation32_spill] sm:$0xff] %v10219_v57  ;;  %v8526_v14 = vld [vmem:[#allocation3 + $0xf4] sm:$0xf]  ;;  %v5769_v28 = vadd.f32 %v10046_v55, %v10059_v40 }
 0x46f   : > { %10781 = vst [vmem:[#allocation31_spill] sm:$0xff] %v10213_v8  ;;  %v8574_v8 = vld [vmem:[#allocation3 + $0x270] sm:$0xf0]  ;;  %v7549_v63 = vor.u32 %v8526_v14, %v7546_v21  ;;  %v5557_v14 = vadd.f32 %v10181_v29, %v10144_v22  ;;  %v7752_v22 = vld [vmem:[#allocation3 + $0x298] sm:$0xf] }
 0x471   : > { %5891 = vmatmul.bf16.gmra.mxu1 %v7681_v60 }
 0x474   : > { %v5726_v10 = vpop.f32.mrf.mxu3  ;;  %v10217_v32 = vpop.f32.mrf.mxu1 }
 0x475   : > { %v10221_v39 = vadd.f32 %v5726_v10, %v5638_v52  ;;  %5955 = vmatmul.bf16.gmra.mxu2 %v7505_v12  ;;  %v7716_v10 = vld [vmem:[#allocation3 + $0x250] sm:$0xf]  ;;  %v10229_v36 = vpop.f32.mrf.mxu0 }
 0x476   : > { %6133 = vmatmul.bf16.gmra.mxu0 %v7513_v7  ;;  %v7508_v7 = vld [vmem:[#allocation3 + $0xa8] sm:$0xf]  ;;  %v7717_v12 = vor.u32 %v8574_v8, %v7716_v10  ;;  %10784 = vst [vmem:[#allocation34_spill] sm:$0xff] %v10229_v36  ;;  %v8530_v8 = vld [vmem:[#allocation3 + $0x110] sm:$0xf0] }
 0x477   : > { %10783 = vst [vmem:[#allocation33_spill] sm:$0xff] %v10221_v39  ;;  %v7509_v11 = vor.u32 %v8521_v23, %v7508_v7  ;;  %v7538_v7 = vld [vmem:[#allocation3 + $0x10c] sm:$0xf0] }
 0x478   : > { %v5640_v58 = vpop.f32.mrf.mxu2 }
 0x479   : > { %v5641_v60 = vadd.f32 %v5640_v58, %v5552_v0  ;;  %v8525_v0 = vld [vmem:[#allocation3 + $0xec] sm:$0xf]  ;;  %v5554_v58 = vadd.f32 %v10181_v29, %v10140_v26 }
 0x47a   : > { %v7541_v40 = vor.u32 %v8525_v0, %v7538_v7  ;;  %v8535_v0 = vld [vmem:[#allocation3 + $0x13c] sm:$0xf]  ;;  %v5774_v7 = vadd.f32 %v10074_v49, %v10078_v54 }
 0x47b   : > { %6044 = vmatmul.bf16.gmra.mxu3 %v7509_v11 }
 0x47c   : > { %v5857_v53 = vpop.f32.mrf.mxu1 }
 0x47d   : > { %v10227_v52 = vadd.f32 %v5857_v53, %v5769_v28  ;;  %v7582_v53 = vld [vmem:[#allocation3 + $0x15c] sm:$0xf0]  ;;  %v10241_v10 = vpop.f32.mrf.mxu0 }
 0x47e   : > { %v5729_v57 = vpop.f32.mrf.mxu3 }
 0x47f   : > { %v10231_v39 = vadd.f32 %v5729_v57, %v5641_v60  ;;  %v8706_v57 = vld [vmem:[#allocation9 + $0x210] sm:$0xff] }
 0x480   : > { %v5642_v23 = vpop.f32.mrf.mxu2  ;;  %v7544_v60 = vld [vmem:[#allocation3 + $0xf0] sm:$0xf]  ;;  %6209 = vmatpush.bf16.msra.mxu1 %v8706_v57  ;;  %v7574_v57 = vld [vmem:[#allocation3 + $0x154] sm:$0xf0] }
 0x481   : > { %5896 = vmatmul.bf16.gmra.mxu1 %v7717_v12  ;;  %v5643_v55 = vadd.f32 %v5642_v23, %v5554_v58  ;;  %v7545_v12 = vor.u32 %v8530_v8, %v7544_v60  ;;  %v8583_v23 = vld [vmem:[#allocation3 + $0x2b8] sm:$0xf0]  ;;  %v7585_v58 = vor.u32 %v8535_v0, %v7582_v53  ;;  %v5559_v60 = vadd.f32 %v10181_v29, %v10154_v13  ;;  %v7580_v0 = vld [vmem:[#allocation3 + $0x138] sm:$0xf]  ;;  %v8592_v13 = vld [vmem:[#allocation3 + $0x300] sm:$0xf0] }
 0x484   : > { %v10235_v21 = vpop.f32.mrf.mxu1 }
 0x485   : > { %5960 = vmatmul.bf16.gmra.mxu2 %v7541_v40 }
 0x486   : > { %6138 = vmatmul.bf16.gmra.mxu0 %v7549_v63  ;;  %v5731_v11 = vpop.f32.mrf.mxu3 }
 0x487   : > { %v10239_v28 = vadd.f32 %v5731_v11, %v5643_v55  ;;  %v7753_v11 = vor.u32 %v8583_v23, %v7752_v22  ;;  %v8539_v23 = vld [vmem:[#allocation3 + $0x158] sm:$0xf0] }
 0x488   : > { %v5645_v63 = vpop.f32.mrf.mxu2 }
 0x489   : > { %10785 = vst [vmem:[#allocation35_spill] sm:$0xff] %v10239_v28  ;;  %v5646_v26 = vadd.f32 %v5645_v63, %v5557_v14  ;;  %v8534_v14 = vld [vmem:[#allocation3 + $0x134] sm:$0xf]  ;;  %v10251_v63 = vpop.f32.mrf.mxu0 }
 0x48a   : > { %10786 = vst [vmem:[#allocation36_spill] sm:$0xff] %v10251_v63  ;;  %v7577_v54 = vor.u32 %v8534_v14, %v7574_v57 }
 0x48b   : > { %6049 = vmatmul.bf16.gmra.mxu3 %v7545_v12 }
 0x48c   : > { %v5862_v40 = vpop.f32.mrf.mxu1 }
 0x48d   : > { %v10245_v55 = vadd.f32 %v5862_v40, %v5774_v7  ;;  %v7581_v40 = vor.u32 %v8539_v23, %v7580_v0  ;;  %v7610_v0 = vld [vmem:[#allocation3 + $0x19c] sm:$0xf0] }
 0x48e   : > { %v5734_v28 = vpop.f32.mrf.mxu3 }
 0x48f   : > { %v10247_v36 = vadd.f32 %v5734_v28, %v5646_v26  ;;  %v5562_v28 = vadd.f32 %v10181_v29, %v10160_v4 }
 0x490   : > { %v5647_v8 = vpop.f32.mrf.mxu2 }
 0x491   : > { %5901 = vmatmul.bf16.gmra.mxu1 %v7753_v11  ;;  %v5648_v49 = vadd.f32 %v5647_v8, %v5559_v60  ;;  %v8544_v11 = vld [vmem:[#allocation3 + $0x184] sm:$0xf]  ;;  %v5779_v8 = vadd.f32 %v10090_v16, %v10092_v19  ;;  %v7788_v60 = vld [vmem:[#allocation3 + $0x2e0] sm:$0xf] }
 0x492   : > { %v7789_v4 = vor.u32 %v8592_v13, %v7788_v60  ;;  %v5567_v13 = vadd.f32 %v10181_v29, %v10176_v56  ;;  %v7824_v56 = vld [vmem:[#allocation3 + $0x328] sm:$0xf] }
 0x494   : > { %v10253_v53 = vpop.f32.mrf.mxu1 }
 0x495   : > { %5965 = vmatmul.bf16.gmra.mxu2 %v7577_v54  ;;  %v10261_v54 = vpop.f32.mrf.mxu0 }
 0x496   : > { %6143 = vmatmul.bf16.gmra.mxu0 %v7585_v58  ;;  %v5736_v12 = vpop.f32.mrf.mxu3  ;;  %v7618_v58 = vld [vmem:[#allocation3 + $0x1a4] sm:$0xf0] }
 0x497   : > { %v10257_v26 = vadd.f32 %v5736_v12, %v5648_v49  ;;  %v7621_v14 = vor.u32 %v8544_v11, %v7618_v58  ;;  %v8548_v11 = vld [vmem:[#allocation3 + $0x1a0] sm:$0xf0] }
 0x498   : > { %v5650_v7 = vpop.f32.mrf.mxu2 }
 0x499   : > { %v5651_v22 = vadd.f32 %v5650_v7, %v5562_v28  ;;  %v8543_v28 = vld [vmem:[#allocation3 + $0x17c] sm:$0xf]  ;;  %v5564_v7 = vadd.f32 %v10181_v29, %v10168_v24 }
 0x49a   : > { %v7613_v19 = vor.u32 %v8543_v28, %v7610_v0  ;;  %v8553_v28 = vld [vmem:[#allocation3 + $0x1cc] sm:$0xf]  ;;  %v5784_v0 = vadd.f32 %v10108_v31, %v10106_v25 }
 0x49b   : > { %6054 = vmatmul.bf16.gmra.mxu3 %v7581_v40 }
 0x49c   : > { %v5867_v57 = vpop.f32.mrf.mxu1 }
 0x49d   : > { %v10263_v63 = vadd.f32 %v5867_v57, %v5779_v8  ;;  %v10273_v8 = vpop.f32.mrf.mxu0  ;;  %v7616_v57 = vld [vmem:[#allocation3 + $0x180] sm:$0xf] }
 0x49e   : > { %v5739_v49 = vpop.f32.mrf.mxu3 }
 0x49f   : > { %v10265_v12 = vadd.f32 %v5739_v49, %v5651_v22  ;;  %v7617_v49 = vor.u32 %v8548_v11, %v7616_v57  ;;  %v7646_v57 = vld [vmem:[#allocation3 + $0x1e4] sm:$0xf0] }
 0x4a0   : > { %v5652_v23 = vpop.f32.mrf.mxu2 }
 0x4a1   : > { %10787 = vst [vmem:[#allocation37_spill] sm:$0xff] %v10265_v12  ;;  %5906 = vmatmul.bf16.gmra.mxu1 %v7789_v4  ;;  %v5653_v16 = vadd.f32 %v5652_v23, %v5564_v7  ;;  %v7654_v4 = vld [vmem:[#allocation3 + $0x1ec] sm:$0xf0]  ;;  %v8601_v23 = vld [vmem:[#allocation3 + $0x348] sm:$0xf0] }
 0x4a2   : > { %v7657_v7 = vor.u32 %v8553_v28, %v7654_v4  ;;  %v5572_v28 = vadd.f32 %v10181_v29, %v10197_v38 }
 0x4a4   : > { %v10269_v58 = vpop.f32.mrf.mxu1 }
 0x4a5   : > { %5970 = vmatmul.bf16.gmra.mxu2 %v7613_v19 }
 0x4a6   : > { %6148 = vmatmul.bf16.gmra.mxu0 %v7621_v14  ;;  %v5741_v40 = vpop.f32.mrf.mxu3  ;;  %v8705_v14 = vld [vmem:[#allocation9 + $0x208] sm:$0xff] }
 0x4a7   : > { %v10275_v22 = vadd.f32 %v5741_v40, %v5653_v16  ;;  %6210 = vmatpush.bf16.msra.mxu1 %v8705_v14  ;;  %v7825_v16 = vor.u32 %v8601_v23, %v7824_v56  ;;  %v8552_v14 = vld [vmem:[#allocation3 + $0x1c4] sm:$0xf]  ;;  %v8557_v23 = vld [vmem:[#allocation3 + $0x1e8] sm:$0xf0] }
 0x4a8   : > { %v5655_v60 = vpop.f32.mrf.mxu2  ;;  %v7649_v31 = vor.u32 %v8552_v14, %v7646_v57  ;;  %v7860_v57 = vld [vmem:[#allocation3 + $0x370] sm:$0xf] }
 0x4a9   : > { %10788 = vst [vmem:[#allocation38_spill] sm:$0xff] %v10275_v22  ;;  %v5656_v24 = vadd.f32 %v5655_v60, %v5567_v13  ;;  %v5569_v22 = vadd.f32 %v10181_v29, %v10189_v3  ;;  %v10285_v60 = vpop.f32.mrf.mxu0  ;;  %v7652_v3 = vld [vmem:[#allocation3 + $0x1c8] sm:$0xf] }
 0x4ab   : > { %6059 = vmatmul.bf16.gmra.mxu3 %v7617_v49 }
 0x4ae   : > { %v5872_v19 = vpop.f32.mrf.mxu1  ;;  %v5744_v40 = vpop.f32.mrf.mxu3 }
 0x4af   : > { %v10279_v12 = vadd.f32 %v5872_v19, %v5784_v0  ;;  %v10283_v11 = vadd.f32 %v5744_v40, %v5656_v24  ;;  %v7653_v19 = vor.u32 %v8557_v23, %v7652_v3  ;;  %v8562_v40 = vld [vmem:[#allocation3 + $0x214] sm:$0xf]  ;;  %v8561_v3 = vld [vmem:[#allocation3 + $0x20c] sm:$0xf] }
 0x4b0   : > { %v5657_v13 = vpop.f32.mrf.mxu2 }
 0x4b1   : > { %10789 = vst [vmem:[#allocation39_spill] sm:$0xff] %v10283_v11  ;;  %5911 = vmatmul.bf16.gmra.mxu1 %v7825_v16  ;;  %v5658_v25 = vadd.f32 %v5657_v13, %v5569_v22  ;;  %v8610_v16 = vld [vmem:[#allocation3 + $0x390] sm:$0xf0]  ;;  %v10293_v11 = vpop.f32.mrf.mxu0  ;;  %v5789_v22 = vadd.f32 %v10130_v61, %v10122_v42 }
 0x4b2   : > { %v7861_v38 = vor.u32 %v8610_v16, %v7860_v57  ;;  %v8566_v16 = vld [vmem:[#allocation3 + $0x230] sm:$0xf0] }
 0x4b5   : > { %5975 = vmatmul.bf16.gmra.mxu2 %v7649_v31 }
 0x4b6   : > { %6153 = vmatmul.bf16.gmra.mxu0 %v7657_v7  ;;  %v10287_v4 = vpop.f32.mrf.mxu1  ;;  %v5746_v49 = vpop.f32.mrf.mxu3  ;;  %v7690_v7 = vld [vmem:[#allocation3 + $0x234] sm:$0xf0] }
 0x4b7   : > { %v10291_v0 = vadd.f32 %v5746_v49, %v5658_v25  ;;  %v7693_v13 = vor.u32 %v8562_v40, %v7690_v7  ;;  %v5574_v49 = vadd.f32 %v10181_v29, %v10205_v45  ;;  %v5577_v40 = vadd.f32 %v10181_v29, %v10211_v43  ;;  %v8704_v45 = vld [vmem:[#allocation9 + $0x200] sm:$0xff] }
 0x4b8   : > { %v5660_v24 = vpop.f32.mrf.mxu2  ;;  %6211 = vmatpush.bf16.msra.mxu1 %v8704_v45 }
 0x4b9   : > { %10790 = vst [vmem:[#allocation40_spill] sm:$0xff] %v10291_v0  ;;  %v5661_v56 = vadd.f32 %v5660_v24, %v5572_v28  ;;  %v7682_v24 = vld [vmem:[#allocation3 + $0x22c] sm:$0xf0]  ;;  %v10305_v61 = vpop.f32.mrf.mxu0 }
 0x4ba   : > { %v7685_v0 = vor.u32 %v8561_v3, %v7682_v24  ;;  %v7896_v24 = vld [vmem:[#allocation3 + $0x3b8] sm:$0xf] }
 0x4bb   : > { %6064 = vmatmul.bf16.gmra.mxu3 %v7653_v19 }
 0x4be   : > { %v5877_v14 = vpop.f32.mrf.mxu1  ;;  %v5749_v25 = vpop.f32.mrf.mxu3 }
 0x4bf   : > { %v10297_v31 = vadd.f32 %v5877_v14, %v5789_v22  ;;  %v10301_v23 = vadd.f32 %v5749_v25, %v5661_v56  ;;  %v7688_v56 = vld [vmem:[#allocation3 + $0x210] sm:$0xf]  ;;  %v7726_v14 = vld [vmem:[#allocation3 + $0x27c] sm:$0xf0]  ;;  %v8619_v25 = vld [vmem:[#allocation3 + $0x3d8] sm:$0xf0] }
 0x4c0   : > { %v5662_v28 = vpop.f32.mrf.mxu2  ;;  %v7689_v57 = vor.u32 %v8566_v16, %v7688_v56  ;;  %v7897_v43 = vor.u32 %v8619_v25, %v7896_v24  ;;  %v8570_v56 = vld [vmem:[#allocation3 + $0x254] sm:$0xf] }
 0x4c1   : > { %5916 = vmatmul.bf16.gmra.mxu1 %v7861_v38  ;;  %v5663_v19 = vadd.f32 %v5662_v28, %v5574_v49  ;;  %v8571_v49 = vld [vmem:[#allocation3 + $0x25c] sm:$0xf]  ;;  %v10317_v16 = vpop.f32.mrf.mxu0 }
 0x4c2   : > { %v7729_v28 = vor.u32 %v8571_v49, %v7726_v14 }
 0x4c5   : > { %5980 = vmatmul.bf16.gmra.mxu2 %v7685_v0  ;;  %v5794_v0 = vadd.f32 %v10142_v27, %v10136_v44  ;;  %v5504_v27 = vadd.f32 %v10181_v29, %v9886_v30 }
 0x4c6   : > { %6158 = vmatmul.bf16.gmra.mxu0 %v7693_v13  ;;  %v10303_v42 = vpop.f32.mrf.mxu1  ;;  %v5751_v7 = vpop.f32.mrf.mxu3 }
 0x4c7   : > { %10791 = vst [vmem:[#allocation41_spill] sm:$0xff] %v10303_v42  ;;  %v10309_v22 = vadd.f32 %v5751_v7, %v5663_v19  ;;  %v5579_v7 = vadd.f32 %v10181_v29, %v10217_v32  ;;  %v5593_v25 = vadd.f32 %v10068_v6, %v5504_v27  ;;  %v8575_v32 = vld [vmem:[#allocation3 + $0x278] sm:$0xf0]  ;;  %v5799_v6 = vadd.f32 %v10156_v37, %v10158_v59 }
 0x4c8   : > { %v5665_v13 = vpop.f32.mrf.mxu2  ;;  %v5509_v37 = vadd.f32 %v10181_v29, %v9927_v46 }
 0x4c9   : > { %v5666_v38 = vadd.f32 %v5665_v13, %v5577_v40  ;;  %v7718_v13 = vld [vmem:[#allocation3 + $0x274] sm:$0xf0]  ;;  %v5682_v24 = vadd.f32 %v10062_v62, %v5593_v25 }
 0x4ca   : > { %v7721_v14 = vor.u32 %v8570_v56, %v7718_v13 }
 0x4cb   : > { %6069 = vmatmul.bf16.gmra.mxu3 %v7689_v57  ;;  %v5771_v27 = vadd.f32 %v10064_v17, %v5682_v24  ;;  %v5598_v24 = vadd.f32 %v10082_v15, %v5509_v37 }
 0x4cd   : > { %v5860_v25 = vadd.f32 %v10235_v21, %v5771_v27  ;;  %v8584_v21 = vld [vmem:[#allocation3 + $0x2c0] sm:$0xf0]  ;;  %v8637_v27 = vld [vmem:[#allocation3 + $0x468] sm:$0xf0] }
 0x4ce   : > { %v5882_v3 = vpop.f32.mrf.mxu1  ;;  %v5754_v19 = vpop.f32.mrf.mxu3 }
 0x4cf   : > { %v10313_v42 = vadd.f32 %v5882_v3, %v5794_v0  ;;  %v10319_v40 = vadd.f32 %v5754_v19, %v5666_v38  ;;  %v7724_v38 = vld [vmem:[#allocation3 + $0x258] sm:$0xf]  ;;  %v7762_v3 = vld [vmem:[#allocation3 + $0x2c4] sm:$0xf0] }
 0x4d0   : > { %v5667_v45 = vpop.f32.mrf.mxu2  ;;  %v7725_v19 = vor.u32 %v8575_v32, %v7724_v38  ;;  %v8579_v38 = vld [vmem:[#allocation3 + $0x29c] sm:$0xf] }
 0x4d1   : > { %5921 = vmatmul.bf16.gmra.mxu1 %v7897_v43  ;;  %v5668_v44 = vadd.f32 %v5667_v45, %v5579_v7  ;;  %v10329_v43 = vpop.f32.mrf.mxu0  ;;  %v8628_v7 = vld [vmem:[#allocation3 + $0x420] sm:$0xf0] }
 0x4d2   : > { %v8580_v45 = vld [vmem:[#allocation3 + $0x2a4] sm:$0xf] }
 0x4d3   : > { %v7765_v56 = vor.u32 %v8580_v45, %v7762_v3  ;;  %v7760_v45 = vld [vmem:[#allocation3 + $0x2a0] sm:$0xf] }
 0x4d5   : > { %5985 = vmatmul.bf16.gmra.mxu2 %v7721_v14 }
 0x4d6   : > { %6163 = vmatmul.bf16.gmra.mxu0 %v7729_v28  ;;  %v10323_v57 = vpop.f32.mrf.mxu1  ;;  %v5756_v49 = vpop.f32.mrf.mxu3 }
 0x4d7   : > { %v10326_v0 = vadd.f32 %v5756_v49, %v5668_v44  ;;  %v7932_v44 = vld [vmem:[#allocation3 + $0x400] sm:$0xf] }
 0x4d8   : > { %v5946_v28 = vpop.f32.mrf.mxu2  ;;  %v7933_v49 = vor.u32 %v8628_v7, %v7932_v44  ;;  %v7761_v44 = vor.u32 %v8584_v21, %v7760_v45  ;;  %v5514_v21 = vadd.f32 %v10181_v29, %v9964_v35 }
 0x4d9   : > { %v5947_v30 = vadd.f32 %v5946_v28, %v10227_v52  ;;  %v7754_v28 = vld [vmem:[#allocation3 + $0x2bc] sm:$0xf0]  ;;  %v10342_v59 = vpop.f32.mrf.mxu0 }
 0x4da   : > { %v7757_v17 = vor.u32 %v8579_v38, %v7754_v28 }
 0x4db   : > { %6074 = vmatmul.bf16.gmra.mxu3 %v7725_v19 }
 0x4de   : > { %v5887_v13 = vpop.f32.mrf.mxu1  ;;  %v6035_v62 = vpop.f32.mrf.mxu3 }
 0x4df   : > { %v10335_v14 = vadd.f32 %v5887_v13, %v5799_v6  ;;  %v10338_v32 = vadd.f32 %v6035_v62, %v5947_v30  ;;  %v5687_v13 = vadd.f32 %v10080_v50, %v5598_v24  ;;  %v5804_v62 = vadd.f32 %v10172_v18, %v10174_v48  ;;  %v7790_v18 = vld [vmem:[#allocation3 + $0x304] sm:$0xf0] }
 0x4e0   : > { %v5948_v52 = vpop.f32.mrf.mxu2 }
 0x4e1   : > { %5926 = vmatmul.bf16.gmra.mxu1 %v7933_v49  ;;  %v5949_v19 = vadd.f32 %v5948_v52, %v5860_v25  ;;  %v8589_v49 = vld [vmem:[#allocation3 + $0x2ec] sm:$0xf]  ;;  %v7968_v52 = vld [vmem:[#allocation3 + $0x448] sm:$0xf]  ;;  %v5776_v38 = vadd.f32 %v10084_v33, %v5687_v13  ;;  %v10354_v28 = vpop.f32.mrf.mxu0  ;;  %v5806_v33 = vadd.f32 %v10185_v5, %v10187_v20  ;;  %v7444_v20 = vld [vmem:[#allocation3 + $0x20] sm:$0xf] }
 0x4e2   : > { %v7969_v37 = vor.u32 %v8637_v27, %v7968_v52  ;;  %v8504_v52 = vld [vmem:[#allocation3 + $0x40] sm:$0xf0] }
 0x4e5   : > { %5990 = vmatmul.bf16.gmra.mxu2 %v7757_v17 }
 0x4e6   : > { %6168 = vmatmul.bf16.gmra.mxu0 %v7765_v56  ;;  %v10344_v3 = vpop.f32.mrf.mxu1  ;;  %v6037_v7 = vpop.f32.mrf.mxu3  ;;  %v7798_v56 = vld [vmem:[#allocation3 + $0x30c] sm:$0xf0] }
 0x4e7   : > { %v10347_v30 = vadd.f32 %v6037_v7, %v5949_v19  ;;  %v7801_v15 = vor.u32 %v8589_v49, %v7798_v56  ;;  %v8588_v7 = vld [vmem:[#allocation3 + $0x2e4] sm:$0xf]  ;;  %v5603_v56 = vadd.f32 %v10096_v1, %v5514_v21  ;;  %v7796_v49 = vld [vmem:[#allocation3 + $0x2e8] sm:$0xf]  ;;  %v8598_v1 = vld [vmem:[#allocation3 + $0x334] sm:$0xf] }
 0x4e8   : > { %v5951_v6 = vpop.f32.mrf.mxu2  ;;  %v7793_v45 = vor.u32 %v8588_v7, %v7790_v18  ;;  %v7445_v7 = vor.u32 %v8504_v52, %v7444_v20  ;;  %v8597_v21 = vld [vmem:[#allocation3 + $0x32c] sm:$0xf]  ;;  %v7870_v20 = vld [vmem:[#allocation3 + $0x39c] sm:$0xf0] }
 0x4e9   : > { %v5952_v46 = vadd.f32 %v5951_v6, %v10245_v55  ;;  %v5865_v55 = vadd.f32 %v10253_v53, %v5776_v38  ;;  %v5692_v35 = vadd.f32 %v10098_v51, %v5603_v56  ;;  %v5809_v38 = vadd.f32 %v10193_v47, %v10195_v34  ;;  %v10794_v52 = vld [vmem:[#allocation14_spill] sm:$0xff] }
 0x4ea   : > { %v5519_v34 = vadd.f32 %v10181_v29, %v9997_v41 }
 0x4eb   : > { %6079 = vmatmul.bf16.gmra.mxu3 %v7761_v44  ;;  %v8593_v44 = vld [vmem:[#allocation3 + $0x308] sm:$0xf0] }
 0x4ee   : > { %v5892_v25 = vpop.f32.mrf.mxu1  ;;  %v6040_v50 = vpop.f32.mrf.mxu3 }
 0x4ef   : > { %v10356_v19 = vadd.f32 %v5892_v25, %v5804_v62  ;;  %v10359_v17 = vadd.f32 %v6040_v50, %v5952_v46  ;;  %v10368_v46 = vpop.f32.mrf.mxu0  ;;  %v7797_v25 = vor.u32 %v8593_v44, %v7796_v49  ;;  %v10793_v44 = vld [vmem:[#allocation15_spill] sm:$0xff] }
 0x4f0   : > { %v5953_v24 = vpop.f32.mrf.mxu2  ;;  %v5608_v49 = vadd.f32 %v10793_v44, %v5519_v34  ;;  %v7862_v44 = vld [vmem:[#allocation3 + $0x394] sm:$0xf0] }
 0x4f1   : > { %5931 = vmatmul.bf16.gmra.mxu1 %v7969_v37  ;;  %v5954_v48 = vadd.f32 %v5953_v24, %v5865_v55  ;;  %v5781_v55 = vadd.f32 %v10100_v9, %v5692_v35  ;;  %v10792_v9 = vld [vmem:[#allocation29_spill] sm:$0xff] }
 0x4f3   : > { %v5870_v51 = vadd.f32 %v10269_v58, %v5781_v55  ;;  %v10795_v55 = vld [vmem:[#allocation31_spill] sm:$0xff] }
 0x4f5   : > { %5995 = vmatmul.bf16.gmra.mxu2 %v7793_v45 }
 0x4f6   : > { %6173 = vmatmul.bf16.gmra.mxu0 %v7801_v15  ;;  %v5894_v6 = vpop.f32.mrf.mxu1  ;;  %v6042_v53 = vpop.f32.mrf.mxu3  ;;  %v7834_v15 = vld [vmem:[#allocation3 + $0x354] sm:$0xf0] }
 0x4f7   : > { %v10366_v13 = vadd.f32 %v5894_v6, %v5806_v33  ;;  %v10370_v27 = vadd.f32 %v6042_v53, %v5954_v48  ;;  %v7837_v37 = vor.u32 %v8598_v1, %v7834_v15  ;;  %v7826_v33 = vld [vmem:[#allocation3 + $0x34c] sm:$0xf0]  ;;  %v10382_v45 = vpop.f32.mrf.mxu0  ;;  %v5811_v6 = vadd.f32 %v10792_v9, %v10203_v2  ;;  %v8602_v15 = vld [vmem:[#allocation3 + $0x350] sm:$0xf0]  ;;  %v7480_v2 = vld [vmem:[#allocation3 + $0x68] sm:$0xf] }
 0x4f8   : > { %v5956_v62 = vpop.f32.mrf.mxu2  ;;  %v7829_v56 = vor.u32 %v8597_v21, %v7826_v33  ;;  %v5697_v1 = vadd.f32 %v10794_v52, %v5608_v49  ;;  %v10797_v21 = vld [vmem:[#allocation16_spill] sm:$0xff] }
 0x4f9   : > { %v5957_v5 = vadd.f32 %v5956_v62, %v10263_v63 }
 0x4fa   : > { %v5786_v33 = vadd.f32 %v10797_v21, %v5697_v1 }
 0x4fb   : > { %6084 = vmatmul.bf16.gmra.mxu3 %v7797_v25  ;;  %v7832_v25 = vld [vmem:[#allocation3 + $0x330] sm:$0xf] }
 0x4fc   : > { %v7833_v41 = vor.u32 %v8602_v15, %v7832_v25  ;;  %v10799_v15 = vld [vmem:[#allocation32_spill] sm:$0xff] }
 0x4fe   : > { %v5897_v50 = vpop.f32.mrf.mxu1  ;;  %v6045_v18 = vpop.f32.mrf.mxu3 }
 0x4ff   : > { %v10377_v24 = vadd.f32 %v5897_v50, %v5809_v38  ;;  %v10380_v48 = vadd.f32 %v6045_v18, %v5957_v5  ;;  %v8513_v38 = vld [vmem:[#allocation3 + $0x88] sm:$0xf0]  ;;  %v10395_v50 = vpop.f32.mrf.mxu0 }
 0x500   : > { %v5958_v63 = vpop.f32.mrf.mxu2  ;;  %v7481_v34 = vor.u32 %v8513_v38, %v7480_v2  ;;  %v8611_v2 = vld [vmem:[#allocation3 + $0x398] sm:$0xf0]  ;;  %v7906_v38 = vld [vmem:[#allocation3 + $0x3e4] sm:$0xf0] }
 0x501   : > { %6212 = vmatmul.bf16.vlgmr.msra.gmra.mxu1 %v7445_v7  ;;  %v5959_v47 = vadd.f32 %v5958_v63, %v5870_v51  ;;  %v10796_v7 = vld [vmem:[#allocation30_spill] sm:$0xff] }
 0x502   : > { %v5814_v18 = vadd.f32 %v10796_v7, %v10795_v55  ;;  %v7516_v55 = vld [vmem:[#allocation3 + $0xb0] sm:$0xf]  ;;  %v8522_v7 = vld [vmem:[#allocation3 + $0xd0] sm:$0xf0] }
 0x505   : > { %6000 = vmatmul.bf16.gmra.mxu2 %v7829_v56 }
 0x506   : > { %6178 = vmatmul.bf16.gmra.mxu0 %v7837_v37  ;;  %v5899_v53 = vpop.f32.mrf.mxu1  ;;  %v6047_v62 = vpop.f32.mrf.mxu3  ;;  %v8607_v37 = vld [vmem:[#allocation3 + $0x37c] sm:$0xf] }
 0x507   : > { %v10389_v58 = vadd.f32 %v5899_v53, %v5811_v6  ;;  %v10391_v35 = vadd.f32 %v6047_v62, %v5959_v47  ;;  %v7873_v51 = vor.u32 %v8607_v37, %v7870_v20  ;;  %v8606_v53 = vld [vmem:[#allocation3 + $0x374] sm:$0xf]  ;;  %v10798_v62 = vld [vmem:[#allocation33_spill] sm:$0xff]  ;;  %v10407_v52 = vpop.f32.mrf.mxu0 }
 0x508   : > { %v5961_v5 = vpop.f32.mrf.mxu2  ;;  %v5816_v25 = vadd.f32 %v10799_v15, %v10798_v62 }
 0x509   : > { %v5962_v29 = vadd.f32 %v5961_v5, %v10279_v12  ;;  %v5875_v12 = vadd.f32 %v10287_v4, %v5786_v33  ;;  %v7865_v5 = vor.u32 %v8606_v53, %v7862_v44  ;;  %v7898_v53 = vld [vmem:[#allocation3 + $0x3dc] sm:$0xf0]  ;;  %v10801_v44 = vld [vmem:[#allocation35_spill] sm:$0xff] }
 0x50b   : > { %6089 = vmatmul.bf16.gmra.mxu3 %v7833_v41 }
 0x50e   : > { %v5902_v63 = vpop.f32.mrf.mxu1  ;;  %v6050_v9 = vpop.f32.mrf.mxu3 }
 0x50f   : > { %v10400_v47 = vadd.f32 %v5902_v63, %v5814_v18  ;;  %v10403_v6 = vadd.f32 %v6050_v9, %v5962_v29  ;;  %v7868_v29 = vld [vmem:[#allocation3 + $0x378] sm:$0xf]  ;;  %v8616_v18 = vld [vmem:[#allocation3 + $0x3c4] sm:$0xf]  ;;  %v7517_v9 = vor.u32 %v8522_v7, %v7516_v55  ;;  %v10802_v55 = vld [vmem:[#allocation36_spill] sm:$0xff] }
 0x510   : > { %v5963_v56 = vpop.f32.mrf.mxu2  ;;  %v7869_v37 = vor.u32 %v8611_v2, %v7868_v29  ;;  %v7909_v21 = vor.u32 %v8616_v18, %v7906_v38  ;;  %v7552_v29 = vld [vmem:[#allocation3 + $0xf8] sm:$0xf]  ;;  %v8531_v38 = vld [vmem:[#allocation3 + $0x118] sm:$0xf0]  ;;  %v5824_v7 = vadd.f32 %v10802_v55, %v10247_v36  ;;  %v8629_v36 = vld [vmem:[#allocation3 + $0x428] sm:$0xf0] }
 0x511   : > { %6217 = vmatmul.bf16.gmra.mxu1 %v7481_v34  ;;  %v5964_v49 = vadd.f32 %v5963_v56, %v5875_v12  ;;  %v10417_v12 = vpop.f32.mrf.mxu0  ;;  %v8615_v56 = vld [vmem:[#allocation3 + $0x3bc] sm:$0xf] }
 0x512   : > { %v7901_v62 = vor.u32 %v8615_v56, %v7898_v53  ;;  %v5826_v56 = vadd.f32 %v10261_v54, %v10257_v26 }
 0x515   : > { %6005 = vmatmul.bf16.gmra.mxu2 %v7865_v5  ;;  %v7904_v5 = vld [vmem:[#allocation3 + $0x3c0] sm:$0xf] }
 0x516   : > { %6183 = vmatmul.bf16.gmra.mxu0 %v7873_v51  ;;  %v5904_v20 = vpop.f32.mrf.mxu1  ;;  %v6052_v41 = vpop.f32.mrf.mxu3  ;;  %v10800_v51 = vld [vmem:[#allocation34_spill] sm:$0xff] }
 0x517   : > { %v10409_v1 = vadd.f32 %v5904_v20, %v5816_v25  ;;  %v10411_v4 = vadd.f32 %v6052_v41, %v5964_v49  ;;  %v5819_v63 = vadd.f32 %v10800_v51, %v10231_v39  ;;  %v5821_v49 = vadd.f32 %v10241_v10, %v10801_v44  ;;  %v8620_v39 = vld [vmem:[#allocation3 + $0x3e0] sm:$0xf0]  ;;  %v7942_v20 = vld [vmem:[#allocation3 + $0x42c] sm:$0xf0] }
 0x518   : > { %v7905_v2 = vor.u32 %v8620_v39, %v7904_v5  ;;  %v7940_v39 = vld [vmem:[#allocation3 + $0x408] sm:$0xf] }
 0x519   : > { %v10423_v41 = vpop.f32.mrf.mxu0  ;;  %v7941_v5 = vor.u32 %v8629_v36, %v7940_v39  ;;  %v10805_v39 = vld [vmem:[#allocation39_spill] sm:$0xff] }
 0x51b   : > { %6094 = vmatmul.bf16.gmra.mxu3 %v7869_v37  ;;  %v8625_v37 = vld [vmem:[#allocation3 + $0x40c] sm:$0xf] }
 0x51c   : > { %v7945_v18 = vor.u32 %v8625_v37, %v7942_v20 }
 0x51e   : > { %v5907_v33 = vpop.f32.mrf.mxu1 }
 0x51f   : > { %v10415_v34 = vadd.f32 %v5907_v33, %v5819_v63  ;;  %v7553_v63 = vor.u32 %v8531_v38, %v7552_v29  ;;  %v7934_v33 = vld [vmem:[#allocation3 + $0x424] sm:$0xf0]  ;;  %v8540_v29 = vld [vmem:[#allocation3 + $0x160] sm:$0xf0]  ;;  %v10803_v38 = vld [vmem:[#allocation37_spill] sm:$0xff] }
 0x520   : > { %v5829_v37 = vadd.f32 %v10273_v8, %v10803_v38 }
 0x521   : > { %6222 = vmatmul.bf16.gmra.mxu1 %v7517_v9  ;;  %v10429_v9 = vpop.f32.mrf.mxu0 }
 0x525   : > { %6010 = vmatmul.bf16.gmra.mxu2 %v7901_v62  ;;  %v8634_v62 = vld [vmem:[#allocation3 + $0x454] sm:$0xf] }
 0x526   : > { %6188 = vmatmul.bf16.gmra.mxu0 %v7909_v21  ;;  %v5909_v15 = vpop.f32.mrf.mxu1  ;;  %v8624_v21 = vld [vmem:[#allocation3 + $0x404] sm:$0xf] }
 0x527   : > { %v10421_v25 = vadd.f32 %v5909_v15, %v5821_v49  ;;  %v7937_v53 = vor.u32 %v8624_v21, %v7934_v33  ;;  %v7978_v15 = vld [vmem:[#allocation3 + $0x474] sm:$0xf0] }
 0x528   : > { %v7981_v20 = vor.u32 %v8634_v62, %v7978_v15  ;;  %v7624_v62 = vld [vmem:[#allocation3 + $0x188] sm:$0xf]  ;;  %v8549_v15 = vld [vmem:[#allocation3 + $0x1a8] sm:$0xf0] }
 0x52b   : > { %6099 = vmatmul.bf16.gmra.mxu3 %v7905_v2  ;;  %v7588_v2 = vld [vmem:[#allocation3 + $0x140] sm:$0xf] }
 0x52c   : > { %v7589_v54 = vor.u32 %v8540_v29, %v7588_v2  ;;  %v7625_v29 = vor.u32 %v8549_v15, %v7624_v62 }
 0x52e   : > { %v5912_v10 = vpop.f32.mrf.mxu1 }
 0x52f   : > { %v10427_v51 = vadd.f32 %v5912_v10, %v5824_v7  ;;  %v10437_v7 = vpop.f32.mrf.mxu0  ;;  %v7970_v10 = vld [vmem:[#allocation3 + $0x46c] sm:$0xf0] }
 0x531   : > { %6227 = vmatmul.bf16.gmra.mxu1 %v7553_v63  ;;  %v10804_v63 = vld [vmem:[#allocation38_spill] sm:$0xff] }
 0x532   : > { %v5831_v21 = vadd.f32 %v10285_v60, %v10804_v63  ;;  %v10806_v60 = vld [vmem:[#allocation40_spill] sm:$0xff] }
 0x533   : > { %v5836_v38 = vadd.f32 %v10305_v61, %v10806_v60  ;;  %v7696_v61 = vld [vmem:[#allocation3 + $0x218] sm:$0xf] }
 0x535   : > { %6015 = vmatmul.bf16.gmra.mxu2 %v7937_v53  ;;  %v7976_v53 = vld [vmem:[#allocation3 + $0x450] sm:$0xf] }
 0x536   : > { %6193 = vmatmul.bf16.gmra.mxu0 %v7945_v18  ;;  %v5914_v44 = vpop.f32.mrf.mxu1  ;;  %v8633_v18 = vld [vmem:[#allocation3 + $0x44c] sm:$0xf] }
 0x537   : > { %v10433_v49 = vadd.f32 %v5914_v44, %v5826_v56  ;;  %v7973_v33 = vor.u32 %v8633_v18, %v7970_v10  ;;  %v8638_v44 = vld [vmem:[#allocation3 + $0x470] sm:$0xf0]  ;;  %v5839_v10 = vadd.f32 %v10317_v16, %v10301_v23  ;;  %v5846_v16 = vadd.f32 %v10354_v28, %v10326_v0 }
 0x538   : > { %v7977_v8 = vor.u32 %v8638_v44, %v7976_v53  ;;  %v8558_v18 = vld [vmem:[#allocation3 + $0x1f0] sm:$0xf0]  ;;  %v8567_v44 = vld [vmem:[#allocation3 + $0x238] sm:$0xf0] }
 0x539   : > { %v7697_v23 = vor.u32 %v8567_v44, %v7696_v61  ;;  %v10491_v61 = vpop.f32.mrf.mxu0  ;;  %v6130_v44 = vadd.f32 %v10395_v50, %v10359_v17 }
 0x53b   : > { %6104 = vmatmul.bf16.gmra.mxu3 %v7941_v5  ;;  %v5834_v5 = vadd.f32 %v10293_v11, %v10805_v39 }
 0x53e   : > { %v5917_v55 = vpop.f32.mrf.mxu1 }
 0x53f   : > { %v10439_v26 = vadd.f32 %v5917_v55, %v5829_v37 }
 0x541   : > { %6232 = vmatmul.bf16.gmra.mxu1 %v7589_v54  ;;  %v7660_v54 = vld [vmem:[#allocation3 + $0x1d0] sm:$0xf]  ;;  %v10505_v50 = vpop.f32.mrf.mxu0 }
 0x542   : > { %v7661_v11 = vor.u32 %v8558_v18, %v7660_v54  ;;  %v6294_v18 = vld [vmem:[%s9183_s7 + $0x8] sm:$0xff] }
 0x545   : > { %6020 = vmatmul.bf16.gmra.mxu2 %v7973_v33  ;;  %v5841_v33 = vadd.f32 %v10329_v43, %v10309_v22  ;;  %v7732_v43 = vld [vmem:[#allocation3 + $0x260] sm:$0xf] }
 0x546   : > { %6198 = vmatmul.bf16.gmra.mxu0 %v7981_v20  ;;  %v5919_v56 = vpop.f32.mrf.mxu1 }
 0x547   : > { %v10443_v36 = vadd.f32 %v5919_v56, %v5831_v21 }
 0x54b   : > { %6109 = vmatmul.bf16.gmra.mxu3 %v7977_v8  ;;  %v5844_v8 = vadd.f32 %v10342_v59, %v10319_v40  ;;  %v10474_v40 = vld [vmem:[%s10739_s5] ss:$0 sm:$0xff] }
 0x54e   : > { %v5922_v20 = vpop.f32.mrf.mxu1 }
 0x54f   : > { %v10447_v2 = vadd.f32 %v5922_v20, %v5834_v5  ;;  %v8576_v5 = vld [vmem:[#allocation3 + $0x280] sm:$0xf0]  ;;  %v6125_v20 = vadd.f32 %v10368_v46, %v10338_v32  ;;  %v6127_v32 = vadd.f32 %v10382_v45, %v10347_v30 }
 0x550   : > { %v7733_v60 = vor.u32 %v8576_v5, %v7732_v43  ;;  %v6132_v5 = vadd.f32 %v10407_v52, %v10370_v27 }
 0x551   : > { %6237 = vmatmul.bf16.gmra.mxu1 %v7625_v29 }
 0x556   : > { %v5924_v37 = vpop.f32.mrf.mxu1 }
 0x557   : > { %v10451_v55 = vadd.f32 %v5924_v37, %v5836_v38  ;;  %v6293_v38 = vld [vmem:[%s9183_s7] sm:$0xff]  ;;  %v10478_v37 = vpop.f32.mrf.mxu2 }
 0x55e   : > { %v5927_v63 = vpop.f32.mrf.mxu1 }
 0x55f   : > { %v10455_v21 = vadd.f32 %v5927_v63, %v5839_v10  ;;  %v10489_v63 = vpop.f32.mrf.mxu3  ;;  %v10496_v30 = vpop.f32.mrf.mxu2 }
 0x561   : > { %6242 = vmatmul.bf16.gmra.mxu1 %v7661_v11 }
 0x566   : > { %v5929_v56 = vpop.f32.mrf.mxu1 }
 0x567   : > { %v10459_v53 = vadd.f32 %v5929_v56, %v5841_v33  ;;  %v7768_v33 = vld [vmem:[#allocation3 + $0x2a8] sm:$0xf]  ;;  %v8585_v56 = vld [vmem:[#allocation3 + $0x2c8] sm:$0xf0]  ;;  %v10500_v43 = vpop.f32.mrf.mxu3 }
 0x56e   : > { %v5932_v62 = vpop.f32.mrf.mxu1 }
 0x56f   : > { %v10463_v15 = vadd.f32 %v5932_v62, %v5844_v8  ;;  %v7769_v62 = vor.u32 %v8585_v56, %v7768_v33  ;;  %v10514_v27 = vpop.f32.mrf.mxu3 }
 0x571   : > { %6247 = vmatmul.bf16.gmra.mxu1 %v7697_v23  ;;  %v6295_v23 = vld [vmem:[%s9183_s7 + $0x10] sm:$0xff] }
 0x576   : > { %v5934_v39 = vpop.f32.mrf.mxu1 }
 0x577   : > { %v10467_v22 = vadd.f32 %v5934_v39, %v5846_v16 }
 0x57e   : > { %v6213_v59 = vpop.f32.mrf.mxu1 }
 0x57f   : > { %v6214_v29 = vadd.f32 %v6213_v59, %v6125_v20  ;;  %v10507_v59 = vpop.f32.mrf.mxu2 }
 0x581   : > { %v6329_v0 = vmul.f32 %v10474_v40, %v6214_v29  ;;  %6252 = vmatmul.bf16.gmra.mxu1 %v7733_v60  ;;  %v6296_v29 = vld [vmem:[%s9183_s7 + $0x18] sm:$0xff] }
 0x583   : > { %v6361_v28 = vadd.f32 %v6329_v0, %v6293_v38  ;;  %v7804_v0 = vld [vmem:[#allocation3 + $0x2f0] sm:$0xf] }
 0x585   : > { %6393 = vst [vmem:[%s10482_s13] sm:$0xff] %v6361_v28  ;;  %v8594_v28 = vld [vmem:[#allocation3 + $0x310] sm:$0xf0] }
 0x586   : > { %v6215_v46 = vpop.f32.mrf.mxu1 }
 0x587   : > { %v6216_v54 = vadd.f32 %v6215_v46, %v6127_v32  ;;  %v6135_v32 = vadd.f32 %v10417_v12, %v10380_v48  ;;  %v10520_v33 = vpop.f32.mrf.mxu2  ;;  %v6137_v48 = vadd.f32 %v10423_v41, %v10391_v35  ;;  %v6140_v35 = vadd.f32 %v10429_v9, %v10403_v6  ;;  %v10809_v9 = vld [vmem:[#allocation21_spill] sm:$0xff] }
 0x589   : > { %v6330_v10 = vmul.f32 %v10474_v40, %v6216_v54  ;;  %v7805_v54 = vor.u32 %v8594_v28, %v7804_v0  ;;  %v6299_v28 = vld [vmem:[%s9183_s7 + $0x30] sm:$0xff] }
 0x58b   : > { %v6362_v11 = vadd.f32 %v6330_v10, %v6294_v18  ;;  %v6297_v18 = vld [vmem:[%s9183_s7 + $0x20] sm:$0xff]  ;;  %v10517_v10 = vpop.f32.mrf.mxu0 }
 0x58d   : > { %6394 = vst [vmem:[%s10482_s13 + $0x8] sm:$0xff] %v6362_v11 }
 0x58e   : > { %v6218_v45 = vpop.f32.mrf.mxu1 }
 0x58f   : > { %v6219_v8 = vadd.f32 %v6218_v45, %v6130_v44  ;;  %v10525_v45 = vpop.f32.mrf.mxu3 }
 0x591   : > { %v6331_v16 = vmul.f32 %v10474_v40, %v6219_v8  ;;  %6257 = vmatmul.bf16.gmra.mxu1 %v7769_v62  ;;  %v6298_v8 = vld [vmem:[%s9183_s7 + $0x28] sm:$0xff] }
 0x593   : > { %v6363_v39 = vadd.f32 %v6331_v16, %v6295_v23  ;;  %v10529_v23 = vpop.f32.mrf.mxu0 }
 0x595   : > { %6395 = vst [vmem:[%s10482_s13 + $0x10] sm:$0xff] %v6363_v39  ;;  %v10531_v39 = vpop.f32.mrf.mxu2 }
 0x596   : > { %v6220_v17 = vpop.f32.mrf.mxu1 }
 0x597   : > { %v6221_v20 = vadd.f32 %v6220_v17, %v6132_v5  ;;  %v7840_v5 = vld [vmem:[#allocation3 + $0x338] sm:$0xf]  ;;  %v8603_v17 = vld [vmem:[#allocation3 + $0x358] sm:$0xf0] }
 0x598   : > { %v7841_v0 = vor.u32 %v8603_v17, %v7840_v5 }
 0x599   : > { %v6332_v60 = vmul.f32 %v10474_v40, %v6221_v20  ;;  %v10539_v20 = vld [vmem:[%s10738_s4] ss:$0 sm:$0xff] }
 0x59b   : > { %v6364_v38 = vadd.f32 %v6332_v60, %v6296_v29  ;;  %v10807_v29 = vld [vmem:[#allocation17_spill] sm:$0xff] }
 0x59c   : > { %v5524_v60 = vadd.f32 %v10539_v20, %v10807_v29 }
 0x59d   : > { %6396 = vst [vmem:[%s10482_s13 + $0x18] sm:$0xff] %v6364_v38 }
 0x59e   : > { %v6223_v52 = vpop.f32.mrf.mxu1 }
 0x59f   : > { %v6224_v46 = vadd.f32 %v6223_v52, %v6135_v32  ;;  %v10808_v32 = vld [vmem:[#allocation20_spill] sm:$0xff] }
 0x5a0   : > { %v5613_v52 = vadd.f32 %v10808_v32, %v5524_v60  ;;  %v7876_v60 = vld [vmem:[#allocation3 + $0x380] sm:$0xf] }
 0x5a1   : > { %v6333_v11 = vmul.f32 %v10474_v40, %v6224_v46  ;;  %6262 = vmatmul.bf16.gmra.mxu1 %v7805_v54  ;;  %v10546_v54 = vpop.f32.mrf.mxu3 }
 0x5a3   : > { %v6365_v56 = vadd.f32 %v6333_v11, %v6297_v18  ;;  %v5702_v18 = vadd.f32 %v10809_v9, %v5613_v52  ;;  %v5967_v11 = vadd.f32 %v10478_v37, %v10297_v31  ;;  %v10811_v31 = vld [vmem:[#allocation41_spill] sm:$0xff]  ;;  %v6301_v9 = vld [vmem:[%s9183_s7 + $0x40] sm:$0xff] }
 0x5a5   : > { %6397 = vst [vmem:[%s10482_s13 + $0x20] sm:$0xff] %v6365_v56  ;;  %v10551_v56 = vpop.f32.mrf.mxu0  ;;  %v6056_v17 = vadd.f32 %v10489_v63, %v5967_v11 }
 0x5a6   : > { %v6225_v12 = vpop.f32.mrf.mxu1 }
 0x5a7   : > { %v6226_v44 = vadd.f32 %v6225_v12, %v6137_v48  ;;  %v6142_v48 = vadd.f32 %v10437_v7, %v10411_v4  ;;  %v10556_v12 = vpop.f32.mrf.mxu2  ;;  %v6145_v7 = vadd.f32 %v10491_v61, %v6056_v17 }
 0x5a9   : > { %v6334_v62 = vmul.f32 %v10474_v40, %v6226_v44  ;;  %v10563_v29 = vpop.f32.mrf.mxu3 }
 0x5ab   : > { %v6366_v16 = vadd.f32 %v6334_v62, %v6298_v8  ;;  %v6300_v62 = vld [vmem:[%s9183_s7 + $0x38] sm:$0xff] }
 0x5ad   : > { %6398 = vst [vmem:[%s10482_s13 + $0x28] sm:$0xff] %v6366_v16  ;;  %v10810_v16 = vld [vmem:[#allocation22_spill] sm:$0xff]  ;;  %v10570_v32 = vpop.f32.mrf.mxu0 }
 0x5ae   : > { %v6228_v41 = vpop.f32.mrf.mxu1  ;;  %v5791_v5 = vadd.f32 %v10810_v16, %v5702_v18  ;;  %v10813_v18 = vld [vmem:[#allocation23_spill] sm:$0xff] }
 0x5af   : > { %v6229_v38 = vadd.f32 %v6228_v41, %v6140_v35 }
 0x5b0   : > { %v5880_v37 = vadd.f32 %v10811_v31, %v5791_v5  ;;  %v6302_v31 = vld [vmem:[%s9183_s7 + $0x48] sm:$0xff] }
 0x5b1   : > { %v6335_v46 = vmul.f32 %v10474_v40, %v6229_v38  ;;  %6267 = vmatmul.bf16.gmra.mxu1 %v7841_v0  ;;  %v8612_v38 = vld [vmem:[#allocation3 + $0x3a0] sm:$0xf0]  ;;  %v10583_v5 = vpop.f32.mrf.mxu3 }
 0x5b2   : > { %v5969_v4 = vadd.f32 %v10496_v30, %v5880_v37  ;;  %v10815_v37 = vld [vmem:[#allocation24_spill] sm:$0xff] }
 0x5b3   : > { %v6367_v6 = vadd.f32 %v6335_v46, %v6299_v28  ;;  %v10812_v28 = vld [vmem:[#allocation18_spill] sm:$0xff]  ;;  %v7877_v46 = vor.u32 %v8612_v38, %v7876_v60 }
 0x5b4   : > { %v5529_v63 = vadd.f32 %v10539_v20, %v10812_v28  ;;  %v6058_v30 = vadd.f32 %v10500_v43, %v5969_v4 }
 0x5b5   : > { %6399 = vst [vmem:[%s10482_s13 + $0x30] sm:$0xff] %v6367_v6  ;;  %v10572_v6 = vpop.f32.mrf.mxu2  ;;  %v10588_v60 = vpop.f32.mrf.mxu0 }
 0x5b6   : > { %v6230_v44 = vpop.f32.mrf.mxu1  ;;  %v5618_v11 = vadd.f32 %v10813_v18, %v5529_v63  ;;  %v6147_v16 = vadd.f32 %v10505_v50, %v6058_v30  ;;  %v7912_v50 = vld [vmem:[#allocation3 + $0x3c8] sm:$0xf]  ;;  %v10817_v30 = vld [vmem:[#allocation26_spill] sm:$0xff] }
 0x5b7   : > { %v6231_v8 = vadd.f32 %v6230_v44, %v6142_v48  ;;  %v10814_v44 = vld [vmem:[#allocation25_spill] sm:$0xff] }
 0x5b9   : > { %v6336_v35 = vmul.f32 %v10474_v40, %v6231_v8  ;;  %v5707_v8 = vadd.f32 %v10814_v44, %v5618_v11  ;;  %v6072_v18 = vpop.f32.mrf.mxu3  ;;  %v6303_v11 = vld [vmem:[%s9183_s7 + $0x50] sm:$0xff] }
 0x5bb   : > { %v6368_v41 = vadd.f32 %v6336_v35, %v6300_v62  ;;  %v5972_v62 = vadd.f32 %v10507_v59, %v10313_v42  ;;  %v5796_v43 = vadd.f32 %v10815_v37, %v5707_v8  ;;  %v10818_v8 = vld [vmem:[#allocation28_spill] sm:$0xff]  ;;  %v10819_v37 = vld [vmem:[#allocation27_spill] sm:$0xff] }
 0x5bd   : > { %6400 = vst [vmem:[%s10482_s13 + $0x38] sm:$0xff] %v6368_v41  ;;  %v6061_v41 = vadd.f32 %v10514_v27, %v5972_v62  ;;  %v10591_v4 = vpop.f32.mrf.mxu2  ;;  %v5885_v42 = vadd.f32 %v10323_v57, %v5796_v43  ;;  %v10816_v27 = vld [vmem:[#allocation19_spill] sm:$0xff] }
 0x5be   : > { %v6233_v0 = vpop.f32.mrf.mxu1 }
 0x5bf   : > { %v6234_v52 = vadd.f32 %v6233_v0, %v6145_v7  ;;  %v8621_v7 = vld [vmem:[#allocation3 + $0x3e8] sm:$0xf0]  ;;  %v5974_v0 = vadd.f32 %v10520_v33, %v5885_v42  ;;  %v6150_v28 = vadd.f32 %v10517_v10, %v6061_v41  ;;  %v6161_v33 = vpop.f32.mrf.mxu0 }
 0x5c1   : > { %v6337_v48 = vmul.f32 %v10474_v40, %v6234_v52  ;;  %6272 = vmatmul.bf16.gmra.mxu1 %v7877_v46  ;;  %v5534_v52 = vadd.f32 %v10539_v20, %v10816_v27  ;;  %v5977_v20 = vadd.f32 %v10531_v39, %v10335_v14  ;;  %v8630_v14 = vld [vmem:[#allocation3 + $0x430] sm:$0xf0]  ;;  %v6305_v27 = vld [vmem:[%s9183_s7 + $0x60] sm:$0xff] }
 0x5c3   : > { %v6369_v61 = vadd.f32 %v6337_v48, %v6301_v9  ;;  %v7913_v9 = vor.u32 %v8621_v7, %v7912_v50  ;;  %v5623_v57 = vadd.f32 %v10817_v30, %v5534_v52  ;;  %v6063_v48 = vadd.f32 %v10525_v45, %v5974_v0  ;;  %v7948_v50 = vld [vmem:[#allocation3 + $0x410] sm:$0xf] }
 0x5c4   : > { %v6066_v43 = vadd.f32 %v10546_v54, %v5977_v20  ;;  %v7949_v54 = vor.u32 %v8630_v14, %v7948_v50  ;;  %v6308_v50 = vld [vmem:[%s9183_s7 + $0x78] sm:$0xff] }
 0x5c5   : > { %6401 = vst [vmem:[%s10482_s13 + $0x40] sm:$0xff] %v6369_v61  ;;  %v5986_v10 = vpop.f32.mrf.mxu2  ;;  %v5712_v62 = vadd.f32 %v10818_v8, %v5623_v57  ;;  %v7984_v8 = vld [vmem:[#allocation3 + $0x458] sm:$0xf] }
 0x5c6   : > { %v6235_v17 = vpop.f32.mrf.mxu1  ;;  %v6155_v7 = vadd.f32 %v10551_v56, %v6066_v43 }
 0x5c7   : > { %v6236_v35 = vadd.f32 %v6235_v17, %v6147_v16  ;;  %v6152_v16 = vadd.f32 %v10529_v23, %v6063_v48  ;;  %v5801_v45 = vadd.f32 %v10819_v37, %v5712_v62  ;;  %v6164_v23 = vpop.f32.mrf.mxu0  ;;  %v8639_v62 = vld [vmem:[#allocation3 + $0x478] sm:$0xf0] }
 0x5c9   : > { %v6338_v38 = vmul.f32 %v10474_v40, %v6236_v35  ;;  %v5890_v42 = vadd.f32 %v10344_v3, %v5801_v45 }
 0x5cb   : > { %v6370_v59 = vadd.f32 %v6338_v38, %v6302_v31  ;;  %v6304_v31 = vld [vmem:[%s9183_s7 + $0x58] sm:$0xff]  ;;  %v6075_v38 = vpop.f32.mrf.mxu3  ;;  %v5979_v39 = vadd.f32 %v10556_v12, %v5890_v42  ;;  %v5982_v12 = vadd.f32 %v10572_v6, %v10356_v19  ;;  %v5984_v19 = vadd.f32 %v10591_v4, %v10366_v13 }
 0x5cc   : > { %v7985_v6 = vor.u32 %v8639_v62, %v7984_v8  ;;  %v5987_v42 = vadd.f32 %v5986_v10, %v10377_v24 }
 0x5cd   : > { %6402 = vst [vmem:[%s10482_s13 + $0x48] sm:$0xff] %v6370_v59  ;;  %v5988_v0 = vpop.f32.mrf.mxu2  ;;  %v6068_v52 = vadd.f32 %v10563_v29, %v5979_v39  ;;  %v6071_v29 = vadd.f32 %v10583_v5, %v5982_v12  ;;  %v6073_v37 = vadd.f32 %v6072_v18, %v5984_v19 }
 0x5ce   : > { %v6238_v63 = vpop.f32.mrf.mxu1  ;;  %v6076_v14 = vadd.f32 %v6075_v38, %v5987_v42 }
 0x5cf   : > { %v6239_v46 = vadd.f32 %v6238_v63, %v6150_v28  ;;  %v6157_v56 = vadd.f32 %v10570_v32, %v6068_v52  ;;  %v6166_v30 = vpop.f32.mrf.mxu0  ;;  %v6160_v32 = vadd.f32 %v10588_v60, %v6071_v29  ;;  %v6162_v13 = vadd.f32 %v6161_v33, %v6073_v37  ;;  %v6312_v37 = vld [vmem:[%s9183_s7 + $0x98] sm:$0xff] }
 0x5d1   : > { %v6339_v61 = vmul.f32 %v10474_v40, %v6239_v46  ;;  %6277 = vmatmul.bf16.gmra.mxu1 %v7913_v9 }
 0x5d3   : > { %v6371_v44 = vadd.f32 %v6339_v61, %v6303_v11  ;;  %v6077_v9 = vpop.f32.mrf.mxu3  ;;  %v6306_v61 = vld [vmem:[%s9183_s7 + $0x68] sm:$0xff] }
 0x5d5   : > { %6403 = vst [vmem:[%s10482_s13 + $0x50] sm:$0xff] %v6371_v44  ;;  %v5991_v48 = vpop.f32.mrf.mxu2 }
 0x5d6   : > { %v6240_v17 = vpop.f32.mrf.mxu1 }
 0x5d7   : > { %v6241_v35 = vadd.f32 %v6240_v17, %v6152_v16  ;;  %v6169_v5 = vpop.f32.mrf.mxu0 }
 0x5d9   : > { %v6340_v41 = vmul.f32 %v10474_v40, %v6241_v35 }
 0x5db   : > { %v6372_v59 = vadd.f32 %v6340_v41, %v6304_v31  ;;  %v6080_v16 = vpop.f32.mrf.mxu3  ;;  %v6307_v31 = vld [vmem:[%s9183_s7 + $0x70] sm:$0xff] }
 0x5dd   : > { %6404 = vst [vmem:[%s10482_s13 + $0x58] sm:$0xff] %v6372_v59  ;;  %v5993_v43 = vpop.f32.mrf.mxu2 }
 0x5de   : > { %v6243_v28 = vpop.f32.mrf.mxu1 }
 0x5df   : > { %v6244_v63 = vadd.f32 %v6243_v28, %v6155_v7  ;;  %v6171_v18 = vpop.f32.mrf.mxu0 }
 0x5e1   : > { %v6341_v3 = vmul.f32 %v10474_v40, %v6244_v63  ;;  %6282 = vmatmul.bf16.gmra.mxu1 %v7949_v54  ;;  %v5989_v63 = vadd.f32 %v5988_v0, %v10389_v58  ;;  %v6165_v54 = vadd.f32 %v6164_v23, %v6076_v14 }
 0x5e3   : > { %v6373_v46 = vadd.f32 %v6341_v3, %v6305_v27  ;;  %v6082_v59 = vpop.f32.mrf.mxu3  ;;  %v6309_v27 = vld [vmem:[%s9183_s7 + $0x80] sm:$0xff]  ;;  %v6078_v33 = vadd.f32 %v6077_v9, %v5989_v63 }
 0x5e5   : > { %6405 = vst [vmem:[%s10482_s13 + $0x60] sm:$0xff] %v6373_v46  ;;  %v5996_v28 = vpop.f32.mrf.mxu2  ;;  %v5992_v46 = vadd.f32 %v5991_v48, %v10400_v47 }
 0x5e6   : > { %v6245_v11 = vpop.f32.mrf.mxu1 }
 0x5e7   : > { %v6246_v57 = vadd.f32 %v6245_v11, %v6157_v56  ;;  %v6174_v12 = vpop.f32.mrf.mxu0  ;;  %v6167_v56 = vadd.f32 %v6166_v30, %v6078_v33  ;;  %v6081_v23 = vadd.f32 %v6080_v16, %v5992_v46  ;;  %v5997_v16 = vadd.f32 %v5996_v28, %v10415_v34 }
 0x5e9   : > { %v6342_v44 = vmul.f32 %v10474_v40, %v6246_v57  ;;  %v6310_v57 = vld [vmem:[%s9183_s7 + $0x88] sm:$0xff]  ;;  %v6170_v8 = vadd.f32 %v6169_v5, %v6081_v23 }
 0x5eb   : > { %v6374_v20 = vadd.f32 %v6342_v44, %v6306_v61  ;;  %v6085_v3 = vpop.f32.mrf.mxu3  ;;  %v5994_v44 = vadd.f32 %v5993_v43, %v10409_v1 }
 0x5ec   : > { %v6086_v5 = vadd.f32 %v6085_v3, %v5997_v16 }
 0x5ed   : > { %6406 = vst [vmem:[%s10482_s13 + $0x68] sm:$0xff] %v6374_v20  ;;  %v5998_v11 = vpop.f32.mrf.mxu2  ;;  %v6311_v20 = vld [vmem:[%s9183_s7 + $0x90] sm:$0xff]  ;;  %v6083_v19 = vadd.f32 %v6082_v59, %v5994_v44 }
 0x5ee   : > { %v6248_v17 = vpop.f32.mrf.mxu1 }
 0x5ef   : > { %v6249_v35 = vadd.f32 %v6248_v17, %v6160_v32  ;;  %v6176_v48 = vpop.f32.mrf.mxu0  ;;  %v6172_v17 = vadd.f32 %v6171_v18, %v6083_v19 }
 0x5f1   : > { %v6343_v45 = vmul.f32 %v10474_v40, %v6249_v35  ;;  %6287 = vmatmul.bf16.gmra.mxu1 %v7985_v6 }
 0x5f3   : > { %v6375_v41 = vadd.f32 %v6343_v45, %v6307_v31  ;;  %v6087_v29 = vpop.f32.mrf.mxu3 }
 0x5f5   : > { %6407 = vst [vmem:[%s10482_s13 + $0x70] sm:$0xff] %v6375_v41  ;;  %v6001_v30 = vpop.f32.mrf.mxu2 }
 0x5f6   : > { %v6250_v60 = vpop.f32.mrf.mxu1  ;;  %v6002_v63 = vadd.f32 %v6001_v30, %v10427_v51 }
 0x5f7   : > { %v6251_v4 = vadd.f32 %v6250_v60, %v6162_v13  ;;  %v6179_v45 = vpop.f32.mrf.mxu0  ;;  %v5999_v13 = vadd.f32 %v5998_v11, %v10421_v25  ;;  %v6175_v60 = vadd.f32 %v6174_v12, %v6086_v5 }
 0x5f9   : > { %v6344_v39 = vmul.f32 %v10474_v40, %v6251_v4  ;;  %v6088_v14 = vadd.f32 %v6087_v29, %v5999_v13  ;;  %v6318_v13 = vld [vmem:[%s9183_s7 + $0xc8] sm:$0xff] }
 0x5fb   : > { %v6376_v7 = vadd.f32 %v6344_v39, %v6308_v50  ;;  %v6090_v35 = vpop.f32.mrf.mxu3  ;;  %v6313_v50 = vld [vmem:[%s9183_s7 + $0xa0] sm:$0xff] }
 0x5fd   : > { %6408 = vst [vmem:[%s10482_s13 + $0x78] sm:$0xff] %v6376_v7  ;;  %v6003_v41 = vpop.f32.mrf.mxu2 }
 0x5fe   : > { %v6253_v24 = vpop.f32.mrf.mxu1 }
 0x5ff   : > { %v6254_v10 = vadd.f32 %v6253_v24, %v6165_v54  ;;  %v6181_v18 = vpop.f32.mrf.mxu0  ;;  %v6177_v54 = vadd.f32 %v6176_v48, %v6088_v14  ;;  %v6316_v48 = vld [vmem:[%s9183_s7 + $0xb8] sm:$0xff] }
 0x601   : > { %v6345_v52 = vmul.f32 %v10474_v40, %v6254_v10  ;;  %v6314_v10 = vld [vmem:[%s9183_s7 + $0xa8] sm:$0xff] }
 0x603   : > { %v6377_v38 = vadd.f32 %v6345_v52, %v6309_v27  ;;  %v6092_v59 = vpop.f32.mrf.mxu3  ;;  %v6091_v27 = vadd.f32 %v6090_v35, %v6002_v63 }
 0x605   : > { %6409 = vst [vmem:[%s10482_s13 + $0x80] sm:$0xff] %v6377_v38  ;;  %v6006_v28 = vpop.f32.mrf.mxu2  ;;  %v6004_v38 = vadd.f32 %v6003_v41, %v10433_v49  ;;  %v6180_v12 = vadd.f32 %v6179_v45, %v6091_v27 }
 0x606   : > { %v6255_v58 = vpop.f32.mrf.mxu1 }
 0x607   : > { %v6256_v0 = vadd.f32 %v6255_v58, %v6167_v56  ;;  %v6184_v46 = vpop.f32.mrf.mxu0  ;;  %v6315_v58 = vld [vmem:[%s9183_s7 + $0xb0] sm:$0xff] }
 0x609   : > { %v6346_v61 = vmul.f32 %v10474_v40, %v6256_v0  ;;  %v6093_v0 = vadd.f32 %v6092_v59, %v6004_v38 }
 0x60b   : > { %v6378_v9 = vadd.f32 %v6346_v61, %v6310_v57  ;;  %v6095_v52 = vpop.f32.mrf.mxu3  ;;  %v6182_v29 = vadd.f32 %v6181_v18, %v6093_v0 }
 0x60d   : > { %6410 = vst [vmem:[%s10482_s13 + $0x88] sm:$0xff] %v6378_v9  ;;  %v6008_v56 = vpop.f32.mrf.mxu2  ;;  %v6007_v9 = vadd.f32 %v6006_v28, %v10439_v26 }
 0x60e   : > { %v6258_v47 = vpop.f32.mrf.mxu1  ;;  %v6009_v19 = vadd.f32 %v6008_v56, %v10443_v36 }
 0x60f   : > { %v6259_v62 = vadd.f32 %v6258_v47, %v6170_v8  ;;  %v6186_v44 = vpop.f32.mrf.mxu0 }
 0x611   : > { %v6347_v32 = vmul.f32 %v10474_v40, %v6259_v62  ;;  %v6096_v62 = vadd.f32 %v6095_v52, %v6007_v9 }
 0x613   : > { %v6379_v6 = vadd.f32 %v6347_v32, %v6311_v20  ;;  %v6097_v61 = vpop.f32.mrf.mxu3  ;;  %v6185_v32 = vadd.f32 %v6184_v46, %v6096_v62  ;;  %v6322_v62 = vld [vmem:[%s9183_s7 + $0xe8] sm:$0xff] }
 0x614   : > { %v6098_v35 = vadd.f32 %v6097_v61, %v6009_v19 }
 0x615   : > { %6411 = vst [vmem:[%s10482_s13 + $0x90] sm:$0xff] %v6379_v6  ;;  %v6011_v47 = vpop.f32.mrf.mxu2 }
 0x616   : > { %v6260_v1 = vpop.f32.mrf.mxu1  ;;  %v6012_v45 = vadd.f32 %v6011_v47, %v10447_v2 }
 0x617   : > { %v6261_v31 = vadd.f32 %v6260_v1, %v6172_v17  ;;  %v6317_v17 = vld [vmem:[%s9183_s7 + $0xc0] sm:$0xff]  ;;  %v6189_v1 = vpop.f32.mrf.mxu0 }
 0x619   : > { %v6348_v43 = vmul.f32 %v10474_v40, %v6261_v31 }
 0x61b   : > { %v6380_v42 = vadd.f32 %v6348_v43, %v6312_v37  ;;  %v6100_v6 = vpop.f32.mrf.mxu3  ;;  %v6187_v43 = vadd.f32 %v6186_v44, %v6098_v35  ;;  %v6323_v35 = vld [vmem:[%s9183_s7 + $0xf0] sm:$0xff] }
 0x61d   : > { %6412 = vst [vmem:[%s10482_s13 + $0x98] sm:$0xff] %v6380_v42  ;;  %v6013_v37 = vpop.f32.mrf.mxu2 }
 0x61e   : > { %v6263_v34 = vpop.f32.mrf.mxu1  ;;  %v6014_v14 = vadd.f32 %v6013_v37, %v10451_v55 }
 0x61f   : > { %v6264_v4 = vadd.f32 %v6263_v34, %v6175_v60  ;;  %v6101_v60 = vadd.f32 %v6100_v6, %v6012_v45 }
 0x621   : > { %v6349_v39 = vmul.f32 %v10474_v40, %v6264_v4  ;;  %v6191_v4 = vpop.f32.mrf.mxu0 }
 0x623   : > { %v6381_v7 = vadd.f32 %v6349_v39, %v6313_v50  ;;  %v6102_v42 = vpop.f32.mrf.mxu3  ;;  %v6190_v39 = vadd.f32 %v6189_v1, %v6101_v60 }
 0x624   : > { %v6103_v28 = vadd.f32 %v6102_v42, %v6014_v14 }
 0x625   : > { %6413 = vst [vmem:[%s10482_s13 + $0xa0] sm:$0xff] %v6381_v7  ;;  %v6016_v50 = vpop.f32.mrf.mxu2  ;;  %v6319_v7 = vld [vmem:[%s9183_s7 + $0xd0] sm:$0xff] }
 0x626   : > { %v6265_v25 = vpop.f32.mrf.mxu1  ;;  %v6192_v27 = vadd.f32 %v6191_v4, %v6103_v28 }
 0x627   : > { %v6266_v24 = vadd.f32 %v6265_v25, %v6177_v54 }
 0x629   : > { %v6350_v33 = vmul.f32 %v10474_v40, %v6266_v24  ;;  %v6194_v24 = vpop.f32.mrf.mxu0 }
 0x62b   : > { %v6382_v3 = vadd.f32 %v6350_v33, %v6314_v10  ;;  %v6105_v54 = vpop.f32.mrf.mxu3  ;;  %v6017_v10 = vadd.f32 %v6016_v50, %v10455_v21 }
 0x62d   : > { %6414 = vst [vmem:[%s10482_s13 + $0xa8] sm:$0xff] %v6382_v3  ;;  %v6018_v33 = vpop.f32.mrf.mxu2  ;;  %v6320_v3 = vld [vmem:[%s9183_s7 + $0xd8] sm:$0xff]  ;;  %v6106_v38 = vadd.f32 %v6105_v54, %v6017_v10 }
 0x62e   : > { %v6268_v51 = vpop.f32.mrf.mxu1 }
 0x62f   : > { %v6269_v11 = vadd.f32 %v6268_v51, %v6180_v12  ;;  %v6019_v51 = vadd.f32 %v6018_v33, %v10459_v53 }
 0x631   : > { %v6351_v57 = vmul.f32 %v10474_v40, %v6269_v11  ;;  %v6195_v11 = vadd.f32 %v6194_v24, %v6106_v38  ;;  %v6196_v0 = vpop.f32.mrf.mxu0 }
 0x633   : > { %v6383_v23 = vadd.f32 %v6351_v57, %v6315_v58  ;;  %v6107_v56 = vpop.f32.mrf.mxu3 }
 0x634   : > { %v6108_v61 = vadd.f32 %v6107_v56, %v6019_v51 }
 0x635   : > { %6415 = vst [vmem:[%s10482_s13 + $0xb0] sm:$0xff] %v6383_v23  ;;  %v6021_v57 = vpop.f32.mrf.mxu2  ;;  %v6321_v23 = vld [vmem:[%s9183_s7 + $0xe0] sm:$0xff] }
 0x636   : > { %v6270_v49 = vpop.f32.mrf.mxu1  ;;  %v6022_v44 = vadd.f32 %v6021_v57, %v10463_v15 }
 0x637   : > { %v6271_v8 = vadd.f32 %v6270_v49, %v6182_v29 }
 0x639   : > { %v6352_v30 = vmul.f32 %v10474_v40, %v6271_v8  ;;  %v6197_v8 = vadd.f32 %v6196_v0, %v6108_v61 }
 0x63b   : > { %v6384_v20 = vadd.f32 %v6352_v30, %v6316_v48  ;;  %v6110_v49 = vpop.f32.mrf.mxu3  ;;  %v6199_v48 = vpop.f32.mrf.mxu0 }
 0x63c   : > { %v6111_v30 = vadd.f32 %v6110_v49, %v6022_v44 }
 0x63d   : > { %6416 = vst [vmem:[%s10482_s13 + $0xb8] sm:$0xff] %v6384_v20  ;;  %v6023_v19 = vpop.f32.mrf.mxu2 }
 0x63e   : > { %v6273_v26 = vpop.f32.mrf.mxu1  ;;  %v6200_v6 = vadd.f32 %v6199_v48, %v6111_v30 }
 0x63f   : > { %v6274_v16 = vadd.f32 %v6273_v26, %v6185_v32  ;;  %v6024_v26 = vadd.f32 %v6023_v19, %v10467_v22 }
 0x641   : > { %v6353_v31 = vmul.f32 %v10474_v40, %v6274_v16 }
 0x643   : > { %v6385_v5 = vadd.f32 %v6353_v31, %v6317_v17  ;;  %v6112_v15 = vpop.f32.mrf.mxu3  ;;  %v6201_v37 = vpop.f32.mrf.mxu0 }
 0x644   : > { %v6113_v1 = vadd.f32 %v6112_v15, %v6024_v26 }
 0x645   : > { %6417 = vst [vmem:[%s10482_s13 + $0xc0] sm:$0xff] %v6385_v5 }
 0x646   : > { %v6275_v36 = vpop.f32.mrf.mxu1  ;;  %v6202_v22 = vadd.f32 %v6201_v37, %v6113_v1 }
 0x647   : > { %v6276_v41 = vadd.f32 %v6275_v36, %v6187_v43  ;;  %v6324_v36 = vld [vmem:[%s9183_s7 + $0xf8] sm:$0xff] }
 0x649   : > { %v6354_v34 = vmul.f32 %v10474_v40, %v6276_v41 }
 0x64b   : > { %v6386_v59 = vadd.f32 %v6354_v34, %v6318_v13 }
 0x64d   : > { %6418 = vst [vmem:[%s10482_s13 + $0xc8] sm:$0xff] %v6386_v59 }
 0x64e   : > { %v6278_v2 = vpop.f32.mrf.mxu1 }
 0x64f   : > { %v6279_v18 = vadd.f32 %v6278_v2, %v6190_v39 }
 0x651   : > { %v6355_v63 = vmul.f32 %v10474_v40, %v6279_v18 }
 0x653   : > { %v6387_v25 = vadd.f32 %v6355_v63, %v6319_v7 }
 0x655   : > { %6419 = vst [vmem:[%s10482_s13 + $0xd0] sm:$0xff] %v6387_v25 }
 0x656   : > { %v6280_v55 = vpop.f32.mrf.mxu1 }
 0x657   : > { %v6281_v52 = vadd.f32 %v6280_v55, %v6192_v27 }
 0x659   : > { %v6356_v46 = vmul.f32 %v10474_v40, %v6281_v52 }
 0x65b   : > { %v6388_v12 = vadd.f32 %v6356_v46, %v6320_v3 }
 0x65d   : > { %6420 = vst [vmem:[%s10482_s13 + $0xd8] sm:$0xff] %v6388_v12 }
 0x65e   : > { %v6283_v58 = vpop.f32.mrf.mxu1 }
 0x65f   : > { %v6284_v21 = vadd.f32 %v6283_v58, %v6195_v11 }
 0x661   : > { %v6357_v9 = vmul.f32 %v10474_v40, %v6284_v21 }
 0x663   : > { %v6389_v29 = vadd.f32 %v6357_v9, %v6321_v23 }
 0x665   : > { %6421 = vst [vmem:[%s10482_s13 + $0xe0] sm:$0xff] %v6389_v29 }
 0x666   : > { %v6285_v53 = vpop.f32.mrf.mxu1 }
 0x667   : > { %v6286_v47 = vadd.f32 %v6285_v53, %v6197_v8 }
 0x669   : > { %v6358_v20 = vmul.f32 %v10474_v40, %v6286_v47 }
 0x66b   : > { %v6390_v32 = vadd.f32 %v6358_v20, %v6322_v62 }
 0x66d   : > { %6422 = vst [vmem:[%s10482_s13 + $0xe8] sm:$0xff] %v6390_v32 }
 0x66e   : > { %v6288_v16 = vpop.f32.mrf.mxu1 }
 0x66f   : > { %v6289_v17 = vadd.f32 %v6288_v16, %v6200_v6 }
 0x671   : > { %v6359_v31 = vmul.f32 %v10474_v40, %v6289_v17 }
 0x673   : > { %v6391_v5 = vadd.f32 %v6359_v31, %v6323_v35 }
 0x675   : > { %6423 = vst [vmem:[%s10482_s13 + $0xf0] sm:$0xff] %v6391_v5 }
 0x676   : > { %v6290_v45 = vpop.f32.mrf.mxu1 }
 0x677   : > { %v6291_v43 = vadd.f32 %v6290_v45, %v6202_v22 }
 0x679   : > { %v6360_v41 = vmul.f32 %v10474_v40, %v6291_v43 }
 0x67b   : > { %v6392_v42 = vadd.f32 %v6360_v41, %v6324_v36 }
 0x67d   : > { %6424 = vst [vmem:[%s10482_s13 + $0xf8] sm:$0xff] %v6392_v42 }
 0x67e   : > { %8991 = shalt.err (!%p8988_p10)
}
 0x67f   : > { %s9044_s9 = smov 128   ;;  %s9045_s13 = smov 8  }
 0x680   : > { %8739 = dma.vmem_to_hbm [thread:$0]  (%p9147_p3), %s6439_s16, 4096, %s6441_s17, %s6426_s25, %s9044_s9, %s9044_s9, %s9045_s13  }
 0x681 PF: > { %s6455_s27 = sand.u32 1, %s9022_s21   ;;  %p10820_p12 = scmp.ge.s32.totalorder %s9034_s24, 2 }
 0x682   : > { %s6456_s8 = scalar_lea.sflag [#allocation6], %s6455_s27 }
 0x683   : > { %p8753_p13 = pnand %p10820_p12, %p9116_p6 }
 0x685   : > { %p8754_p0 = pneg %p8753_p13 }
 0x687   : > { %9017 = dma.done.wait (%p8754_p0), %s6456_s8, 4096  }
 0x688   : > { %9019 = vsyncadd (%p8754_p0), %s6456_s8, 4294963200  ;;  %p20_p5 = scmp.ge.s32.totalorder %s9137_s18, 4   ;;  %s10821_s21 = smov %s9026_s22 }
 0x689   : > { %s10822_s22 = smov %s9030_s23  ;;  %s10823_s23 = smov %s9153_s29 }
 0x68a   : > { %s10824_s24 = smov %s9137_s18  ;;  %22 = sbr.rel (!%p20_p5) target bundleno = 6 (0x6), region = 99 }
 0x68f   :  { %6462 = vsyncpa [#allocation5], 1 }
 0x690   :  { %6464 = vsyncpa [#allocation5 + $0x1], 1 }
 0x691   :  { %6465 = vsyncpa [#allocation8], 1 }
 0x692   :  { %6466 = vsyncpa [#allocation6], 1 }
 0x693   :  { %6468 = vsyncpa [#allocation6 + $0x1], 1 }

</bundles_post_ra>
